<compile_context>
chip_gen: v5e
topology: v5e:2x2
jax: 0.10.0
libtpu: 0.0.40
codegen_flags: <defaults>
</compile_context>

<pallas_src>
import functools

import jax
import jax.numpy as jnp
from jax.experimental import pallas as pl
from jax.experimental.pallas import tpu as pltpu

EPS = 1e-5


# ---------------------------------------------------------------------------
# Kernel 1: (affine [+ReLU]) -> 3x3 conv (stride 1, pad 1) as one K=9*C MXU
# matmul per tile -> raw conv output + per-tile BN partial stats.
# ---------------------------------------------------------------------------
def _conv_bn_stats_kernel(pre_relu,
                          in_ref, sc_ref, sh_ref, w_ref,
                          raw_ref, stats_ref,
                          pad_ref, patch_ref):
    n, H, W, C = in_ref.shape
    Cout = w_ref.shape[1]
    rows = n * H * W

    # Zero ONLY the 1-pixel halo of the padded scratch (interior is fully
    # overwritten below).  Done every grid step so correctness does not
    # depend on which TensorCore sees step 0 when the tile axis is parallel.
    pad_ref[:, 0:1, :, :] = jnp.zeros((n, 1, W + 2, C), jnp.float32)
    pad_ref[:, H + 1:H + 2, :, :] = jnp.zeros((n, 1, W + 2, C), jnp.float32)
    pad_ref[:, :, 0:1, :] = jnp.zeros((n, H + 2, 1, C), jnp.float32)
    pad_ref[:, :, W + 1:W + 2, :] = jnp.zeros((n, H + 2, 1, C), jnp.float32)

    # Input affine (identity for conv1, bn1 scale/shift for conv2) + ReLU,
    # written into the interior of the padded scratch (f32).
    v = in_ref[...] * sc_ref[...] + sh_ref[...]
    if pre_relu:
        v = jnp.maximum(v, 0.0)
    pad_ref[:, 1:H + 1, 1:W + 1, :] = v

    # im2col into a bf16 patch: one tap ref-read at a time (short live
    # ranges).  K ordering (kh, kw, cin) matches the wrapper weight packing.
    for kh in range(3):
        for kw in range(3):
            k = kh * 3 + kw
            tap = pad_ref[:, kh:kh + H, kw:kw + W, :]
            patch_ref[:, k * C:(k + 1) * C] = (
                tap.reshape(rows, C).astype(patch_ref.dtype))

    # Single K=9*C bf16 matmul on the MXU, f32 accumulation.
    acc = jnp.dot(patch_ref[...], w_ref[...],
                  preferred_element_type=jnp.float32)
    raw_ref[...] = acc.reshape(n, H, W, Cout)

    # Per-tile BN partials: tile mean and M2 (sum of squared deviations from
    # the tile mean).  Combined across tiles in the wrapper with Chan's
    # parallel-variance formula -> no one-pass E[x^2]-mean^2 cancellation.
    # TODO(synk): at very large tiles fold these two axis-0 reductions into a
    # ones-row MXU matmul to keep them off the XLU.
    mean_t = jnp.sum(acc, axis=0, keepdims=True) * (1.0 / rows)
    d = acc - mean_t
    m2_t = jnp.sum(d * d, axis=0, keepdims=True)
    stats_ref[:, 0:1, :] = mean_t.reshape(1, 1, Cout)
    stats_ref[:, 1:2, :] = m2_t.reshape(1, 1, Cout)


# ---------------------------------------------------------------------------
# Kernel 2: lane-dense elementwise finalize: relu(y*scale + shift + residual).
# ---------------------------------------------------------------------------
def _bn_add_relu_kernel(y_ref, res_ref, sc_ref, sh_ref, o_ref):
    o_ref[...] = jnp.maximum(
        y_ref[...] * sc_ref[...] + sh_ref[...] + res_ref[...], 0.0)


# ---------------------------------------------------------------------------
# Wrappers
# ---------------------------------------------------------------------------
def _conv_bn_stats(inp_nhwc, pre_scale, pre_shift, w_bf16, *, pre_relu,
                   tile_n=1):
    """3x3 conv (stride 1, pad 1, no bias) of affine(+relu)(inp) with packed
    weight (9*Cin, Cout) bf16.  Returns (raw f32 NHWC conv output,
    per-tile stats (num_tiles, 2, Cout))."""
    N, H, W, C = inp_nhwc.shape
    Cout = w_bf16.shape[1]
    assert w_bf16.shape[0] == 9 * C
    assert N % tile_n == 0
    nt = N // tile_n
    rows = tile_n * H * W

    # Per-tile VMEM footprint: pad + patch scratch + double-buffered blocks.
    est = (tile_n * (H + 2) * (W + 2) * C * 4            # padded scratch f32
           + rows * 9 * C * 2                            # im2col patch bf16
           + 2 * (tile_n * H * W * C * 4                 # input block
                  + tile_n * H * W * Cout * 4            # raw output block
                  + 9 * C * Cout * 2))                   # weights
    vmem_limit = int(min(max(2 * est, 32 * 1024 * 1024), 64 * 1024 * 1024))

    kernel = functools.partial(_conv_bn_stats_kernel, pre_relu)
    raw, stats = pl.pallas_call(
        kernel,
        out_shape=(jax.ShapeDtypeStruct((N, H, W, Cout), jnp.float32),
                   jax.ShapeDtypeStruct((nt, 2, Cout), jnp.float32)),
        grid=(nt,),
        in_specs=[
            pl.BlockSpec((tile_n, H, W, C), lambda t: (t, 0, 0, 0)),
            pl.BlockSpec((1, C), lambda t: (0, 0)),
            pl.BlockSpec((1, C), lambda t: (0, 0)),
            pl.BlockSpec((9 * C, Cout), lambda t: (0, 0)),
        ],
        out_specs=(
            pl.BlockSpec((tile_n, H, W, Cout), lambda t: (t, 0, 0, 0)),
            pl.BlockSpec((1, 2, Cout), lambda t: (t, 0, 0)),
        ),
        scratch_shapes=[
            pltpu.VMEM((tile_n, H + 2, W + 2, C), jnp.float32),
            pltpu.VMEM((rows, 9 * C), jnp.bfloat16),
        ],
        compiler_params=pltpu.CompilerParams(
            dimension_semantics=("parallel",),
            vmem_limit_bytes=vmem_limit),
        cost_estimate=pl.CostEstimate(
            flops=2 * N * H * W * 9 * C * Cout,
            transcendentals=0,
            bytes_accessed=(N * H * W * C * 4 + 9 * C * Cout * 2
                            + N * H * W * Cout * 4 + nt * 2 * Cout * 4)),
    )(inp_nhwc, pre_scale, pre_shift, w_bf16)
    return raw, stats


def _bn_scale_shift(stats, rows_per_tile, gamma, beta):
    """Combine per-tile (mean, M2) partials into global biased batch stats
    (Chan's formula) and fold training-mode BN into one scale/shift."""
    mean_t = stats[:, 0, :]                               # (nt, C)
    m2_t = stats[:, 1, :]
    nt = stats.shape[0]
    total = nt * rows_per_tile
    mean = jnp.mean(mean_t, axis=0)                       # equal tile sizes
    m2 = jnp.sum(m2_t, axis=0) + rows_per_tile * jnp.sum(
        (mean_t - mean[None, :]) ** 2, axis=0)
    var = m2 / total                                      # biased, as in BN
    scale = gamma * jax.lax.rsqrt(var + EPS)
    shift = beta - mean * scale
    return scale.reshape(1, -1), shift.reshape(1, -1)


def _pick_block_rows(rows, cap=1024):
    if rows <= cap:
        return rows
    for d in range(cap - cap % 8, 7, -8):
        if rows % d == 0:
            return d
    return rows


def _bn_add_relu(y_nhwc, res_nhwc, scale, shift, *, block_cap=1024):
    """out = relu(y*scale + shift + residual), stored lane-dense."""
    N, H, W, C = y_nhwc.shape
    total = N * H * W * C
    if C % 128 == 0:                       # already lane-dense
        lane, rep = C, 1
    elif 128 % C == 0 and total % 128 == 0:  # fold channels into 128 lanes
        lane, rep = 128, 128 // C
    else:
        lane, rep = C, 1                   # TODO(synk): masked-store fallback
    rows = total // lane
    y2 = y_nhwc.reshape(rows, lane)
    r2 = res_nhwc.reshape(rows, lane)
    sc = jnp.tile(scale, (1, rep))
    sh = jnp.tile(shift, (1, rep))
    bt = _pick_block_rows(rows, block_cap)
    out = pl.pallas_call(
        _bn_add_relu_kernel,
        out_shape=jax.ShapeDtypeStruct((rows, lane), jnp.float32),
        grid=(rows // bt,),
        in_specs=[
            pl.BlockSpec((bt, lane), lambda t: (t, 0)),
            pl.BlockSpec((bt, lane), lambda t: (t, 0)),
            pl.BlockSpec((1, lane), lambda t: (0, 0)),
            pl.BlockSpec((1, lane), lambda t: (0, 0)),
        ],
        out_specs=pl.BlockSpec((bt, lane), lambda t: (t, 0)),
        compiler_params=pltpu.CompilerParams(
            dimension_semantics=("parallel",)),
    )(y2, r2, sc, sh)
    return out.reshape(N, H, W, C)


def basic_block_forward(x_nchw, params):
    """x_nchw: (N, C, H, W) f32 (PyTorch layout).  Returns (N, C, H, W) f32."""
    w1, g1, b1, w2, g2, b2 = params        # w*: (9C, C) bf16; g/b: (C,) f32
    N, C, H, W = x_nchw.shape
    x = jnp.transpose(x_nchw, (0, 2, 3, 1))               # NCHW -> NHWC

    tile_n = 1                                            # per-image tiles
    rows_per_tile = tile_n * H * W
    ident_s = jnp.ones((1, C), jnp.float32)
    ident_b = jnp.zeros((1, C), jnp.float32)

    # conv1 -> bn1 batch stats
    conv1_raw, st1 = _conv_bn_stats(x, ident_s, ident_b, w1,
                                    pre_relu=False, tile_n=tile_n)
    scale1, shift1 = _bn_scale_shift(st1, rows_per_tile, g1, b1)

    # bn1 + relu + conv2 -> bn2 batch stats
    conv2_raw, st2 = _conv_bn_stats(conv1_raw, scale1, shift1, w2,
                                    pre_relu=True, tile_n=tile_n)
    scale2, shift2 = _bn_scale_shift(st2, rows_per_tile, g2, b2)

    # bn2 + residual + relu
    out = _bn_add_relu(conv2_raw, x, scale2, shift2)
    return jnp.transpose(out, (0, 3, 1, 2))               # NHWC -> NCHW


def pack_params(w1_oihw, g1, b1, w2_oihw, g2, b2):
    """OIHW conv weights -> (9*Cin, Cout) bf16 with K ordering (kh, kw, cin)."""
    def pack_w(w):
        o = w.shape[0]
        return jnp.transpose(w, (2, 3, 1, 0)).reshape(-1, o).astype(jnp.bfloat16)
    return (pack_w(w1_oihw), g1, b1, pack_w(w2_oihw), g2, b2)


def reference_forward(x, w1, g1, b1, w2, g2, b2, conv_dtype=jnp.float32):
    """Pure-JAX mirror of the PyTorch forward (training-mode BN).  With
    conv_dtype=bfloat16 the conv operands are rounded exactly like the
    kernel's bf16 im2col/weights (f32 accumulation either way)."""
    def conv(a, w):
        return jax.lax.conv_general_dilated(
            a.astype(conv_dtype), w.astype(conv_dtype),
            window_strides=(1, 1), padding=((1, 1), (1, 1)),
            dimension_numbers=("NCHW", "OIHW", "NCHW"),
            preferred_element_type=jnp.float32)

    def bn(a, g, b):
        mean = jnp.mean(a, axis=(0, 2, 3), keepdims=True)
        var = jnp.mean((a - mean) ** 2, axis=(0, 2, 3), keepdims=True)
        return ((a - mean) * jax.lax.rsqrt(var + EPS)
                * g.reshape(1, -1, 1, 1) + b.reshape(1, -1, 1, 1))

    out = jax.nn.relu(bn(conv(x, w1), g1, b1))
    out = bn(conv(out, w2), g2, b2)
    return jax.nn.relu(out + x)


if __name__ == "__main__":
    # Small shapes implied by the module defaults: inplanes == planes,
    # stride=1, downsample=None.  (Realistic lane-dense regime is C>=128.)
    N, C, H, W = 2, 4, 16, 16
    inplanes = planes = C

    key = jax.random.PRNGKey(0)
    kx, kw1, kw2, kg1, kb1, kg2, kb2 = jax.random.split(key, 7)

    x = jax.random.normal(kx, (N, C, H, W), jnp.float32)
    fan_in = inplanes * 9
    w1_oihw = jax.random.normal(kw1, (planes, inplanes, 3, 3),
                                jnp.float32) / jnp.sqrt(fan_in)
    w2_oihw = jax.random.normal(kw2, (planes, inplanes, 3, 3),
                                jnp.float32) / jnp.sqrt(fan_in)
    g1 = 1.0 + 0.1 * jax.random.normal(kg1, (planes,), jnp.float32)
    b1 = 0.1 * jax.random.normal(kb1, (planes,), jnp.float32)
    g2 = 1.0 + 0.1 * jax.random.normal(kg2, (planes,), jnp.float32)
    b2 = 0.1 * jax.random.normal(kb2, (planes,), jnp.float32)

    params = pack_params(w1_oihw, g1, b1, w2_oihw, g2, b2)

    out = jax.jit(basic_block_forward)(x, params)
    out = jax.block_until_ready(out)
    assert out.shape == (N, C, H, W)

    # f32 module reference (tolerance sized for the kernel's bf16 conv
    # operands) and a bf16-operand-matched reference (tighter logic check).
    ref32 = reference_forward(x, w1_oihw, g1, b1, w2_oihw, g2, b2)
    refbf = reference_forward(x, w1_oihw, g1, b1, w2_oihw, g2, b2,
                              conv_dtype=jnp.bfloat16)
    err32 = float(jnp.max(jnp.abs(out - ref32)))
    errbf = float(jnp.max(jnp.abs(out - refbf)))
    assert jnp.allclose(out, ref32, rtol=5e-2, atol=5e-2), err32
    assert jnp.allclose(out, refbf, rtol=1e-2, atol=1e-2), errbf

    print("KERNEL_OK")
</pallas_src>

<mosaic_0001>
module attributes {stable_mosaic.version = 11 : i64} {
  func.func @_conv_bn_stats_kernel(%arg0: i32, %arg1: memref<1x16x16x4xf32, #tpu.memory_space<vmem>>, %arg2: memref<1x4xf32, #tpu.memory_space<vmem>>, %arg3: memref<1x4xf32, #tpu.memory_space<vmem>>, %arg4: memref<36x4xbf16, #tpu.memory_space<vmem>>, %arg5: memref<1x16x16x4xf32, #tpu.memory_space<vmem>>, %arg6: memref<1x2x4xf32, #tpu.memory_space<vmem>>, %arg7: memref<1x18x18x4xf32, #tpu.memory_space<vmem>>, %arg8: memref<256x36xbf16, #tpu.memory_space<vmem>>) attributes {dimension_semantics = [#tpu.dimension_semantics<parallel>], iteration_bounds = array<i64: 2>, scalar_prefetch = 0 : i64, scratch_operands = 2 : i64, tpu.core_type = #tpu.core_type<tc>, window_params = [{transform_indices = @transform_0, window_bounds = array<i64: 1, 16, 16, 4>}, {pipeline_mode = #tpu.pipeline_mode<synchronous>, transform_indices = @transform_1, window_bounds = array<i64: 1, 4>}, {pipeline_mode = #tpu.pipeline_mode<synchronous>, transform_indices = @transform_2, window_bounds = array<i64: 1, 4>}, {pipeline_mode = #tpu.pipeline_mode<synchronous>, transform_indices = @transform_3, window_bounds = array<i64: 36, 4>}, {transform_indices = @transform_4, window_bounds = array<i64: 1, 16, 16, 4>}, {transform_indices = @transform_5, window_bounds = array<i64: 1, 2, 4>}]} {
    %cst = arith.constant 0.000000e+00 : f32
    %0 = vector.broadcast %cst : f32 to vector<1x1x18x4xf32>
    %c0 = arith.constant 0 : index
    %c0_0 = arith.constant 0 : index
    %c0_1 = arith.constant 0 : index
    %c0_2 = arith.constant 0 : index
    %1 = vector.load %arg7[%c0, %c0_0, %c0_1, %c0_2] : memref<1x18x18x4xf32, #tpu.memory_space<vmem>>, vector<1x1x18x4xf32>
    tpu.vector_store %arg7[%c0, %c0_0, %c0_1, %c0_2], %0 {strides = array<i32>} : memref<1x18x18x4xf32, #tpu.memory_space<vmem>>, vector<1x1x18x4xf32>,
    %cst_3 = arith.constant 0.000000e+00 : f32
    %2 = vector.broadcast %cst_3 : f32 to vector<1x1x18x4xf32>
    %c0_4 = arith.constant 0 : index
    %c17 = arith.constant 17 : index
    %c0_5 = arith.constant 0 : index
    %c0_6 = arith.constant 0 : index
    %3 = vector.load %arg7[%c0_4, %c17, %c0_5, %c0_6] : memref<1x18x18x4xf32, #tpu.memory_space<vmem>>, vector<1x1x18x4xf32>
    tpu.vector_store %arg7[%c0_4, %c17, %c0_5, %c0_6], %2 {strides = array<i32>} : memref<1x18x18x4xf32, #tpu.memory_space<vmem>>, vector<1x1x18x4xf32>,
    %cst_7 = arith.constant 0.000000e+00 : f32
    %4 = vector.broadcast %cst_7 : f32 to vector<1x18x1x4xf32>
    %c0_8 = arith.constant 0 : index
    %c0_9 = arith.constant 0 : index
    %c0_10 = arith.constant 0 : index
    %c0_11 = arith.constant 0 : index
    %5 = vector.load %arg7[%c0_8, %c0_9, %c0_10, %c0_11] : memref<1x18x18x4xf32, #tpu.memory_space<vmem>>, vector<1x18x1x4xf32>
    tpu.vector_store %arg7[%c0_8, %c0_9, %c0_10, %c0_11], %4 {strides = array<i32>} : memref<1x18x18x4xf32, #tpu.memory_space<vmem>>, vector<1x18x1x4xf32>,
    %cst_12 = arith.constant 0.000000e+00 : f32
    %6 = vector.broadcast %cst_12 : f32 to vector<1x18x1x4xf32>
    %c0_13 = arith.constant 0 : index
    %c0_14 = arith.constant 0 : index
    %c17_15 = arith.constant 17 : index
    %c0_16 = arith.constant 0 : index
    %7 = vector.load %arg7[%c0_13, %c0_14, %c17_15, %c0_16] : memref<1x18x18x4xf32, #tpu.memory_space<vmem>>, vector<1x18x1x4xf32>
    tpu.vector_store %arg7[%c0_13, %c0_14, %c17_15, %c0_16], %6 {strides = array<i32>} : memref<1x18x18x4xf32, #tpu.memory_space<vmem>>, vector<1x18x1x4xf32>,
    %c0_17 = arith.constant 0 : index
    %c0_18 = arith.constant 0 : index
    %c0_19 = arith.constant 0 : index
    %c0_20 = arith.constant 0 : index
    %8 = vector.load %arg1[%c0_17, %c0_18, %c0_19, %c0_20] : memref<1x16x16x4xf32, #tpu.memory_space<vmem>>, vector<1x16x16x4xf32>
    %c0_21 = arith.constant 0 : index
    %c0_22 = arith.constant 0 : index
    %9 = vector.load %arg2[%c0_21, %c0_22] : memref<1x4xf32, #tpu.memory_space<vmem>>, vector<1x4xf32>
    %10 = vector.shape_cast %9 : vector<1x4xf32> to vector<1x1x1x4xf32>
    %11 = vector.broadcast %10 : vector<1x1x1x4xf32> to vector<1x16x16x4xf32>
    %12 = arith.mulf %8, %11 : vector<1x16x16x4xf32>
    %c0_23 = arith.constant 0 : index
    %c0_24 = arith.constant 0 : index
    %13 = vector.load %arg3[%c0_23, %c0_24] : memref<1x4xf32, #tpu.memory_space<vmem>>, vector<1x4xf32>
    %14 = vector.shape_cast %13 : vector<1x4xf32> to vector<1x1x1x4xf32>
    %15 = vector.broadcast %14 : vector<1x1x1x4xf32> to vector<1x16x16x4xf32>
    %16 = arith.addf %12, %15 : vector<1x16x16x4xf32>
    %c0_25 = arith.constant 0 : index
    %c1 = arith.constant 1 : index
    %c1_26 = arith.constant 1 : index
    %c0_27 = arith.constant 0 : index
    %17 = vector.load %arg7[%c0_25, %c1, %c1_26, %c0_27] : memref<1x18x18x4xf32, #tpu.memory_space<vmem>>, vector<1x16x16x4xf32>
    tpu.vector_store %arg7[%c0_25, %c1, %c1_26, %c0_27], %16 {strides = array<i32>} : memref<1x18x18x4xf32, #tpu.memory_space<vmem>>, vector<1x16x16x4xf32>,
    %c0_28 = arith.constant 0 : index
    %c0_29 = arith.constant 0 : index
    %c0_30 = arith.constant 0 : index
    %c0_31 = arith.constant 0 : index
    %18 = vector.load %arg7[%c0_28, %c0_29, %c0_30, %c0_31] : memref<1x18x18x4xf32, #tpu.memory_space<vmem>>, vector<1x16x16x4xf32>
    %19 = vector.shape_cast %18 : vector<1x16x16x4xf32> to vector<256x4xf32>
    %20 = arith.truncf %19 : vector<256x4xf32> to vector<256x4xbf16>
    %c0_32 = arith.constant 0 : index
    %c0_33 = arith.constant 0 : index
    %21 = vector.load %arg8[%c0_32, %c0_33] : memref<256x36xbf16, #tpu.memory_space<vmem>>, vector<256x4xbf16>
    tpu.vector_store %arg8[%c0_32, %c0_33], %20 {strides = array<i32>} : memref<256x36xbf16, #tpu.memory_space<vmem>>, vector<256x4xbf16>,
    %c0_34 = arith.constant 0 : index
    %c0_35 = arith.constant 0 : index
    %c1_36 = arith.constant 1 : index
    %c0_37 = arith.constant 0 : index
    %22 = vector.load %arg7[%c0_34, %c0_35, %c1_36, %c0_37] : memref<1x18x18x4xf32, #tpu.memory_space<vmem>>, vector<1x16x16x4xf32>
    %23 = vector.shape_cast %22 : vector<1x16x16x4xf32> to vector<256x4xf32>
    %24 = arith.truncf %23 : vector<256x4xf32> to vector<256x4xbf16>
    %c0_38 = arith.constant 0 : index
    %c4 = arith.constant 4 : index
    %25 = vector.load %arg8[%c0_38, %c4] : memref<256x36xbf16, #tpu.memory_space<vmem>>, vector<256x4xbf16>
    tpu.vector_store %arg8[%c0_38, %c4], %24 {strides = array<i32>} : memref<256x36xbf16, #tpu.memory_space<vmem>>, vector<256x4xbf16>,
    %c0_39 = arith.constant 0 : index
    %c0_40 = arith.constant 0 : index
    %c2 = arith.constant 2 : index
    %c0_41 = arith.constant 0 : index
    %26 = vector.load %arg7[%c0_39, %c0_40, %c2, %c0_41] : memref<1x18x18x4xf32, #tpu.memory_space<vmem>>, vector<1x16x16x4xf32>
    %27 = vector.shape_cast %26 : vector<1x16x16x4xf32> to vector<256x4xf32>
    %28 = arith.truncf %27 : vector<256x4xf32> to vector<256x4xbf16>
    %c0_42 = arith.constant 0 : index
    %c8 = arith.constant 8 : index
    %29 = vector.load %arg8[%c0_42, %c8] : memref<256x36xbf16, #tpu.memory_space<vmem>>, vector<256x4xbf16>
    tpu.vector_store %arg8[%c0_42, %c8], %28 {strides = array<i32>} : memref<256x36xbf16, #tpu.memory_space<vmem>>, vector<256x4xbf16>,
    %c0_43 = arith.constant 0 : index
    %c1_44 = arith.constant 1 : index
    %c0_45 = arith.constant 0 : index
    %c0_46 = arith.constant 0 : index
    %30 = vector.load %arg7[%c0_43, %c1_44, %c0_45, %c0_46] : memref<1x18x18x4xf32, #tpu.memory_space<vmem>>, vector<1x16x16x4xf32>
    %31 = vector.shape_cast %30 : vector<1x16x16x4xf32> to vector<256x4xf32>
    %32 = arith.truncf %31 : vector<256x4xf32> to vector<256x4xbf16>
    %c0_47 = arith.constant 0 : index
    %c12 = arith.constant 12 : index
    %33 = vector.load %arg8[%c0_47, %c12] : memref<256x36xbf16, #tpu.memory_space<vmem>>, vector<256x4xbf16>
    tpu.vector_store %arg8[%c0_47, %c12], %32 {strides = array<i32>} : memref<256x36xbf16, #tpu.memory_space<vmem>>, vector<256x4xbf16>,
    %c0_48 = arith.constant 0 : index
    %c1_49 = arith.constant 1 : index
    %c1_50 = arith.constant 1 : index
    %c0_51 = arith.constant 0 : index
    %34 = vector.load %arg7[%c0_48, %c1_49, %c1_50, %c0_51] : memref<1x18x18x4xf32, #tpu.memory_space<vmem>>, vector<1x16x16x4xf32>
    %35 = vector.shape_cast %34 : vector<1x16x16x4xf32> to vector<256x4xf32>
    %36 = arith.truncf %35 : vector<256x4xf32> to vector<256x4xbf16>
    %c0_52 = arith.constant 0 : index
    %c16 = arith.constant 16 : index
    %37 = vector.load %arg8[%c0_52, %c16] : memref<256x36xbf16, #tpu.memory_space<vmem>>, vector<256x4xbf16>
    tpu.vector_store %arg8[%c0_52, %c16], %36 {strides = array<i32>} : memref<256x36xbf16, #tpu.memory_space<vmem>>, vector<256x4xbf16>,
    %c0_53 = arith.constant 0 : index
    %c1_54 = arith.constant 1 : index
    %c2_55 = arith.constant 2 : index
    %c0_56 = arith.constant 0 : index
    %38 = vector.load %arg7[%c0_53, %c1_54, %c2_55, %c0_56] : memref<1x18x18x4xf32, #tpu.memory_space<vmem>>, vector<1x16x16x4xf32>
    %39 = vector.shape_cast %38 : vector<1x16x16x4xf32> to vector<256x4xf32>
    %40 = arith.truncf %39 : vector<256x4xf32> to vector<256x4xbf16>
    %c0_57 = arith.constant 0 : index
    %c20 = arith.constant 20 : index
    %41 = vector.load %arg8[%c0_57, %c20] : memref<256x36xbf16, #tpu.memory_space<vmem>>, vector<256x4xbf16>
    tpu.vector_store %arg8[%c0_57, %c20], %40 {strides = array<i32>} : memref<256x36xbf16, #tpu.memory_space<vmem>>, vector<256x4xbf16>,
    %c0_58 = arith.constant 0 : index
    %c2_59 = arith.constant 2 : index
    %c0_60 = arith.constant 0 : index
    %c0_61 = arith.constant 0 : index
    %42 = vector.load %arg7[%c0_58, %c2_59, %c0_60, %c0_61] : memref<1x18x18x4xf32, #tpu.memory_space<vmem>>, vector<1x16x16x4xf32>
    %43 = vector.shape_cast %42 : vector<1x16x16x4xf32> to vector<256x4xf32>
    %44 = arith.truncf %43 : vector<256x4xf32> to vector<256x4xbf16>
    %c0_62 = arith.constant 0 : index
    %c24 = arith.constant 24 : index
    %45 = vector.load %arg8[%c0_62, %c24] : memref<256x36xbf16, #tpu.memory_space<vmem>>, vector<256x4xbf16>
    tpu.vector_store %arg8[%c0_62, %c24], %44 {strides = array<i32>} : memref<256x36xbf16, #tpu.memory_space<vmem>>, vector<256x4xbf16>,
    %c0_63 = arith.constant 0 : index
    %c2_64 = arith.constant 2 : index
    %c1_65 = arith.constant 1 : index
    %c0_66 = arith.constant 0 : index
    %46 = vector.load %arg7[%c0_63, %c2_64, %c1_65, %c0_66] : memref<1x18x18x4xf32, #tpu.memory_space<vmem>>, vector<1x16x16x4xf32>
    %47 = vector.shape_cast %46 : vector<1x16x16x4xf32> to vector<256x4xf32>
    %48 = arith.truncf %47 : vector<256x4xf32> to vector<256x4xbf16>
    %c0_67 = arith.constant 0 : index
    %c28 = arith.constant 28 : index
    %49 = vector.load %arg8[%c0_67, %c28] : memref<256x36xbf16, #tpu.memory_space<vmem>>, vector<256x4xbf16>
    tpu.vector_store %arg8[%c0_67, %c28], %48 {strides = array<i32>} : memref<256x36xbf16, #tpu.memory_space<vmem>>, vector<256x4xbf16>,
    %c0_68 = arith.constant 0 : index
    %c2_69 = arith.constant 2 : index
    %c2_70 = arith.constant 2 : index
    %c0_71 = arith.constant 0 : index
    %50 = vector.load %arg7[%c0_68, %c2_69, %c2_70, %c0_71] : memref<1x18x18x4xf32, #tpu.memory_space<vmem>>, vector<1x16x16x4xf32>
    %51 = vector.shape_cast %50 : vector<1x16x16x4xf32> to vector<256x4xf32>
    %52 = arith.truncf %51 : vector<256x4xf32> to vector<256x4xbf16>
    %c0_72 = arith.constant 0 : index
    %c32 = arith.constant 32 : index
    %53 = vector.load %arg8[%c0_72, %c32] : memref<256x36xbf16, #tpu.memory_space<vmem>>, vector<256x4xbf16>
    tpu.vector_store %arg8[%c0_72, %c32], %52 {strides = array<i32>} : memref<256x36xbf16, #tpu.memory_space<vmem>>, vector<256x4xbf16>,
    %c0_73 = arith.constant 0 : index
    %c0_74 = arith.constant 0 : index
    %54 = vector.load %arg8[%c0_73, %c0_74] : memref<256x36xbf16, #tpu.memory_space<vmem>>, vector<256x36xbf16>
    %c0_75 = arith.constant 0 : index
    %c0_76 = arith.constant 0 : index
    %55 = vector.load %arg4[%c0_75, %c0_76] : memref<36x4xbf16, #tpu.memory_space<vmem>>, vector<36x4xbf16>
    %cst_77 = arith.constant dense<0.000000e+00> : vector<256x4xf32>
    %56 = tpu.matmul %54, %55, %cst_77 {dimension_numbers = #tpu.dot_dimension_numbers<[1], [0], [0], [1], [0, 0, 1, 1], [], []>} : vector<256x36xbf16>, vector<36x4xbf16>, vector<256x4xf32> -> vector<256x4xf32>
    %57 = vector.shape_cast %56 : vector<256x4xf32> to vector<1x16x16x4xf32>
    %c0_78 = arith.constant 0 : index
    %c0_79 = arith.constant 0 : index
    %c0_80 = arith.constant 0 : index
    %c0_81 = arith.constant 0 : index
    %58 = vector.load %arg5[%c0_78, %c0_79, %c0_80, %c0_81] : memref<1x16x16x4xf32, #tpu.memory_space<vmem>>, vector<1x16x16x4xf32>
    tpu.vector_store %arg5[%c0_78, %c0_79, %c0_80, %c0_81], %57 {strides = array<i32>} : memref<1x16x16x4xf32, #tpu.memory_space<vmem>>, vector<1x16x16x4xf32>,
    %cst_82 = arith.constant dense<0.000000e+00> : vector<4xf32>
    %59 = vector.multi_reduction <add>, %56, %cst_82 [0] : vector<256x4xf32> to vector<4xf32>
    %60 = vector.shape_cast %59 : vector<4xf32> to vector<1x4xf32>
    %cst_83 = arith.constant 3.906250e-03 : f32
    %61 = vector.broadcast %cst_83 : f32 to vector<1x4xf32>
    %62 = arith.mulf %60, %61 : vector<1x4xf32>
    %63 = vector.broadcast %62 : vector<1x4xf32> to vector<256x4xf32>
    %64 = arith.subf %56, %63 : vector<256x4xf32>
    %65 = arith.mulf %64, %64 : vector<256x4xf32>
    %cst_84 = arith.constant dense<0.000000e+00> : vector<4xf32>
    %66 = vector.multi_reduction <add>, %65, %cst_84 [0] : vector<256x4xf32> to vector<4xf32>
    %67 = vector.shape_cast %66 : vector<4xf32> to vector<1x4xf32>
    %68 = vector.shape_cast %62 : vector<1x4xf32> to vector<1x1x4xf32>
    %c0_85 = arith.constant 0 : index
    %c0_86 = arith.constant 0 : index
    %c0_87 = arith.constant 0 : index
    %69 = vector.load %arg6[%c0_85, %c0_86, %c0_87] : memref<1x2x4xf32, #tpu.memory_space<vmem>>, vector<1x1x4xf32>
    tpu.vector_store %arg6[%c0_85, %c0_86, %c0_87], %68 {strides = array<i32>} : memref<1x2x4xf32, #tpu.memory_space<vmem>>, vector<1x1x4xf32>,
    %70 = vector.shape_cast %67 : vector<1x4xf32> to vector<1x1x4xf32>
    %c0_88 = arith.constant 0 : index
    %c1_89 = arith.constant 1 : index
    %c0_90 = arith.constant 0 : index
    %71 = vector.load %arg6[%c0_88, %c1_89, %c0_90] : memref<1x2x4xf32, #tpu.memory_space<vmem>>, vector<1x1x4xf32>
    tpu.vector_store %arg6[%c0_88, %c1_89, %c0_90], %70 {strides = array<i32>} : memref<1x2x4xf32, #tpu.memory_space<vmem>>, vector<1x1x4xf32>,
    return
  }
  func.func @transform_0(%arg0: i32) -> (i32, i32, i32, i32) {
    %c0_i32 = arith.constant 0 : i32
    %c0_i32_0 = arith.constant 0 : i32
    %c0_i32_1 = arith.constant 0 : i32
    %c0_i32_2 = arith.constant 0 : i32
    return %arg0, %c0_i32, %c0_i32_0, %c0_i32_1 : i32, i32, i32, i32
  }
  func.func @transform_1(%arg0: i32) -> (i32, i32) {
    %c0_i32 = arith.constant 0 : i32
    %c0_i32_0 = arith.constant 0 : i32
    %c0_i32_1 = arith.constant 0 : i32
    return %c0_i32, %c0_i32_0 : i32, i32
  }
  func.func @transform_2(%arg0: i32) -> (i32, i32) {
    %c0_i32 = arith.constant 0 : i32
    %c0_i32_0 = arith.constant 0 : i32
    %c0_i32_1 = arith.constant 0 : i32
    return %c0_i32, %c0_i32_0 : i32, i32
  }
  func.func @transform_3(%arg0: i32) -> (i32, i32) {
    %c0_i32 = arith.constant 0 : i32
    %c0_i32_0 = arith.constant 0 : i32
    %c0_i32_1 = arith.constant 0 : i32
    return %c0_i32, %c0_i32_0 : i32, i32
  }
  func.func @transform_4(%arg0: i32) -> (i32, i32, i32, i32) {
    %c0_i32 = arith.constant 0 : i32
    %c0_i32_0 = arith.constant 0 : i32
    %c0_i32_1 = arith.constant 0 : i32
    %c0_i32_2 = arith.constant 0 : i32
    return %arg0, %c0_i32, %c0_i32_0, %c0_i32_1 : i32, i32, i32, i32
  }
  func.func @transform_5(%arg0: i32) -> (i32, i32, i32) {
    %c0_i32 = arith.constant 0 : i32
    %c0_i32_0 = arith.constant 0 : i32
    %c0_i32_1 = arith.constant 0 : i32
    return %arg0, %c0_i32, %c0_i32_0 : i32, i32, i32
  }
}

module attributes {stable_mosaic.version = 11 : i64} {
  func.func @_conv_bn_stats_kernel(%arg0: i32, %arg1: memref<1x16x16x4xf32, #tpu.memory_space<vmem>>, %arg2: memref<1x4xf32, #tpu.memory_space<vmem>>, %arg3: memref<1x4xf32, #tpu.memory_space<vmem>>, %arg4: memref<36x4xbf16, #tpu.memory_space<vmem>>, %arg5: memref<1x16x16x4xf32, #tpu.memory_space<vmem>>, %arg6: memref<1x2x4xf32, #tpu.memory_space<vmem>>, %arg7: memref<1x18x18x4xf32, #tpu.memory_space<vmem>>, %arg8: memref<256x36xbf16, #tpu.memory_space<vmem>>) attributes {dimension_semantics = [#tpu.dimension_semantics<parallel>], iteration_bounds = array<i64: 2>, scalar_prefetch = 0 : i64, scratch_operands = 2 : i64, tpu.core_type = #tpu.core_type<tc>, window_params = [{transform_indices = @transform_0, window_bounds = array<i64: 1, 16, 16, 4>}, {pipeline_mode = #tpu.pipeline_mode<synchronous>, transform_indices = @transform_1, window_bounds = array<i64: 1, 4>}, {pipeline_mode = #tpu.pipeline_mode<synchronous>, transform_indices = @transform_2, window_bounds = array<i64: 1, 4>}, {pipeline_mode = #tpu.pipeline_mode<synchronous>, transform_indices = @transform_3, window_bounds = array<i64: 36, 4>}, {transform_indices = @transform_4, window_bounds = array<i64: 1, 16, 16, 4>}, {transform_indices = @transform_5, window_bounds = array<i64: 1, 2, 4>}]} {
    %cst = arith.constant 0.000000e+00 : f32
    %0 = vector.broadcast %cst : f32 to vector<1x1x18x4xf32>
    %c0 = arith.constant 0 : index
    %c0_0 = arith.constant 0 : index
    %c0_1 = arith.constant 0 : index
    %c0_2 = arith.constant 0 : index
    %1 = vector.load %arg7[%c0, %c0_0, %c0_1, %c0_2] : memref<1x18x18x4xf32, #tpu.memory_space<vmem>>, vector<1x1x18x4xf32>
    tpu.vector_store %arg7[%c0, %c0_0, %c0_1, %c0_2], %0 {strides = array<i32>} : memref<1x18x18x4xf32, #tpu.memory_space<vmem>>, vector<1x1x18x4xf32>,
    %cst_3 = arith.constant 0.000000e+00 : f32
    %2 = vector.broadcast %cst_3 : f32 to vector<1x1x18x4xf32>
    %c0_4 = arith.constant 0 : index
    %c17 = arith.constant 17 : index
    %c0_5 = arith.constant 0 : index
    %c0_6 = arith.constant 0 : index
    %3 = vector.load %arg7[%c0_4, %c17, %c0_5, %c0_6] : memref<1x18x18x4xf32, #tpu.memory_space<vmem>>, vector<1x1x18x4xf32>
    tpu.vector_store %arg7[%c0_4, %c17, %c0_5, %c0_6], %2 {strides = array<i32>} : memref<1x18x18x4xf32, #tpu.memory_space<vmem>>, vector<1x1x18x4xf32>,
    %cst_7 = arith.constant 0.000000e+00 : f32
    %4 = vector.broadcast %cst_7 : f32 to vector<1x18x1x4xf32>
    %c0_8 = arith.constant 0 : index
    %c0_9 = arith.constant 0 : index
    %c0_10 = arith.constant 0 : index
    %c0_11 = arith.constant 0 : index
    %5 = vector.load %arg7[%c0_8, %c0_9, %c0_10, %c0_11] : memref<1x18x18x4xf32, #tpu.memory_space<vmem>>, vector<1x18x1x4xf32>
    tpu.vector_store %arg7[%c0_8, %c0_9, %c0_10, %c0_11], %4 {strides = array<i32>} : memref<1x18x18x4xf32, #tpu.memory_space<vmem>>, vector<1x18x1x4xf32>,
    %cst_12 = arith.constant 0.000000e+00 : f32
    %6 = vector.broadcast %cst_12 : f32 to vector<1x18x1x4xf32>
    %c0_13 = arith.constant 0 : index
    %c0_14 = arith.constant 0 : index
    %c17_15 = arith.constant 17 : index
    %c0_16 = arith.constant 0 : index
    %7 = vector.load %arg7[%c0_13, %c0_14, %c17_15, %c0_16] : memref<1x18x18x4xf32, #tpu.memory_space<vmem>>, vector<1x18x1x4xf32>
    tpu.vector_store %arg7[%c0_13, %c0_14, %c17_15, %c0_16], %6 {strides = array<i32>} : memref<1x18x18x4xf32, #tpu.memory_space<vmem>>, vector<1x18x1x4xf32>,
    %c0_17 = arith.constant 0 : index
    %c0_18 = arith.constant 0 : index
    %c0_19 = arith.constant 0 : index
    %c0_20 = arith.constant 0 : index
    %8 = vector.load %arg1[%c0_17, %c0_18, %c0_19, %c0_20] : memref<1x16x16x4xf32, #tpu.memory_space<vmem>>, vector<1x16x16x4xf32>
    %c0_21 = arith.constant 0 : index
    %c0_22 = arith.constant 0 : index
    %9 = vector.load %arg2[%c0_21, %c0_22] : memref<1x4xf32, #tpu.memory_space<vmem>>, vector<1x4xf32>
    %10 = vector.shape_cast %9 : vector<1x4xf32> to vector<1x1x1x4xf32>
    %11 = vector.broadcast %10 : vector<1x1x1x4xf32> to vector<1x16x16x4xf32>
    %12 = arith.mulf %8, %11 : vector<1x16x16x4xf32>
    %c0_23 = arith.constant 0 : index
    %c0_24 = arith.constant 0 : index
    %13 = vector.load %arg3[%c0_23, %c0_24] : memref<1x4xf32, #tpu.memory_space<vmem>>, vector<1x4xf32>
    %14 = vector.shape_cast %13 : vector<1x4xf32> to vector<1x1x1x4xf32>
    %15 = vector.broadcast %14 : vector<1x1x1x4xf32> to vector<1x16x16x4xf32>
    %16 = arith.addf %12, %15 : vector<1x16x16x4xf32>
    %cst_25 = arith.constant 0.000000e+00 : f32
    %17 = vector.broadcast %cst_25 : f32 to vector<1x16x16x4xf32>
    %18 = arith.maximumf %16, %17 : vector<1x16x16x4xf32>
    %c0_26 = arith.constant 0 : index
    %c1 = arith.constant 1 : index
    %c1_27 = arith.constant 1 : index
    %c0_28 = arith.constant 0 : index
    %19 = vector.load %arg7[%c0_26, %c1, %c1_27, %c0_28] : memref<1x18x18x4xf32, #tpu.memory_space<vmem>>, vector<1x16x16x4xf32>
    tpu.vector_store %arg7[%c0_26, %c1, %c1_27, %c0_28], %18 {strides = array<i32>} : memref<1x18x18x4xf32, #tpu.memory_space<vmem>>, vector<1x16x16x4xf32>,
    %c0_29 = arith.constant 0 : index
    %c0_30 = arith.constant 0 : index
    %c0_31 = arith.constant 0 : index
    %c0_32 = arith.constant 0 : index
    %20 = vector.load %arg7[%c0_29, %c0_30, %c0_31, %c0_32] : memref<1x18x18x4xf32, #tpu.memory_space<vmem>>, vector<1x16x16x4xf32>
    %21 = vector.shape_cast %20 : vector<1x16x16x4xf32> to vector<256x4xf32>
    %22 = arith.truncf %21 : vector<256x4xf32> to vector<256x4xbf16>
    %c0_33 = arith.constant 0 : index
    %c0_34 = arith.constant 0 : index
    %23 = vector.load %arg8[%c0_33, %c0_34] : memref<256x36xbf16, #tpu.memory_space<vmem>>, vector<256x4xbf16>
    tpu.vector_store %arg8[%c0_33, %c0_34], %22 {strides = array<i32>} : memref<256x36xbf16, #tpu.memory_space<vmem>>, vector<256x4xbf16>,
    %c0_35 = arith.constant 0 : index
    %c0_36 = arith.constant 0 : index
    %c1_37 = arith.constant 1 : index
    %c0_38 = arith.constant 0 : index
    %24 = vector.load %arg7[%c0_35, %c0_36, %c1_37, %c0_38] : memref<1x18x18x4xf32, #tpu.memory_space<vmem>>, vector<1x16x16x4xf32>
    %25 = vector.shape_cast %24 : vector<1x16x16x4xf32> to vector<256x4xf32>
    %26 = arith.truncf %25 : vector<256x4xf32> to vector<256x4xbf16>
    %c0_39 = arith.constant 0 : index
    %c4 = arith.constant 4 : index
    %27 = vector.load %arg8[%c0_39, %c4] : memref<256x36xbf16, #tpu.memory_space<vmem>>, vector<256x4xbf16>
    tpu.vector_store %arg8[%c0_39, %c4], %26 {strides = array<i32>} : memref<256x36xbf16, #tpu.memory_space<vmem>>, vector<256x4xbf16>,
    %c0_40 = arith.constant 0 : index
    %c0_41 = arith.constant 0 : index
    %c2 = arith.constant 2 : index
    %c0_42 = arith.constant 0 : index
    %28 = vector.load %arg7[%c0_40, %c0_41, %c2, %c0_42] : memref<1x18x18x4xf32, #tpu.memory_space<vmem>>, vector<1x16x16x4xf32>
    %29 = vector.shape_cast %28 : vector<1x16x16x4xf32> to vector<256x4xf32>
    %30 = arith.truncf %29 : vector<256x4xf32> to vector<256x4xbf16>
    %c0_43 = arith.constant 0 : index
    %c8 = arith.constant 8 : index
    %31 = vector.load %arg8[%c0_43, %c8] : memref<256x36xbf16, #tpu.memory_space<vmem>>, vector<256x4xbf16>
    tpu.vector_store %arg8[%c0_43, %c8], %30 {strides = array<i32>} : memref<256x36xbf16, #tpu.memory_space<vmem>>, vector<256x4xbf16>,
    %c0_44 = arith.constant 0 : index
    %c1_45 = arith.constant 1 : index
    %c0_46 = arith.constant 0 : index
    %c0_47 = arith.constant 0 : index
    %32 = vector.load %arg7[%c0_44, %c1_45, %c0_46, %c0_47] : memref<1x18x18x4xf32, #tpu.memory_space<vmem>>, vector<1x16x16x4xf32>
    %33 = vector.shape_cast %32 : vector<1x16x16x4xf32> to vector<256x4xf32>
    %34 = arith.truncf %33 : vector<256x4xf32> to vector<256x4xbf16>
    %c0_48 = arith.constant 0 : index
    %c12 = arith.constant 12 : index
    %35 = vector.load %arg8[%c0_48, %c12] : memref<256x36xbf16, #tpu.memory_space<vmem>>, vector<256x4xbf16>
    tpu.vector_store %arg8[%c0_48, %c12], %34 {strides = array<i32>} : memref<256x36xbf16, #tpu.memory_space<vmem>>, vector<256x4xbf16>,
    %c0_49 = arith.constant 0 : index
    %c1_50 = arith.constant 1 : index
    %c1_51 = arith.constant 1 : index
    %c0_52 = arith.constant 0 : index
    %36 = vector.load %arg7[%c0_49, %c1_50, %c1_51, %c0_52] : memref<1x18x18x4xf32, #tpu.memory_space<vmem>>, vector<1x16x16x4xf32>
    %37 = vector.shape_cast %36 : vector<1x16x16x4xf32> to vector<256x4xf32>
    %38 = arith.truncf %37 : vector<256x4xf32> to vector<256x4xbf16>
    %c0_53 = arith.constant 0 : index
    %c16 = arith.constant 16 : index
    %39 = vector.load %arg8[%c0_53, %c16] : memref<256x36xbf16, #tpu.memory_space<vmem>>, vector<256x4xbf16>
    tpu.vector_store %arg8[%c0_53, %c16], %38 {strides = array<i32>} : memref<256x36xbf16, #tpu.memory_space<vmem>>, vector<256x4xbf16>,
    %c0_54 = arith.constant 0 : index
    %c1_55 = arith.constant 1 : index
    %c2_56 = arith.constant 2 : index
    %c0_57 = arith.constant 0 : index
    %40 = vector.load %arg7[%c0_54, %c1_55, %c2_56, %c0_57] : memref<1x18x18x4xf32, #tpu.memory_space<vmem>>, vector<1x16x16x4xf32>
    %41 = vector.shape_cast %40 : vector<1x16x16x4xf32> to vector<256x4xf32>
    %42 = arith.truncf %41 : vector<256x4xf32> to vector<256x4xbf16>
    %c0_58 = arith.constant 0 : index
    %c20 = arith.constant 20 : index
    %43 = vector.load %arg8[%c0_58, %c20] : memref<256x36xbf16, #tpu.memory_space<vmem>>, vector<256x4xbf16>
    tpu.vector_store %arg8[%c0_58, %c20], %42 {strides = array<i32>} : memref<256x36xbf16, #tpu.memory_space<vmem>>, vector<256x4xbf16>,
    %c0_59 = arith.constant 0 : index
    %c2_60 = arith.constant 2 : index
    %c0_61 = arith.constant 0 : index
    %c0_62 = arith.constant 0 : index
    %44 = vector.load %arg7[%c0_59, %c2_60, %c0_61, %c0_62] : memref<1x18x18x4xf32, #tpu.memory_space<vmem>>, vector<1x16x16x4xf32>
    %45 = vector.shape_cast %44 : vector<1x16x16x4xf32> to vector<256x4xf32>
    %46 = arith.truncf %45 : vector<256x4xf32> to vector<256x4xbf16>
    %c0_63 = arith.constant 0 : index
    %c24 = arith.constant 24 : index
    %47 = vector.load %arg8[%c0_63, %c24] : memref<256x36xbf16, #tpu.memory_space<vmem>>, vector<256x4xbf16>
    tpu.vector_store %arg8[%c0_63, %c24], %46 {strides = array<i32>} : memref<256x36xbf16, #tpu.memory_space<vmem>>, vector<256x4xbf16>,
    %c0_64 = arith.constant 0 : index
    %c2_65 = arith.constant 2 : index
    %c1_66 = arith.constant 1 : index
    %c0_67 = arith.constant 0 : index
    %48 = vector.load %arg7[%c0_64, %c2_65, %c1_66, %c0_67] : memref<1x18x18x4xf32, #tpu.memory_space<vmem>>, vector<1x16x16x4xf32>
    %49 = vector.shape_cast %48 : vector<1x16x16x4xf32> to vector<256x4xf32>
    %50 = arith.truncf %49 : vector<256x4xf32> to vector<256x4xbf16>
    %c0_68 = arith.constant 0 : index
    %c28 = arith.constant 28 : index
    %51 = vector.load %arg8[%c0_68, %c28] : memref<256x36xbf16, #tpu.memory_space<vmem>>, vector<256x4xbf16>
    tpu.vector_store %arg8[%c0_68, %c28], %50 {strides = array<i32>} : memref<256x36xbf16, #tpu.memory_space<vmem>>, vector<256x4xbf16>,
    %c0_69 = arith.constant 0 : index
    %c2_70 = arith.constant 2 : index
    %c2_71 = arith.constant 2 : index
    %c0_72 = arith.constant 0 : index
    %52 = vector.load %arg7[%c0_69, %c2_70, %c2_71, %c0_72] : memref<1x18x18x4xf32, #tpu.memory_space<vmem>>, vector<1x16x16x4xf32>
    %53 = vector.shape_cast %52 : vector<1x16x16x4xf32> to vector<256x4xf32>
    %54 = arith.truncf %53 : vector<256x4xf32> to vector<256x4xbf16>
    %c0_73 = arith.constant 0 : index
    %c32 = arith.constant 32 : index
    %55 = vector.load %arg8[%c0_73, %c32] : memref<256x36xbf16, #tpu.memory_space<vmem>>, vector<256x4xbf16>
    tpu.vector_store %arg8[%c0_73, %c32], %54 {strides = array<i32>} : memref<256x36xbf16, #tpu.memory_space<vmem>>, vector<256x4xbf16>,
    %c0_74 = arith.constant 0 : index
    %c0_75 = arith.constant 0 : index
    %56 = vector.load %arg8[%c0_74, %c0_75] : memref<256x36xbf16, #tpu.memory_space<vmem>>, vector<256x36xbf16>
    %c0_76 = arith.constant 0 : index
    %c0_77 = arith.constant 0 : index
    %57 = vector.load %arg4[%c0_76, %c0_77] : memref<36x4xbf16, #tpu.memory_space<vmem>>, vector<36x4xbf16>
    %cst_78 = arith.constant dense<0.000000e+00> : vector<256x4xf32>
    %58 = tpu.matmul %56, %57, %cst_78 {dimension_numbers = #tpu.dot_dimension_numbers<[1], [0], [0], [1], [0, 0, 1, 1], [], []>} : vector<256x36xbf16>, vector<36x4xbf16>, vector<256x4xf32> -> vector<256x4xf32>
    %59 = vector.shape_cast %58 : vector<256x4xf32> to vector<1x16x16x4xf32>
    %c0_79 = arith.constant 0 : index
    %c0_80 = arith.constant 0 : index
    %c0_81 = arith.constant 0 : index
    %c0_82 = arith.constant 0 : index
    %60 = vector.load %arg5[%c0_79, %c0_80, %c0_81, %c0_82] : memref<1x16x16x4xf32, #tpu.memory_space<vmem>>, vector<1x16x16x4xf32>
    tpu.vector_store %arg5[%c0_79, %c0_80, %c0_81, %c0_82], %59 {strides = array<i32>} : memref<1x16x16x4xf32, #tpu.memory_space<vmem>>, vector<1x16x16x4xf32>,
    %cst_83 = arith.constant dense<0.000000e+00> : vector<4xf32>
    %61 = vector.multi_reduction <add>, %58, %cst_83 [0] : vector<256x4xf32> to vector<4xf32>
    %62 = vector.shape_cast %61 : vector<4xf32> to vector<1x4xf32>
    %cst_84 = arith.constant 3.906250e-03 : f32
    %63 = vector.broadcast %cst_84 : f32 to vector<1x4xf32>
    %64 = arith.mulf %62, %63 : vector<1x4xf32>
    %65 = vector.broadcast %64 : vector<1x4xf32> to vector<256x4xf32>
    %66 = arith.subf %58, %65 : vector<256x4xf32>
    %67 = arith.mulf %66, %66 : vector<256x4xf32>
    %cst_85 = arith.constant dense<0.000000e+00> : vector<4xf32>
    %68 = vector.multi_reduction <add>, %67, %cst_85 [0] : vector<256x4xf32> to vector<4xf32>
    %69 = vector.shape_cast %68 : vector<4xf32> to vector<1x4xf32>
    %70 = vector.shape_cast %64 : vector<1x4xf32> to vector<1x1x4xf32>
    %c0_86 = arith.constant 0 : index
    %c0_87 = arith.constant 0 : index
    %c0_88 = arith.constant 0 : index
    %71 = vector.load %arg6[%c0_86, %c0_87, %c0_88] : memref<1x2x4xf32, #tpu.memory_space<vmem>>, vector<1x1x4xf32>
    tpu.vector_store %arg6[%c0_86, %c0_87, %c0_88], %70 {strides = array<i32>} : memref<1x2x4xf32, #tpu.memory_space<vmem>>, vector<1x1x4xf32>,
    %72 = vector.shape_cast %69 : vector<1x4xf32> to vector<1x1x4xf32>
    %c0_89 = arith.constant 0 : index
    %c1_90 = arith.constant 1 : index
    %c0_91 = arith.constant 0 : index
    %73 = vector.load %arg6[%c0_89, %c1_90, %c0_91] : memref<1x2x4xf32, #tpu.memory_space<vmem>>, vector<1x1x4xf32>
    tpu.vector_store %arg6[%c0_89, %c1_90, %c0_91], %72 {strides = array<i32>} : memref<1x2x4xf32, #tpu.memory_space<vmem>>, vector<1x1x4xf32>,
    return
  }
  func.func @transform_0(%arg0: i32) -> (i32, i32, i32, i32) {
    %c0_i32 = arith.constant 0 : i32
    %c0_i32_0 = arith.constant 0 : i32
    %c0_i32_1 = arith.constant 0 : i32
    %c0_i32_2 = arith.constant 0 : i32
    return %arg0, %c0_i32, %c0_i32_0, %c0_i32_1 : i32, i32, i32, i32
  }
  func.func @transform_1(%arg0: i32) -> (i32, i32) {
    %c0_i32 = arith.constant 0 : i32
    %c0_i32_0 = arith.constant 0 : i32
    %c0_i32_1 = arith.constant 0 : i32
    return %c0_i32, %c0_i32_0 : i32, i32
  }
  func.func @transform_2(%arg0: i32) -> (i32, i32) {
    %c0_i32 = arith.constant 0 : i32
    %c0_i32_0 = arith.constant 0 : i32
    %c0_i32_1 = arith.constant 0 : i32
    return %c0_i32, %c0_i32_0 : i32, i32
  }
  func.func @transform_3(%arg0: i32) -> (i32, i32) {
    %c0_i32 = arith.constant 0 : i32
    %c0_i32_0 = arith.constant 0 : i32
    %c0_i32_1 = arith.constant 0 : i32
    return %c0_i32, %c0_i32_0 : i32, i32
  }
  func.func @transform_4(%arg0: i32) -> (i32, i32, i32, i32) {
    %c0_i32 = arith.constant 0 : i32
    %c0_i32_0 = arith.constant 0 : i32
    %c0_i32_1 = arith.constant 0 : i32
    %c0_i32_2 = arith.constant 0 : i32
    return %arg0, %c0_i32, %c0_i32_0, %c0_i32_1 : i32, i32, i32, i32
  }
  func.func @transform_5(%arg0: i32) -> (i32, i32, i32) {
    %c0_i32 = arith.constant 0 : i32
    %c0_i32_0 = arith.constant 0 : i32
    %c0_i32_1 = arith.constant 0 : i32
    return %arg0, %c0_i32, %c0_i32_0 : i32, i32, i32
  }
}

module attributes {stable_mosaic.version = 11 : i64} {
  func.func @_bn_add_relu_kernel(%arg0: i32, %arg1: memref<16x128xf32, #tpu.memory_space<vmem>>, %arg2: memref<16x128xf32, #tpu.memory_space<vmem>>, %arg3: memref<1x128xf32, #tpu.memory_space<vmem>>, %arg4: memref<1x128xf32, #tpu.memory_space<vmem>>, %arg5: memref<16x128xf32, #tpu.memory_space<vmem>>) attributes {dimension_semantics = [#tpu.dimension_semantics<parallel>], iteration_bounds = array<i64: 1>, scalar_prefetch = 0 : i64, scratch_operands = 0 : i64, tpu.core_type = #tpu.core_type<tc>, window_params = [{transform_indices = @transform_0, window_bounds = array<i64: 16, 128>}, {transform_indices = @transform_1, window_bounds = array<i64: 16, 128>}, {pipeline_mode = #tpu.pipeline_mode<synchronous>, transform_indices = @transform_2, window_bounds = array<i64: 1, 128>}, {pipeline_mode = #tpu.pipeline_mode<synchronous>, transform_indices = @transform_3, window_bounds = array<i64: 1, 128>}, {transform_indices = @transform_4, window_bounds = array<i64: 16, 128>}]} {
    %c0 = arith.constant 0 : index
    %c0_0 = arith.constant 0 : index
    %0 = vector.load %arg1[%c0, %c0_0] : memref<16x128xf32, #tpu.memory_space<vmem>>, vector<16x128xf32>
    %c0_1 = arith.constant 0 : index
    %c0_2 = arith.constant 0 : index
    %1 = vector.load %arg3[%c0_1, %c0_2] : memref<1x128xf32, #tpu.memory_space<vmem>>, vector<1x128xf32>
    %2 = vector.broadcast %1 : vector<1x128xf32> to vector<16x128xf32>
    %3 = arith.mulf %0, %2 : vector<16x128xf32>
    %c0_3 = arith.constant 0 : index
    %c0_4 = arith.constant 0 : index
    %4 = vector.load %arg4[%c0_3, %c0_4] : memref<1x128xf32, #tpu.memory_space<vmem>>, vector<1x128xf32>
    %5 = vector.broadcast %4 : vector<1x128xf32> to vector<16x128xf32>
    %6 = arith.addf %3, %5 : vector<16x128xf32>
    %c0_5 = arith.constant 0 : index
    %c0_6 = arith.constant 0 : index
    %7 = vector.load %arg2[%c0_5, %c0_6] : memref<16x128xf32, #tpu.memory_space<vmem>>, vector<16x128xf32>
    %8 = arith.addf %6, %7 : vector<16x128xf32>
    %cst = arith.constant 0.000000e+00 : f32
    %9 = vector.broadcast %cst : f32 to vector<16x128xf32>
    %10 = arith.maximumf %8, %9 : vector<16x128xf32>
    %c0_7 = arith.constant 0 : index
    %c0_8 = arith.constant 0 : index
    %11 = vector.load %arg5[%c0_7, %c0_8] : memref<16x128xf32, #tpu.memory_space<vmem>>, vector<16x128xf32>
    tpu.vector_store %arg5[%c0_7, %c0_8], %10 {strides = array<i32>} : memref<16x128xf32, #tpu.memory_space<vmem>>, vector<16x128xf32>,
    return
  }
  func.func @transform_0(%arg0: i32) -> (i32, i32) {
    %c0_i32 = arith.constant 0 : i32
    %c0_i32_0 = arith.constant 0 : i32
    return %arg0, %c0_i32 : i32, i32
  }
  func.func @transform_1(%arg0: i32) -> (i32, i32) {
    %c0_i32 = arith.constant 0 : i32
    %c0_i32_0 = arith.constant 0 : i32
    return %arg0, %c0_i32 : i32, i32
  }
  func.func @transform_2(%arg0: i32) -> (i32, i32) {
    %c0_i32 = arith.constant 0 : i32
    %c0_i32_0 = arith.constant 0 : i32
    %c0_i32_1 = arith.constant 0 : i32
    return %c0_i32, %c0_i32_0 : i32, i32
  }
  func.func @transform_3(%arg0: i32) -> (i32, i32) {
    %c0_i32 = arith.constant 0 : i32
    %c0_i32_0 = arith.constant 0 : i32
    %c0_i32_1 = arith.constant 0 : i32
    return %c0_i32, %c0_i32_0 : i32, i32
  }
  func.func @transform_4(%arg0: i32) -> (i32, i32) {
    %c0_i32 = arith.constant 0 : i32
    %c0_i32_0 = arith.constant 0 : i32
    return %arg0, %c0_i32 : i32, i32
  }
}

</mosaic_0001>

<bundles_post_ra>
// kernel: basic_block_forward.5
= control target key start
LH: loop header
LB: loop body
LE: loop exit
PB: predicated region body
PF: predicated region fallthrough
CT: control target
= control target key end

     0   :  { %s94_s0 = inlined_call_operand.vmem [shape: f32[16,128], index: 0, kind: input, shape index: {}]   ;;  %s95_s2 = inlined_call_operand.vmem [shape: f32[1,128], index: 2, kind: input, shape index: {}]   ;;  %s96_s3 = inlined_call_operand.vmem [shape: f32[1,128], index: 3, kind: input, shape index: {}]   ;;  %s97_s1 = inlined_call_operand.vmem [shape: f32[16,128], index: 1, kind: input, shape index: {}]   ;;  %s98_s4 = inlined_call_operand.vmem [shape: f32[16,128], index: 4, kind: output, shape index: {}]  }
   0x1   :  { %v17_v0 = vld [vmem:[%s94_s0] sm:$0xff]  ;;  %v18_v4 = vld [vmem:[%s94_s0 + $0x8] sm:$0xff] }
   0x2   :  { %v43_v1 = vld [vmem:[%s95_s2] ss:$0 sm:$0xff]  ;;  %v32_v8 = vld [vmem:[%s97_s1 + $0x8] sm:$0xff] }
   0x3   :  { %v44_v2 = vld [vmem:[%s96_s3] ss:$0 sm:$0xff]  ;;  %v23_v3 = vmul.f32 %v43_v1, %v17_v0  ;;  %v24_v6 = vmul.f32 %v43_v1, %v18_v4 }
   0x4   :  { %v31_v5 = vld [vmem:[%s97_s1] sm:$0xff] }
   0x5   :  { %v29_v7 = vadd.f32 %v44_v2, %v23_v3  ;;  %v30_v9 = vadd.f32 %v44_v2, %v24_v6 }
   0x7   :  { %v33_v10 = vadd.f32 %v31_v5, %v29_v7  ;;  %v34_v11 = vadd.f32 %v32_v8, %v30_v9 }
   0x9   :  { %v35_v12 = vmax.f32 %v33_v10, 0.0  ;;  %v36_v13 = vmax.f32 %v34_v11, 0.0 }
   0xb   :  { %37 = vst [vmem:[%s98_s4] sm:$0xff] %v35_v12 }
   0xc   :  { %38 = vst [vmem:[%s98_s4 + $0x8] sm:$0xff] %v36_v13 }

// kernel: basic_block_forward.4
= control target key start
LH: loop header
LB: loop body
LE: loop exit
PB: predicated region body
PF: predicated region fallthrough
CT: control target
= control target key end

     0   :  { %s3144_s18 = smov 0   ;;  %s4571_s0 = inlined_call_operand.vmem [shape: f32[2,16,16,4], index: 0, kind: input, shape index: {}]   ;;  %s4572_s1 = inlined_call_operand.vmem [shape: f32[1,4], index: 1, kind: input, shape index: {}]   ;;  %s4573_s2 = inlined_call_operand.vmem [shape: f32[1,4], index: 2, kind: input, shape index: {}]   ;;  %s4574_s3 = inlined_call_operand.vmem [shape: bf16[36,4], index: 3, kind: input, shape index: {}]   ;;  %s4575_s4 = inlined_call_operand.vmem [shape: f32[2,16,16,4], index: 4, kind: output, shape index: {0}]   ;;  %s4576_s5 = inlined_call_operand.vmem [shape: f32[2,2,4], index: 5, kind: output, shape index: {1}]  }
   0x1 LB: > { %s2947_s19 = sadd.s32 4294967295, %s3103_s18   ;;  %p2951_p0 = scmp.ge.s32.totalorder %s3103_s18, 1  ;;  %s3103_s18 = sphi %s3144_s18, %s16_s18  }
   0x2   : > { %p190_p1 = scmp.lt.s32.totalorder %s3103_s18, 3 }
   0x4   : > { %p191_p2 = pnand %p2951_p0, %p190_p1 }
   0x5   : > { %s3106_s20 = smov (!%p191_p2), 4   ;;  %p222_p3 = scmp.lt.s32.totalorder (!%p191_p2), %s2947_s19, 1 }
   0x6   : > { %194 = sbr.rel (%p191_p2) target bundleno = 1098 (0x44a), region = 36  ;;  %s3107_s29 = smov (!%p191_p2), 8  }
   0x7   : > { %s3108_s30 = smov (!%p191_p2), 12   ;;  %s3109_s10 = smov (!%p191_p2), 16  }
   0x8   : > { %s3110_s11 = smov (!%p191_p2), 20   ;;  %s3111_s12 = smov (!%p191_p2), 24  }
   0x9   : > { %s3112_s13 = smov (!%p191_p2), 32   ;;  %s3113_s14 = smov (!%p191_p2), 28  }
   0xb   : > { %vm237_vm0 = vcmask 31744   ;;  %v3105_v0 = vmov 0.0   ;;  %vm246_vm1 = vcmask 24576   ;;  %s4578_s19 = smov (!%p222_p3, %s2947_s19), 1  ;;  %v3224_v3 = vld [vmem:[%s4572_s1] ss:$0 sm:$0xff] }
   0xc   : > { %238 = vst.msk [vmem:[#allocation2] sm:$0xff] %vm237_vm0, %v3105_v0  ;;  %s3047_s21 = sshll.u32 %s4578_s19, 8  ;;  %v3241_v8 = vld [vmem:[%s4573_s2] ss:$0 sm:$0xff]  ;;  %vm240_vm2 = vcmask 25600   ;;  %vm516_vm3 = vcmask 27648  }
   0xd   : > { %239 = vst.msk [vmem:[#allocation2 + $0x8] sm:$0xff] %vm237_vm0, %v3105_v0  ;;  %s3215_s24 = scalar_lea.vmem %s4571_s0, %s3047_s21  ;;  %vm741_vm4 = vcmask 60448   ;;  %vm966_vm5 = vcmask 93248   ;;  %vm1191_vm6 = vcmask 126048   ;;  %vm1416_vm7 = vcmask 158848   ;;  %s4130_s26 = scalar_lea.vmem %s4575_s4, %s3047_s21 }
   0xe   : > { %247 = vst.msk [vmem:[#allocation2] sm:$0x1] %vm246_vm1, %v3105_v0  ;;  %v283_v4 = vld [vmem:[%s3215_s24] sm:$0xff]  ;;  %v284_v6 = vld [vmem:[%s3215_s24 + $0x8] sm:$0xff]  ;;  %v290_v9 = vld [vmem:[%s3215_s24 + $0x38] sm:$0xff]  ;;  %vm1641_vm8 = vcmask 191648  }
   0xf   : > { %243 = vst.msk [vmem:[#allocation2 + $0x198] sm:$0xff] %vm237_vm0, %v3105_v0  ;;  %v287_v5 = vld [vmem:[%s3215_s24 + $0x20] sm:$0xff]  ;;  %v319_v7 = vmul.f32 %v3224_v3, %v283_v4  ;;  %v288_v11 = vld [vmem:[%s3215_s24 + $0x28] sm:$0xff]  ;;  %v320_v12 = vmul.f32 %v3224_v3, %v284_v6  ;;  %v293_v13 = vld [vmem:[%s3215_s24 + $0x50] sm:$0xff]  ;;  %v326_v14 = vmul.f32 %v3224_v3, %v290_v9  ;;  %vm1867_vm9 = vcmask 224448   ;;  %s2956_s21 = sshll.u32 %s4578_s19, 1 }
  0x10   : > { %244 = vst.msk [vmem:[#allocation2 + $0x1a0] sm:$0xff] %vm237_vm0, %v3105_v0  ;;  %v323_v10 = vmul.f32 %v3224_v3, %v287_v5  ;;  %v285_v15 = vld [vmem:[%s3215_s24 + $0x10] sm:$0xff]  ;;  %v324_v17 = vmul.f32 %v3224_v3, %v288_v11  ;;  %v291_v18 = vld [vmem:[%s3215_s24 + $0x40] sm:$0xff]  ;;  %v329_v20 = vmul.f32 %v3224_v3, %v293_v13  ;;  %v296_v21 = vld [vmem:[%s3215_s24 + $0x68] sm:$0xff]  ;;  %vm2531_vm10 = vcmask 1041408  }
  0x11   : > { %248 = vst.msk [vmem:[#allocation2 + $0x18] sm:$0x1] %vm246_vm1, %v3105_v0  ;;  %v355_v16 = vadd.f32 %v3241_v8, %v319_v7  ;;  %v356_v22 = vadd.f32 %v3241_v8, %v320_v12  ;;  %v321_v23 = vmul.f32 %v3224_v3, %v285_v15  ;;  %v286_v24 = vld [vmem:[%s3215_s24 + $0x18] sm:$0xff]  ;;  %v362_v25 = vadd.f32 %v3241_v8, %v326_v14  ;;  %v299_v34 = vld [vmem:[%s3215_s24 + $0x80] sm:$0xff]  ;;  %v289_v35 = vld [vmem:[%s3215_s24 + $0x30] sm:$0xff] }
  0x12   : > { %249 = vst.msk [vmem:[#allocation2 + $0x30] sm:$0x1] %vm246_vm1, %v3105_v0  ;;  %v359_v19 = vadd.f32 %v3241_v8, %v323_v10  ;;  %v327_v26 = vmul.f32 %v3224_v3, %v291_v18  ;;  %v294_v27 = vld [vmem:[%s3215_s24 + $0x58] sm:$0xff]  ;;  %v360_v29 = vadd.f32 %v3241_v8, %v324_v17  ;;  %v332_v30 = vmul.f32 %v3224_v3, %v296_v21  ;;  %v297_v47 = vld [vmem:[%s3215_s24 + $0x70] sm:$0xff]  ;;  %v292_v60 = vld [vmem:[%s3215_s24 + $0x48] sm:$0xff] }
  0x13   : > { %250 = vst.msk [vmem:[#allocation2 + $0x48] sm:$0x1] %vm246_vm1, %v3105_v0  ;;  %v387_v28 = vmax.f32 %v355_v16, 0.0  ;;  %v365_v32 = vadd.f32 %v3241_v8, %v329_v20  ;;  %v322_v33 = vmul.f32 %v3224_v3, %v286_v24  ;;  %v388_v36 = vmax.f32 %v356_v22, 0.0  ;;  %v302_v59 = vld [vmem:[%s3215_s24 + $0x98] sm:$0xff]  ;;  %v300_v11 = vld [vmem:[%s3215_s24 + $0x88] sm:$0xff] }
  0x14   : > { %v549_v1 = vld [vmem:[#allocation2 + $0x1] sm:$0xff]  ;;  %251 = vst.msk [vmem:[#allocation2 + $0x60] sm:$0x1] %vm246_vm1, %v3105_v0  ;;  %v391_v31 = vmax.f32 %v359_v19, 0.0  ;;  %v357_v37 = vadd.f32 %v3241_v8, %v321_v23  ;;  %v330_v38 = vmul.f32 %v3224_v3, %v294_v27  ;;  %v394_v39 = vmax.f32 %v362_v25, 0.0  ;;  %v305_v19 = vld [vmem:[%s3215_s24 + $0xb0] sm:$0xff] }
  0x15   : > { %v581_v2 = vpack.c.bf16 %v549_v1, %v549_v1  ;;  %252 = vst.msk [vmem:[#allocation2 + $0x78] sm:$0x1] %vm246_vm1, %v3105_v0  ;;  %v363_v40 = vadd.f32 %v3241_v8, %v327_v26  ;;  %v335_v41 = vmul.f32 %v3224_v3, %v299_v34  ;;  %v392_v42 = vmax.f32 %v360_v29, 0.0  ;;  %v295_v20 = vld [vmem:[%s3215_s24 + $0x60] sm:$0xff] }
  0x16   : > { %253 = vst.msk [vmem:[#allocation2 + $0x90] sm:$0x1] %vm246_vm1, %v3105_v0  ;;  %v368_v43 = vadd.f32 %v3241_v8, %v332_v30  ;;  %v325_v44 = vmul.f32 %v3224_v3, %v289_v35  ;;  %v397_v45 = vmax.f32 %v365_v32, 0.0  ;;  %v358_v46 = vadd.f32 %v3241_v8, %v322_v33  ;;  %v303_v30 = vld [vmem:[%s3215_s24 + $0xa0] sm:$0xff] }
  0x17   : > { %645 = vrot.lane.b32.xlu0 %v581_v2, %s3106_s20  ;;  %254 = vst.msk [vmem:[#allocation2 + $0xa8] sm:$0x1] %vm246_vm1, %v3105_v0  ;;  %v389_v49 = vmax.f32 %v357_v37, 0.0  ;;  %v366_v50 = vadd.f32 %v3241_v8, %v330_v38  ;;  %v333_v51 = vmul.f32 %v3224_v3, %v297_v47  ;;  %v395_v53 = vmax.f32 %v363_v40, 0.0  ;;  %v308_v37 = vld [vmem:[%s3215_s24 + $0xc8] sm:$0xff]  ;;  %v298_v38 = vld [vmem:[%s3215_s24 + $0x78] sm:$0xff] }
  0x18   : > { %255 = vst.msk [vmem:[#allocation2 + $0xc0] sm:$0x1] %vm246_vm1, %v3105_v0  ;;  %v371_v54 = vadd.f32 %v3241_v8, %v335_v41  ;;  %v400_v55 = vmax.f32 %v368_v43, 0.0  ;;  %v361_v56 = vadd.f32 %v3241_v8, %v325_v44  ;;  %v390_v57 = vmax.f32 %v358_v46, 0.0 }
  0x19   : > { %256 = vst.msk [vmem:[#allocation2 + $0xd8] sm:$0x1] %vm246_vm1, %v3105_v0  ;;  %v369_v58 = vadd.f32 %v3241_v8, %v333_v51  ;;  %v398_v61 = vmax.f32 %v366_v50, 0.0  ;;  %v338_v62 = vmul.f32 %v3224_v3, %v302_v59  ;;  %v328_v63 = vmul.f32 %v3224_v3, %v292_v60 }
  0x1a   : > { %257 = vst.msk [vmem:[#allocation2 + $0xf0] sm:$0x1] %vm246_vm1, %v3105_v0  ;;  %v403_v1 = vmax.f32 %v371_v54, 0.0  ;;  %v393_v5 = vmax.f32 %v361_v56, 0.0  ;;  %v336_v14 = vmul.f32 %v3224_v3, %v300_v11  ;;  %v341_v24 = vmul.f32 %v3224_v3, %v305_v19  ;;  %v301_v56 = vld [vmem:[%s3215_s24 + $0x90] sm:$0xff]  ;;  %v304_v11 = vld [vmem:[%s3215_s24 + $0xa8] sm:$0xff] }
  0x1b   : > { %258 = vst.msk [vmem:[#allocation2 + $0x108] sm:$0x1] %vm246_vm1, %v3105_v0  ;;  %v374_v6 = vadd.f32 %v3241_v8, %v338_v62  ;;  %v364_v7 = vadd.f32 %v3241_v8, %v328_v63  ;;  %v401_v10 = vmax.f32 %v369_v58, 0.0  ;;  %v331_v25 = vmul.f32 %v3224_v3, %v295_v20  ;;  %v312_v19 = vld [vmem:[%s3215_s24 + $0xe8] sm:$0xff] }
  0x1c   : > { %259 = vst.msk [vmem:[#allocation2 + $0x120] sm:$0x1] %vm246_vm1, %v3105_v0  ;;  %v372_v16 = vadd.f32 %v3241_v8, %v336_v14  ;;  %v377_v26 = vadd.f32 %v3241_v8, %v341_v24  ;;  %v339_v33 = vmul.f32 %v3224_v3, %v303_v30  ;;  %v334_v43 = vmul.f32 %v3224_v3, %v298_v38 }
  0x1d   : > { %260 = vst.msk [vmem:[#allocation2 + $0x138] sm:$0x1] %vm246_vm1, %v3105_v0  ;;  %v406_v13 = vmax.f32 %v374_v6, 0.0  ;;  %v396_v15 = vmax.f32 %v364_v7, 0.0  ;;  %v367_v27 = vadd.f32 %v3241_v8, %v331_v25  ;;  %v307_v25 = vld [vmem:[%s3215_s24 + $0xc0] sm:$0xff]  ;;  %vm2092_vm11 = vcmask 257248  }
  0x1e   : > { %261 = vst.msk [vmem:[#allocation2 + $0x150] sm:$0x1] %vm246_vm1, %v3105_v0  ;;  %v404_v23 = vmax.f32 %v372_v16, 0.0  ;;  %vm2317_vm12 = vcmask 290048   ;;  %vm2482_vm13 = vcmask 293888  }
  0x1f   : > { %262 = vst.msk [vmem:[#allocation2 + $0x168] sm:$0x1] %vm246_vm1, %v3105_v0  ;;  %v399_v32 = vmax.f32 %v367_v27, 0.0 }
  0x20   : > { %263 = vst.msk [vmem:[#allocation2 + $0x180] sm:$0x1] %vm246_vm1, %v3105_v0 }
  0x21   : > { %266 = vst.msk [vmem:[#allocation2 + $0x29] sm:$0x1] %vm246_vm1, %v3105_v0 }
  0x22   : > { %267 = vst.msk [vmem:[#allocation2 + $0x41] sm:$0x1] %vm246_vm1, %v3105_v0 }
  0x23   : > { %268 = vst.msk [vmem:[#allocation2 + $0x59] sm:$0x1] %vm246_vm1, %v3105_v0 }
  0x24   : > { %269 = vst.msk [vmem:[#allocation2 + $0x71] sm:$0x1] %vm246_vm1, %v3105_v0 }
  0x25   : > { %270 = vst.msk [vmem:[#allocation2 + $0x89] sm:$0x1] %vm246_vm1, %v3105_v0 }
  0x26   : > { %271 = vst.msk [vmem:[#allocation2 + $0xa1] sm:$0x1] %vm246_vm1, %v3105_v0 }
  0x27   : > { %272 = vst.msk [vmem:[#allocation2 + $0xb9] sm:$0x1] %vm246_vm1, %v3105_v0 }
  0x28   : > { %273 = vst.msk [vmem:[#allocation2 + $0xd1] sm:$0x1] %vm246_vm1, %v3105_v0 }
  0x29   : > { %274 = vst.msk [vmem:[#allocation2 + $0xe9] sm:$0x1] %vm246_vm1, %v3105_v0 }
  0x2a   : > { %275 = vst.msk [vmem:[#allocation2 + $0x101] sm:$0x1] %vm246_vm1, %v3105_v0 }
  0x2b   : > { %276 = vst.msk [vmem:[#allocation2 + $0x119] sm:$0x1] %vm246_vm1, %v3105_v0 }
  0x2c   : > { %277 = vst.msk [vmem:[#allocation2 + $0x131] sm:$0x1] %vm246_vm1, %v3105_v0 }
  0x2d   : > { %278 = vst.msk [vmem:[#allocation2 + $0x149] sm:$0x1] %vm246_vm1, %v3105_v0 }
  0x2e   : > { %279 = vst.msk [vmem:[#allocation2 + $0x161] sm:$0x1] %vm246_vm1, %v3105_v0 }
  0x2f   : > { %280 = vst.msk [vmem:[#allocation2 + $0x179] sm:$0x1] %vm246_vm1, %v3105_v0 }
  0x30   : > { %281 = vst.msk [vmem:[#allocation2 + $0x191] sm:$0x1] %vm246_vm1, %v3105_v0 }
  0x31   : > { %241 = vst.msk [vmem:[#allocation2 + $0x10] sm:$0x3] %vm240_vm2, %v3105_v0 }
  0x32   : > { %245 = vst.msk [vmem:[#allocation2 + $0x1a8] sm:$0x3] %vm240_vm2, %v3105_v0 }
  0x33   : > { %264 = vst.msk [vmem:[#allocation2 + $0x198] sm:$0x1] %vm246_vm1, %v3105_v0 }
  0x34   : > { %265 = vst.msk [vmem:[#allocation2 + $0x11] sm:$0x1] %vm246_vm1, %v3105_v0 }
  0x35   : > { %282 = vst.msk [vmem:[#allocation2 + $0x1a9] sm:$0x1] %vm246_vm1, %v3105_v0 }
  0x36   : > { %420 = vst.msk [vmem:[#allocation2 + $0x19] sm:$0xff] %vm237_vm0, %v387_v28 }
  0x37   : > { %424 = vst.msk [vmem:[#allocation2 + $0x49] sm:$0xff] %vm237_vm0, %v391_v31  ;;  %v409_v31 = vmax.f32 %v377_v26, 0.0 }
  0x38   : > { %v550_v48 = vld [vmem:[#allocation2 + $0x9] sm:$0xff]  ;;  %421 = vst.msk [vmem:[#allocation2 + $0x21] sm:$0xff] %vm237_vm0, %v388_v36  ;;  %v375_v36 = vadd.f32 %v3241_v8, %v339_v33 }
  0x39   : > { %v582_v52 = vpack.c.bf16 %v550_v48, %v550_v48  ;;  %427 = vst.msk [vmem:[#allocation2 + $0x69] sm:$0xff] %vm237_vm0, %v394_v39  ;;  %v306_v48 = vld [vmem:[%s3215_s24 + $0xb8] sm:$0xff] }
  0x3a   : > { %425 = vst.msk [vmem:[#allocation2 + $0x51] sm:$0xff] %vm237_vm0, %v392_v42  ;;  %v407_v41 = vmax.f32 %v375_v36, 0.0  ;;  %v344_v42 = vmul.f32 %v3224_v3, %v308_v37  ;;  %v342_v51 = vmul.f32 %v3224_v3, %v306_v48  ;;  %v310_v36 = vld [vmem:[%s3215_s24 + $0xd8] sm:$0xff] }
  0x3b   : > { %647 = vrot.lane.b32.xlu0 %v582_v52, %s3106_s20  ;;  %430 = vst.msk [vmem:[#allocation2 + $0x91] sm:$0xff] %vm237_vm0, %v397_v45  ;;  %v370_v45 = vadd.f32 %v3241_v8, %v334_v43 }
  0x3c   : > { %422 = vst.msk [vmem:[#allocation2 + $0x31] sm:$0xff] %vm237_vm0, %v389_v49  ;;  %v380_v44 = vadd.f32 %v3241_v8, %v344_v42  ;;  %v378_v54 = vadd.f32 %v3241_v8, %v342_v51 }
  0x3d   : > { %v551_v0 = vld [vmem:[#allocation2 + $0x19] sm:$0xff]  ;;  %428 = vst.msk [vmem:[#allocation2 + $0x79] sm:$0xff] %vm237_vm0, %v395_v53  ;;  %v402_v50 = vmax.f32 %v370_v45, 0.0 }
  0x3e   : > { %v583_v2 = vpack.c.bf16 %v551_v0, %v551_v0  ;;  %v555_v4 = vld [vmem:[#allocation2 + $0x49] sm:$0xff]  ;;  %433 = vst.msk [vmem:[#allocation2 + $0xb1] sm:$0xff] %vm237_vm0, %v400_v55  ;;  %v412_v49 = vmax.f32 %v380_v44, 0.0  ;;  %v311_v55 = vld [vmem:[%s3215_s24 + $0xe0] sm:$0xff]  ;;  %v410_v59 = vmax.f32 %v378_v54, 0.0 }
  0x3f   : > { %v587_v9 = vpack.c.bf16 %v555_v4, %v555_v4  ;;  %423 = vst.msk [vmem:[#allocation2 + $0x39] sm:$0xff] %vm237_vm0, %v390_v57  ;;  %v552_v12 = vld [vmem:[#allocation2 + $0x21] sm:$0xff]  ;;  %v347_v60 = vmul.f32 %v3224_v3, %v311_v55 }
  0x40   : > { %649 = vrot.lane.b32.xlu1 %v583_v2, %s3106_s20  ;;  %431 = vst.msk [vmem:[#allocation2 + $0x99] sm:$0xff] %vm237_vm0, %v398_v61  ;;  %v584_v17 = vpack.c.bf16 %v552_v12, %v552_v12  ;;  %v558_v21 = vld [vmem:[#allocation2 + $0x69] sm:$0xff]  ;;  %v337_v61 = vmul.f32 %v3224_v3, %v301_v56  ;;  %v452_v56 = vld [vmem:[#allocation2] sm:$0xff] }
  0x41   : > { %436 = vst.msk [vmem:[#allocation2 + $0xd9] sm:$0xff] %vm237_vm0, %v403_v1  ;;  %v590_v28 = vpack.c.bf16 %v558_v21, %v558_v21  ;;  %v556_v34 = vld [vmem:[#allocation2 + $0x51] sm:$0xff]  ;;  %v383_v62 = vadd.f32 %v3241_v8, %v347_v60  ;;  %v348_v21 = vmul.f32 %v3224_v3, %v312_v19 }
  0x42   : > { %426 = vst.msk [vmem:[#allocation2 + $0x61] sm:$0xff] %vm237_vm0, %v393_v5  ;;  %v588_v39 = vpack.c.bf16 %v556_v34, %v556_v34  ;;  %v561_v40 = vld [vmem:[#allocation2 + $0x91] sm:$0xff]  ;;  %v373_v63 = vadd.f32 %v3241_v8, %v337_v61 }
  0x43   : > { %657 = vrot.lane.b32.xlu0 %v587_v9, %s3106_s20  ;;  %v553_v18 = vld [vmem:[#allocation2 + $0x31] sm:$0xff]  ;;  %434 = vst.msk [vmem:[#allocation2 + $0xc1] sm:$0xff] %vm237_vm0, %v401_v10  ;;  %v593_v46 = vpack.c.bf16 %v561_v40, %v561_v40  ;;  %v415_v4 = vmax.f32 %v383_v62, 0.0  ;;  %v384_v24 = vadd.f32 %v3241_v8, %v348_v21  ;;  %v777_v21 = vld [vmem:[#allocation2 + $0x22] sm:$0xff] }
  0x44   : > { %v585_v22 = vpack.c.bf16 %v553_v18, %v553_v18  ;;  %439 = vst.msk [vmem:[#allocation2 + $0xf9] sm:$0xff] %vm237_vm0, %v406_v13  ;;  %v559_v52 = vld [vmem:[#allocation2 + $0x79] sm:$0xff]  ;;  %v309_v2 = vld [vmem:[%s3215_s24 + $0xd0] sm:$0xff]  ;;  %v405_v5 = vmax.f32 %v373_v63, 0.0 }
  0x45   : > { %429 = vst.msk [vmem:[#allocation2 + $0x81] sm:$0xff] %vm237_vm0, %v396_v15  ;;  %v591_v57 = vpack.c.bf16 %v559_v52, %v559_v52  ;;  %v564_v58 = vld [vmem:[#allocation2 + $0xb1] sm:$0xff]  ;;  %v345_v6 = vmul.f32 %v3224_v3, %v309_v2  ;;  %v340_v15 = vmul.f32 %v3224_v3, %v304_v11 }
  0x46   : > { %653 = vrot.lane.b32.xlu2 %v585_v22, %s3106_s20  ;;  %437 = vst.msk [vmem:[#allocation2 + $0xe1] sm:$0xff] %vm237_vm0, %v404_v23  ;;  %v554_v29 = vld [vmem:[#allocation2 + $0x39] sm:$0xff]  ;;  %v596_v0 = vpack.c.bf16 %v564_v58, %v564_v58  ;;  %v775_v58 = vld [vmem:[#allocation2 + $0xa] sm:$0xff] }
  0x47   : > { %v586_v35 = vpack.c.bf16 %v554_v29, %v554_v29  ;;  %442 = vst.msk [vmem:[#allocation2 + $0x121] sm:$0xff] %vm237_vm0, %v409_v31  ;;  %v562_v7 = vld [vmem:[#allocation2 + $0x99] sm:$0xff]  ;;  %v381_v10 = vadd.f32 %v3241_v8, %v345_v6  ;;  %v376_v16 = vadd.f32 %v3241_v8, %v340_v15  ;;  %v343_v29 = vmul.f32 %v3224_v3, %v307_v25  ;;  %v456_v6 = vld [vmem:[#allocation2 + $0x30] sm:$0xff] }
  0x48   : > { %651 = vrot.lane.b32.xlu1 %v584_v17, %s3106_s20  ;;  %432 = vst.msk [vmem:[#allocation2 + $0xa9] sm:$0xff] %vm237_vm0, %v399_v32  ;;  %v594_v12 = vpack.c.bf16 %v562_v7, %v562_v7  ;;  %v567_v13 = vld [vmem:[#allocation2 + $0xd9] sm:$0xff]  ;;  %v807_v60 = vpack.c.bf16 %v775_v58, %v775_v58 }
  0x49   : > { %440 = vst.msk [vmem:[#allocation2 + $0x109] sm:$0xff] %vm237_vm0, %v407_v41  ;;  %v557_v47 = vld [vmem:[#allocation2 + $0x61] sm:$0xff]  ;;  %v413_v14 = vmax.f32 %v381_v10, 0.0  ;;  %v599_v17 = vpack.c.bf16 %v567_v13, %v567_v13  ;;  %v408_v20 = vmax.f32 %v376_v16, 0.0  ;;  %v379_v30 = vadd.f32 %v3241_v8, %v343_v29  ;;  %v454_v11 = vld [vmem:[#allocation2 + $0x18] sm:$0xff] }
  0x4a   : > { %v589_v53 = vpack.c.bf16 %v557_v47, %v557_v47  ;;  %445 = vst.msk [vmem:[#allocation2 + $0x141] sm:$0xff] %vm237_vm0, %v412_v49  ;;  %v565_v22 = vld [vmem:[#allocation2 + $0xc1] sm:$0xff]  ;;  %v3415_v10 = vpack.c.bf16 %v456_v6, %v456_v6  ;;  %v781_v16 = vld [vmem:[#allocation2 + $0x52] sm:$0xff] }
  0x4b   : > { %663 = vrot.lane.b32.xlu0 %v590_v28, %s3106_s20  ;;  %435 = vst.msk [vmem:[#allocation2 + $0xc9] sm:$0xff] %vm237_vm0, %v402_v50  ;;  %v597_v26 = vpack.c.bf16 %v565_v22, %v565_v22  ;;  %v570_v27 = vld [vmem:[#allocation2 + $0xf9] sm:$0xff]  ;;  %v416_v28 = vmax.f32 %v384_v24, 0.0  ;;  %v411_v33 = vmax.f32 %v379_v30, 0.0 }
  0x4c   : > { %443 = vst.msk [vmem:[#allocation2 + $0x129] sm:$0xff] %vm237_vm0, %v410_v59  ;;  %v560_v1 = vld [vmem:[#allocation2 + $0x81] sm:$0xff]  ;;  %v602_v31 = vpack.c.bf16 %v570_v27, %v570_v27  ;;  %v484_v59 = vpack.c.bf16 %v452_v56, %v452_v56  ;;  %v457_v19 = vld [vmem:[#allocation2 + $0x38] sm:$0xff] }
  0x4d   : > { %v592_v9 = vpack.c.bf16 %v560_v1, %v560_v1  ;;  %448 = vst.msk [vmem:[#allocation2 + $0x169] sm:$0xff] %vm237_vm0, %v415_v4  ;;  %v568_v34 = vld [vmem:[#allocation2 + $0xe1] sm:$0xff]  ;;  %v778_v4 = vld [vmem:[#allocation2 + $0x32] sm:$0xff]  ;;  %v3428_v22 = vpack.c.bf16 %v457_v19, %v457_v19 }
  0x4e   : > { %655 = vrot.lane.b32.xlu2 %v586_v35, %s3106_s20  ;;  %438 = vst.msk [vmem:[#allocation2 + $0xf1] sm:$0xff] %vm237_vm0, %v405_v5  ;;  %v600_v37 = vpack.c.bf16 %v568_v34, %v568_v34  ;;  %v573_v38 = vld [vmem:[#allocation2 + $0x121] sm:$0xff]  ;;  %v810_v7 = vpack.c.bf16 %v778_v4, %v778_v4  ;;  %v786_v58 = vld [vmem:[#allocation2 + $0x92] sm:$0xff] }
  0x4f   : > { %446 = vst.msk [vmem:[#allocation2 + $0x151] sm:$0xff] %vm237_vm0, %v413_v14  ;;  %v563_v18 = vld [vmem:[#allocation2 + $0xa9] sm:$0xff]  ;;  %v605_v41 = vpack.c.bf16 %v573_v38, %v573_v38  ;;  %v776_v13 = vld [vmem:[#allocation2 + $0x1a] sm:$0xff] }
  0x50   : > { %659 = vrot.lane.b32.xlu1 %v588_v39, %s3106_s20  ;;  %v595_v23 = vpack.c.bf16 %v563_v18, %v563_v18  ;;  %441 = vst.msk [vmem:[#allocation2 + $0x111] sm:$0xff] %vm237_vm0, %v408_v20  ;;  %v346_v39 = vmul.f32 %v3224_v3, %v310_v36  ;;  %v571_v44 = vld [vmem:[#allocation2 + $0x109] sm:$0xff]  ;;  %v808_v15 = vpack.c.bf16 %v776_v13, %v776_v13  ;;  %v779_v25 = vld [vmem:[#allocation2 + $0x3a] sm:$0xff]  ;;  %v789_v13 = vld [vmem:[#allocation2 + $0xb2] sm:$0xff] }
  0x51   : > { %449 = vst.msk [vmem:[#allocation2 + $0x171] sm:$0xff] %vm237_vm0, %v416_v28  ;;  %v576_v47 = vld [vmem:[#allocation2 + $0x141] sm:$0xff]  ;;  %v813_v20 = vpack.c.bf16 %v781_v16, %v781_v16  ;;  %v811_v28 = vpack.c.bf16 %v779_v25, %v779_v25 }
  0x52   : > { %v566_v32 = vld [vmem:[#allocation2 + $0xc9] sm:$0xff]  ;;  %444 = vst.msk [vmem:[#allocation2 + $0x139] sm:$0xff] %vm237_vm0, %v411_v33  ;;  %v382_v40 = vadd.f32 %v3241_v8, %v346_v39  ;;  %v608_v3 = vpack.c.bf16 %v576_v47, %v576_v47  ;;  %v784_v29 = vld [vmem:[#allocation2 + $0x7a] sm:$0xff] }
  0x53   : > { %669 = vrot.lane.b32.xlu0 %v593_v46, %s3106_s20  ;;  %v598_v35 = vpack.c.bf16 %v566_v32, %v566_v32  ;;  %v603_v46 = vpack.c.bf16 %v571_v44, %v571_v44  ;;  %v574_v8 = vld [vmem:[#allocation2 + $0x129] sm:$0xff]  ;;  %517 = vst.msk [vmem:[#allocation3] sm:$0xf] %vm516_vm3, %v484_v59  ;;  %v816_v32 = vpack.c.bf16 %v784_v29, %v784_v29  ;;  %v463_v44 = vld [vmem:[#allocation2 + $0x80] sm:$0xff] }
  0x54   : > { %v414_v43 = vmax.f32 %v382_v40, 0.0  ;;  %v606_v50 = vpack.c.bf16 %v574_v8, %v574_v8  ;;  %v579_v51 = vld [vmem:[#allocation2 + $0x169] sm:$0xff]  ;;  %521 = vst.msk [vmem:[#allocation3 + $0x10] sm:$0xf] %vm516_vm3, %v3415_v10  ;;  %v3461_v47 = vpack.c.bf16 %v463_v44, %v463_v44 }
  0x55   : > { %v569_v42 = vld [vmem:[#allocation2 + $0xf1] sm:$0xff]  ;;  %v611_v52 = vpack.c.bf16 %v579_v51, %v579_v51  ;;  %v453_v1 = vld [vmem:[#allocation2 + $0x8] sm:$0xff]  ;;  %522 = vst.msk [vmem:[#allocation3 + $0x14] sm:$0xf] %vm516_vm3, %v3428_v22 }
  0x56   : > { %661 = vrot.lane.b32.xlu2 %v589_v53, %s3106_s20  ;;  %v601_v45 = vpack.c.bf16 %v569_v42, %v569_v42  ;;  %447 = vst.msk [vmem:[#allocation2 + $0x159] sm:$0xff] %vm237_vm0, %v414_v43  ;;  %v577_v54 = vld [vmem:[#allocation2 + $0x151] sm:$0xff]  ;;  %v485_v5 = vpack.c.bf16 %v453_v1, %v453_v1  ;;  %v461_v27 = vld [vmem:[#allocation2 + $0x68] sm:$0xff]  ;;  %v787_v42 = vld [vmem:[#allocation2 + $0x9a] sm:$0xff]  ;;  %v818_v1 = vpack.c.bf16 %v786_v58, %v786_v58 }
  0x57   : > { %v572_v48 = vld [vmem:[#allocation2 + $0x111] sm:$0xff]  ;;  %v3440_v30 = vpack.c.bf16 %v461_v27, %v461_v27  ;;  %v782_v38 = vld [vmem:[#allocation2 + $0x62] sm:$0xff]  ;;  %528 = vst.msk [vmem:[#allocation3 + $0x2c] sm:$0xf] %vm516_vm3, %v3461_v47 }
  0x58   : > { %665 = vrot.lane.b32.xlu1 %v591_v57, %s3106_s20  ;;  %v604_v49 = vpack.c.bf16 %v572_v48, %v572_v48  ;;  %v609_v57 = vpack.c.bf16 %v577_v54, %v577_v54  ;;  %v580_v62 = vld [vmem:[#allocation2 + $0x171] sm:$0xff]  ;;  %518 = vst.msk [vmem:[#allocation3 + $0x4] sm:$0xf] %vm516_vm3, %v485_v5  ;;  %v466_v56 = vld [vmem:[#allocation2 + $0xa8] sm:$0xff] }
  0x59   : > { %v575_v53 = vld [vmem:[#allocation2 + $0x139] sm:$0xff]  ;;  %v612_v2 = vpack.c.bf16 %v580_v62, %v580_v62  ;;  %526 = vst.msk [vmem:[#allocation3 + $0x24] sm:$0xf] %vm516_vm3, %v3440_v30  ;;  %v780_v33 = vld [vmem:[#allocation2 + $0x4a] sm:$0xff]  ;;  %v3478_v59 = vpack.c.bf16 %v466_v56, %v466_v56  ;;  %v793_v5 = vld [vmem:[#allocation2 + $0xe2] sm:$0xff] }
  0x5a   : > { %v607_v55 = vpack.c.bf16 %v575_v53, %v575_v53  ;;  %v812_v39 = vpack.c.bf16 %v780_v33, %v780_v33  ;;  %v464_v40 = vld [vmem:[#allocation2 + $0x90] sm:$0xff]  ;;  %v790_v53 = vld [vmem:[#allocation2 + $0xc2] sm:$0xff] }
  0x5b   : > { %675 = vrot.lane.b32.xlu0 %v596_v0, %s3106_s20  ;;  %v3456_v43 = vpack.c.bf16 %v464_v40, %v464_v40  ;;  %v467_v51 = vld [vmem:[#allocation2 + $0xb0] sm:$0xff]  ;;  %531 = vst.msk [vmem:[#allocation3 + $0x38] sm:$0xf] %vm516_vm3, %v3478_v59 }
  0x5c   : > { %v3472_v54 = vpack.c.bf16 %v467_v51, %v467_v51  ;;  %v791_v19 = vld [vmem:[#allocation2 + $0xca] sm:$0xff]  ;;  %v797_v56 = vld [vmem:[#allocation2 + $0x112] sm:$0xff] }
  0x5d   : > { %v578_v61 = vld [vmem:[#allocation2 + $0x159] sm:$0xff]  ;;  %529 = vst.msk [vmem:[#allocation3 + $0x30] sm:$0xf] %vm516_vm3, %v3456_v43  ;;  %v823_v25 = vpack.c.bf16 %v791_v19, %v791_v19  ;;  %v472_v29 = vld [vmem:[#allocation2 + $0xf0] sm:$0xff] }
  0x5e   : > { %667 = vrot.lane.b32.xlu2 %v592_v9, %s3106_s20  ;;  %v610_v0 = vpack.c.bf16 %v578_v61, %v578_v61  ;;  %v774_v9 = vld [vmem:[#allocation2 + $0x2] sm:$0xff]  ;;  %532 = vst.msk [vmem:[#allocation3 + $0x3c] sm:$0xf] %vm516_vm3, %v3472_v54  ;;  %v3514_v33 = vpack.c.bf16 %v472_v29, %v472_v29 }
  0x5f   : > { %v806_v14 = vpack.c.bf16 %v774_v9, %v774_v9  ;;  %v469_v9 = vld [vmem:[#allocation2 + $0xc8] sm:$0xff] }
  0x60   : > { %671 = vrot.lane.b32.xlu1 %v594_v12, %s3106_s20  ;;  %v3418_v12 = vpack.c.bf16 %v454_v11, %v454_v11  ;;  %v825_v11 = vpack.c.bf16 %v793_v5, %v793_v5  ;;  %537 = vst.msk [vmem:[#allocation3 + $0x50] sm:$0xf] %vm516_vm3, %v3514_v33  ;;  %v798_v5 = vld [vmem:[#allocation2 + $0x122] sm:$0xff] }
  0x61   : > { %v830_v19 = vpack.c.bf16 %v798_v5, %v798_v5 }
  0x62   : > { %519 = vst.msk [vmem:[#allocation3 + $0x8] sm:$0xf] %vm516_vm3, %v3418_v12 }
  0x63   : > { %681 = vrot.lane.b32.xlu0 %v599_v17, %s3106_s20  ;;  %v458_v17 = vld [vmem:[#allocation2 + $0x48] sm:$0xff] }
  0x64   : > { %v3426_v18 = vpack.c.bf16 %v458_v17, %v458_v17 }
  0x66   : > { %673 = vrot.lane.b32.xlu2 %v595_v23, %s3106_s20  ;;  %v455_v23 = vld [vmem:[#allocation2 + $0x20] sm:$0xff]  ;;  %523 = vst.msk [vmem:[#allocation3 + $0x18] sm:$0xf] %vm516_vm3, %v3426_v18 }
  0x67   : > { %v3433_v24 = vpack.c.bf16 %v455_v23, %v455_v23  ;;  %v473_v23 = vld [vmem:[#allocation2 + $0xf8] sm:$0xff] }
  0x68   : > { %677 = vrot.lane.b32.xlu1 %v597_v26, %s3106_s20  ;;  %v809_v26 = vpack.c.bf16 %v777_v21, %v777_v21  ;;  %v821_v21 = vpack.c.bf16 %v789_v13, %v789_v13  ;;  %v3508_v27 = vpack.c.bf16 %v473_v23, %v473_v23  ;;  %v805_v23 = vld [vmem:[#allocation2 + $0x172] sm:$0xff] }
  0x69   : > { %520 = vst.msk [vmem:[#allocation3 + $0xc] sm:$0xf] %vm516_vm3, %v3433_v24  ;;  %v837_v29 = vpack.c.bf16 %v805_v23, %v805_v23 }
  0x6a   : > { %538 = vst.msk [vmem:[#allocation3 + $0x54] sm:$0xf] %vm516_vm3, %v3508_v27 }
  0x6b   : > { %687 = vrot.lane.b32.xlu0 %v602_v31, %s3106_s20  ;;  %v460_v31 = vld [vmem:[#allocation2 + $0x60] sm:$0xff] }
  0x6c   : > { %v3445_v34 = vpack.c.bf16 %v460_v31, %v460_v31 }
  0x6e   : > { %679 = vrot.lane.b32.xlu2 %v598_v35, %s3106_s20  ;;  %v459_v35 = vld [vmem:[#allocation2 + $0x50] sm:$0xff]  ;;  %525 = vst.msk [vmem:[#allocation3 + $0x20] sm:$0xf] %vm516_vm3, %v3445_v34 }
  0x70   : > { %683 = vrot.lane.b32.xlu1 %v600_v37, %s3106_s20  ;;  %v3448_v37 = vpack.c.bf16 %v459_v35, %v459_v35  ;;  %v471_v35 = vld [vmem:[#allocation2 + $0xe0] sm:$0xff] }
  0x72   : > { %524 = vst.msk [vmem:[#allocation3 + $0x1c] sm:$0xf] %vm516_vm3, %v3448_v37 }
  0x73   : > { %693 = vrot.lane.b32.xlu0 %v605_v41, %s3106_s20  ;;  %v814_v41 = vpack.c.bf16 %v782_v38, %v782_v38  ;;  %v3517_v38 = vpack.c.bf16 %v471_v35, %v471_v35  ;;  %v480_v35 = vld [vmem:[#allocation2 + $0x150] sm:$0xff] }
  0x75   : > { %536 = vst.msk [vmem:[#allocation3 + $0x4c] sm:$0xf] %vm516_vm3, %v3517_v38 }
  0x76   : > { %685 = vrot.lane.b32.xlu2 %v601_v45, %s3106_s20  ;;  %v819_v45 = vpack.c.bf16 %v787_v42, %v787_v42  ;;  %v476_v42 = vld [vmem:[#allocation2 + $0x120] sm:$0xff] }
  0x78   : > { %689 = vrot.lane.b32.xlu1 %v603_v46, %s3106_s20  ;;  %v783_v46 = vld [vmem:[#allocation2 + $0x6a] sm:$0xff] }
  0x7b   : > { %699 = vrot.lane.b32.xlu0 %v608_v3, %s3106_s20  ;;  %v462_v3 = vld [vmem:[#allocation2 + $0x78] sm:$0xff] }
  0x7c   : > { %v3464_v8 = vpack.c.bf16 %v462_v3, %v462_v3 }
  0x7e   : > { %691 = vrot.lane.b32.xlu2 %v604_v49, %s3106_s20  ;;  %v785_v49 = vld [vmem:[#allocation2 + $0x82] sm:$0xff]  ;;  %527 = vst.msk [vmem:[#allocation3 + $0x28] sm:$0xf] %vm516_vm3, %v3464_v8 }
  0x80   : > { %695 = vrot.lane.b32.xlu1 %v606_v50, %s3106_s20  ;;  %v815_v50 = vpack.c.bf16 %v783_v46, %v783_v46  ;;  %v3526_v46 = vpack.c.bf16 %v476_v42, %v476_v42 }
  0x82   : > { %541 = vst.msk [vmem:[#allocation3 + $0x60] sm:$0xf] %vm516_vm3, %v3526_v46 }
  0x83   : > { %705 = vrot.lane.b32.xlu0 %v611_v52, %s3106_s20  ;;  %v817_v52 = vpack.c.bf16 %v785_v49, %v785_v49 }
  0x86   : > { %697 = vrot.lane.b32.xlu2 %v607_v55, %s3106_s20 }
  0x88   : > { %701 = vrot.lane.b32.xlu1 %v609_v57, %s3106_s20  ;;  %v822_v57 = vpack.c.bf16 %v790_v53, %v790_v53 }
  0x89   : > { %v646_v63 = vpop.permute.xlu0 %645 }
  0x8a   : > { %742 = vst.msk [vmem:[#allocation3] sm:$0xf] %vm741_vm4, %v646_v63  ;;  %v788_v63 = vld [vmem:[#allocation2 + $0xaa] sm:$0xff] }
  0x8b   : > { %872 = vrot.lane.b32.xlu0 %v807_v60, %s3107_s29  ;;  %v465_v60 = vld [vmem:[#allocation2 + $0x98] sm:$0xff]  ;;  %v820_v4 = vpack.c.bf16 %v788_v63, %v788_v63 }
  0x8c   : > { %v3481_v62 = vpack.c.bf16 %v465_v60, %v465_v60  ;;  %v479_v60 = vld [vmem:[#allocation2 + $0x140] sm:$0xff]  ;;  %v802_v63 = vld [vmem:[#allocation2 + $0x152] sm:$0xff] }
  0x8e   : > { %703 = vrot.lane.b32.xlu2 %v610_v0, %s3106_s20  ;;  %530 = vst.msk [vmem:[#allocation3 + $0x34] sm:$0xf] %vm516_vm3, %v3481_v62 }
  0x90   : > { %707 = vrot.lane.b32.xlu1 %v612_v2, %s3106_s20  ;;  %v470_v2 = vld [vmem:[#allocation2 + $0xd8] sm:$0xff] }
  0x91   : > { %v3490_v6 = vpack.c.bf16 %v470_v2, %v470_v2  ;;  %v478_v2 = vld [vmem:[#allocation2 + $0x138] sm:$0xff] }
  0x93   : > { %878 = vrot.lane.b32.xlu0 %v810_v7, %s3107_s29  ;;  %535 = vst.msk [vmem:[#allocation3 + $0x48] sm:$0xf] %vm516_vm3, %v3490_v6 }
  0x96   : > { %870 = vrot.lane.b32.xlu2 %v806_v14, %s3107_s29  ;;  %v3496_v14 = vpack.c.bf16 %v469_v9, %v469_v9  ;;  %v477_v9 = vld [vmem:[#allocation2 + $0x128] sm:$0xff] }
  0x97   : > { %v3553_v13 = vpack.c.bf16 %v477_v9, %v477_v9 }
  0x98   : > { %874 = vrot.lane.b32.xlu1 %v808_v15, %s3107_s29  ;;  %v468_v15 = vld [vmem:[#allocation2 + $0xc0] sm:$0xff]  ;;  %534 = vst.msk [vmem:[#allocation3 + $0x44] sm:$0xf] %vm516_vm3, %v3496_v14 }
  0x99   : > { %v3499_v17 = vpack.c.bf16 %v468_v15, %v468_v15  ;;  %v800_v15 = vld [vmem:[#allocation2 + $0x13a] sm:$0xff]  ;;  %542 = vst.msk [vmem:[#allocation3 + $0x64] sm:$0xf] %vm516_vm3, %v3553_v13 }
  0x9b   : > { %884 = vrot.lane.b32.xlu0 %v813_v20, %s3107_s29  ;;  %533 = vst.msk [vmem:[#allocation3 + $0x40] sm:$0xf] %vm516_vm3, %v3499_v17 }
  0x9e   : > { %876 = vrot.lane.b32.xlu2 %v809_v26, %s3107_s29  ;;  %v796_v26 = vld [vmem:[#allocation2 + $0x10a] sm:$0xff] }
  0x9f   : > { %v828_v31 = vpack.c.bf16 %v796_v26, %v796_v26 }
  0xa0   : > { %880 = vrot.lane.b32.xlu1 %v811_v28, %s3107_s29  ;;  %v654_v36 = vpop.permute.xlu2 %653 }
  0xa1   : > { %746 = vst.msk [vmem:[#allocation3 + $0x10] sm:$0xf] %vm741_vm4, %v654_v36 }
  0xa3   : > { %890 = vrot.lane.b32.xlu0 %v816_v32, %s3107_s29  ;;  %v792_v32 = vld [vmem:[#allocation2 + $0xda] sm:$0xff] }
  0xa6   : > { %882 = vrot.lane.b32.xlu2 %v812_v39, %s3107_s29  ;;  %v794_v39 = vld [vmem:[#allocation2 + $0xf2] sm:$0xff] }
  0xa7   : > { %v826_v44 = vpack.c.bf16 %v794_v39, %v794_v39  ;;  %v3571_v39 = vpack.c.bf16 %v480_v35, %v480_v35 }
  0xa8   : > { %886 = vrot.lane.b32.xlu1 %v814_v41, %s3107_s29  ;;  %v656_v48 = vpop.permute.xlu2 %655  ;;  %v824_v41 = vpack.c.bf16 %v792_v32, %v792_v32 }
  0xa9   : > { %747 = vst.msk [vmem:[#allocation3 + $0x14] sm:$0xf] %vm741_vm4, %v656_v48  ;;  %v475_v48 = vld [vmem:[#allocation2 + $0x110] sm:$0xff] }
  0xaa   : > { %v3532_v51 = vpack.c.bf16 %v475_v48, %v475_v48  ;;  %545 = vst.msk [vmem:[#allocation3 + $0x70] sm:$0xf] %vm516_vm3, %v3571_v39  ;;  %v483_v48 = vld [vmem:[#allocation2 + $0x170] sm:$0xff] }
  0xab   : > { %896 = vrot.lane.b32.xlu0 %v819_v45, %s3107_s29  ;;  %v799_v45 = vld [vmem:[#allocation2 + $0x12a] sm:$0xff] }
  0xac   : > { %v831_v49 = vpack.c.bf16 %v799_v45, %v799_v45  ;;  %540 = vst.msk [vmem:[#allocation3 + $0x5c] sm:$0xf] %vm516_vm3, %v3532_v51 }
  0xad   : > { %v648_v55 = vpop.permute.xlu0 %647 }
  0xae   : > { %743 = vst.msk [vmem:[#allocation3 + $0x4] sm:$0xf] %vm741_vm4, %v648_v55  ;;  %888 = vrot.lane.b32.xlu2 %v815_v50, %s3107_s29  ;;  %v795_v50 = vld [vmem:[#allocation2 + $0xfa] sm:$0xff] }
  0xaf   : > { %v827_v58 = vpack.c.bf16 %v795_v50, %v795_v50  ;;  %v3583_v50 = vpack.c.bf16 %v483_v48, %v483_v48  ;;  %v1228_v48 = vld [vmem:[#allocation2 + $0x49] sm:$0xff] }
  0xb0   : > { %892 = vrot.lane.b32.xlu1 %v817_v52, %s3107_s29  ;;  %v662_v61 = vpop.permute.xlu2 %661  ;;  %v474_v52 = vld [vmem:[#allocation2 + $0x108] sm:$0xff] }
  0xb1   : > { %750 = vst.msk [vmem:[#allocation3 + $0x20] sm:$0xf] %vm741_vm4, %v662_v61  ;;  %v3535_v55 = vpack.c.bf16 %v474_v52, %v474_v52  ;;  %v829_v61 = vpack.c.bf16 %v797_v56, %v797_v56 }
  0xb2   : > { %v650_v0 = vpop.permute.xlu1 %649  ;;  %548 = vst.msk [vmem:[#allocation3 + $0x7c] sm:$0xf] %vm516_vm3, %v3583_v50 }
  0xb3   : > { %744 = vst.msk [vmem:[#allocation3 + $0x8] sm:$0xf] %vm741_vm4, %v650_v0  ;;  %902 = vrot.lane.b32.xlu0 %v822_v57, %s3107_s29  ;;  %v3544_v0 = vpack.c.bf16 %v479_v60, %v479_v60 }
  0xb4   : > { %539 = vst.msk [vmem:[#allocation3 + $0x58] sm:$0xf] %vm516_vm3, %v3535_v55 }
  0xb5   : > { %v658_v7 = vpop.permute.xlu0 %657  ;;  %544 = vst.msk [vmem:[#allocation3 + $0x6c] sm:$0xf] %vm516_vm3, %v3544_v0 }
  0xb6   : > { %748 = vst.msk [vmem:[#allocation3 + $0x18] sm:$0xf] %vm741_vm4, %v658_v7  ;;  %894 = vrot.lane.b32.xlu2 %v818_v1, %s3107_s29  ;;  %v3550_v7 = vpack.c.bf16 %v478_v2, %v478_v2 }
  0xb8   : > { %898 = vrot.lane.b32.xlu1 %v820_v4, %s3107_s29  ;;  %v668_v16 = vpop.permute.xlu2 %667  ;;  %v834_v4 = vpack.c.bf16 %v802_v63, %v802_v63  ;;  %543 = vst.msk [vmem:[#allocation3 + $0x68] sm:$0xf] %vm516_vm3, %v3550_v7 }
  0xb9   : > { %753 = vst.msk [vmem:[#allocation3 + $0x2c] sm:$0xf] %vm741_vm4, %v668_v16 }
  0xba   : > { %v652_v20 = vpop.permute.xlu1 %651 }
  0xbb   : > { %745 = vst.msk [vmem:[#allocation3 + $0xc] sm:$0xf] %vm741_vm4, %v652_v20  ;;  %908 = vrot.lane.b32.xlu0 %v825_v11, %s3107_s29  ;;  %v482_v20 = vld [vmem:[#allocation2 + $0x168] sm:$0xff] }
  0xbd   : > { %v664_v28 = vpop.permute.xlu0 %663 }
  0xbe   : > { %751 = vst.msk [vmem:[#allocation3 + $0x24] sm:$0xf] %vm741_vm4, %v664_v28  ;;  %900 = vrot.lane.b32.xlu2 %v821_v21, %s3107_s29  ;;  %v832_v21 = vpack.c.bf16 %v800_v15, %v800_v15  ;;  %v481_v28 = vld [vmem:[#allocation2 + $0x158] sm:$0xff] }
  0xbf   : > { %v3568_v32 = vpack.c.bf16 %v481_v28, %v481_v28 }
  0xc0   : > { %904 = vrot.lane.b32.xlu1 %v823_v25, %s3107_s29  ;;  %v674_v36 = vpop.permute.xlu2 %673  ;;  %v3562_v25 = vpack.c.bf16 %v482_v20, %v482_v20  ;;  %v1224_v20 = vld [vmem:[#allocation2 + $0x19] sm:$0xff] }
  0xc1   : > { %756 = vst.msk [vmem:[#allocation3 + $0x38] sm:$0xf] %vm741_vm4, %v674_v36 }
  0xc2   : > { %v660_v40 = vpop.permute.xlu1 %659  ;;  %547 = vst.msk [vmem:[#allocation3 + $0x78] sm:$0xf] %vm516_vm3, %v3562_v25 }
  0xc3   : > { %749 = vst.msk [vmem:[#allocation3 + $0x1c] sm:$0xf] %vm741_vm4, %v660_v40  ;;  %914 = vrot.lane.b32.xlu0 %v828_v31, %s3107_s29  ;;  %v801_v31 = vld [vmem:[#allocation2 + $0x142] sm:$0xff]  ;;  %v803_v40 = vld [vmem:[#allocation2 + $0x15a] sm:$0xff] }
  0xc4   : > { %v833_v42 = vpack.c.bf16 %v801_v31, %v801_v31  ;;  %546 = vst.msk [vmem:[#allocation3 + $0x74] sm:$0xf] %vm516_vm3, %v3568_v32 }
  0xc5   : > { %v670_v3 = vpop.permute.xlu0 %669 }
  0xc6   : > { %754 = vst.msk [vmem:[#allocation3 + $0x30] sm:$0xf] %vm741_vm4, %v670_v3  ;;  %906 = vrot.lane.b32.xlu2 %v824_v41, %s3107_s29  ;;  %v804_v3 = vld [vmem:[#allocation2 + $0x16a] sm:$0xff] }
  0xc8   : > { %910 = vrot.lane.b32.xlu1 %v826_v44, %s3107_s29  ;;  %v680_v53 = vpop.permute.xlu2 %679  ;;  %v835_v44 = vpack.c.bf16 %v803_v40, %v803_v40 }
  0xc9   : > { %759 = vst.msk [vmem:[#allocation3 + $0x44] sm:$0xf] %vm741_vm4, %v680_v53  ;;  %v836_v53 = vpack.c.bf16 %v804_v3, %v804_v3 }
  0xca   : > { %v666_v57 = vpop.permute.xlu1 %665 }
  0xcb   : > { %752 = vst.msk [vmem:[#allocation3 + $0x28] sm:$0xf] %vm741_vm4, %v666_v57  ;;  %920 = vrot.lane.b32.xlu0 %v831_v49, %s3107_s29 }
  0xcd   : > { %v676_v1 = vpop.permute.xlu0 %675 }
  0xce   : > { %757 = vst.msk [vmem:[#allocation3 + $0x3c] sm:$0xf] %vm741_vm4, %v676_v1  ;;  %912 = vrot.lane.b32.xlu2 %v827_v58, %s3107_s29 }
  0xd0   : > { %916 = vrot.lane.b32.xlu1 %v829_v61, %s3107_s29  ;;  %v686_v11 = vpop.permute.xlu2 %685 }
  0xd1   : > { %762 = vst.msk [vmem:[#allocation3 + $0x50] sm:$0xf] %vm741_vm4, %v686_v11  ;;  %v314_v11 = vld [vmem:[%s3215_s24 + $0xf8] sm:$0xff] }
  0xd2   : > { %v672_v16 = vpop.permute.xlu1 %671 }
  0xd3   : > { %755 = vst.msk [vmem:[#allocation3 + $0x34] sm:$0xf] %vm741_vm4, %v672_v16  ;;  %926 = vrot.lane.b32.xlu0 %v834_v4, %s3107_s29 }
  0xd5   : > { %v682_v26 = vpop.permute.xlu0 %681 }
  0xd6   : > { %760 = vst.msk [vmem:[#allocation3 + $0x48] sm:$0xf] %vm741_vm4, %v682_v26  ;;  %918 = vrot.lane.b32.xlu2 %v830_v19, %s3107_s29 }
  0xd8   : > { %922 = vrot.lane.b32.xlu1 %v832_v21, %s3107_s29  ;;  %v692_v36 = vpop.permute.xlu2 %691 }
  0xd9   : > { %765 = vst.msk [vmem:[#allocation3 + $0x5c] sm:$0xf] %vm741_vm4, %v692_v36  ;;  %v1225_v36 = vld [vmem:[#allocation2 + $0x21] sm:$0xff] }
  0xda   : > { %v678_v41 = vpop.permute.xlu1 %677 }
  0xdb   : > { %758 = vst.msk [vmem:[#allocation3 + $0x40] sm:$0xf] %vm741_vm4, %v678_v41  ;;  %932 = vrot.lane.b32.xlu0 %v837_v29, %s3107_s29  ;;  %v1227_v29 = vld [vmem:[#allocation2 + $0x39] sm:$0xff]  ;;  %v1257_v41 = vpack.c.bf16 %v1225_v36, %v1225_v36 }
  0xdd   : > { %v688_v45 = vpop.permute.xlu0 %687 }
  0xde   : > { %763 = vst.msk [vmem:[#allocation3 + $0x54] sm:$0xf] %vm741_vm4, %v688_v45  ;;  %924 = vrot.lane.b32.xlu2 %v833_v42, %s3107_s29  ;;  %v1230_v42 = vld [vmem:[#allocation2 + $0x61] sm:$0xff]  ;;  %v1226_v45 = vld [vmem:[#allocation2 + $0x31] sm:$0xff] }
  0xe0   : > { %928 = vrot.lane.b32.xlu1 %v835_v44, %s3107_s29  ;;  %v698_v49 = vpop.permute.xlu2 %697 }
  0xe1   : > { %768 = vst.msk [vmem:[#allocation3 + $0x68] sm:$0xf] %vm741_vm4, %v698_v49 }
  0xe2   : > { %v684_v52 = vpop.permute.xlu1 %683 }
  0xe3   : > { %761 = vst.msk [vmem:[#allocation3 + $0x4c] sm:$0xf] %vm741_vm4, %v684_v52  ;;  %1099 = vrot.lane.b32.xlu0 %v3415_v10, %s3108_s30  ;;  %v3710_v52 = vpack.c.bf16 %v1228_v48, %v1228_v48  ;;  %v1247_v48 = vld [vmem:[#allocation2 + $0x129] sm:$0xff] }
  0xe5   : > { %v694_v56 = vpop.permute.xlu0 %693 }
  0xe6   : > { %766 = vst.msk [vmem:[#allocation3 + $0x60] sm:$0xf] %vm741_vm4, %v694_v56  ;;  %930 = vrot.lane.b32.xlu2 %v836_v53, %s3107_s29  ;;  %v1233_v53 = vld [vmem:[#allocation2 + $0x81] sm:$0xff]  ;;  %s4451_s29 = scalar_lea.vmem %s4576_s5, %s2956_s21 }
  0xe8   : > { %1095 = vrot.lane.b32.xlu1 %v3418_v12, %s3108_s30  ;;  %v704_v57 = vpop.permute.xlu2 %703 }
  0xe9   : > { %771 = vst.msk [vmem:[#allocation3 + $0x74] sm:$0xf] %vm741_vm4, %v704_v57  ;;  %v1265_v57 = vpack.c.bf16 %v1233_v53, %v1233_v53  ;;  %v1249_v53 = vld [vmem:[#allocation2 + $0x141] sm:$0xff] }
  0xea   : > { %v690_v58 = vpop.permute.xlu1 %689 }
  0xeb   : > { %764 = vst.msk [vmem:[#allocation3 + $0x58] sm:$0xf] %vm741_vm4, %v690_v58  ;;  %1105 = vrot.lane.b32.xlu0 %v3448_v37, %s3108_s30  ;;  %v1229_v58 = vld [vmem:[#allocation2 + $0x51] sm:$0xff] }
  0xed   : > { %v700_v60 = vpop.permute.xlu0 %699 }
  0xee   : > { %769 = vst.msk [vmem:[#allocation3 + $0x6c] sm:$0xf] %vm741_vm4, %v700_v60  ;;  %1097 = vrot.lane.b32.xlu2 %v3433_v24, %s3108_s30 }
  0xf0   : > { %1101 = vrot.lane.b32.xlu1 %v3428_v22, %s3108_s30  ;;  %v871_v10 = vpop.permute.xlu2 %870 }
  0xf1   : > { %967 = vst.msk [vmem:[#allocation3] sm:$0xf] %vm966_vm5, %v871_v10  ;;  %v1231_v10 = vld [vmem:[#allocation2 + $0x69] sm:$0xff] }
  0xf2   : > { %v696_v12 = vpop.permute.xlu1 %695 }
  0xf3   : > { %767 = vst.msk [vmem:[#allocation3 + $0x64] sm:$0xf] %vm741_vm4, %v696_v12  ;;  %1111 = vrot.lane.b32.xlu0 %v3464_v8, %s3108_s30 }
  0xf5   : > { %v706_v37 = vpop.permute.xlu0 %705 }
  0xf6   : > { %772 = vst.msk [vmem:[#allocation3 + $0x78] sm:$0xf] %vm741_vm4, %v706_v37  ;;  %1103 = vrot.lane.b32.xlu2 %v3426_v18, %s3108_s30  ;;  %v3718_v37 = vpack.c.bf16 %v1229_v58, %v1229_v58  ;;  %v1281_v58 = vpack.c.bf16 %v1249_v53, %v1249_v53 }
  0xf8   : > { %1107 = vrot.lane.b32.xlu1 %v3445_v34, %s3108_s30  ;;  %v877_v24 = vpop.permute.xlu2 %876 }
  0xf9   : > { %970 = vst.msk [vmem:[#allocation3 + $0xc] sm:$0xf] %vm966_vm5, %v877_v24  ;;  %v3722_v24 = vpack.c.bf16 %v1231_v10, %v1231_v10 }
  0xfa   : > { %v702_v61 = vpop.permute.xlu1 %701 }
  0xfb   : > { %770 = vst.msk [vmem:[#allocation3 + $0x70] sm:$0xf] %vm741_vm4, %v702_v61  ;;  %1117 = vrot.lane.b32.xlu0 %v3481_v62, %s3108_s30  ;;  %v313_v62 = vld [vmem:[%s3215_s24 + $0xf0] sm:$0xff] }
  0xfc   : > { %v1236_v61 = vld [vmem:[#allocation2 + $0xa9] sm:$0xff] }
  0xfd   : > { %v873_v8 = vpop.permute.xlu0 %872 }
  0xfe   : > { %968 = vst.msk [vmem:[#allocation3 + $0x4] sm:$0xf] %vm966_vm5, %v873_v8  ;;  %1109 = vrot.lane.b32.xlu2 %v3440_v30, %s3108_s30 }
 0x100   : > { %1113 = vrot.lane.b32.xlu1 %v3461_v47, %s3108_s30  ;;  %v883_v18 = vpop.permute.xlu2 %882  ;;  %v3095_v47 = vld [vmem:[%s4572_s1] ss:$0 sm:$0xff] }
 0x101   : > { %973 = vst.msk [vmem:[#allocation3 + $0x18] sm:$0xf] %vm966_vm5, %v883_v18  ;;  %v349_v1 = vmul.f32 %v3095_v47, %v313_v62  ;;  %v3727_v18 = vpack.c.bf16 %v1236_v61, %v1236_v61  ;;  %v1234_v62 = vld [vmem:[#allocation2 + $0x91] sm:$0xff] }
 0x102   : > { %v708_v34 = vpop.permute.xlu1 %707  ;;  %v1250_v61 = vld [vmem:[#allocation2 + $0x151] sm:$0xff] }
 0x103   : > { %773 = vst.msk [vmem:[#allocation3 + $0x7c] sm:$0xf] %vm741_vm4, %v708_v34  ;;  %1123 = vrot.lane.b32.xlu0 %v3499_v17, %s3108_s30  ;;  %v3096_v17 = vld [vmem:[%s4573_s2] ss:$0 sm:$0xff] }
 0x104   : > { %v385_v4 = vadd.f32 %v3096_v17, %v349_v1  ;;  %v1232_v34 = vld [vmem:[#allocation2 + $0x79] sm:$0xff]  ;;  %v3735_v1 = vpack.c.bf16 %v1234_v62, %v1234_v62  ;;  %v3799_v62 = vpack.c.bf16 %v1250_v61, %v1250_v61 }
 0x105   : > { %v879_v63 = vpop.permute.xlu0 %878  ;;  %v1684_v61 = vld [vmem:[#allocation2 + $0x98] sm:$0xff] }
 0x106   : > { %971 = vst.msk [vmem:[#allocation3 + $0x10] sm:$0xf] %vm966_vm5, %v879_v63  ;;  %1115 = vrot.lane.b32.xlu2 %v3456_v43, %s3108_s30  ;;  %v417_v43 = vmax.f32 %v385_v4, 0.0 }
 0x108   : > { %1119 = vrot.lane.b32.xlu1 %v3478_v59, %s3108_s30  ;;  %v889_v30 = vpop.permute.xlu2 %888  ;;  %450 = vst.msk [vmem:[#allocation2 + $0x181] sm:$0xff] %vm237_vm0, %v417_v43  ;;  %v1235_v43 = vld [vmem:[#allocation2 + $0x99] sm:$0xff] }
 0x109   : > { %976 = vst.msk [vmem:[#allocation3 + $0x24] sm:$0xf] %vm966_vm5, %v889_v30 }
 0x10a   : > { %v875_v2 = vpop.permute.xlu1 %874 }
 0x10b   : > { %969 = vst.msk [vmem:[#allocation3 + $0x8] sm:$0xf] %vm966_vm5, %v875_v2  ;;  %1129 = vrot.lane.b32.xlu0 %v3517_v38, %s3108_s30  ;;  %v1239_v2 = vld [vmem:[#allocation2 + $0xc9] sm:$0xff] }
 0x10c   : > { %v1271_v4 = vpack.c.bf16 %v1239_v2, %v1239_v2 }
 0x10d   : > { %v885_v59 = vpop.permute.xlu0 %884 }
 0x10e   : > { %974 = vst.msk [vmem:[#allocation3 + $0x1c] sm:$0xf] %vm966_vm5, %v885_v59  ;;  %1121 = vrot.lane.b32.xlu2 %v3472_v54, %s3108_s30 }
 0x10f   : > { %v1029_v23 = vld [vmem:[#allocation2 + $0x180] sm:$0xff] }
 0x110   : > { %1125 = vrot.lane.b32.xlu1 %v3496_v14, %s3108_s30  ;;  %v895_v5 = vpop.permute.xlu2 %894  ;;  %v1061_v28 = vpack.c.bf16 %v1029_v23, %v1029_v23 }
 0x111   : > { %979 = vst.msk [vmem:[#allocation3 + $0x30] sm:$0xf] %vm966_vm5, %v895_v5  ;;  %v1237_v5 = vld [vmem:[#allocation2 + $0xb1] sm:$0xff] }
 0x112   : > { %v881_v9 = vpop.permute.xlu1 %880 }
 0x113   : > { %972 = vst.msk [vmem:[#allocation3 + $0x14] sm:$0xf] %vm966_vm5, %v881_v9  ;;  %1135 = vrot.lane.b32.xlu0 %v3535_v55, %s3108_s30  ;;  %v350_v55 = vmul.f32 %v3095_v47, %v314_v11  ;;  %v1264_v47 = vpack.c.bf16 %v1232_v34, %v1232_v34  ;;  %v1252_v34 = vld [vmem:[#allocation2 + $0x169] sm:$0xff] }
 0x115   : > { %v891_v38 = vpop.permute.xlu0 %890 }
 0x116   : > { %977 = vst.msk [vmem:[#allocation3 + $0x28] sm:$0xf] %vm966_vm5, %v891_v38  ;;  %1127 = vrot.lane.b32.xlu2 %v3490_v6, %s3108_s30  ;;  %v386_v6 = vadd.f32 %v3096_v17, %v350_v55  ;;  %v3742_v38 = vpack.c.bf16 %v1235_v43, %v1235_v43 }
 0x118   : > { %1131 = vrot.lane.b32.xlu1 %v3514_v33, %s3108_s30  ;;  %v901_v54 = vpop.permute.xlu2 %900  ;;  %v418_v16 = vmax.f32 %v386_v6, 0.0 }
 0x119   : > { %982 = vst.msk [vmem:[#allocation3 + $0x3c] sm:$0xf] %vm966_vm5, %v901_v54  ;;  %v3746_v54 = vpack.c.bf16 %v1237_v5, %v1237_v5 }
 0x11a   : > { %v887_v14 = vpop.permute.xlu1 %886  ;;  %451 = vst.msk [vmem:[#allocation2 + $0x189] sm:$0xff] %vm237_vm0, %v418_v16 }
 0x11b   : > { %975 = vst.msk [vmem:[#allocation3 + $0x20] sm:$0xf] %vm966_vm5, %v887_v14  ;;  %1141 = vrot.lane.b32.xlu0 %v3553_v13, %s3108_s30  ;;  %v1242_v14 = vld [vmem:[#allocation2 + $0xf1] sm:$0xff] }
 0x11c   : > { %v3751_v55 = vpack.c.bf16 %v1242_v14, %v1242_v14 }
 0x11d   : > { %v897_v15 = vpop.permute.xlu0 %896 }
 0x11e   : > { %980 = vst.msk [vmem:[#allocation3 + $0x34] sm:$0xf] %vm966_vm5, %v897_v15  ;;  %1133 = vrot.lane.b32.xlu2 %v3508_v27, %s3108_s30  ;;  %v1238_v15 = vld [vmem:[#allocation2 + $0xc1] sm:$0xff] }
 0x120   : > { %1137 = vrot.lane.b32.xlu1 %v3532_v51, %s3108_s30  ;;  %v907_v33 = vpop.permute.xlu2 %906 }
 0x121   : > { %985 = vst.msk [vmem:[#allocation3 + $0x48] sm:$0xf] %vm966_vm5, %v907_v33  ;;  %v1240_v33 = vld [vmem:[#allocation2 + $0xd9] sm:$0xff] }
 0x122   : > { %v893_v19 = vpop.permute.xlu1 %892 }
 0x123   : > { %978 = vst.msk [vmem:[#allocation3 + $0x2c] sm:$0xf] %vm966_vm5, %v893_v19  ;;  %1147 = vrot.lane.b32.xlu0 %v3571_v39, %s3108_s30  ;;  %v3756_v19 = vpack.c.bf16 %v1238_v15, %v1238_v15  ;;  %v1449_v15 = vld [vmem:[#allocation2 + $0x1a] sm:$0xff] }
 0x125   : > { %v903_v13 = vpop.permute.xlu0 %902 }
 0x126   : > { %983 = vst.msk [vmem:[#allocation3 + $0x40] sm:$0xf] %vm966_vm5, %v903_v13  ;;  %1139 = vrot.lane.b32.xlu2 %v3526_v46, %s3108_s30  ;;  %v1256_v46 = vpack.c.bf16 %v1224_v20, %v1224_v20  ;;  %v1272_v13 = vpack.c.bf16 %v1240_v33, %v1240_v33  ;;  %v1451_v33 = vld [vmem:[#allocation2 + $0x32] sm:$0xff] }
 0x128   : > { %1143 = vrot.lane.b32.xlu1 %v3550_v7, %s3108_s30  ;;  %v913_v27 = vpop.permute.xlu2 %912 }
 0x129   : > { %988 = vst.msk [vmem:[#allocation3 + $0x54] sm:$0xf] %vm966_vm5, %v913_v27  ;;  %v1245_v27 = vld [vmem:[#allocation2 + $0x111] sm:$0xff] }
 0x12a   : > { %v899_v51 = vpop.permute.xlu1 %898  ;;  %v3764_v20 = vpack.c.bf16 %v1245_v27, %v1245_v27  ;;  %v1483_v27 = vpack.c.bf16 %v1451_v33, %v1451_v33 }
 0x12b   : > { %981 = vst.msk [vmem:[#allocation3 + $0x38] sm:$0xf] %vm966_vm5, %v899_v51  ;;  %1153 = vrot.lane.b32.xlu0 %v3583_v50, %s3108_s30  ;;  %v3705_v50 = vpack.c.bf16 %v1226_v45, %v1226_v45 }
 0x12d   : > { %v909_v21 = vpop.permute.xlu0 %908 }
 0x12e   : > { %986 = vst.msk [vmem:[#allocation3 + $0x4c] sm:$0xf] %vm966_vm5, %v909_v21  ;;  %1145 = vrot.lane.b32.xlu2 %v3544_v0, %s3108_s30  ;;  %v3692_v0 = vpack.c.bf16 %v1227_v29, %v1227_v29  ;;  %v1241_v21 = vld [vmem:[#allocation2 + $0xe1] sm:$0xff]  ;;  %v1248_v29 = vld [vmem:[#allocation2 + $0x139] sm:$0xff] }
 0x130   : > { %1149 = vrot.lane.b32.xlu1 %v3568_v32, %s3108_s30  ;;  %v919_v7 = vpop.permute.xlu2 %918  ;;  %v1030_v32 = vld [vmem:[#allocation2 + $0x188] sm:$0xff] }
 0x131   : > { %991 = vst.msk [vmem:[#allocation3 + $0x60] sm:$0xf] %vm966_vm5, %v919_v7  ;;  %v1062_v40 = vpack.c.bf16 %v1030_v32, %v1030_v32  ;;  %v1243_v7 = vld [vmem:[#allocation2 + $0xf9] sm:$0xff]  ;;  %v1280_v32 = vpack.c.bf16 %v1248_v29, %v1248_v29 }
 0x132   : > { %v905_v26 = vpop.permute.xlu1 %904 }
 0x133   : > { %984 = vst.msk [vmem:[#allocation3 + $0x44] sm:$0xf] %vm966_vm5, %v905_v26  ;;  %1320 = vrot.lane.b32.xlu0 %v1256_v46, %s3109_s10  ;;  %v1273_v26 = vpack.c.bf16 %v1241_v21, %v1241_v21  ;;  %v1675_v21 = vld [vmem:[#allocation2 + $0x30] sm:$0xff] }
 0x135   : > { %v915_v31 = vpop.permute.xlu0 %914 }
 0x136   : > { %989 = vst.msk [vmem:[#allocation3 + $0x58] sm:$0xf] %vm966_vm5, %v915_v31  ;;  %1151 = vrot.lane.b32.xlu2 %v3562_v25, %s3108_s30  ;;  %v3701_v25 = vpack.c.bf16 %v1230_v42, %v1230_v42 }
 0x138   : > { %1155 = vrot.lane.b32.xlu1 %v1061_v28, %s3108_s30  ;;  %v925_v35 = vpop.permute.xlu2 %924  ;;  %v3771_v28 = vpack.c.bf16 %v1243_v7, %v1243_v7 }
 0x139   : > { %994 = vst.msk [vmem:[#allocation3 + $0x6c] sm:$0xf] %vm966_vm5, %v925_v35  ;;  %v1244_v35 = vld [vmem:[#allocation2 + $0x109] sm:$0xff] }
 0x13a   : > { %v911_v39 = vpop.permute.xlu1 %910 }
 0x13b   : > { %987 = vst.msk [vmem:[#allocation3 + $0x50] sm:$0xf] %vm966_vm5, %v911_v39  ;;  %1326 = vrot.lane.b32.xlu0 %v3692_v0, %s3109_s10  ;;  %v1246_v39 = vld [vmem:[#allocation2 + $0x121] sm:$0xff] }
 0x13c   : > { %v1278_v42 = vpack.c.bf16 %v1246_v39, %v1246_v39  ;;  %v1678_v39 = vld [vmem:[#allocation2 + $0x50] sm:$0xff] }
 0x13d   : > { %v921_v44 = vpop.permute.xlu0 %920 }
 0x13e   : > { %992 = vst.msk [vmem:[#allocation3 + $0x64] sm:$0xf] %vm966_vm5, %v921_v44  ;;  %1157 = vrot.lane.b32.xlu2 %v1062_v40, %s3108_s30  ;;  %v1251_v44 = vld [vmem:[#allocation2 + $0x159] sm:$0xff] }
 0x140   : > { %1322 = vrot.lane.b32.xlu1 %v1257_v41, %s3109_s10  ;;  %v931_v3 = vpop.permute.xlu2 %930  ;;  %v3778_v41 = vpack.c.bf16 %v1244_v35, %v1244_v35 }
 0x141   : > { %997 = vst.msk [vmem:[#allocation3 + $0x78] sm:$0xf] %vm966_vm5, %v931_v3  ;;  %v3785_v3 = vpack.c.bf16 %v1251_v44, %v1251_v44  ;;  %v1458_v44 = vld [vmem:[#allocation2 + $0x82] sm:$0xff] }
 0x142   : > { %v917_v49 = vpop.permute.xlu1 %916 }
 0x143   : > { %990 = vst.msk [vmem:[#allocation3 + $0x5c] sm:$0xf] %vm966_vm5, %v917_v49  ;;  %1332 = vrot.lane.b32.xlu0 %v3701_v25, %s3109_s10 }
 0x145   : > { %v927_v56 = vpop.permute.xlu0 %926 }
 0x146   : > { %995 = vst.msk [vmem:[#allocation3 + $0x70] sm:$0xf] %vm966_vm5, %v927_v56  ;;  %1324 = vrot.lane.b32.xlu2 %v3705_v50, %s3109_s10 }
 0x148   : > { %1328 = vrot.lane.b32.xlu1 %v3710_v52, %s3109_s10  ;;  %v1098_v60 = vpop.permute.xlu2 %1097 }
 0x149   : > { %1193 = vst.msk [vmem:[#allocation3 + $0x4] sm:$0xf] %vm1191_vm6, %v1098_v60  ;;  %v1254_v60 = vld [vmem:[#allocation2 + $0x181] sm:$0xff] }
 0x14a   : > { %v923_v12 = vpop.permute.xlu1 %922 }
 0x14b   : > { %993 = vst.msk [vmem:[#allocation3 + $0x68] sm:$0xf] %vm966_vm5, %v923_v12  ;;  %1338 = vrot.lane.b32.xlu0 %v1265_v57, %s3109_s10  ;;  %v3789_v57 = vpack.c.bf16 %v1247_v48, %v1247_v48  ;;  %v1286_v12 = vpack.c.bf16 %v1254_v60, %v1254_v60  ;;  %v3843_v48 = vpack.c.bf16 %v1458_v44, %v1458_v44 }
 0x14d   : > { %v933_v8 = vpop.permute.xlu0 %932 }
 0x14e   : > { %998 = vst.msk [vmem:[#allocation3 + $0x7c] sm:$0xf] %vm966_vm5, %v933_v8  ;;  %1330 = vrot.lane.b32.xlu2 %v3718_v37, %s3109_s10 }
 0x150   : > { %1334 = vrot.lane.b32.xlu1 %v3722_v24, %s3109_s10  ;;  %v1104_v63 = vpop.permute.xlu2 %1103 }
 0x151   : > { %1196 = vst.msk [vmem:[#allocation3 + $0x10] sm:$0xf] %vm1191_vm6, %v1104_v63 }
 0x152   : > { %v929_v30 = vpop.permute.xlu1 %928 }
 0x153   : > { %996 = vst.msk [vmem:[#allocation3 + $0x74] sm:$0xf] %vm966_vm5, %v929_v30  ;;  %1344 = vrot.lane.b32.xlu0 %v3727_v18, %s3109_s10  ;;  %v1284_v30 = vpack.c.bf16 %v1252_v34, %v1252_v34 }
 0x155   : > { %v1100_v17 = vpop.permute.xlu0 %1099 }
 0x156   : > { %1194 = vst.msk [vmem:[#allocation3 + $0x8] sm:$0xf] %vm1191_vm6, %v1100_v17  ;;  %1336 = vrot.lane.b32.xlu2 %v1264_v47, %s3109_s10  ;;  %v1450_v47 = vld [vmem:[#allocation2 + $0x22] sm:$0xff] }
 0x157   : > { %v1482_v17 = vpack.c.bf16 %v1450_v47, %v1450_v47 }
 0x158   : > { %1340 = vrot.lane.b32.xlu1 %v3735_v1, %s3109_s10  ;;  %v1110_v59 = vpop.permute.xlu2 %1109 }
 0x159   : > { %1199 = vst.msk [vmem:[#allocation3 + $0x1c] sm:$0xf] %vm1191_vm6, %v1110_v59  ;;  %v1255_v59 = vld [vmem:[#allocation2 + $0x189] sm:$0xff] }
 0x15a   : > { %v1096_v9 = vpop.permute.xlu1 %1095  ;;  %v1287_v14 = vpack.c.bf16 %v1255_v59, %v1255_v59 }
 0x15b   : > { %1192 = vst.msk [vmem:[#allocation3] sm:$0xf] %vm1191_vm6, %v1096_v9  ;;  %1350 = vrot.lane.b32.xlu0 %v1271_v4, %s3109_s10  ;;  %v1253_v4 = vld [vmem:[#allocation2 + $0x171] sm:$0xff] }
 0x15c   : > { %v3808_v9 = vpack.c.bf16 %v1253_v4, %v1253_v4 }
 0x15d   : > { %v1106_v11 = vpop.permute.xlu0 %1105 }
 0x15e   : > { %1197 = vst.msk [vmem:[#allocation3 + $0x14] sm:$0xf] %vm1191_vm6, %v1106_v11  ;;  %1342 = vrot.lane.b32.xlu2 %v3742_v38, %s3109_s10 }
 0x160   : > { %1346 = vrot.lane.b32.xlu1 %v3746_v54, %s3109_s10  ;;  %v1116_v6 = vpop.permute.xlu2 %1115 }
 0x161   : > { %1202 = vst.msk [vmem:[#allocation3 + $0x28] sm:$0xf] %vm1191_vm6, %v1116_v6 }
 0x162   : > { %v1102_v16 = vpop.permute.xlu1 %1101 }
 0x163   : > { %1195 = vst.msk [vmem:[#allocation3 + $0xc] sm:$0xf] %vm1191_vm6, %v1102_v16  ;;  %1356 = vrot.lane.b32.xlu0 %v3751_v55, %s3109_s10 }
 0x165   : > { %v1112_v51 = vpop.permute.xlu0 %1111 }
 0x166   : > { %1200 = vst.msk [vmem:[#allocation3 + $0x20] sm:$0xf] %vm1191_vm6, %v1112_v51  ;;  %1348 = vrot.lane.b32.xlu2 %v3756_v19, %s3109_s10 }
 0x168   : > { %1352 = vrot.lane.b32.xlu1 %v1272_v13, %s3109_s10  ;;  %v1122_v46 = vpop.permute.xlu2 %1121  ;;  %v1481_v13 = vpack.c.bf16 %v1449_v15, %v1449_v15 }
 0x169   : > { %1205 = vst.msk [vmem:[#allocation3 + $0x34] sm:$0xf] %vm1191_vm6, %v1122_v46 }
 0x16a   : > { %v1108_v23 = vpop.permute.xlu1 %1107 }
 0x16b   : > { %1198 = vst.msk [vmem:[#allocation3 + $0x18] sm:$0xf] %vm1191_vm6, %v1108_v23  ;;  %1362 = vrot.lane.b32.xlu0 %v3764_v20, %s3109_s10  ;;  %v1707_v23 = vpack.c.bf16 %v1675_v21, %v1675_v21 }
 0x16d   : > { %v1118_v31 = vpop.permute.xlu0 %1117 }
 0x16e   : > { %1203 = vst.msk [vmem:[#allocation3 + $0x2c] sm:$0xf] %vm1191_vm6, %v1118_v31  ;;  %1354 = vrot.lane.b32.xlu2 %v1273_v26, %s3109_s10 }
 0x170   : > { %1358 = vrot.lane.b32.xlu1 %v3771_v28, %s3109_s10  ;;  %v1128_v36 = vpop.permute.xlu2 %1127 }
 0x171   : > { %1208 = vst.msk [vmem:[#allocation3 + $0x40] sm:$0xf] %vm1191_vm6, %v1128_v36 }
 0x172   : > { %v1114_v40 = vpop.permute.xlu1 %1113 }
 0x173   : > { %1201 = vst.msk [vmem:[#allocation3 + $0x24] sm:$0xf] %vm1191_vm6, %v1114_v40  ;;  %1368 = vrot.lane.b32.xlu0 %v1280_v32, %s3109_s10  ;;  %v2126_v32 = vld [vmem:[#allocation2 + $0x3a] sm:$0xff] }
 0x174   : > { %v2158_v36 = vpack.c.bf16 %v2126_v32, %v2126_v32 }
 0x175   : > { %v1124_v45 = vpop.permute.xlu0 %1123 }
 0x176   : > { %1206 = vst.msk [vmem:[#allocation3 + $0x38] sm:$0xf] %vm1191_vm6, %v1124_v45  ;;  %1360 = vrot.lane.b32.xlu2 %v3778_v41, %s3109_s10 }
 0x178   : > { %1364 = vrot.lane.b32.xlu1 %v1278_v42, %s3109_s10  ;;  %v1134_v49 = vpop.permute.xlu2 %1133 }
 0x179   : > { %1211 = vst.msk [vmem:[#allocation3 + $0x4c] sm:$0xf] %vm1191_vm6, %v1134_v49 }
 0x17a   : > { %v1120_v56 = vpop.permute.xlu1 %1119 }
 0x17b   : > { %1204 = vst.msk [vmem:[#allocation3 + $0x30] sm:$0xf] %vm1191_vm6, %v1120_v56  ;;  %1374 = vrot.lane.b32.xlu0 %v3785_v3, %s3109_s10  ;;  %v1683_v56 = vld [vmem:[#allocation2 + $0x90] sm:$0xff] }
 0x17d   : > { %v1130_v10 = vpop.permute.xlu0 %1129 }
 0x17e   : > { %1209 = vst.msk [vmem:[#allocation3 + $0x44] sm:$0xf] %vm1191_vm6, %v1130_v10  ;;  %1366 = vrot.lane.b32.xlu2 %v3789_v57, %s3109_s10  ;;  %v1715_v10 = vpack.c.bf16 %v1683_v56, %v1683_v56 }
 0x180   : > { %1370 = vrot.lane.b32.xlu1 %v1281_v58, %s3109_s10  ;;  %v1140_v8 = vpop.permute.xlu2 %1139 }
 0x181   : > { %1214 = vst.msk [vmem:[#allocation3 + $0x58] sm:$0xf] %vm1191_vm6, %v1140_v8 }
 0x182   : > { %v1126_v63 = vpop.permute.xlu1 %1125 }
 0x183   : > { %1207 = vst.msk [vmem:[#allocation3 + $0x3c] sm:$0xf] %vm1191_vm6, %v1126_v63  ;;  %1380 = vrot.lane.b32.xlu0 %v1286_v12, %s3109_s10  ;;  %v1716_v63 = vpack.c.bf16 %v1684_v61, %v1684_v61 }
 0x185   : > { %v1136_v2 = vpop.permute.xlu0 %1135 }
 0x186   : > { %1212 = vst.msk [vmem:[#allocation3 + $0x50] sm:$0xf] %vm1191_vm6, %v1136_v2  ;;  %1372 = vrot.lane.b32.xlu2 %v3799_v62, %s3109_s10 }
 0x188   : > { %1376 = vrot.lane.b32.xlu1 %v1284_v30, %s3109_s10  ;;  %v1146_v43 = vpop.permute.xlu2 %1145 }
 0x189   : > { %1217 = vst.msk [vmem:[#allocation3 + $0x64] sm:$0xf] %vm1191_vm6, %v1146_v43  ;;  %v1466_v43 = vld [vmem:[#allocation2 + $0xe2] sm:$0xff] }
 0x18a   : > { %v1132_v5 = vpop.permute.xlu1 %1131 }
 0x18b   : > { %1210 = vst.msk [vmem:[#allocation3 + $0x48] sm:$0xf] %vm1191_vm6, %v1132_v5  ;;  %1547 = vrot.lane.b32.xlu0 %v1482_v17, %s3110_s11  ;;  %v2127_v17 = vld [vmem:[#allocation2 + $0x4a] sm:$0xff]  ;;  %v3870_v5 = vpack.c.bf16 %v1466_v43, %v1466_v43 }
 0x18d   : > { %v1142_v11 = vpop.permute.xlu0 %1141 }
 0x18e   : > { %1215 = vst.msk [vmem:[#allocation3 + $0x5c] sm:$0xf] %vm1191_vm6, %v1142_v11  ;;  %1378 = vrot.lane.b32.xlu2 %v3808_v9, %s3109_s10  ;;  %v2134_v11 = vld [vmem:[#allocation2 + $0x9a] sm:$0xff] }
 0x18f   : > { %v2166_v33 = vpack.c.bf16 %v2134_v11, %v2134_v11 }
 0x190   : > { %1382 = vrot.lane.b32.xlu1 %v1287_v14, %s3109_s10  ;;  %v1152_v6 = vpop.permute.xlu2 %1151 }
 0x191   : > { %1220 = vst.msk [vmem:[#allocation3 + $0x70] sm:$0xf] %vm1191_vm6, %v1152_v6 }
 0x192   : > { %v1138_v16 = vpop.permute.xlu1 %1137 }
 0x193   : > { %1213 = vst.msk [vmem:[#allocation3 + $0x54] sm:$0xf] %vm1191_vm6, %v1138_v16  ;;  %1773 = vrot.lane.b32.xlu0 %v3428_v22, %s3111_s12  ;;  %v1457_v22 = vld [vmem:[#allocation2 + $0x7a] sm:$0xff] }
 0x194   : > { %v3828_v29 = vpack.c.bf16 %v1457_v22, %v1457_v22 }
 0x195   : > { %v1148_v51 = vpop.permute.xlu0 %1147 }
 0x196   : > { %1218 = vst.msk [vmem:[#allocation3 + $0x68] sm:$0xf] %vm1191_vm6, %v1148_v51  ;;  %1545 = vrot.lane.b32.xlu2 %v1481_v13, %s3110_s11 }
 0x198   : > { %1549 = vrot.lane.b32.xlu1 %v1483_v27, %s3110_s11  ;;  %v1158_v46 = vpop.permute.xlu2 %1157 }
 0x199   : > { %1223 = vst.msk [vmem:[#allocation3 + $0x7c] sm:$0xf] %vm1191_vm6, %v1158_v46 }
 0x19a   : > { %v1144_v7 = vpop.permute.xlu1 %1143 }
 0x19b   : > { %1216 = vst.msk [vmem:[#allocation3 + $0x60] sm:$0xf] %vm1191_vm6, %v1144_v7  ;;  %2221 = vrot.lane.b32.xlu0 %v1483_v27, %s3112_s13  ;;  %v1691_v27 = vld [vmem:[#allocation2 + $0xf0] sm:$0xff]  ;;  %v2142_v7 = vld [vmem:[#allocation2 + $0xfa] sm:$0xff] }
 0x19c   : > { %v1723_v46 = vpack.c.bf16 %v1691_v27, %v1691_v27  ;;  %v3889_v22 = vpack.c.bf16 %v2142_v7, %v2142_v7  ;;  %v1473_v7 = vld [vmem:[#allocation2 + $0x13a] sm:$0xff] }
 0x19d   : > { %v1154_v26 = vpop.permute.xlu0 %1153 }
 0x19e   : > { %1221 = vst.msk [vmem:[#allocation3 + $0x74] sm:$0xf] %vm1191_vm6, %v1154_v26  ;;  %1771 = vrot.lane.b32.xlu2 %v1707_v23, %s3111_s12  ;;  %v1692_v26 = vld [vmem:[#allocation2 + $0xf8] sm:$0xff] }
 0x1a0   : > { %1996 = vrot.lane.b32.xlu1 %v3705_v50, %s3113_s14  ;;  %v1325_v31 = vpop.permute.xlu2 %1324  ;;  %v1710_v50 = vpack.c.bf16 %v1678_v39, %v1678_v39 }
 0x1a1   : > { %1419 = vst.msk [vmem:[#allocation3 + $0x8] sm:$0xf] %vm1416_vm7, %v1325_v31 }
 0x1a2   : > { %v1150_v35 = vpop.permute.xlu1 %1149 }
 0x1a3   : > { %1219 = vst.msk [vmem:[#allocation3 + $0x6c] sm:$0xf] %vm1191_vm6, %v1150_v35  ;;  %1561 = vrot.lane.b32.xlu0 %v3828_v29, %s3110_s11  ;;  %v1724_v35 = vpack.c.bf16 %v1692_v26, %v1692_v26  ;;  %v1700_v26 = vld [vmem:[#allocation2 + $0x158] sm:$0xff] }
 0x1a5   : > { %v1321_v40 = vpop.permute.xlu0 %1320 }
 0x1a6   : > { %1417 = vst.msk [vmem:[#allocation3] sm:$0xf] %vm1416_vm7, %v1321_v40  ;;  %1998 = vrot.lane.b32.xlu2 %v3692_v0, %s3113_s14  ;;  %v1677_v0 = vld [vmem:[#allocation2 + $0x48] sm:$0xff] }
 0x1a7   : > { %v1709_v60 = vpack.c.bf16 %v1677_v0, %v1677_v0 }
 0x1a8   : > { %2223 = vrot.lane.b32.xlu1 %v2158_v36, %s3112_s13  ;;  %v1331_v42 = vpop.permute.xlu2 %1330 }
 0x1a9   : > { %1422 = vst.msk [vmem:[#allocation3 + $0x14] sm:$0xf] %vm1416_vm7, %v1331_v42  ;;  %v1680_v42 = vld [vmem:[#allocation2 + $0x68] sm:$0xff] }
 0x1aa   : > { %v1156_v45 = vpop.permute.xlu1 %1155 }
 0x1ab   : > { %1222 = vst.msk [vmem:[#allocation3 + $0x78] sm:$0xf] %vm1191_vm6, %v1156_v45  ;;  %1777 = vrot.lane.b32.xlu0 %v1710_v50, %s3111_s12  ;;  %v1712_v45 = vpack.c.bf16 %v1680_v42, %v1680_v42 }
 0x1ad   : > { %v1327_v49 = vpop.permute.xlu0 %1326 }
 0x1ae   : > { %1420 = vst.msk [vmem:[#allocation3 + $0xc] sm:$0xf] %vm1416_vm7, %v1327_v49  ;;  %1551 = vrot.lane.b32.xlu2 %v2158_v36, %s3110_s11  ;;  %v2141_v36 = vld [vmem:[#allocation2 + $0xf2] sm:$0xff] }
 0x1af   : > { %v3901_v50 = vpack.c.bf16 %v2141_v36, %v2141_v36  ;;  %v1694_v36 = vld [vmem:[#allocation2 + $0x110] sm:$0xff] }
 0x1b0   : > { %1563 = vrot.lane.b32.xlu1 %v3843_v48, %s3110_s11  ;;  %v1337_v53 = vpop.permute.xlu2 %1336  ;;  %v1726_v42 = vpack.c.bf16 %v1694_v36, %v1694_v36 }
 0x1b1   : > { %1425 = vst.msk [vmem:[#allocation3 + $0x20] sm:$0xf] %vm1416_vm7, %v1337_v53  ;;  %v1679_v53 = vld [vmem:[#allocation2 + $0x60] sm:$0xff] }
 0x1b2   : > { %v1323_v58 = vpop.permute.xlu1 %1322 }
 0x1b3   : > { %1418 = vst.msk [vmem:[#allocation3 + $0x4] sm:$0xf] %vm1416_vm7, %v1323_v58  ;;  %2000 = vrot.lane.b32.xlu0 %v3710_v52, %s3113_s14  ;;  %v2133_v52 = vld [vmem:[#allocation2 + $0x92] sm:$0xff]  ;;  %v1685_v58 = vld [vmem:[#allocation2 + $0xa8] sm:$0xff] }
 0x1b4   : > { %v2165_v47 = vpack.c.bf16 %v2133_v52, %v2133_v52  ;;  %v1717_v61 = vpack.c.bf16 %v1685_v58, %v1685_v58  ;;  %v1686_v52 = vld [vmem:[#allocation2 + $0xb0] sm:$0xff] }
 0x1b5   : > { %v1333_v12 = vpop.permute.xlu0 %1332 }
 0x1b6   : > { %1423 = vst.msk [vmem:[#allocation3 + $0x18] sm:$0xf] %vm1416_vm7, %v1333_v12  ;;  %1775 = vrot.lane.b32.xlu2 %v1709_v60, %s3111_s12  ;;  %v2386_v12 = vld [vmem:[%s4574_s3 + $0x10] sm:$0x3] }
 0x1b8   : > { %1787 = vrot.lane.b32.xlu1 %v1715_v10, %s3111_s12  ;;  %v1343_v8 = vpop.permute.xlu2 %1342  ;;  %v1711_v10 = vpack.c.bf16 %v1679_v53, %v1679_v53  ;;  %v2144_v53 = vld [vmem:[#allocation2 + $0x112] sm:$0xff] }
 0x1b9   : > { %1428 = vst.msk [vmem:[#allocation3 + $0x2c] sm:$0xf] %vm1416_vm7, %v1343_v8  ;;  %v2476_v8 = vunpack.c.l.b16 %v2386_v12  ;;  %v3990_v58 = vpack.c.bf16 %v2144_v53, %v2144_v53  ;;  %v2143_v12 = vld [vmem:[#allocation2 + $0x10a] sm:$0xff]  ;;  %v1920_v53 = vld [vmem:[#allocation2 + $0x121] sm:$0xff] }
 0x1ba   : > { %v1329_v34 = vpop.permute.xlu1 %1328 }
 0x1bb   : > { %1421 = vst.msk [vmem:[#allocation3 + $0x10] sm:$0xf] %vm1416_vm7, %v1329_v34  ;;  %2014 = vrot.lane.b32.xlu0 %v3742_v38, %s3113_s14  ;;  %v2159_v38 = vpack.c.bf16 %v2127_v17, %v2127_v17  ;;  %v3066_v17 = vld [vmem:[%s4574_s3 + $0x8] sm:$0xff] }
 0x1bd   : > { %v1339_v30 = vpop.permute.xlu0 %1338 }
 0x1be   : > { %1426 = vst.msk [vmem:[#allocation3 + $0x24] sm:$0xf] %vm1416_vm7, %v1339_v30  ;;  %1789 = vrot.lane.b32.xlu2 %v1716_v63, %s3111_s12  ;;  %v2479_v63 = vpack.c.b16 %v2476_v8, %v2476_v8 }
 0x1c0   : > { %2002 = vrot.lane.b32.xlu1 %v3718_v37, %s3113_s14  ;;  %v1349_v2 = vpop.permute.xlu2 %1348  ;;  %v2128_v37 = vld [vmem:[#allocation2 + $0x52] sm:$0xff] }
 0x1c1   : > { %1431 = vst.msk [vmem:[#allocation3 + $0x38] sm:$0xf] %vm1416_vm7, %v1349_v2  ;;  %v2160_v6 = vpack.c.bf16 %v2128_v37, %v2128_v37  ;;  %v1718_v2 = vpack.c.bf16 %v1686_v52, %v1686_v52  ;;  %v2129_v37 = vld [vmem:[#allocation2 + $0x62] sm:$0xff] }
 0x1c2   : > { %v1335_v4 = vpop.permute.xlu1 %1334  ;;  %v3944_v11 = vpack.c.bf16 %v2129_v37, %v2129_v37 }
 0x1c3   : > { %1424 = vst.msk [vmem:[#allocation3 + $0x1c] sm:$0xf] %vm1416_vm7, %v1335_v4  ;;  %2237 = vrot.lane.b32.xlu0 %v2165_v47, %s3112_s13  ;;  %v2135_v4 = vld [vmem:[#allocation2 + $0xaa] sm:$0xff] }
 0x1c4   : > { %v3934_v43 = vpack.c.bf16 %v2135_v4, %v2135_v4 }
 0x1c5   : > { %v1345_v59 = vpop.permute.xlu0 %1344 }
 0x1c6   : > { %1429 = vst.msk [vmem:[#allocation3 + $0x30] sm:$0xf] %vm1416_vm7, %v1345_v59  ;;  %2012 = vrot.lane.b32.xlu2 %v3735_v1, %s3113_s14  ;;  %v1465_v1 = vld [vmem:[#allocation2 + $0xda] sm:$0xff] }
 0x1c7   : > { %v3881_v21 = vpack.c.bf16 %v1465_v1, %v1465_v1  ;;  %v3065_v59 = vld [vmem:[%s4574_s3] sm:$0xff] }
 0x1c8   : > { %2225 = vrot.lane.b32.xlu1 %v2159_v38, %s3112_s13  ;;  %v1355_v14 = vpop.permute.xlu2 %1354 }
 0x1c9   : > { %1434 = vst.msk [vmem:[#allocation3 + $0x44] sm:$0xf] %vm1416_vm7, %v1355_v14 }
 0x1ca   : > { %v1341_v15 = vpop.permute.xlu1 %1340 }
 0x1cb   : > { %1427 = vst.msk [vmem:[#allocation3 + $0x28] sm:$0xf] %vm1416_vm7, %v1341_v15  ;;  %1579 = vrot.lane.b32.xlu0 %v3870_v5, %s3110_s11 }
 0x1cd   : > { %v1351_v16 = vpop.permute.xlu0 %1350 }
 0x1ce   : > { %1432 = vst.msk [vmem:[#allocation3 + $0x3c] sm:$0xf] %vm1416_vm7, %v1351_v16  ;;  %2227 = vrot.lane.b32.xlu2 %v2160_v6, %s3112_s13 }
 0x1d0   : > { %2239 = vrot.lane.b32.xlu1 %v2166_v33, %s3112_s13  ;;  %v1361_v13 = vpop.permute.xlu2 %1360 }
 0x1d1   : > { %1437 = vst.msk [vmem:[#allocation3 + $0x50] sm:$0xf] %vm1416_vm7, %v1361_v13 }
 0x1d2   : > { %v1347_v51 = vpop.permute.xlu1 %1346 }
 0x1d3   : > { %1430 = vst.msk [vmem:[#allocation3 + $0x34] sm:$0xf] %vm1416_vm7, %v1347_v51  ;;  %2028 = vrot.lane.b32.xlu0 %v3751_v55, %s3113_s14 }
 0x1d5   : > { %v1357_v23 = vpop.permute.xlu0 %1356 }
 0x1d6   : > { %1435 = vst.msk [vmem:[#allocation3 + $0x48] sm:$0xf] %vm1416_vm7, %v1357_v23  ;;  %1577 = vrot.lane.b32.xlu2 %v3881_v21, %s3110_s11 }
 0x1d8   : > { %1803 = vrot.lane.b32.xlu1 %v1723_v46, %s3111_s12  ;;  %v1367_v31 = vpop.permute.xlu2 %1366 }
 0x1d9   : > { %1440 = vst.msk [vmem:[#allocation3 + $0x5c] sm:$0xf] %vm1416_vm7, %v1367_v31 }
 0x1da   : > { %v1353_v32 = vpop.permute.xlu1 %1352 }
 0x1db   : > { %1433 = vst.msk [vmem:[#allocation3 + $0x40] sm:$0xf] %vm1416_vm7, %v1353_v32  ;;  %2255 = vrot.lane.b32.xlu0 %v3889_v22, %s3112_s13  ;;  %v1732_v32 = vpack.c.bf16 %v1700_v26, %v1700_v26 }
 0x1dd   : > { %v1363_v55 = vpop.permute.xlu0 %1362 }
 0x1de   : > { %1438 = vst.msk [vmem:[#allocation3 + $0x54] sm:$0xf] %vm1416_vm7, %v1363_v55  ;;  %1805 = vrot.lane.b32.xlu2 %v1724_v35, %s3111_s12  ;;  %v1474_v35 = vld [vmem:[#allocation2 + $0x142] sm:$0xff] }
 0x1e0   : > { %2030 = vrot.lane.b32.xlu1 %v3771_v28, %s3113_s14  ;;  %v1373_v39 = vpop.permute.xlu2 %1372 }
 0x1e1   : > { %1443 = vst.msk [vmem:[#allocation3 + $0x68] sm:$0xf] %vm1416_vm7, %v1373_v39 }
 0x1e2   : > { %v1359_v40 = vpop.permute.xlu1 %1358 }
 0x1e3   : > { %1436 = vst.msk [vmem:[#allocation3 + $0x4c] sm:$0xf] %vm1416_vm7, %v1359_v40  ;;  %1565 = vrot.lane.b32.xlu0 %v2165_v47, %s3110_s11  ;;  %v2533_v47 = vsel %vm2531_vm10, %v2479_v63, 0  ;;  %v3975_v40 = vpack.c.bf16 %v1474_v35, %v1474_v35 }
 0x1e4   : > { %2540 = vmatpush.bf16.msra.mxu0 %v2533_v47  ;;  %3067 = vmatpush.bf16.msra.mxu1 %v2533_v47 }
 0x1e5   : > { %v1369_v44 = vpop.permute.xlu0 %1368  ;;  %3068 = vmatpush.bf16.msra.mxu2 %v2533_v47  ;;  %3069 = vmatpush.bf16.msra.mxu3 %v2533_v47 }
 0x1e6   : > { %1441 = vst.msk [vmem:[#allocation3 + $0x60] sm:$0xf] %vm1416_vm7, %v1369_v44  ;;  %2253 = vrot.lane.b32.xlu2 %v3901_v50, %s3112_s13 }
 0x1e8   : > { %1553 = vrot.lane.b32.xlu1 %v2159_v38, %s3110_s11  ;;  %v1379_v28 = vpop.permute.xlu2 %1378  ;;  %2541 = vmatpush.bf16.msra.mxu0 %v3066_v17 }
 0x1e9   : > { %1446 = vst.msk [vmem:[#allocation3 + $0x74] sm:$0xf] %vm1416_vm7, %v1379_v28  ;;  %3070 = vmatpush.bf16.msra.mxu1 %v3066_v17  ;;  %3071 = vmatpush.bf16.msra.mxu2 %v3066_v17 }
 0x1ea   : > { %v1365_v49 = vpop.permute.xlu1 %1364  ;;  %3072 = vmatpush.bf16.msra.mxu3 %v3066_v17 }
 0x1eb   : > { %1439 = vst.msk [vmem:[#allocation3 + $0x58] sm:$0xf] %vm1416_vm7, %v1365_v49  ;;  %1781 = vrot.lane.b32.xlu0 %v1712_v45, %s3111_s12 }
 0x1ec   : > { %2542 = vmatpush.bf16.msra.mxu0 %v3065_v59 }
 0x1ed   : > { %v1375_v0 = vpop.permute.xlu0 %1374  ;;  %3073 = vmatpush.bf16.msra.mxu1 %v3065_v59  ;;  %3074 = vmatpush.bf16.msra.mxu2 %v3065_v59 }
 0x1ee   : > { %1444 = vst.msk [vmem:[#allocation3 + $0x6c] sm:$0xf] %vm1416_vm7, %v1375_v0  ;;  %1555 = vrot.lane.b32.xlu2 %v2160_v6, %s3110_s11  ;;  %3075 = vmatpush.bf16.msra.mxu3 %v3065_v59 }
 0x1f0   : > { %1567 = vrot.lane.b32.xlu1 %v2166_v33, %s3110_s11  ;;  %v1546_v56 = vpop.permute.xlu2 %1545  ;;  %v2136_v33 = vld [vmem:[#allocation2 + $0xb2] sm:$0xff] }
 0x1f1   : > { %1642 = vst.msk [vmem:[#allocation3] sm:$0xf] %vm1641_vm8, %v1546_v56  ;;  %v3958_v13 = vpack.c.bf16 %v2136_v33, %v2136_v33  ;;  %v1688_v33 = vld [vmem:[#allocation2 + $0xc8] sm:$0xff] }
 0x1f2   : > { %v1371_v60 = vpop.permute.xlu1 %1370 }
 0x1f3   : > { %1442 = vst.msk [vmem:[#allocation3 + $0x64] sm:$0xf] %vm1416_vm7, %v1371_v60  ;;  %2004 = vrot.lane.b32.xlu0 %v3701_v25, %s3113_s14 }
 0x1f5   : > { %v1381_v34 = vpop.permute.xlu0 %1380 }
 0x1f6   : > { %1447 = vst.msk [vmem:[#allocation3 + $0x78] sm:$0xf] %vm1416_vm7, %v1381_v34  ;;  %1779 = vrot.lane.b32.xlu2 %v1711_v10, %s3111_s12  ;;  %v4004_v34 = vpack.c.bf16 %v2143_v12, %v2143_v12  ;;  %v1701_v12 = vld [vmem:[#allocation2 + $0x168] sm:$0xff] }
 0x1f8   : > { %1791 = vrot.lane.b32.xlu1 %v1717_v61, %s3111_s12  ;;  %v1772_v30 = vpop.permute.xlu2 %1771  ;;  %v2149_v61 = vld [vmem:[#allocation2 + $0x152] sm:$0xff] }
 0x1f9   : > { %1868 = vst.msk [vmem:[#allocation3] sm:$0xf] %vm1867_vm9, %v1772_v30  ;;  %v4010_v63 = vpack.c.bf16 %v2149_v61, %v2149_v61 }
 0x1fa   : > { %v1377_v25 = vpop.permute.xlu1 %1376 }
 0x1fb   : > { %1445 = vst.msk [vmem:[#allocation3 + $0x70] sm:$0xf] %vm1416_vm7, %v1377_v25  ;;  %2018 = vrot.lane.b32.xlu0 %v3746_v54, %s3113_s14  ;;  %v1687_v25 = vld [vmem:[#allocation2 + $0xc0] sm:$0xff] }
 0x1fc   : > { %v1719_v17 = vpack.c.bf16 %v1687_v25, %v1687_v25  ;;  %v1926_v25 = vld [vmem:[#allocation2 + $0x169] sm:$0xff] }
 0x1fd   : > { %v1548_v38 = vpop.permute.xlu0 %1547 }
 0x1fe   : > { %1643 = vst.msk [vmem:[#allocation3 + $0x4] sm:$0xf] %vm1641_vm8, %v1548_v38  ;;  %1793 = vrot.lane.b32.xlu2 %v1718_v2, %s3111_s12  ;;  %v1681_v38 = vld [vmem:[#allocation2 + $0x78] sm:$0xff] }
 0x1ff   : > { %v1713_v37 = vpack.c.bf16 %v1681_v38, %v1681_v38 }
 0x200   : > { %2006 = vrot.lane.b32.xlu1 %v3722_v24, %s3113_s14  ;;  %v1999_v54 = vpop.permute.xlu2 %1998  ;;  %v2130_v24 = vld [vmem:[#allocation2 + $0x6a] sm:$0xff] }
 0x201   : > { %v3953_v1 = vpack.c.bf16 %v2130_v24, %v2130_v24  ;;  %v1682_v24 = vld [vmem:[#allocation2 + $0x80] sm:$0xff] }
 0x202   : > { %v1383_v14 = vpop.permute.xlu1 %1382 }
 0x203   : > { %1448 = vst.msk [vmem:[#allocation3 + $0x7c] sm:$0xf] %vm1416_vm7, %v1383_v14  ;;  %2241 = vrot.lane.b32.xlu0 %v3934_v43, %s3112_s13  ;;  %v1907_v14 = vld [vmem:[#allocation2 + $0x81] sm:$0xff] }
 0x205   : > { %v1774_v15 = vpop.permute.xlu0 %1773 }
 0x206   : > { %1869 = vst.msk [vmem:[#allocation3 + $0x4] sm:$0xf] %vm1867_vm9, %v1774_v15  ;;  %2016 = vrot.lane.b32.xlu2 %v3727_v18, %s3113_s14  ;;  %v1693_v18 = vld [vmem:[#allocation2 + $0x108] sm:$0xff]  ;;  %v1939_v15 = vpack.c.bf16 %v1907_v14, %v1907_v14  ;;  %v2152_v14 = vld [vmem:[#allocation2 + $0x172] sm:$0xff] }
 0x207   : > { %2094 = vst.msk [vmem:[#allocation3 + $0x4] sm:$0xf] %vm2092_vm11, %v1999_v54  ;;  %v1725_v51 = vpack.c.bf16 %v1693_v18, %v1693_v18 }
 0x208   : > { %2229 = vrot.lane.b32.xlu1 %v3944_v11, %s3112_s13  ;;  %v1552_v6 = vpop.permute.xlu2 %1551 }
 0x209   : > { %1645 = vst.msk [vmem:[#allocation3 + $0xc] sm:$0xf] %vm1641_vm8, %v1552_v6 }
 0x20a   : > { %v1550_v16 = vpop.permute.xlu1 %1549 }
 0x20b   : > { %1644 = vst.msk [vmem:[#allocation3 + $0x8] sm:$0xf] %vm1641_vm8, %v1550_v16  ;;  %1583 = vrot.lane.b32.xlu0 %v3889_v22, %s3110_s11  ;;  %v3968_v22 = vpack.c.bf16 %v1473_v7, %v1473_v7 }
 0x20d   : > { %v2222_v27 = vpop.permute.xlu0 %2221 }
 0x20e   : > { %2231 = vrot.lane.b32.xlu2 %v3953_v1, %s3112_s13 }
 0x210   : > { %2243 = vrot.lane.b32.xlu1 %v3958_v13, %s3112_s13  ;;  %v1776_v46 = vpop.permute.xlu2 %1775 }
 0x211   : > { %1870 = vst.msk [vmem:[#allocation3 + $0x8] sm:$0xf] %vm1867_vm9, %v1776_v46 }
 0x212   : > { %v1997_v23 = vpop.permute.xlu1 %1996 }
 0x213   : > { %2093 = vst.msk [vmem:[#allocation3] sm:$0xf] %vm2092_vm11, %v1997_v23  ;;  %1807 = vrot.lane.b32.xlu0 %v1725_v51, %s3111_s12  ;;  %v2138_v23 = vld [vmem:[#allocation2 + $0xca] sm:$0xff] }
 0x214   : > { %2318 = vst.msk [vmem:[#allocation3] sm:$0xf] %vm2317_vm12, %v2222_v27  ;;  %v1906_v27 = vld [vmem:[#allocation2 + $0x79] sm:$0xff] }
 0x215   : > { %v1562_v31 = vpop.permute.xlu0 %1561  ;;  %v1938_v7 = vpack.c.bf16 %v1906_v27, %v1906_v27 }
 0x216   : > { %1650 = vst.msk [vmem:[#allocation3 + $0x20] sm:$0xf] %vm1641_vm8, %v1562_v31  ;;  %1581 = vrot.lane.b32.xlu2 %v3901_v50, %s3110_s11  ;;  %v1699_v50 = vld [vmem:[#allocation2 + $0x150] sm:$0xff]  ;;  %v4048_v31 = vpack.c.bf16 %v2138_v23, %v2138_v23  ;;  %v1915_v23 = vld [vmem:[#allocation2 + $0xe1] sm:$0xff] }
 0x217   : > { %v1731_v0 = vpack.c.bf16 %v1699_v50, %v1699_v50 }
 0x218   : > { %1593 = vrot.lane.b32.xlu1 %v3968_v22, %s3110_s11  ;;  %v1790_v55 = vpop.permute.xlu2 %1789 }
 0x21a   : > { %v2224_v39 = vpop.permute.xlu1 %2223 }
 0x21b   : > { %2319 = vst.msk [vmem:[#allocation3 + $0x4] sm:$0xf] %vm2317_vm12, %v2224_v39  ;;  %1821 = vrot.lane.b32.xlu0 %v1732_v32, %s3111_s12  ;;  %v1913_v32 = vld [vmem:[#allocation2 + $0xc9] sm:$0xff] }
 0x21c   : > { %v1945_v36 = vpack.c.bf16 %v1913_v32, %v1913_v32  ;;  %v1947_v32 = vpack.c.bf16 %v1915_v23, %v1915_v23 }
 0x21d   : > { %v1778_v44 = vpop.permute.xlu0 %1777 }
 0x21e   : > { %1871 = vst.msk [vmem:[#allocation3 + $0xc] sm:$0xf] %vm1867_vm9, %v1778_v44  ;;  %1595 = vrot.lane.b32.xlu2 %v3975_v40, %s3110_s11 }
 0x220   : > { %1809 = vrot.lane.b32.xlu1 %v1726_v42, %s3111_s12  ;;  %v2013_v45 = vpop.permute.xlu2 %2012  ;;  %v2137_v42 = vld [vmem:[#allocation2 + $0xc2] sm:$0xff] }
 0x221   : > { %v4061_v50 = vpack.c.bf16 %v2137_v42, %v2137_v42 }
 0x222   : > { %v1564_v28 = vpop.permute.xlu1 %1563  ;;  %v3049_v49 = vld [vmem:[#allocation3] sm:$0xff] }
 0x223   : > { %1651 = vst.msk [vmem:[#allocation3 + $0x24] sm:$0xf] %vm1641_vm8, %v1564_v28  ;;  %2044 = vrot.lane.b32.xlu0 %v3799_v62, %s3113_s14  ;;  %3029 = vmatmul.msk.bf16.vlgmr.msra.gmra.mxu0 %vm2482_vm13, %v3049_v49 }
 0x224   : > { %1877 = vst.msk [vmem:[#allocation3 + $0x24] sm:$0xf] %vm1867_vm9, %v1790_v55 }
 0x225   : > { %v2001_v56 = vpop.permute.xlu0 %2000 }
 0x226   : > { %2095 = vst.msk [vmem:[#allocation3 + $0x8] sm:$0xf] %vm2092_vm11, %v2001_v56  ;;  %1819 = vrot.lane.b32.xlu2 %v1731_v0, %s3111_s12 }
 0x228   : > { %2032 = vrot.lane.b32.xlu1 %v3778_v41, %s3113_s14  ;;  %v2228_v60 = vpop.permute.xlu2 %2227 }
 0x22a   : > { %v1788_v10 = vpop.permute.xlu1 %1787 }
 0x22b   : > { %1876 = vst.msk [vmem:[#allocation3 + $0x20] sm:$0xf] %vm1867_vm9, %v1788_v10  ;;  %2259 = vrot.lane.b32.xlu0 %v3990_v58, %s3112_s13  ;;  %v1695_v10 = vld [vmem:[#allocation2 + $0x120] sm:$0xff] }
 0x22c   : > { %2101 = vst.msk [vmem:[#allocation3 + $0x20] sm:$0xf] %vm2092_vm11, %v2013_v45  ;;  %v1696_v45 = vld [vmem:[#allocation2 + $0x128] sm:$0xff]  ;;  %v1727_v61 = vpack.c.bf16 %v1695_v10, %v1695_v10 }
 0x22d   : > { %v2015_v62 = vpop.permute.xlu0 %2014  ;;  %v1728_v49 = vpack.c.bf16 %v1696_v45, %v1696_v45 }
 0x22e   : > { %2102 = vst.msk [vmem:[#allocation3 + $0x24] sm:$0xf] %vm2092_vm11, %v2015_v62  ;;  %2034 = vrot.lane.b32.xlu2 %v3764_v20, %s3113_s14 }
 0x230   : > { %2046 = vrot.lane.b32.xlu1 %v3785_v3, %s3113_s14  ;;  %v1578_v41 = vpop.permute.xlu2 %1577  ;;  %v2150_v3 = vld [vmem:[#allocation2 + $0x15a] sm:$0xff] }
 0x231   : > { %1658 = vst.msk [vmem:[#allocation3 + $0x40] sm:$0xf] %vm1641_vm8, %v1578_v41  ;;  %v4017_v47 = vpack.c.bf16 %v2150_v3, %v2150_v3 }
 0x232   : > { %v2003_v8 = vpop.permute.xlu1 %2002 }
 0x233   : > { %2096 = vst.msk [vmem:[#allocation3 + $0xc] sm:$0xf] %vm2092_vm11, %v2003_v8  ;;  %1557 = vrot.lane.b32.xlu0 %v3944_v11, %s3110_s11  ;;  %v1733_v8 = vpack.c.bf16 %v1701_v12, %v1701_v12  ;;  %v1929_v12 = vld [vmem:[#allocation2 + $0x189] sm:$0xff] }
 0x234   : > { %2321 = vst.msk [vmem:[#allocation3 + $0xc] sm:$0xf] %vm2317_vm12, %v2228_v60  ;;  %v1952_v60 = vpack.c.bf16 %v1920_v53, %v1920_v53  ;;  %v1703_v53 = vld [vmem:[#allocation2 + $0x180] sm:$0xff] }
 0x235   : > { %v2238_v20 = vpop.permute.xlu0 %2237 }
 0x236   : > { %2326 = vst.msk [vmem:[#allocation3 + $0x20] sm:$0xf] %vm2317_vm12, %v2238_v20  ;;  %2257 = vrot.lane.b32.xlu2 %v4004_v34, %s3112_s13 }
 0x238   : > { %2269 = vrot.lane.b32.xlu1 %v4010_v63, %s3112_s13  ;;  %v1806_v52 = vpop.permute.xlu2 %1805 }
 0x23a   : > { %v2226_v30 = vpop.permute.xlu1 %2225 }
 0x23b   : > { %2320 = vst.msk [vmem:[#allocation3 + $0x8] sm:$0xf] %vm2317_vm12, %v2226_v30  ;;  %1571 = vrot.lane.b32.xlu0 %v3958_v13, %s3110_s11  ;;  %v1714_v13 = vpack.c.bf16 %v1682_v24, %v1682_v24 }
 0x23d   : > { %v1580_v2 = vpop.permute.xlu0 %1579 }
 0x23e   : > { %1659 = vst.msk [vmem:[#allocation3 + $0x44] sm:$0xf] %vm1641_vm8, %v1580_v2  ;;  %2271 = vrot.lane.b32.xlu2 %v4017_v47, %s3112_s13 }
 0x23f   : > { %1885 = vst.msk [vmem:[#allocation3 + $0x44] sm:$0xf] %vm1867_vm9, %v1806_v52  ;;  %v2151_v52 = vld [vmem:[#allocation2 + $0x16a] sm:$0xff] }
 0x240   : > { %1559 = vrot.lane.b32.xlu1 %v3953_v1, %s3110_s11  ;;  %v2254_v4 = vpop.permute.xlu2 %2253 }
 0x242   : > { %v2240_v59 = vpop.permute.xlu1 %2239  ;;  %v3050_v54 = vld [vmem:[#allocation3 + $0x8] sm:$0xff] }
 0x243   : > { %2327 = vst.msk [vmem:[#allocation3 + $0x24] sm:$0xf] %vm2317_vm12, %v2240_v59  ;;  %1795 = vrot.lane.b32.xlu0 %v1719_v17, %s3111_s12  ;;  %3030 = vmatmul.msk.bf16.gmra.mxu0 %vm2482_vm13, %v3050_v54  ;;  %v2145_v17 = vld [vmem:[#allocation2 + $0x122] sm:$0xff]  ;;  %v1958_v59 = vpack.c.bf16 %v1926_v25, %v1926_v25 }
 0x244   : > { %v1928_v25 = vld [vmem:[#allocation2 + $0x181] sm:$0xff] }
 0x245   : > { %v2029_v11 = vpop.permute.xlu0 %2028 }
 0x246   : > { %1569 = vrot.lane.b32.xlu2 %v3934_v43, %s3110_s11  ;;  %v1720_v43 = vpack.c.bf16 %v1688_v33, %v1688_v33  ;;  %v1914_v33 = vld [vmem:[#allocation2 + $0xd9] sm:$0xff] }
 0x248   : > { %1783 = vrot.lane.b32.xlu1 %v1713_v37, %s3111_s12  ;;  %v1556_v6 = vpop.permute.xlu2 %1555  ;;  %v2146_v37 = vld [vmem:[#allocation2 + $0x12a] sm:$0xff] }
 0x249   : > { %1647 = vst.msk [vmem:[#allocation3 + $0x14] sm:$0xf] %vm1641_vm8, %v1556_v6  ;;  %v2178_v24 = vpack.c.bf16 %v2146_v37, %v2146_v37  ;;  %v2184_v6 = vpack.c.bf16 %v2152_v14, %v2152_v14 }
 0x24a   : > { %v1804_v16 = vpop.permute.xlu1 %1803  ;;  %v3053_v1 = vld [vmem:[#allocation3 + $0x20] sm:$0xff] }
 0x24b   : > { %1884 = vst.msk [vmem:[#allocation3 + $0x40] sm:$0xf] %vm1867_vm9, %v1804_v16  ;;  %2010 = vrot.lane.b32.xlu0 %v1939_v15, %s3113_s14  ;;  %3033 = vmatmul.msk.bf16.vlgmr.msra.gmra.mxu1 %vm2482_vm13, %v3053_v1  ;;  %v1946_v1 = vpack.c.bf16 %v1914_v33, %v1914_v33 }
 0x24c   : > { %2109 = vst.msk [vmem:[#allocation3 + $0x40] sm:$0xf] %vm2092_vm11, %v2029_v11 }
 0x24d   : > { %v2256_v18 = vpop.permute.xlu0 %2255  ;;  %2334 = vst.msk [vmem:[#allocation3 + $0x40] sm:$0xf] %vm2317_vm12, %v2254_v4 }
 0x24e   : > { %1785 = vrot.lane.b32.xlu2 %v1714_v13, %s3111_s12 }
 0x250   : > { %1797 = vrot.lane.b32.xlu1 %v1720_v43, %s3111_s12  ;;  %v1780_v51 = vpop.permute.xlu2 %1779  ;;  %v1689_v43 = vld [vmem:[#allocation2 + $0xd8] sm:$0xff] }
 0x251   : > { %v1721_v27 = vpack.c.bf16 %v1689_v43, %v1689_v43  ;;  %v2156_v43 = vld [vmem:[#allocation2 + $0x1a2] sm:$0xff] }
 0x252   : > { %v2031_v46 = vpop.permute.xlu1 %2030 }
 0x253   : > { %2110 = vst.msk [vmem:[#allocation3 + $0x44] sm:$0xf] %vm2092_vm11, %v2031_v46  ;;  %2233 = vrot.lane.b32.xlu0 %v3828_v29, %s3112_s13  ;;  %v1690_v46 = vld [vmem:[#allocation2 + $0xe0] sm:$0xff] }
 0x254   : > { %2335 = vst.msk [vmem:[#allocation3 + $0x44] sm:$0xf] %vm2317_vm12, %v2256_v18 }
 0x255   : > { %v1566_v26 = vpop.permute.xlu0 %1565 }
 0x256   : > { %1652 = vst.msk [vmem:[#allocation3 + $0x28] sm:$0xf] %vm1641_vm8, %v1566_v26  ;;  %2008 = vrot.lane.b32.xlu2 %v1938_v7, %s3113_s14 }
 0x258   : > { %2020 = vrot.lane.b32.xlu1 %v3756_v19, %s3113_s14  ;;  %v1794_v35 = vpop.permute.xlu2 %1793 }
 0x25a   : > { %v1554_v55 = vpop.permute.xlu1 %1553 }
 0x25b   : > { %1646 = vst.msk [vmem:[#allocation3 + $0x10] sm:$0xf] %vm1641_vm8, %v1554_v55  ;;  %2247 = vrot.lane.b32.xlu0 %v4048_v31, %s3112_s13  ;;  %v3057_v29 = vld [vmem:[#allocation3 + $0x40] sm:$0xff] }
 0x25c   : > { %1872 = vst.msk [vmem:[#allocation3 + $0x10] sm:$0xf] %vm1867_vm9, %v1780_v51  ;;  %3037 = vmatmul.msk.bf16.vlgmr.msra.gmra.mxu2 %vm2482_vm13, %v3057_v29  ;;  %v1698_v29 = vld [vmem:[#allocation2 + $0x140] sm:$0xff] }
 0x25d   : > { %v1782_v39 = vpop.permute.xlu0 %1781 }
 0x25e   : > { %1873 = vst.msk [vmem:[#allocation3 + $0x14] sm:$0xf] %vm1867_vm9, %v1782_v39  ;;  %2022 = vrot.lane.b32.xlu2 %v1945_v36, %s3113_s14 }
 0x260   : > { %2235 = vrot.lane.b32.xlu1 %v3843_v48, %s3112_s13  ;;  %v2017_v19 = vpop.permute.xlu2 %2016 }
 0x262   : > { %v1568_v44 = vpop.permute.xlu1 %1567 }
 0x263   : > { %1653 = vst.msk [vmem:[#allocation3 + $0x2c] sm:$0xf] %vm1641_vm8, %v1568_v44  ;;  %1597 = vrot.lane.b32.xlu0 %v4010_v63, %s3110_s11 }
 0x264   : > { %1879 = vst.msk [vmem:[#allocation3 + $0x2c] sm:$0xf] %vm1867_vm9, %v1794_v35 }
 0x265   : > { %v2005_v28 = vpop.permute.xlu0 %2004 }
 0x266   : > { %2097 = vst.msk [vmem:[#allocation3 + $0x10] sm:$0xf] %vm2092_vm11, %v2005_v28  ;;  %2245 = vrot.lane.b32.xlu2 %v4061_v50, %s3112_s13  ;;  %v1922_v28 = vld [vmem:[#allocation2 + $0x139] sm:$0xff] }
 0x268   : > { %1585 = vrot.lane.b32.xlu1 %v4004_v34, %s3110_s11  ;;  %v2232_v48 = vpop.permute.xlu2 %2231 }
 0x26a   : > { %v1792_v0 = vpop.permute.xlu1 %1791 }
 0x26b   : > { %1878 = vst.msk [vmem:[#allocation3 + $0x28] sm:$0xf] %vm1867_vm9, %v1792_v0  ;;  %1813 = vrot.lane.b32.xlu0 %v1728_v49, %s3111_s12 }
 0x26c   : > { %2103 = vst.msk [vmem:[#allocation3 + $0x28] sm:$0xf] %vm2092_vm11, %v2017_v19  ;;  %v1730_v19 = vpack.c.bf16 %v1698_v29, %v1698_v29 }
 0x26d   : > { %v2019_v56 = vpop.permute.xlu0 %2018 }
 0x26e   : > { %2104 = vst.msk [vmem:[#allocation3 + $0x2c] sm:$0xf] %vm2092_vm11, %v2019_v56  ;;  %1587 = vrot.lane.b32.xlu2 %v3990_v58, %s3110_s11  ;;  %v1702_v58 = vld [vmem:[#allocation2 + $0x170] sm:$0xff] }
 0x26f   : > { %v1734_v3 = vpack.c.bf16 %v1702_v58, %v1702_v58  ;;  %v1923_v58 = vld [vmem:[#allocation2 + $0x141] sm:$0xff] }
 0x270   : > { %1599 = vrot.lane.b32.xlu1 %v4017_v47, %s3110_s11  ;;  %v1582_v62 = vpop.permute.xlu2 %1581  ;;  %v4093_v47 = vpack.c.bf16 %v2151_v52, %v2151_v52  ;;  %v2153_v52 = vld [vmem:[#allocation2 + $0x182] sm:$0xff] }
 0x271   : > { %1660 = vst.msk [vmem:[#allocation3 + $0x48] sm:$0xf] %vm1641_vm8, %v1582_v62  ;;  %v1735_v62 = vpack.c.bf16 %v1703_v53, %v1703_v53 }
 0x272   : > { %v2007_v41 = vpop.permute.xlu1 %2006 }
 0x273   : > { %2098 = vst.msk [vmem:[#allocation3 + $0x14] sm:$0xf] %vm2092_vm11, %v2007_v41  ;;  %2036 = vrot.lane.b32.xlu0 %v1952_v60, %s3113_s14 }
 0x274   : > { %2323 = vst.msk [vmem:[#allocation3 + $0x14] sm:$0xf] %vm2317_vm12, %v2232_v48  ;;  %v1697_v48 = vld [vmem:[#allocation2 + $0x138] sm:$0xff] }
 0x275   : > { %v2242_v34 = vpop.permute.xlu0 %2241  ;;  %v1729_v10 = vpack.c.bf16 %v1697_v48, %v1697_v48 }
 0x276   : > { %2328 = vst.msk [vmem:[#allocation3 + $0x28] sm:$0xf] %vm2317_vm12, %v2242_v34  ;;  %1811 = vrot.lane.b32.xlu2 %v1727_v61, %s3111_s12  ;;  %v1961_v61 = vpack.c.bf16 %v1929_v12, %v1929_v12 }
 0x278   : > { %1823 = vrot.lane.b32.xlu1 %v1733_v8, %s3111_s12  ;;  %v1596_v63 = vpop.permute.xlu2 %1595  ;;  %v1704_v8 = vld [vmem:[#allocation2 + $0x188] sm:$0xff] }
 0x279   : > { %1667 = vst.msk [vmem:[#allocation3 + $0x64] sm:$0xf] %vm1641_vm8, %v1596_v63 }
 0x27a   : > { %v2230_v20 = vpop.permute.xlu1 %2229 }
 0x27b   : > { %2322 = vst.msk [vmem:[#allocation3 + $0x10] sm:$0xf] %vm2317_vm12, %v2230_v20  ;;  %2050 = vrot.lane.b32.xlu0 %v3808_v9, %s3113_s14  ;;  %v2177_v9 = vpack.c.bf16 %v2145_v17, %v2145_v17  ;;  %v1736_v20 = vpack.c.bf16 %v1704_v8, %v1704_v8 }
 0x27d   : > { %v1584_v30 = vpop.permute.xlu0 %1583 }
 0x27e   : > { %1661 = vst.msk [vmem:[#allocation3 + $0x4c] sm:$0xf] %vm1641_vm8, %v1584_v30  ;;  %1825 = vrot.lane.b32.xlu2 %v1734_v3, %s3111_s12  ;;  %v1955_v3 = vpack.c.bf16 %v1923_v58, %v1923_v58 }
 0x280   : > { %2038 = vrot.lane.b32.xlu1 %v3789_v57, %s3113_s14  ;;  %v1820_v2 = vpop.permute.xlu2 %1819 }
 0x282   : > { %v2244_v4 = vpop.permute.xlu1 %2243  ;;  %v3051_v38 = vld [vmem:[#allocation3 + $0x10] sm:$0xff] }
 0x283   : > { %2329 = vst.msk [vmem:[#allocation3 + $0x2c] sm:$0xf] %vm2317_vm12, %v2244_v4  ;;  %2273 = vrot.lane.b32.xlu0 %v4093_v47, %s3112_s13  ;;  %3031 = vmatmul.msk.bf16.gmra.mxu0 %vm2482_vm13, %v3051_v38  ;;  %v1960_v38 = vpack.c.bf16 %v1928_v25, %v1928_v25 }
 0x285   : > { %v1808_v54 = vpop.permute.xlu0 %1807 }
 0x286   : > { %1886 = vst.msk [vmem:[#allocation3 + $0x48] sm:$0xf] %vm1867_vm9, %v1808_v54  ;;  %2048 = vrot.lane.b32.xlu2 %v1958_v59, %s3113_s14  ;;  %v2154_v59 = vld [vmem:[#allocation2 + $0x18a] sm:$0xff] }
 0x287   : > { %v2186_v54 = vpack.c.bf16 %v2154_v59, %v2154_v59 }
 0x288   : > { %2261 = vrot.lane.b32.xlu1 %v2177_v9, %s3112_s13  ;;  %v2035_v57 = vpop.permute.xlu2 %2034 }
 0x28a   : > { %v1594_v11 = vpop.permute.xlu1 %1593  ;;  %v3054_v15 = vld [vmem:[#allocation3 + $0x28] sm:$0xff] }
 0x28b   : > { %1666 = vst.msk [vmem:[#allocation3 + $0x60] sm:$0xf] %vm1641_vm8, %v1594_v11  ;;  %1575 = vrot.lane.b32.xlu0 %v4048_v31, %s3110_s11  ;;  %3034 = vmatmul.msk.bf16.gmra.mxu1 %vm2482_vm13, %v3054_v15  ;;  %v1722_v31 = vpack.c.bf16 %v1690_v46, %v1690_v46 }
 0x28c   : > { %1892 = vst.msk [vmem:[#allocation3 + $0x60] sm:$0xf] %vm1867_vm9, %v1820_v2 }
 0x28d   : > { %v1822_v16 = vpop.permute.xlu0 %1821 }
 0x28e   : > { %1893 = vst.msk [vmem:[#allocation3 + $0x64] sm:$0xf] %vm1867_vm9, %v1822_v16  ;;  %2263 = vrot.lane.b32.xlu2 %v2178_v24, %s3112_s13  ;;  %v1705_v16 = vld [vmem:[#allocation2 + $0x198] sm:$0xff] }
 0x290   : > { %2275 = vrot.lane.b32.xlu1 %v2184_v6, %s3112_s13  ;;  %v2258_v13 = vpop.permute.xlu2 %2257 }
 0x292   : > { %v1810_v18 = vpop.permute.xlu1 %1809 }
 0x293   : > { %1887 = vst.msk [vmem:[#allocation3 + $0x4c] sm:$0xf] %vm1867_vm9, %v1810_v18  ;;  %2024 = vrot.lane.b32.xlu0 %v1946_v1, %s3113_s14 }
 0x294   : > { %2112 = vst.msk [vmem:[#allocation3 + $0x4c] sm:$0xf] %vm2092_vm11, %v2035_v57 }
 0x295   : > { %v2045_v51 = vpop.permute.xlu0 %2044 }
 0x296   : > { %2117 = vst.msk [vmem:[#allocation3 + $0x60] sm:$0xf] %vm2092_vm11, %v2045_v51  ;;  %1573 = vrot.lane.b32.xlu2 %v4061_v50, %s3110_s11  ;;  %v1706_v51 = vld [vmem:[#allocation2 + $0x1a0] sm:$0xff] }
 0x298   : > { %1799 = vrot.lane.b32.xlu1 %v1721_v27, %s3111_s12  ;;  %v2272_v7 = vpop.permute.xlu2 %2271 }
 0x29a   : > { %v2033_v26 = vpop.permute.xlu1 %2032 }
 0x29b   : > { %2111 = vst.msk [vmem:[#allocation3 + $0x48] sm:$0xf] %vm2092_vm11, %v2033_v26  ;;  %2251 = vrot.lane.b32.xlu0 %v3870_v5, %s3112_s13 }
 0x29c   : > { %2336 = vst.msk [vmem:[#allocation3 + $0x48] sm:$0xf] %vm2317_vm12, %v2258_v13  ;;  %v1737_v13 = vpack.c.bf16 %v1705_v16, %v1705_v16 }
 0x29d   : > { %v2260_v35 = vpop.permute.xlu0 %2259 }
 0x29e   : > { %2337 = vst.msk [vmem:[#allocation3 + $0x4c] sm:$0xf] %vm2317_vm12, %v2260_v35  ;;  %1801 = vrot.lane.b32.xlu2 %v1722_v31, %s3111_s12  ;;  %v1738_v31 = vpack.c.bf16 %v1706_v51, %v1706_v51 }
 0x2a0   : > { %2026 = vrot.lane.b32.xlu1 %v1947_v32, %s3113_s14  ;;  %v1570_v55 = vpop.permute.xlu2 %1569  ;;  %v4133_v36 = vpop.f32.mrf.mxu0 }
 0x2a1   : > { %1654 = vst.msk [vmem:[#allocation3 + $0x30] sm:$0xf] %vm1641_vm8, %v1570_v55  ;;  %v2155_v55 = vld [vmem:[#allocation2 + $0x19a] sm:$0xff] }
 0x2a2   : > { %2624 = vst.msk [vmem:[%s4130_s26] sm:$0xff] %vm237_vm0, %v4133_v36  ;;  %v2047_v5 = vpop.permute.xlu1 %2046 }
 0x2a3   : > { %2118 = vst.msk [vmem:[#allocation3 + $0x64] sm:$0xf] %vm2092_vm11, %v2047_v5  ;;  %1601 = vrot.lane.b32.xlu0 %v4093_v47, %s3110_s11  ;;  %v2185_v47 = vpack.c.bf16 %v2153_v52, %v2153_v52 }
 0x2a4   : > { %2343 = vst.msk [vmem:[#allocation3 + $0x64] sm:$0xf] %vm2317_vm12, %v2272_v7  ;;  %v1931_v7 = vld [vmem:[#allocation2 + $0x1a1] sm:$0xff] }
 0x2a5   : > { %v1558_v39 = vpop.permute.xlu0 %1557  ;;  %v3058_v42 = vld [vmem:[#allocation3 + $0x48] sm:$0xff]  ;;  %v1963_v32 = vpack.c.bf16 %v1931_v7, %v1931_v7 }
 0x2a6   : > { %1648 = vst.msk [vmem:[#allocation3 + $0x18] sm:$0xf] %vm1641_vm8, %v1558_v39  ;;  %2249 = vrot.lane.b32.xlu2 %v3881_v21, %s3112_s13  ;;  %3038 = vmatmul.msk.bf16.gmra.mxu2 %vm2482_vm13, %v3058_v42  ;;  %v1954_v21 = vpack.c.bf16 %v1922_v28, %v1922_v28  ;;  %v2187_v42 = vpack.c.bf16 %v2155_v55, %v2155_v55 }
 0x2a8   : > { %1589 = vrot.lane.b32.xlu1 %v2177_v9, %s3110_s11  ;;  %v1786_v44 = vpop.permute.xlu2 %1785  ;;  %v4148_v50 = vpop.f32.mrf.mxu0 }
 0x2a9   : > { %2625 = vst.msk [vmem:[%s4130_s26 + $0x8] sm:$0xff] %vm237_vm0, %v4148_v50 }
 0x2aa   : > { %v2270_v45 = vpop.permute.xlu1 %2269 }
 0x2ab   : > { %2342 = vst.msk [vmem:[#allocation3 + $0x60] sm:$0xf] %vm2317_vm12, %v2270_v45  ;;  %1817 = vrot.lane.b32.xlu0 %v1730_v19, %s3111_s12 }
 0x2ad   : > { %v1572_v49 = vpop.permute.xlu0 %1571 }
 0x2ae   : > { %1655 = vst.msk [vmem:[#allocation3 + $0x34] sm:$0xf] %vm1641_vm8, %v1572_v49  ;;  %1591 = vrot.lane.b32.xlu2 %v2178_v24, %s3110_s11 }
 0x2b0   : > { %1603 = vrot.lane.b32.xlu1 %v2184_v6, %s3110_s11  ;;  %v2009_v0 = vpop.permute.xlu2 %2008 }
 0x2b2   : > { %v1560_v56 = vpop.permute.xlu1 %1559  ;;  %v3061_v60 = vld [vmem:[#allocation3 + $0x60] sm:$0xff] }
 0x2b3   : > { %1649 = vst.msk [vmem:[#allocation3 + $0x1c] sm:$0xf] %vm1641_vm8, %v1560_v56  ;;  %2040 = vrot.lane.b32.xlu0 %v1954_v21, %s3113_s14  ;;  %3041 = vmatmul.msk.bf16.vlgmr.msra.gmra.mxu3 %vm2482_vm13, %v3061_v60 }
 0x2b4   : > { %1875 = vst.msk [vmem:[#allocation3 + $0x1c] sm:$0xf] %vm1867_vm9, %v1786_v44 }
 0x2b5   : > { %v1796_v41 = vpop.permute.xlu0 %1795 }
 0x2b6   : > { %1880 = vst.msk [vmem:[#allocation3 + $0x30] sm:$0xf] %vm1867_vm9, %v1796_v41  ;;  %1815 = vrot.lane.b32.xlu2 %v1729_v10, %s3111_s12 }
 0x2b8   : > { %1827 = vrot.lane.b32.xlu1 %v1735_v62, %s3111_s12  ;;  %v2023_v34 = vpop.permute.xlu2 %2022 }
 0x2ba   : > { %v1784_v63 = vpop.permute.xlu1 %1783 }
 0x2bb   : > { %1874 = vst.msk [vmem:[#allocation3 + $0x18] sm:$0xf] %vm1867_vm9, %v1784_v63  ;;  %2054 = vrot.lane.b32.xlu0 %v1961_v61, %s3113_s14 }
 0x2bc   : > { %2099 = vst.msk [vmem:[#allocation3 + $0x18] sm:$0xf] %vm2092_vm11, %v2009_v0 }
 0x2bd   : > { %v2011_v30 = vpop.permute.xlu0 %2010 }
 0x2be   : > { %2100 = vst.msk [vmem:[#allocation3 + $0x1c] sm:$0xf] %vm2092_vm11, %v2011_v30  ;;  %1829 = vrot.lane.b32.xlu2 %v1736_v20, %s3111_s12 }
 0x2c0   : > { %2042 = vrot.lane.b32.xlu1 %v1955_v3, %s3113_s14  ;;  %v2246_v2 = vpop.permute.xlu2 %2245  ;;  %v4171_v17 = vpop.f32.mrf.mxu0 }
 0x2c1   : > { %2626 = vst.msk [vmem:[%s4130_s26 + $0x10] sm:$0xff] %vm237_vm0, %v4171_v17 }
 0x2c2   : > { %v1798_v4 = vpop.permute.xlu1 %1797 }
 0x2c3   : > { %1881 = vst.msk [vmem:[#allocation3 + $0x34] sm:$0xf] %vm1867_vm9, %v1798_v4  ;;  %2277 = vrot.lane.b32.xlu0 %v2185_v47, %s3112_s13 }
 0x2c4   : > { %2106 = vst.msk [vmem:[#allocation3 + $0x34] sm:$0xf] %vm2092_vm11, %v2023_v34 }
 0x2c5   : > { %v2234_v9 = vpop.permute.xlu0 %2233 }
 0x2c6   : > { %2324 = vst.msk [vmem:[#allocation3 + $0x18] sm:$0xf] %vm2317_vm12, %v2234_v9  ;;  %2052 = vrot.lane.b32.xlu2 %v1960_v38, %s3113_s14 }
 0x2c8   : > { %2265 = vrot.lane.b32.xlu1 %v3968_v22, %s3112_s13  ;;  %v1588_v37 = vpop.permute.xlu2 %1587  ;;  %v4183_v57 = vpop.f32.mrf.mxu1  ;;  %v1930_v22 = vld [vmem:[#allocation2 + $0x199] sm:$0xff] }
 0x2c9   : > { %v4185_v14 = vpop.f32.mrf.mxu0  ;;  %1663 = vst.msk [vmem:[#allocation3 + $0x54] sm:$0xf] %vm1641_vm8, %v1588_v37  ;;  %v1962_v24 = vpack.c.bf16 %v1930_v22, %v1930_v22 }
 0x2ca   : > { %2632 = vst.msk [vmem:[%s4130_s26 + $0x40] sm:$0xff] %vm237_vm0, %v4183_v57  ;;  %v2021_v11 = vpop.permute.xlu1 %2020 }
 0x2cb   : > { %2105 = vst.msk [vmem:[#allocation3 + $0x30] sm:$0xf] %vm2092_vm11, %v2021_v11  ;;  %1607 = vrot.lane.b32.xlu0 %v2186_v54, %s3110_s11 }
 0x2cc   : > { %2627 = vst.msk [vmem:[%s4130_s26 + $0x18] sm:$0xff] %vm237_vm0, %v4185_v14 }
 0x2cd   : > { %v2248_v15 = vpop.permute.xlu0 %2247  ;;  %2330 = vst.msk [vmem:[#allocation3 + $0x30] sm:$0xf] %vm2317_vm12, %v2246_v2 }
 0x2ce   : > { %2331 = vst.msk [vmem:[#allocation3 + $0x34] sm:$0xf] %vm2317_vm12, %v2248_v15  ;;  %2267 = vrot.lane.b32.xlu2 %v3975_v40, %s3112_s13  ;;  %v2188_v40 = vpack.c.bf16 %v2156_v43, %v2156_v43 }
 0x2d0   : > { %2279 = vrot.lane.b32.xlu1 %v2186_v54, %s3112_s13  ;;  %v1812_v6 = vpop.permute.xlu2 %1811  ;;  %v4201_v33 = vpop.f32.mrf.mxu1 }
 0x2d1   : > { %2633 = vst.msk [vmem:[%s4130_s26 + $0x48] sm:$0xff] %vm237_vm0, %v4201_v33 }
 0x2d2   : > { %v2236_v1 = vpop.permute.xlu1 %2235 }
 0x2d3   : > { %2325 = vst.msk [vmem:[#allocation3 + $0x1c] sm:$0xf] %vm2317_vm12, %v2236_v1  ;;  %2056 = vrot.lane.b32.xlu0 %v1962_v24, %s3113_s14 }
 0x2d5   : > { %v3055_v18 = vld [vmem:[#allocation3 + $0x30] sm:$0xff]  ;;  %v1598_v27 = vpop.permute.xlu0 %1597 }
 0x2d6   : > { %1668 = vst.msk [vmem:[#allocation3 + $0x68] sm:$0xf] %vm1641_vm8, %v1598_v27  ;;  %1605 = vrot.lane.b32.xlu2 %v2185_v47, %s3110_s11  ;;  %3035 = vmatmul.msk.bf16.gmra.mxu1 %vm2482_vm13, %v3055_v18 }
 0x2d8   : > { %1831 = vrot.lane.b32.xlu1 %v1737_v13, %s3111_s12  ;;  %v1826_v46 = vpop.permute.xlu2 %1825 }
 0x2da   : > { %v1586_v23 = vpop.permute.xlu1 %1585  ;;  %v3052_v26 = vld [vmem:[#allocation3 + $0x18] sm:$0xff] }
 0x2db   : > { %1662 = vst.msk [vmem:[#allocation3 + $0x50] sm:$0xf] %vm1641_vm8, %v1586_v23  ;;  %2283 = vrot.lane.b32.xlu0 %v2188_v40, %s3112_s13  ;;  %3032 = vmatmul.msk.bf16.gmra.mxu0 %vm2482_vm13, %v3052_v26 }
 0x2dc   : > { %1888 = vst.msk [vmem:[#allocation3 + $0x50] sm:$0xf] %vm1867_vm9, %v1812_v6 }
 0x2dd   : > { %v1814_v35 = vpop.permute.xlu0 %1813 }
 0x2de   : > { %1889 = vst.msk [vmem:[#allocation3 + $0x54] sm:$0xf] %vm1867_vm9, %v1814_v35  ;;  %1833 = vrot.lane.b32.xlu2 %v1738_v31, %s3111_s12 }
 0x2df   : > { %v4219_v5 = vpop.f32.mrf.mxu2 }
 0x2e0   : > { %2058 = vrot.lane.b32.xlu1 %v1963_v32, %s3113_s14  ;;  %v2049_v29 = vpop.permute.xlu2 %2048  ;;  %2640 = vst.msk [vmem:[%s4130_s26 + $0x80] sm:$0xff] %vm237_vm0, %v4219_v5 }
 0x2e2   : > { %v1600_v39 = vpop.permute.xlu1 %1599 }
 0x2e3   : > { %1669 = vst.msk [vmem:[#allocation3 + $0x6c] sm:$0xf] %vm1641_vm8, %v1600_v39 }
 0x2e4   : > { %1895 = vst.msk [vmem:[#allocation3 + $0x6c] sm:$0xf] %vm1867_vm9, %v1826_v46 }
 0x2e5   : > { %v2037_v19 = vpop.permute.xlu0 %2036 }
 0x2e6   : > { %2113 = vst.msk [vmem:[#allocation3 + $0x50] sm:$0xf] %vm2092_vm11, %v2037_v19  ;;  %2281 = vrot.lane.b32.xlu2 %v2187_v42, %s3112_s13 }
 0x2e7   : > { %v4228_v44 = vpop.f32.mrf.mxu2 }
 0x2e8   : > { %v2264_v45 = vpop.permute.xlu2 %2263  ;;  %2641 = vst.msk [vmem:[%s4130_s26 + $0x88] sm:$0xff] %vm237_vm0, %v4228_v44 }
 0x2ea   : > { %v1824_v28 = vpop.permute.xlu1 %1823 }
 0x2eb   : > { %1894 = vst.msk [vmem:[#allocation3 + $0x68] sm:$0xf] %vm1867_vm9, %v1824_v28 }
 0x2ec   : > { %2119 = vst.msk [vmem:[#allocation3 + $0x68] sm:$0xf] %vm2092_vm11, %v2049_v29 }
 0x2ed   : > { %v2051_v49 = vpop.permute.xlu0 %2050 }
 0x2ee   : > { %2120 = vst.msk [vmem:[#allocation3 + $0x6c] sm:$0xf] %vm2092_vm11, %v2051_v49  ;;  %v2657_v49 = vsel %vm237_vm0, %v4148_v50, 0.0 }
 0x2f0   : > { %v1574_v21 = vpop.permute.xlu2 %1573 }
 0x2f1   : > { %1656 = vst.msk [vmem:[#allocation3 + $0x38] sm:$0xf] %vm1641_vm8, %v1574_v21  ;;  %v2656_v21 = vsel %vm237_vm0, %v4133_v36, 0.0 }
 0x2f2   : > { %v2039_v48 = vpop.permute.xlu1 %2038 }
 0x2f3   : > { %2114 = vst.msk [vmem:[#allocation3 + $0x54] sm:$0xf] %vm2092_vm11, %v2039_v48  ;;  %v2659_v48 = vsel %vm237_vm0, %v4171_v17, 0.0 }
 0x2f4   : > { %2339 = vst.msk [vmem:[#allocation3 + $0x54] sm:$0xf] %vm2317_vm12, %v2264_v45 }
 0x2f5   : > { %v2274_v0 = vpop.permute.xlu0 %2273 }
 0x2f6   : > { %2344 = vst.msk [vmem:[#allocation3 + $0x68] sm:$0xf] %vm2317_vm12, %v2274_v0  ;;  %v2658_v0 = vadd.f32 %v2657_v49, %v2656_v21 }
 0x2f8   : > { %v1802_v53 = vpop.permute.xlu2 %1801 }
 0x2fa   : > { %v2262_v56 = vpop.permute.xlu1 %2261 }
 0x2fb   : > { %2338 = vst.msk [vmem:[#allocation3 + $0x50] sm:$0xf] %vm2317_vm12, %v2262_v56  ;;  %v2660_v56 = vadd.f32 %v2659_v48, %v2658_v0 }
 0x2fd   : > { %v1576_v60 = vpop.permute.xlu0 %1575 }
 0x2fe   : > { %1657 = vst.msk [vmem:[#allocation3 + $0x3c] sm:$0xf] %vm1641_vm8, %v1576_v60 }
 0x2ff   : > { %1883 = vst.msk [vmem:[#allocation3 + $0x3c] sm:$0xf] %vm1867_vm9, %v1802_v53  ;;  %v2661_v53 = vsel %vm237_vm0, %v4185_v14, 0.0 }
 0x300   : > { %v2250_v10 = vpop.permute.xlu2 %2249  ;;  %v4243_v62 = vpop.f32.mrf.mxu0 }
 0x301   : > { %2628 = vst.msk [vmem:[%s4130_s26 + $0x20] sm:$0xff] %vm237_vm0, %v4243_v62 }
 0x302   : > { %v2276_v12 = vpop.permute.xlu1 %2275  ;;  %v3059_v41 = vld [vmem:[#allocation3 + $0x50] sm:$0xff] }
 0x303   : > { %2345 = vst.msk [vmem:[#allocation3 + $0x6c] sm:$0xf] %vm2317_vm12, %v2276_v12  ;;  %3039 = vmatmul.msk.bf16.gmra.mxu2 %vm2482_vm13, %v3059_v41  ;;  %v2663_v12 = vsel %vm237_vm0, %v4243_v62, 0.0  ;;  %v2662_v41 = vadd.f32 %v2661_v53, %v2660_v56 }
 0x305   : > { %v2025_v61 = vpop.permute.xlu0 %2024 }
 0x308   : > { %v1592_v8 = vpop.permute.xlu2 %1591  ;;  %v4250_v34 = vpop.f32.mrf.mxu1 }
 0x309   : > { %v4252_v58 = vpop.f32.mrf.mxu0  ;;  %1665 = vst.msk [vmem:[#allocation3 + $0x5c] sm:$0xf] %vm1641_vm8, %v1592_v8  ;;  %v2664_v8 = vadd.f32 %v2663_v12, %v2662_v41 }
 0x30a   : > { %2634 = vst.msk [vmem:[%s4130_s26 + $0x50] sm:$0xff] %vm237_vm0, %v4250_v34  ;;  %v1800_v63 = vpop.permute.xlu1 %1799  ;;  %v3062_v20 = vld [vmem:[#allocation3 + $0x68] sm:$0xff] }
 0x30b   : > { %1882 = vst.msk [vmem:[#allocation3 + $0x38] sm:$0xf] %vm1867_vm9, %v1800_v63  ;;  %3042 = vmatmul.msk.bf16.gmra.mxu3 %vm2482_vm13, %v3062_v20 }
 0x30c   : > { %2629 = vst.msk [vmem:[%s4130_s26 + $0x28] sm:$0xff] %vm237_vm0, %v4252_v58 }
 0x30d   : > { %2107 = vst.msk [vmem:[#allocation3 + $0x38] sm:$0xf] %vm2092_vm11, %v2025_v61  ;;  %v2252_v3 = vpop.permute.xlu0 %2251  ;;  %v2665_v61 = vsel %vm237_vm0, %v4252_v58, 0.0 }
 0x30e   : > { %2332 = vst.msk [vmem:[#allocation3 + $0x38] sm:$0xf] %vm2317_vm12, %v2250_v10  ;;  %v2666_v20 = vadd.f32 %v2665_v61, %v2664_v8 }
 0x310   : > { %v1816_v52 = vpop.permute.xlu2 %1815  ;;  %v4265_v30 = vpop.f32.mrf.mxu1 }
 0x311   : > { %2635 = vst.msk [vmem:[%s4130_s26 + $0x58] sm:$0xff] %vm237_vm0, %v4265_v30 }
 0x312   : > { %v2027_v47 = vpop.permute.xlu1 %2026 }
 0x313   : > { %2108 = vst.msk [vmem:[#allocation3 + $0x3c] sm:$0xf] %vm2092_vm11, %v2027_v47 }
 0x314   : > { %2333 = vst.msk [vmem:[#allocation3 + $0x3c] sm:$0xf] %vm2317_vm12, %v2252_v3 }
 0x315   : > { %v1602_v25 = vpop.permute.xlu0 %1601 }
 0x316   : > { %1670 = vst.msk [vmem:[#allocation3 + $0x70] sm:$0xf] %vm1641_vm8, %v1602_v25 }
 0x318   : > { %v1830_v2 = vpop.permute.xlu2 %1829 }
 0x31a   : > { %v1590_v4 = vpop.permute.xlu1 %1589 }
 0x31b   : > { %1664 = vst.msk [vmem:[#allocation3 + $0x58] sm:$0xf] %vm1641_vm8, %v1590_v4  ;;  %v3056_v38 = vld [vmem:[#allocation3 + $0x38] sm:$0xff]  ;;  %v2671_v4 = vsel %vm237_vm0, %v4183_v57, 0.0 }
 0x31c   : > { %1890 = vst.msk [vmem:[#allocation3 + $0x58] sm:$0xf] %vm1867_vm9, %v1816_v52  ;;  %3036 = vmatmul.msk.bf16.gmra.mxu1 %vm2482_vm13, %v3056_v38 }
 0x31d   : > { %v1818_v59 = vpop.permute.xlu0 %1817 }
 0x31e   : > { %1891 = vst.msk [vmem:[#allocation3 + $0x5c] sm:$0xf] %vm1867_vm9, %v1818_v59  ;;  %v2673_v59 = vsel %vm237_vm0, %v4201_v33, 0.0 }
 0x320   : > { %v2053_v9 = vpop.permute.xlu2 %2052 }
 0x322   : > { %v1604_v54 = vpop.permute.xlu1 %1603 }
 0x323   : > { %1671 = vst.msk [vmem:[#allocation3 + $0x74] sm:$0xf] %vm1641_vm8, %v1604_v54 }
 0x324   : > { %1897 = vst.msk [vmem:[#allocation3 + $0x74] sm:$0xf] %vm1867_vm9, %v1830_v2 }
 0x325   : > { %v2041_v37 = vpop.permute.xlu0 %2040 }
 0x326   : > { %2115 = vst.msk [vmem:[#allocation3 + $0x58] sm:$0xf] %vm2092_vm11, %v2041_v37  ;;  %v2675_v37 = vsel %vm237_vm0, %v4250_v34, 0.0 }
 0x328   : > { %v2268_v11 = vpop.permute.xlu2 %2267 }
 0x329   : > { %v4280_v15 = vpop.f32.mrf.mxu2 }
 0x32a   : > { %v1828_v22 = vpop.permute.xlu1 %1827  ;;  %2642 = vst.msk [vmem:[%s4130_s26 + $0x90] sm:$0xff] %vm237_vm0, %v4280_v15 }
 0x32b   : > { %1896 = vst.msk [vmem:[#allocation3 + $0x70] sm:$0xf] %vm1867_vm9, %v1828_v22  ;;  %v2677_v22 = vsel %vm237_vm0, %v4265_v30, 0.0 }
 0x32c   : > { %2121 = vst.msk [vmem:[#allocation3 + $0x70] sm:$0xf] %vm2092_vm11, %v2053_v9 }
 0x32d   : > { %v2055_v24 = vpop.permute.xlu0 %2054 }
 0x32e   : > { %2122 = vst.msk [vmem:[#allocation3 + $0x74] sm:$0xf] %vm2092_vm11, %v2055_v24 }
 0x330   : > { %v1606_v6 = vpop.permute.xlu2 %1605 }
 0x331   : > { %1672 = vst.msk [vmem:[#allocation3 + $0x78] sm:$0xf] %vm1641_vm8, %v1606_v6  ;;  %v4289_v1 = vpop.f32.mrf.mxu2 }
 0x332   : > { %v2043_v16 = vpop.permute.xlu1 %2042  ;;  %2643 = vst.msk [vmem:[%s4130_s26 + $0x98] sm:$0xff] %vm237_vm0, %v4289_v1 }
 0x333   : > { %2116 = vst.msk [vmem:[#allocation3 + $0x5c] sm:$0xf] %vm2092_vm11, %v2043_v16 }
 0x334   : > { %2341 = vst.msk [vmem:[#allocation3 + $0x5c] sm:$0xf] %vm2317_vm12, %v2268_v11 }
 0x335   : > { %v2278_v13 = vpop.permute.xlu0 %2277 }
 0x336   : > { %2346 = vst.msk [vmem:[#allocation3 + $0x70] sm:$0xf] %vm2317_vm12, %v2278_v13  ;;  %v4297_v43 = vpop.f32.mrf.mxu3 }
 0x337   : > { %2648 = vst.msk [vmem:[%s4130_s26 + $0xc0] sm:$0xff] %vm237_vm0, %v4297_v43 }
 0x338   : > { %v1834_v27 = vpop.permute.xlu2 %1833 }
 0x33a   : > { %v2266_v18 = vpop.permute.xlu1 %2265 }
 0x33b   : > { %2340 = vst.msk [vmem:[#allocation3 + $0x58] sm:$0xf] %vm2317_vm12, %v2266_v18 }
 0x33d   : > { %v1608_v40 = vpop.permute.xlu0 %1607 }
 0x33e   : > { %1673 = vst.msk [vmem:[#allocation3 + $0x7c] sm:$0xf] %vm1641_vm8, %v1608_v40  ;;  %v4304_v51 = vpop.f32.mrf.mxu3 }
 0x33f   : > { %1899 = vst.msk [vmem:[#allocation3 + $0x7c] sm:$0xf] %vm1867_vm9, %v1834_v27 }
 0x340   : > { %2649 = vst.msk [vmem:[%s4130_s26 + $0xc8] sm:$0xff] %vm237_vm0, %v4304_v51  ;;  %v2282_v32 = vpop.permute.xlu2 %2281 }
 0x342   : > { %v2280_v46 = vpop.permute.xlu1 %2279  ;;  %v3060_v7 = vld [vmem:[#allocation3 + $0x58] sm:$0xff] }
 0x343   : > { %2347 = vst.msk [vmem:[#allocation3 + $0x74] sm:$0xf] %vm2317_vm12, %v2280_v46  ;;  %3040 = vmatmul.msk.bf16.gmra.mxu2 %vm2482_vm13, %v3060_v7 }
 0x345   : > { %v2057_v23 = vpop.permute.xlu0 %2056 }
 0x34a   : > { %v1832_v26 = vpop.permute.xlu1 %1831  ;;  %v3063_v31 = vld [vmem:[#allocation3 + $0x70] sm:$0xff] }
 0x34b   : > { %1898 = vst.msk [vmem:[#allocation3 + $0x78] sm:$0xf] %vm1867_vm9, %v1832_v26  ;;  %3043 = vmatmul.msk.bf16.gmra.mxu3 %vm2482_vm13, %v3063_v31  ;;  %v2689_v31 = vsel %vm237_vm0, %v4228_v44, 0.0 }
 0x34c   : > { %2123 = vst.msk [vmem:[#allocation3 + $0x78] sm:$0xf] %vm2092_vm11, %v2057_v23  ;;  %v2687_v23 = vsel %vm237_vm0, %v4219_v5, 0.0 }
 0x34d   : > { %2348 = vst.msk [vmem:[#allocation3 + $0x78] sm:$0xf] %vm2317_vm12, %v2282_v32  ;;  %v2284_v35 = vpop.permute.xlu0 %2283 }
 0x352   : > { %v2059_v55 = vpop.permute.xlu1 %2058 }
 0x353   : > { %2124 = vst.msk [vmem:[#allocation3 + $0x7c] sm:$0xf] %vm2092_vm11, %v2059_v55  ;;  %v4318_v29 = vpop.f32.mrf.mxu1 }
 0x354   : > { %2349 = vst.msk [vmem:[#allocation3 + $0x7c] sm:$0xf] %vm2317_vm12, %v2284_v35  ;;  %v2679_v6 = vsel %vm237_vm0, %v4318_v29, 0.0  ;;  %v2691_v35 = vsel %vm237_vm0, %v4280_v15, 0.0 }
 0x355   : > { %2636 = vst.msk [vmem:[%s4130_s26 + $0x60] sm:$0xff] %vm237_vm0, %v4318_v29 }
 0x358   : > { %v4323_v39 = vpop.f32.mrf.mxu0 }
 0x359   : > { %2630 = vst.msk [vmem:[%s4130_s26 + $0x30] sm:$0xff] %vm237_vm0, %v4323_v39  ;;  %v2667_v63 = vsel %vm237_vm0, %v4323_v39, 0.0 }
 0x35a   : > { %v2668_v52 = vadd.f32 %v2667_v63, %v2666_v20 }
 0x35b   : > { %v3064_v42 = vld [vmem:[#allocation3 + $0x78] sm:$0xff]  ;;  %v4328_v19 = vpop.f32.mrf.mxu1 }
 0x35c   : > { %2637 = vst.msk [vmem:[%s4130_s26 + $0x68] sm:$0xff] %vm237_vm0, %v4328_v19  ;;  %3044 = vmatmul.msk.bf16.gmra.mxu3 %vm2482_vm13, %v3064_v42  ;;  %v2681_v13 = vsel %vm237_vm0, %v4328_v19, 0.0  ;;  %v2693_v42 = vsel %vm237_vm0, %v4289_v1, 0.0 }
 0x360   : > { %v4334_v45 = vpop.f32.mrf.mxu0 }
 0x361   : > { %2631 = vst.msk [vmem:[%s4130_s26 + $0x38] sm:$0xff] %vm237_vm0, %v4334_v45  ;;  %v2669_v3 = vsel %vm237_vm0, %v4334_v45, 0.0 }
 0x362   : > { %v2670_v25 = vadd.f32 %v2669_v3, %v2668_v52  ;;  %v2703_v3 = vsel %vm237_vm0, %v4297_v43, 0.0 }
 0x364   : > { %v2672_v38 = vadd.f32 %v2671_v4, %v2670_v25  ;;  %v2705_v25 = vsel %vm237_vm0, %v4304_v51, 0.0 }
 0x366   : > { %v2674_v9 = vadd.f32 %v2673_v59, %v2672_v38 }
 0x368   : > { %v2676_v11 = vadd.f32 %v2675_v37, %v2674_v9 }
 0x36a   : > { %v2678_v24 = vadd.f32 %v2677_v22, %v2676_v11 }
 0x36c   : > { %v2680_v16 = vadd.f32 %v2679_v6, %v2678_v24 }
 0x36e   : > { %v2682_v27 = vadd.f32 %v2681_v13, %v2680_v16 }
 0x386   : > { %v4339_v28 = vpop.f32.mrf.mxu2 }
 0x387   : > { %2644 = vst.msk [vmem:[%s4130_s26 + $0xa0] sm:$0xff] %vm237_vm0, %v4339_v28  ;;  %v2695_v48 = vsel %vm237_vm0, %v4339_v28, 0.0 }
 0x38e   : > { %v4352_v60 = vpop.f32.mrf.mxu2  ;;  %v4354_v10 = vpop.f32.mrf.mxu3 }
 0x38f   : > { %2645 = vst.msk [vmem:[%s4130_s26 + $0xa8] sm:$0xff] %vm237_vm0, %v4352_v60  ;;  %v2697_v53 = vsel %vm237_vm0, %v4352_v60, 0.0  ;;  %v2707_v59 = vsel %vm237_vm0, %v4354_v10, 0.0 }
 0x390   : > { %2650 = vst.msk [vmem:[%s4130_s26 + $0xd0] sm:$0xff] %vm237_vm0, %v4354_v10 }
 0x396   : > { %v4370_v47 = vpop.f32.mrf.mxu3 }
 0x397   : > { %2651 = vst.msk [vmem:[%s4130_s26 + $0xd8] sm:$0xff] %vm237_vm0, %v4370_v47  ;;  %v2709_v37 = vsel %vm237_vm0, %v4370_v47, 0.0 }
 0x399   : > { %v4375_v2 = vpop.f32.mrf.mxu1 }
 0x39a   : > { %2638 = vst.msk [vmem:[%s4130_s26 + $0x70] sm:$0xff] %vm237_vm0, %v4375_v2  ;;  %v2683_v18 = vsel %vm237_vm0, %v4375_v2, 0.0 }
 0x39b   : > { %v2684_v46 = vadd.f32 %v2683_v18, %v2682_v27 }
 0x3a1   : > { %v4384_v54 = vpop.f32.mrf.mxu1 }
 0x3a2   : > { %2639 = vst.msk [vmem:[%s4130_s26 + $0x78] sm:$0xff] %vm237_vm0, %v4384_v54  ;;  %v2685_v40 = vsel %vm237_vm0, %v4384_v54, 0.0 }
 0x3a3   : > { %v2686_v7 = vadd.f32 %v2685_v40, %v2684_v46 }
 0x3a5   : > { %v2688_v26 = vadd.f32 %v2687_v23, %v2686_v7 }
 0x3a7   : > { %v2690_v32 = vadd.f32 %v2689_v31, %v2688_v26 }
 0x3a9   : > { %v2692_v55 = vadd.f32 %v2691_v35, %v2690_v32 }
 0x3ab   : > { %v2694_v49 = vadd.f32 %v2693_v42, %v2692_v55 }
 0x3ad   : > { %v2696_v0 = vadd.f32 %v2695_v48, %v2694_v49 }
 0x3af   : > { %v2698_v12 = vadd.f32 %v2697_v53, %v2696_v0 }
 0x3c6   : > { %v4409_v21 = vpop.f32.mrf.mxu2 }
 0x3c7   : > { %2646 = vst.msk [vmem:[%s4130_s26 + $0xb0] sm:$0xff] %vm237_vm0, %v4409_v21  ;;  %v2699_v56 = vsel %vm237_vm0, %v4409_v21, 0.0 }
 0x3c8   : > { %v2700_v41 = vadd.f32 %v2699_v56, %v2698_v12 }
 0x3ce   : > { %v4420_v61 = vpop.f32.mrf.mxu2  ;;  %v2614_v8 = vpop.f32.mrf.mxu3 }
 0x3cf   : > { %2647 = vst.msk [vmem:[%s4130_s26 + $0xb8] sm:$0xff] %vm237_vm0, %v4420_v61  ;;  %v2701_v63 = vsel %vm237_vm0, %v4420_v61, 0.0  ;;  %v2711_v24 = vsel %vm237_vm0, %v2614_v8, 0.0 }
 0x3d0   : > { %v2702_v20 = vadd.f32 %v2701_v63, %v2700_v41  ;;  %2652 = vst.msk [vmem:[%s4130_s26 + $0xe0] sm:$0xff] %vm237_vm0, %v2614_v8 }
 0x3d2   : > { %v2704_v52 = vadd.f32 %v2703_v3, %v2702_v20 }
 0x3d4   : > { %v2706_v4 = vadd.f32 %v2705_v25, %v2704_v52 }
 0x3d6   : > { %v2616_v38 = vpop.f32.mrf.mxu3  ;;  %v2708_v9 = vadd.f32 %v2707_v59, %v2706_v4 }
 0x3d7   : > { %2653 = vst.msk [vmem:[%s4130_s26 + $0xe8] sm:$0xff] %vm237_vm0, %v2616_v38  ;;  %v2713_v16 = vsel %vm237_vm0, %v2616_v38, 0.0 }
 0x3d8   : > { %v2710_v11 = vadd.f32 %v2709_v37, %v2708_v9 }
 0x3da   : > { %v2712_v6 = vadd.f32 %v2711_v24, %v2710_v11 }
 0x3dc   : > { %v2714_v18 = vadd.f32 %v2713_v16, %v2712_v6 }
 0x3df   : > { %v2619_v22 = vpop.f32.mrf.mxu3 }
 0x3e0   : > { %2654 = vst.msk [vmem:[%s4130_s26 + $0xf0] sm:$0xff] %vm237_vm0, %v2619_v22  ;;  %v2715_v13 = vsel %vm237_vm0, %v2619_v22, 0.0 }
 0x3e1   : > { %v2716_v27 = vadd.f32 %v2715_v13, %v2714_v18 }
 0x3e7   : > { %v2621_v40 = vpop.f32.mrf.mxu3 }
 0x3e8   : > { %2655 = vst.msk [vmem:[%s4130_s26 + $0xf8] sm:$0xff] %vm237_vm0, %v2621_v40  ;;  %v2717_v46 = vsel %vm237_vm0, %v2621_v40, 0.0 }
 0x3e9   : > { %v2718_v7 = vadd.f32 %v2717_v46, %v2716_v27 }
 0x3eb   : > { %v2719_v23 = vrot.slane %v2718_v7, 4 }
 0x3ed   : > { %v2720_v26 = vadd.f32 %v2719_v23, %v2718_v7 }
 0x3ef   : > { %v2721_v31 = vrot.slane %v2720_v26, 2 }
 0x3f1   : > { %v2722_v32 = vadd.f32 %v2721_v31, %v2720_v26 }
 0x3f3   : > { %v2723_v35 = vrot.slane %v2722_v32, 1 }
 0x3f5   : > { %v2724_v55 = vadd.f32 %v2723_v35, %v2722_v32 }
 0x3f7   : > { %v4453_v42 = vmul.f32 0.00390625, %v2724_v55 }
 0x3f9   : > { %2859 = vst.msk [vmem:[%s4451_s29] sm:$0x1] %vm246_vm1, %v4453_v42  ;;  %v4459_v49 = vsub.f32 %v2614_v8, %v4453_v42  ;;  %v4462_v48 = vsub.f32 %v2616_v38, %v4453_v42  ;;  %v4465_v0 = vsub.f32 %v2619_v22, %v4453_v42  ;;  %v4468_v53 = vsub.f32 %v2621_v40, %v4453_v42 }
 0x3fa   : > { %v2726_v56 = vsub.f32 %v4133_v36, %v4453_v42  ;;  %v2727_v12 = vsub.f32 %v4148_v50, %v4453_v42  ;;  %v2728_v41 = vsub.f32 %v4171_v17, %v4453_v42  ;;  %v2729_v8 = vsub.f32 %v4185_v14, %v4453_v42 }
 0x3fb   : > { %v2730_v3 = vsub.f32 %v4243_v62, %v4453_v42  ;;  %v2731_v25 = vsub.f32 %v4252_v58, %v4453_v42  ;;  %v2732_v17 = vsub.f32 %v4323_v39, %v4453_v42  ;;  %v2733_v62 = vsub.f32 %v4334_v45, %v4453_v42 }
 0x3fc   : > { %v2758_v63 = vmul.f32 %v2726_v56, %v2726_v56  ;;  %v2759_v20 = vmul.f32 %v2727_v12, %v2727_v12  ;;  %v2760_v52 = vmul.f32 %v2728_v41, %v2728_v41  ;;  %v2761_v4 = vmul.f32 %v2729_v8, %v2729_v8 }
 0x3fd   : > { %v2762_v59 = vmul.f32 %v2730_v3, %v2730_v3  ;;  %v2763_v37 = vmul.f32 %v2731_v25, %v2731_v25  ;;  %v2734_v22 = vsub.f32 %v4183_v57, %v4453_v42  ;;  %v2764_v24 = vmul.f32 %v2732_v17, %v2732_v17 }
 0x3fe   : > { %v2790_v36 = vsel %vm237_vm0, %v2758_v63, 0.0  ;;  %v2791_v50 = vsel %vm237_vm0, %v2759_v20, 0.0  ;;  %v2793_v14 = vsel %vm237_vm0, %v2760_v52, 0.0  ;;  %v2795_v11 = vsel %vm237_vm0, %v2761_v4, 0.0 }
 0x3ff   : > { %v2792_v38 = vadd.f32 %v2791_v50, %v2790_v36  ;;  %v2797_v6 = vsel %vm237_vm0, %v2762_v59, 0.0  ;;  %v2735_v39 = vsub.f32 %v4201_v33, %v4453_v42  ;;  %v2765_v13 = vmul.f32 %v2733_v62, %v2733_v62 }
 0x400   : > { %v2799_v18 = vsel %vm237_vm0, %v2763_v37, 0.0  ;;  %v2736_v45 = vsub.f32 %v4250_v34, %v4453_v42  ;;  %v2766_v40 = vmul.f32 %v2734_v22, %v2734_v22  ;;  %v2801_v46 = vsel %vm237_vm0, %v2764_v24, 0.0 }
 0x401   : > { %v2794_v9 = vadd.f32 %v2793_v14, %v2792_v38  ;;  %v2737_v57 = vsub.f32 %v4265_v30, %v4453_v42  ;;  %v2767_v23 = vmul.f32 %v2735_v39, %v2735_v39  ;;  %v2803_v26 = vsel %vm237_vm0, %v2765_v13, 0.0 }
 0x402   : > { %v2738_v33 = vsub.f32 %v4318_v29, %v4453_v42  ;;  %v2768_v32 = vmul.f32 %v2736_v45, %v2736_v45  ;;  %v2805_v35 = vsel %vm237_vm0, %v2766_v40, 0.0  ;;  %v2739_v34 = vsub.f32 %v4328_v19, %v4453_v42 }
 0x403   : > { %v2796_v58 = vadd.f32 %v2795_v11, %v2794_v9  ;;  %v2769_v56 = vmul.f32 %v2737_v57, %v2737_v57  ;;  %v2807_v12 = vsel %vm237_vm0, %v2767_v23, 0.0  ;;  %v2740_v30 = vsub.f32 %v4375_v2, %v4453_v42 }
 0x404   : > { %v2770_v8 = vmul.f32 %v2738_v33, %v2738_v33  ;;  %v2809_v63 = vsel %vm237_vm0, %v2768_v32, 0.0  ;;  %v2741_v29 = vsub.f32 %v4384_v54, %v4453_v42  ;;  %v2771_v3 = vmul.f32 %v2739_v34, %v2739_v34 }
 0x405   : > { %v2798_v16 = vadd.f32 %v2797_v6, %v2796_v58  ;;  %v2811_v52 = vsel %vm237_vm0, %v2769_v56, 0.0  ;;  %v2742_v19 = vsub.f32 %v4219_v5, %v4453_v42  ;;  %v2772_v4 = vmul.f32 %v2740_v30, %v2740_v30 }
 0x406   : > { %v2813_v36 = vsel %vm237_vm0, %v2770_v8, 0.0  ;;  %v2743_v2 = vsub.f32 %v4228_v44, %v4453_v42  ;;  %v2773_v38 = vmul.f32 %v2741_v29, %v2741_v29  ;;  %v2815_v17 = vsel %vm237_vm0, %v2771_v3, 0.0 }
 0x407   : > { %v2800_v27 = vadd.f32 %v2799_v18, %v2798_v16  ;;  %v2744_v54 = vsub.f32 %v4280_v15, %v4453_v42  ;;  %v2774_v14 = vmul.f32 %v2742_v19, %v2742_v19  ;;  %v2817_v9 = vsel %vm237_vm0, %v2772_v4, 0.0 }
 0x408   : > { %v2745_v5 = vsub.f32 %v4289_v1, %v4453_v42  ;;  %v2775_v37 = vmul.f32 %v2743_v2, %v2743_v2  ;;  %v2819_v11 = vsel %vm237_vm0, %v2773_v38, 0.0  ;;  %v2746_v44 = vsub.f32 %v4339_v28, %v4453_v42 }
 0x409   : > { %v2802_v7 = vadd.f32 %v2801_v46, %v2800_v27  ;;  %v2776_v22 = vmul.f32 %v2744_v54, %v2744_v54  ;;  %v2821_v24 = vsel %vm237_vm0, %v2774_v14, 0.0  ;;  %v2747_v15 = vsub.f32 %v4352_v60, %v4453_v42 }
 0x40a   : > { %v2777_v16 = vmul.f32 %v2745_v5, %v2745_v5  ;;  %v2823_v39 = vsel %vm237_vm0, %v2775_v37, 0.0  ;;  %v2748_v1 = vsub.f32 %v4409_v21, %v4453_v42  ;;  %v2778_v18 = vmul.f32 %v2746_v44, %v2746_v44 }
 0x40b   : > { %v2804_v31 = vadd.f32 %v2803_v26, %v2802_v7  ;;  %v2825_v27 = vsel %vm237_vm0, %v2776_v22, 0.0  ;;  %v2749_v28 = vsub.f32 %v4420_v61, %v4453_v42  ;;  %v2779_v40 = vmul.f32 %v2747_v15, %v2747_v15 }
 0x40c   : > { %v2827_v46 = vsel %vm237_vm0, %v2777_v16, 0.0  ;;  %v2750_v60 = vsub.f32 %v4297_v43, %v4453_v42  ;;  %v2780_v57 = vmul.f32 %v2748_v1, %v2748_v1  ;;  %v2829_v23 = vsel %vm237_vm0, %v2778_v18, 0.0 }
 0x40d   : > { %v2806_v55 = vadd.f32 %v2805_v35, %v2804_v31  ;;  %v2751_v21 = vsub.f32 %v4304_v51, %v4453_v42  ;;  %v2781_v31 = vmul.f32 %v2749_v28, %v2749_v28  ;;  %v2831_v33 = vsel %vm237_vm0, %v2779_v40, 0.0 }
 0x40e   : > { %v2752_v61 = vsub.f32 %v4354_v10, %v4453_v42  ;;  %v2782_v35 = vmul.f32 %v2750_v60, %v2750_v60  ;;  %v2753_v43 = vsub.f32 %v4370_v47, %v4453_v42  ;;  %v2786_v10 = vmul.f32 %v4459_v49, %v4459_v49 }
 0x40f   : > { %v2808_v41 = vadd.f32 %v2807_v12, %v2806_v55  ;;  %v2833_v55 = vsel %vm237_vm0, %v2780_v57, 0.0  ;;  %v2783_v56 = vmul.f32 %v2751_v21, %v2751_v21  ;;  %v2835_v12 = vsel %vm237_vm0, %v2781_v31, 0.0 }
 0x410   : > { %v2784_v30 = vmul.f32 %v2752_v61, %v2752_v61  ;;  %v2837_v51 = vsel %vm237_vm0, %v2782_v35, 0.0  ;;  %v2787_v47 = vmul.f32 %v4462_v48, %v4462_v48  ;;  %v2788_v19 = vmul.f32 %v4465_v0, %v4465_v0 }
 0x411   : > { %v2810_v20 = vadd.f32 %v2809_v63, %v2808_v41  ;;  %v2785_v63 = vmul.f32 %v2753_v43, %v2753_v43  ;;  %v2845_v4 = vsel %vm237_vm0, %v2786_v10, 0.0 }
 0x412   : > { %v2841_v3 = vsel %vm237_vm0, %v2784_v30, 0.0  ;;  %v2847_v49 = vsel %vm237_vm0, %v2787_v47, 0.0  ;;  %v2849_v38 = vsel %vm237_vm0, %v2788_v19, 0.0 }
 0x413   : > { %v2812_v25 = vadd.f32 %v2811_v52, %v2810_v20  ;;  %v2839_v20 = vsel %vm237_vm0, %v2783_v56, 0.0  ;;  %v2843_v42 = vsel %vm237_vm0, %v2785_v63, 0.0 }
 0x415   : > { %v2814_v50 = vadd.f32 %v2813_v36, %v2812_v25 }
 0x417   : > { %v2816_v59 = vadd.f32 %v2815_v17, %v2814_v50  ;;  %v2789_v50 = vmul.f32 %v4468_v53, %v4468_v53 }
 0x419   : > { %v2818_v62 = vadd.f32 %v2817_v9, %v2816_v59  ;;  %v2851_v48 = vsel %vm237_vm0, %v2789_v50, 0.0 }
 0x41b   : > { %v2820_v58 = vadd.f32 %v2819_v11, %v2818_v62 }
 0x41d   : > { %v2822_v6 = vadd.f32 %v2821_v24, %v2820_v58 }
 0x41f   : > { %v2824_v13 = vadd.f32 %v2823_v39, %v2822_v6 }
 0x421   : > { %v2826_v45 = vadd.f32 %v2825_v27, %v2824_v13 }
 0x423   : > { %v2828_v7 = vadd.f32 %v2827_v46, %v2826_v45 }
 0x425   : > { %v2830_v26 = vadd.f32 %v2829_v23, %v2828_v7 }
 0x427   : > { %v2832_v32 = vadd.f32 %v2831_v33, %v2830_v26 }
 0x429   : > { %v2834_v34 = vadd.f32 %v2833_v55, %v2832_v32 }
 0x42b   : > { %v2836_v41 = vadd.f32 %v2835_v12, %v2834_v34 }
 0x42d   : > { %v2838_v8 = vadd.f32 %v2837_v51, %v2836_v41 }
 0x42f   : > { %v2840_v29 = vadd.f32 %v2839_v20, %v2838_v8 }
 0x431   : > { %v2842_v52 = vadd.f32 %v2841_v3, %v2840_v29 }
 0x433   : > { %v2844_v25 = vadd.f32 %v2843_v42, %v2842_v52 }
 0x435   : > { %v2846_v36 = vadd.f32 %v2845_v4, %v2844_v25 }
 0x437   : > { %v2848_v2 = vadd.f32 %v2847_v49, %v2846_v36 }
 0x439   : > { %v2850_v17 = vadd.f32 %v2849_v38, %v2848_v2 }
 0x43b   : > { %v2852_v59 = vadd.f32 %v2851_v48, %v2850_v17 }
 0x43d   : > { %v2853_v54 = vrot.slane %v2852_v59, 4 }
 0x43f   : > { %v2854_v14 = vadd.f32 %v2853_v54, %v2852_v59 }
 0x441   : > { %v2855_v9 = vrot.slane %v2854_v14, 2 }
 0x443   : > { %v2856_v0 = vadd.f32 %v2855_v9, %v2854_v14 }
 0x445   : > { %v2857_v62 = vrot.slane %v2856_v0, 1 }
 0x447   : > { %v2858_v5 = vadd.f32 %v2857_v62, %v2856_v0 }
 0x449   : > { %2860 = vst.msk [vmem:[%s4451_s29 + $0x1] sm:$0x1] %vm246_vm1, %v2858_v5 }
 0x44a PF: > { %s16_s18 = sadd.s32 1, %s3103_s18  }
 0x44b   : > { %p13_p4 = scmp.ge.s32.totalorder %s16_s18, 4  }
 0x44d   :  { %15 = sbr.rel (!%p13_p4) target bundleno = 1 (0x1), region = 81 }

// kernel: basic_block_forward.3
= control target key start
LH: loop header
LB: loop body
LE: loop exit
PB: predicated region body
PF: predicated region fallthrough
CT: control target
= control target key end

     0   :  { %s3112_s18 = smov 0   ;;  %s4538_s0 = inlined_call_operand.vmem [shape: f32[2,16,16,4], index: 0, kind: input, shape index: {}]   ;;  %s4539_s1 = inlined_call_operand.vmem [shape: f32[1,4], index: 1, kind: input, shape index: {}]   ;;  %s4540_s2 = inlined_call_operand.vmem [shape: f32[1,4], index: 2, kind: input, shape index: {}]   ;;  %s4541_s3 = inlined_call_operand.vmem [shape: bf16[36,4], index: 3, kind: input, shape index: {}]   ;;  %s4542_s4 = inlined_call_operand.vmem [shape: f32[2,16,16,4], index: 4, kind: output, shape index: {0}]   ;;  %s4543_s5 = inlined_call_operand.vmem [shape: f32[2,2,4], index: 5, kind: output, shape index: {1}]  }
   0x1 LB: > { %s2915_s19 = sadd.s32 4294967295, %s3071_s18   ;;  %p2919_p0 = scmp.ge.s32.totalorder %s3071_s18, 1  ;;  %s3071_s18 = sphi %s3112_s18, %s16_s18  }
   0x2   : > { %p190_p1 = scmp.lt.s32.totalorder %s3071_s18, 3 }
   0x4   : > { %p191_p2 = pnand %p2919_p0, %p190_p1 }
   0x5   : > { %s3074_s20 = smov (!%p191_p2), 4   ;;  %p222_p3 = scmp.lt.s32.totalorder (!%p191_p2), %s2915_s19, 1 }
   0x6   : > { %194 = sbr.rel (%p191_p2) target bundleno = 1098 (0x44a), region = 36  ;;  %s3075_s29 = smov (!%p191_p2), 8  }
   0x7   : > { %s3076_s30 = smov (!%p191_p2), 12   ;;  %s3077_s10 = smov (!%p191_p2), 16  }
   0x8   : > { %s3078_s11 = smov (!%p191_p2), 20   ;;  %s3079_s12 = smov (!%p191_p2), 24  }
   0x9   : > { %s3080_s13 = smov (!%p191_p2), 32   ;;  %s3081_s14 = smov (!%p191_p2), 28  }
   0xb   : > { %vm237_vm0 = vcmask 31744   ;;  %v3073_v0 = vmov 0.0   ;;  %vm246_vm1 = vcmask 24576   ;;  %s4545_s19 = smov (!%p222_p3, %s2915_s19), 1  ;;  %v3200_v3 = vld [vmem:[%s4539_s1] ss:$0 sm:$0xff] }
   0xc   : > { %238 = vst.msk [vmem:[#allocation2] sm:$0xff] %vm237_vm0, %v3073_v0  ;;  %s3015_s21 = sshll.u32 %s4545_s19, 8  ;;  %vm240_vm2 = vcmask 25600   ;;  %v3217_v8 = vld [vmem:[%s4540_s2] ss:$0 sm:$0xff]  ;;  %vm484_vm3 = vcmask 27648  }
   0xd   : > { %239 = vst.msk [vmem:[#allocation2 + $0x8] sm:$0xff] %vm237_vm0, %v3073_v0  ;;  %s3191_s24 = scalar_lea.vmem %s4538_s0, %s3015_s21  ;;  %vm709_vm4 = vcmask 60448   ;;  %vm934_vm5 = vcmask 93248   ;;  %vm1159_vm6 = vcmask 126048   ;;  %vm1384_vm7 = vcmask 158848   ;;  %s4097_s26 = scalar_lea.vmem %s4542_s4, %s3015_s21 }
   0xe   : > { %247 = vst.msk [vmem:[#allocation2] sm:$0x1] %vm246_vm1, %v3073_v0  ;;  %v283_v4 = vld [vmem:[%s3191_s24] sm:$0xff]  ;;  %v284_v6 = vld [vmem:[%s3191_s24 + $0x8] sm:$0xff]  ;;  %v290_v9 = vld [vmem:[%s3191_s24 + $0x38] sm:$0xff]  ;;  %vm1609_vm8 = vcmask 191648  }
   0xf   : > { %243 = vst.msk [vmem:[#allocation2 + $0x198] sm:$0xff] %vm237_vm0, %v3073_v0  ;;  %v287_v5 = vld [vmem:[%s3191_s24 + $0x20] sm:$0xff]  ;;  %v319_v7 = vmul.f32 %v3200_v3, %v283_v4  ;;  %v288_v11 = vld [vmem:[%s3191_s24 + $0x28] sm:$0xff]  ;;  %v320_v12 = vmul.f32 %v3200_v3, %v284_v6  ;;  %v293_v13 = vld [vmem:[%s3191_s24 + $0x50] sm:$0xff]  ;;  %v326_v14 = vmul.f32 %v3200_v3, %v290_v9  ;;  %vm1835_vm9 = vcmask 224448   ;;  %s2924_s21 = sshll.u32 %s4545_s19, 1 }
  0x10   : > { %244 = vst.msk [vmem:[#allocation2 + $0x1a0] sm:$0xff] %vm237_vm0, %v3073_v0  ;;  %v323_v10 = vmul.f32 %v3200_v3, %v287_v5  ;;  %v285_v15 = vld [vmem:[%s3191_s24 + $0x10] sm:$0xff]  ;;  %v324_v17 = vmul.f32 %v3200_v3, %v288_v11  ;;  %v291_v18 = vld [vmem:[%s3191_s24 + $0x40] sm:$0xff]  ;;  %v329_v20 = vmul.f32 %v3200_v3, %v293_v13  ;;  %v296_v21 = vld [vmem:[%s3191_s24 + $0x68] sm:$0xff]  ;;  %vm2499_vm10 = vcmask 1041408  }
  0x11   : > { %248 = vst.msk [vmem:[#allocation2 + $0x18] sm:$0x1] %vm246_vm1, %v3073_v0  ;;  %v355_v16 = vadd.f32 %v3217_v8, %v319_v7  ;;  %v356_v22 = vadd.f32 %v3217_v8, %v320_v12  ;;  %v321_v23 = vmul.f32 %v3200_v3, %v285_v15  ;;  %v286_v24 = vld [vmem:[%s3191_s24 + $0x18] sm:$0xff]  ;;  %v362_v25 = vadd.f32 %v3217_v8, %v326_v14  ;;  %v299_v32 = vld [vmem:[%s3191_s24 + $0x80] sm:$0xff]  ;;  %v289_v33 = vld [vmem:[%s3191_s24 + $0x30] sm:$0xff] }
  0x12   : > { %249 = vst.msk [vmem:[#allocation2 + $0x30] sm:$0x1] %vm246_vm1, %v3073_v0  ;;  %v359_v19 = vadd.f32 %v3217_v8, %v323_v10  ;;  %v327_v26 = vmul.f32 %v3200_v3, %v291_v18  ;;  %v294_v27 = vld [vmem:[%s3191_s24 + $0x58] sm:$0xff]  ;;  %v360_v28 = vadd.f32 %v3217_v8, %v324_v17  ;;  %v332_v29 = vmul.f32 %v3200_v3, %v296_v21  ;;  %v297_v40 = vld [vmem:[%s3191_s24 + $0x70] sm:$0xff]  ;;  %v292_v54 = vld [vmem:[%s3191_s24 + $0x48] sm:$0xff] }
  0x13   : > { %250 = vst.msk [vmem:[#allocation2 + $0x48] sm:$0x1] %vm246_vm1, %v3073_v0  ;;  %v365_v30 = vadd.f32 %v3217_v8, %v329_v20  ;;  %v322_v31 = vmul.f32 %v3200_v3, %v286_v24  ;;  %v357_v35 = vadd.f32 %v3217_v8, %v321_v23  ;;  %v330_v36 = vmul.f32 %v3200_v3, %v294_v27  ;;  %v302_v53 = vld [vmem:[%s3191_s24 + $0x98] sm:$0xff]  ;;  %v300_v58 = vld [vmem:[%s3191_s24 + $0x88] sm:$0xff]  ;;  %v305_v6 = vld [vmem:[%s3191_s24 + $0xb0] sm:$0xff] }
  0x14   : > { %v517_v1 = vld [vmem:[#allocation2 + $0x1] sm:$0xff]  ;;  %251 = vst.msk [vmem:[#allocation2 + $0x60] sm:$0x1] %vm246_vm1, %v3073_v0  ;;  %v363_v38 = vadd.f32 %v3217_v8, %v327_v26  ;;  %v335_v39 = vmul.f32 %v3200_v3, %v299_v32  ;;  %v368_v41 = vadd.f32 %v3217_v8, %v332_v29  ;;  %v325_v42 = vmul.f32 %v3200_v3, %v289_v33  ;;  %v298_v23 = vld [vmem:[%s3191_s24 + $0x78] sm:$0xff] }
  0x15   : > { %v549_v2 = vpack.c.bf16 %v517_v1, %v517_v1  ;;  %252 = vst.msk [vmem:[#allocation2 + $0x78] sm:$0x1] %vm246_vm1, %v3073_v0  ;;  %v358_v43 = vadd.f32 %v3217_v8, %v322_v31  ;;  %v333_v44 = vmul.f32 %v3200_v3, %v297_v40  ;;  %v366_v45 = vadd.f32 %v3217_v8, %v330_v36  ;;  %v295_v7 = vld [vmem:[%s3191_s24 + $0x60] sm:$0xff]  ;;  %v306_v27 = vld [vmem:[%s3191_s24 + $0xb8] sm:$0xff] }
  0x16   : > { %253 = vst.msk [vmem:[#allocation2 + $0x90] sm:$0x1] %vm246_vm1, %v3073_v0  ;;  %v371_v47 = vadd.f32 %v3217_v8, %v335_v39  ;;  %v361_v50 = vadd.f32 %v3217_v8, %v325_v42  ;;  %v338_v55 = vmul.f32 %v3200_v3, %v302_v53  ;;  %v328_v56 = vmul.f32 %v3200_v3, %v292_v54  ;;  %v303_v12 = vld [vmem:[%s3191_s24 + $0xa0] sm:$0xff]  ;;  %v309_v42 = vld [vmem:[%s3191_s24 + $0xd0] sm:$0xff] }
  0x17   : > { %613 = vrot.lane.b32.xlu0 %v549_v2, %s3074_s20  ;;  %254 = vst.msk [vmem:[#allocation2 + $0xa8] sm:$0x1] %vm246_vm1, %v3073_v0  ;;  %v369_v52 = vadd.f32 %v3217_v8, %v333_v44  ;;  %v336_v61 = vmul.f32 %v3200_v3, %v300_v58  ;;  %v341_v9 = vmul.f32 %v3200_v3, %v305_v6  ;;  %vm2060_vm11 = vcmask 257248  }
  0x18   : > { %255 = vst.msk [vmem:[#allocation2 + $0xc0] sm:$0x1] %vm246_vm1, %v3073_v0  ;;  %v374_v59 = vadd.f32 %v3217_v8, %v338_v55  ;;  %v364_v60 = vadd.f32 %v3217_v8, %v328_v56  ;;  %v331_v10 = vmul.f32 %v3200_v3, %v295_v7  ;;  %v342_v31 = vmul.f32 %v3200_v3, %v306_v27  ;;  %v312_v55 = vld [vmem:[%s3191_s24 + $0xe8] sm:$0xff]  ;;  %v420_v27 = vld [vmem:[#allocation2] sm:$0xff] }
  0x19   : > { %256 = vst.msk [vmem:[#allocation2 + $0xd8] sm:$0x1] %vm246_vm1, %v3073_v0  ;;  %v372_v2 = vadd.f32 %v3217_v8, %v336_v61  ;;  %v377_v14 = vadd.f32 %v3217_v8, %v341_v9  ;;  %v348_v58 = vmul.f32 %v3200_v3, %v312_v55  ;;  %vm2285_vm12 = vcmask 290048  }
  0x1a   : > { %257 = vst.msk [vmem:[#allocation2 + $0xf0] sm:$0x1] %vm246_vm1, %v3073_v0  ;;  %v367_v15 = vadd.f32 %v3217_v8, %v331_v10  ;;  %vm2450_vm13 = vcmask 293888  }
  0x1b   : > { %258 = vst.msk [vmem:[#allocation2 + $0x108] sm:$0x1] %vm246_vm1, %v3073_v0  ;;  %v384_v61 = vadd.f32 %v3217_v8, %v348_v58 }
  0x1c   : > { %259 = vst.msk [vmem:[#allocation2 + $0x120] sm:$0x1] %vm246_vm1, %v3073_v0 }
  0x1d   : > { %260 = vst.msk [vmem:[#allocation2 + $0x138] sm:$0x1] %vm246_vm1, %v3073_v0 }
  0x1e   : > { %261 = vst.msk [vmem:[#allocation2 + $0x150] sm:$0x1] %vm246_vm1, %v3073_v0 }
  0x1f   : > { %262 = vst.msk [vmem:[#allocation2 + $0x168] sm:$0x1] %vm246_vm1, %v3073_v0 }
  0x20   : > { %263 = vst.msk [vmem:[#allocation2 + $0x180] sm:$0x1] %vm246_vm1, %v3073_v0 }
  0x21   : > { %266 = vst.msk [vmem:[#allocation2 + $0x29] sm:$0x1] %vm246_vm1, %v3073_v0 }
  0x22   : > { %267 = vst.msk [vmem:[#allocation2 + $0x41] sm:$0x1] %vm246_vm1, %v3073_v0 }
  0x23   : > { %268 = vst.msk [vmem:[#allocation2 + $0x59] sm:$0x1] %vm246_vm1, %v3073_v0 }
  0x24   : > { %269 = vst.msk [vmem:[#allocation2 + $0x71] sm:$0x1] %vm246_vm1, %v3073_v0 }
  0x25   : > { %270 = vst.msk [vmem:[#allocation2 + $0x89] sm:$0x1] %vm246_vm1, %v3073_v0 }
  0x26   : > { %271 = vst.msk [vmem:[#allocation2 + $0xa1] sm:$0x1] %vm246_vm1, %v3073_v0 }
  0x27   : > { %272 = vst.msk [vmem:[#allocation2 + $0xb9] sm:$0x1] %vm246_vm1, %v3073_v0 }
  0x28   : > { %273 = vst.msk [vmem:[#allocation2 + $0xd1] sm:$0x1] %vm246_vm1, %v3073_v0 }
  0x29   : > { %274 = vst.msk [vmem:[#allocation2 + $0xe9] sm:$0x1] %vm246_vm1, %v3073_v0 }
  0x2a   : > { %275 = vst.msk [vmem:[#allocation2 + $0x101] sm:$0x1] %vm246_vm1, %v3073_v0 }
  0x2b   : > { %276 = vst.msk [vmem:[#allocation2 + $0x119] sm:$0x1] %vm246_vm1, %v3073_v0 }
  0x2c   : > { %277 = vst.msk [vmem:[#allocation2 + $0x131] sm:$0x1] %vm246_vm1, %v3073_v0 }
  0x2d   : > { %278 = vst.msk [vmem:[#allocation2 + $0x149] sm:$0x1] %vm246_vm1, %v3073_v0 }
  0x2e   : > { %279 = vst.msk [vmem:[#allocation2 + $0x161] sm:$0x1] %vm246_vm1, %v3073_v0 }
  0x2f   : > { %280 = vst.msk [vmem:[#allocation2 + $0x179] sm:$0x1] %vm246_vm1, %v3073_v0 }
  0x30   : > { %281 = vst.msk [vmem:[#allocation2 + $0x191] sm:$0x1] %vm246_vm1, %v3073_v0 }
  0x31   : > { %241 = vst.msk [vmem:[#allocation2 + $0x10] sm:$0x3] %vm240_vm2, %v3073_v0 }
  0x32   : > { %245 = vst.msk [vmem:[#allocation2 + $0x1a8] sm:$0x3] %vm240_vm2, %v3073_v0 }
  0x33   : > { %264 = vst.msk [vmem:[#allocation2 + $0x198] sm:$0x1] %vm246_vm1, %v3073_v0 }
  0x34   : > { %265 = vst.msk [vmem:[#allocation2 + $0x11] sm:$0x1] %vm246_vm1, %v3073_v0 }
  0x35   : > { %282 = vst.msk [vmem:[#allocation2 + $0x1a9] sm:$0x1] %vm246_vm1, %v3073_v0 }
  0x36   : > { %388 = vst.msk [vmem:[#allocation2 + $0x19] sm:$0xff] %vm237_vm0, %v355_v16  ;;  %v339_v16 = vmul.f32 %v3200_v3, %v303_v12 }
  0x37   : > { %392 = vst.msk [vmem:[#allocation2 + $0x49] sm:$0xff] %vm237_vm0, %v359_v19 }
  0x38   : > { %v518_v34 = vld [vmem:[#allocation2 + $0x9] sm:$0xff]  ;;  %389 = vst.msk [vmem:[#allocation2 + $0x21] sm:$0xff] %vm237_vm0, %v356_v22  ;;  %v375_v19 = vadd.f32 %v3217_v8, %v339_v16 }
  0x39   : > { %v550_v37 = vpack.c.bf16 %v518_v34, %v518_v34  ;;  %395 = vst.msk [vmem:[#allocation2 + $0x69] sm:$0xff] %vm237_vm0, %v362_v25  ;;  %v308_v22 = vld [vmem:[%s3191_s24 + $0xc8] sm:$0xff]  ;;  %v334_v25 = vmul.f32 %v3200_v3, %v298_v23  ;;  %v378_v34 = vadd.f32 %v3217_v8, %v342_v31 }
  0x3a   : > { %393 = vst.msk [vmem:[#allocation2 + $0x51] sm:$0xff] %vm237_vm0, %v360_v28  ;;  %v344_v24 = vmul.f32 %v3200_v3, %v308_v22 }
  0x3b   : > { %615 = vrot.lane.b32.xlu0 %v550_v37, %s3074_s20  ;;  %398 = vst.msk [vmem:[#allocation2 + $0x91] sm:$0xff] %vm237_vm0, %v365_v30  ;;  %v370_v30 = vadd.f32 %v3217_v8, %v334_v25  ;;  %v311_v37 = vld [vmem:[%s3191_s24 + $0xe0] sm:$0xff] }
  0x3c   : > { %390 = vst.msk [vmem:[#allocation2 + $0x31] sm:$0xff] %vm237_vm0, %v357_v35  ;;  %v380_v29 = vadd.f32 %v3217_v8, %v344_v24  ;;  %v347_v39 = vmul.f32 %v3200_v3, %v311_v37 }
  0x3d   : > { %v519_v46 = vld [vmem:[#allocation2 + $0x19] sm:$0xff]  ;;  %396 = vst.msk [vmem:[#allocation2 + $0x79] sm:$0xff] %vm237_vm0, %v363_v38  ;;  %v301_v38 = vld [vmem:[%s3191_s24 + $0x90] sm:$0xff] }
  0x3e   : > { %v551_v48 = vpack.c.bf16 %v519_v46, %v519_v46  ;;  %v523_v49 = vld [vmem:[#allocation2 + $0x49] sm:$0xff]  ;;  %401 = vst.msk [vmem:[#allocation2 + $0xb1] sm:$0xff] %vm237_vm0, %v368_v41  ;;  %v337_v40 = vmul.f32 %v3200_v3, %v301_v38  ;;  %v383_v44 = vadd.f32 %v3217_v8, %v347_v39  ;;  %v345_v46 = vmul.f32 %v3200_v3, %v309_v42 }
  0x3f   : > { %v555_v51 = vpack.c.bf16 %v523_v49, %v523_v49  ;;  %391 = vst.msk [vmem:[#allocation2 + $0x39] sm:$0xff] %vm237_vm0, %v358_v43  ;;  %v520_v57 = vld [vmem:[#allocation2 + $0x21] sm:$0xff] }
  0x40   : > { %617 = vrot.lane.b32.xlu1 %v551_v48, %s3074_s20  ;;  %399 = vst.msk [vmem:[#allocation2 + $0x99] sm:$0xff] %vm237_vm0, %v366_v45  ;;  %v552_v63 = vpack.c.bf16 %v520_v57, %v520_v57  ;;  %v526_v0 = vld [vmem:[#allocation2 + $0x69] sm:$0xff]  ;;  %v373_v45 = vadd.f32 %v3217_v8, %v337_v40  ;;  %v381_v49 = vadd.f32 %v3217_v8, %v345_v46  ;;  %v744_v46 = vld [vmem:[#allocation2 + $0x1a] sm:$0xff] }
  0x41   : > { %404 = vst.msk [vmem:[#allocation2 + $0xd9] sm:$0xff] %vm237_vm0, %v371_v47  ;;  %v558_v4 = vpack.c.bf16 %v526_v0, %v526_v0  ;;  %v524_v11 = vld [vmem:[#allocation2 + $0x51] sm:$0xff]  ;;  %v307_v0 = vld [vmem:[%s3191_s24 + $0xc0] sm:$0xff] }
  0x42   : > { %394 = vst.msk [vmem:[#allocation2 + $0x61] sm:$0xff] %vm237_vm0, %v361_v50  ;;  %v556_v17 = vpack.c.bf16 %v524_v11, %v524_v11  ;;  %v529_v18 = vld [vmem:[#allocation2 + $0x91] sm:$0xff]  ;;  %v742_v42 = vld [vmem:[#allocation2 + $0x2] sm:$0xff] }
  0x43   : > { %625 = vrot.lane.b32.xlu0 %v555_v51, %s3074_s20  ;;  %v521_v62 = vld [vmem:[#allocation2 + $0x31] sm:$0xff]  ;;  %402 = vst.msk [vmem:[#allocation2 + $0xc1] sm:$0xff] %vm237_vm0, %v369_v52  ;;  %v561_v20 = vpack.c.bf16 %v529_v18, %v529_v18  ;;  %v304_v52 = vld [vmem:[%s3191_s24 + $0xa8] sm:$0xff] }
  0x44   : > { %v553_v1 = vpack.c.bf16 %v521_v62, %v521_v62  ;;  %407 = vst.msk [vmem:[#allocation2 + $0xf9] sm:$0xff] %vm237_vm0, %v374_v59  ;;  %v527_v26 = vld [vmem:[#allocation2 + $0x79] sm:$0xff]  ;;  %v340_v53 = vmul.f32 %v3200_v3, %v304_v52  ;;  %v424_v40 = vld [vmem:[#allocation2 + $0x30] sm:$0xff] }
  0x45   : > { %397 = vst.msk [vmem:[#allocation2 + $0x81] sm:$0xff] %vm237_vm0, %v364_v60  ;;  %v559_v32 = vpack.c.bf16 %v527_v26, %v527_v26  ;;  %v532_v33 = vld [vmem:[#allocation2 + $0xb1] sm:$0xff] }
  0x46   : > { %621 = vrot.lane.b32.xlu2 %v553_v1, %s3074_s20  ;;  %405 = vst.msk [vmem:[#allocation2 + $0xe1] sm:$0xff] %vm237_vm0, %v372_v2  ;;  %v522_v5 = vld [vmem:[#allocation2 + $0x39] sm:$0xff]  ;;  %v564_v35 = vpack.c.bf16 %v532_v33, %v532_v33  ;;  %v376_v57 = vadd.f32 %v3217_v8, %v340_v53  ;;  %v343_v1 = vmul.f32 %v3200_v3, %v307_v0 }
  0x47   : > { %v554_v13 = vpack.c.bf16 %v522_v5, %v522_v5  ;;  %410 = vst.msk [vmem:[#allocation2 + $0x121] sm:$0xff] %vm237_vm0, %v377_v14  ;;  %v530_v41 = vld [vmem:[#allocation2 + $0x99] sm:$0xff] }
  0x48   : > { %619 = vrot.lane.b32.xlu1 %v552_v63, %s3074_s20  ;;  %400 = vst.msk [vmem:[#allocation2 + $0xa9] sm:$0xff] %vm237_vm0, %v367_v15  ;;  %v562_v47 = vpack.c.bf16 %v530_v41, %v530_v41  ;;  %v535_v48 = vld [vmem:[#allocation2 + $0xd9] sm:$0xff]  ;;  %v379_v5 = vadd.f32 %v3217_v8, %v343_v1 }
  0x49   : > { %408 = vst.msk [vmem:[#allocation2 + $0x109] sm:$0xff] %vm237_vm0, %v375_v19  ;;  %v525_v21 = vld [vmem:[#allocation2 + $0x61] sm:$0xff]  ;;  %v567_v50 = vpack.c.bf16 %v535_v48, %v535_v48  ;;  %v310_v11 = vld [vmem:[%s3191_s24 + $0xd8] sm:$0xff]  ;;  %v776_v48 = vpack.c.bf16 %v744_v46, %v744_v46 }
  0x4a   : > { %v557_v28 = vpack.c.bf16 %v525_v21, %v525_v21  ;;  %413 = vst.msk [vmem:[#allocation2 + $0x141] sm:$0xff] %vm237_vm0, %v380_v29  ;;  %v533_v54 = vld [vmem:[#allocation2 + $0xc1] sm:$0xff]  ;;  %v346_v12 = vmul.f32 %v3200_v3, %v310_v11  ;;  %v743_v29 = vld [vmem:[#allocation2 + $0xa] sm:$0xff]  ;;  %v746_v38 = vld [vmem:[#allocation2 + $0x32] sm:$0xff] }
  0x4b   : > { %631 = vrot.lane.b32.xlu0 %v558_v4, %s3074_s20  ;;  %403 = vst.msk [vmem:[#allocation2 + $0xc9] sm:$0xff] %vm237_vm0, %v370_v30  ;;  %v565_v59 = vpack.c.bf16 %v533_v54, %v533_v54  ;;  %v538_v60 = vld [vmem:[#allocation2 + $0xf9] sm:$0xff]  ;;  %v452_v30 = vpack.c.bf16 %v420_v27, %v420_v27  ;;  %v775_v31 = vpack.c.bf16 %v743_v29, %v743_v29  ;;  %v745_v54 = vld [vmem:[#allocation2 + $0x22] sm:$0xff]  ;;  %v432_v11 = vld [vmem:[#allocation2 + $0x90] sm:$0xff] }
  0x4c   : > { %411 = vst.msk [vmem:[#allocation2 + $0x129] sm:$0xff] %vm237_vm0, %v378_v34  ;;  %v528_v36 = vld [vmem:[#allocation2 + $0x81] sm:$0xff]  ;;  %v570_v62 = vpack.c.bf16 %v538_v60, %v538_v60  ;;  %v382_v15 = vadd.f32 %v3217_v8, %v346_v12  ;;  %v778_v41 = vpack.c.bf16 %v746_v38, %v746_v38  ;;  %v425_v52 = vld [vmem:[#allocation2 + $0x38] sm:$0xff] }
  0x4d   : > { %v560_v43 = vpack.c.bf16 %v528_v36, %v528_v36  ;;  %416 = vst.msk [vmem:[#allocation2 + $0x169] sm:$0xff] %vm237_vm0, %v383_v44  ;;  %v536_v2 = vld [vmem:[#allocation2 + $0xe1] sm:$0xff]  ;;  %v422_v44 = vld [vmem:[#allocation2 + $0x18] sm:$0xff]  ;;  %v3394_v55 = vpack.c.bf16 %v425_v52, %v425_v52 }
  0x4e   : > { %623 = vrot.lane.b32.xlu2 %v554_v13, %s3074_s20  ;;  %406 = vst.msk [vmem:[#allocation2 + $0xf1] sm:$0xff] %vm237_vm0, %v373_v45  ;;  %v568_v6 = vpack.c.bf16 %v536_v2, %v536_v2  ;;  %v541_v7 = vld [vmem:[#allocation2 + $0x121] sm:$0xff]  ;;  %v3384_v45 = vpack.c.bf16 %v422_v44, %v422_v44  ;;  %v748_v2 = vld [vmem:[#allocation2 + $0x4a] sm:$0xff]  ;;  %v438_v38 = vld [vmem:[#allocation2 + $0xd8] sm:$0xff] }
  0x4f   : > { %414 = vst.msk [vmem:[#allocation2 + $0x151] sm:$0xff] %vm237_vm0, %v381_v49  ;;  %v531_v51 = vld [vmem:[#allocation2 + $0xa9] sm:$0xff]  ;;  %v573_v9 = vpack.c.bf16 %v541_v7, %v541_v7  ;;  %v749_v49 = vld [vmem:[#allocation2 + $0x52] sm:$0xff]  ;;  %v747_v58 = vld [vmem:[#allocation2 + $0x3a] sm:$0xff] }
  0x50   : > { %627 = vrot.lane.b32.xlu1 %v556_v17, %s3074_s20  ;;  %v563_v56 = vpack.c.bf16 %v531_v51, %v531_v51  ;;  %409 = vst.msk [vmem:[#allocation2 + $0x111] sm:$0xff] %vm237_vm0, %v376_v57  ;;  %v539_v13 = vld [vmem:[#allocation2 + $0x109] sm:$0xff]  ;;  %v781_v53 = vpack.c.bf16 %v749_v49, %v749_v49  ;;  %v428_v0 = vld [vmem:[#allocation2 + $0x60] sm:$0xff] }
  0x51   : > { %417 = vst.msk [vmem:[#allocation2 + $0x171] sm:$0xff] %vm237_vm0, %v384_v61  ;;  %v571_v16 = vpack.c.bf16 %v539_v13, %v539_v13  ;;  %v544_v17 = vld [vmem:[#allocation2 + $0x141] sm:$0xff]  ;;  %v779_v61 = vpack.c.bf16 %v747_v58, %v747_v58 }
  0x52   : > { %v534_v63 = vld [vmem:[#allocation2 + $0xc9] sm:$0xff]  ;;  %412 = vst.msk [vmem:[#allocation2 + $0x139] sm:$0xff] %vm237_vm0, %v379_v5  ;;  %v576_v18 = vpack.c.bf16 %v544_v17, %v544_v17  ;;  %v755_v13 = vld [vmem:[#allocation2 + $0x9a] sm:$0xff] }
  0x53   : > { %637 = vrot.lane.b32.xlu0 %v561_v20, %s3074_s20  ;;  %v566_v4 = vpack.c.bf16 %v534_v63, %v534_v63  ;;  %415 = vst.msk [vmem:[#allocation2 + $0x159] sm:$0xff] %vm237_vm0, %v382_v15  ;;  %v542_v20 = vld [vmem:[#allocation2 + $0x129] sm:$0xff]  ;;  %v431_v15 = vld [vmem:[#allocation2 + $0x80] sm:$0xff] }
  0x54   : > { %v574_v3 = vpack.c.bf16 %v542_v20, %v542_v20  ;;  %v547_v22 = vld [vmem:[#allocation2 + $0x169] sm:$0xff]  ;;  %485 = vst.msk [vmem:[#allocation3] sm:$0xf] %vm484_vm3, %v452_v30  ;;  %v754_v30 = vld [vmem:[#allocation2 + $0x92] sm:$0xff]  ;;  %v436_v49 = vld [vmem:[#allocation2 + $0xc0] sm:$0xff] }
  0x55   : > { %v537_v10 = vld [vmem:[#allocation2 + $0xf1] sm:$0xff]  ;;  %v579_v23 = vpack.c.bf16 %v547_v22, %v547_v22  ;;  %v421_v36 = vld [vmem:[#allocation2 + $0x8] sm:$0xff]  ;;  %487 = vst.msk [vmem:[#allocation3 + $0x8] sm:$0xf] %vm484_vm3, %v3384_v45  ;;  %v3465_v52 = vpack.c.bf16 %v436_v49, %v436_v49 }
  0x56   : > { %629 = vrot.lane.b32.xlu2 %v557_v28, %s3074_s20  ;;  %v569_v14 = vpack.c.bf16 %v537_v10, %v537_v10  ;;  %v545_v25 = vld [vmem:[#allocation2 + $0x151] sm:$0xff]  ;;  %v453_v39 = vpack.c.bf16 %v421_v36, %v421_v36  ;;  %490 = vst.msk [vmem:[#allocation3 + $0x14] sm:$0xf] %vm484_vm3, %v3394_v55  ;;  %v429_v60 = vld [vmem:[#allocation2 + $0x68] sm:$0xff]  ;;  %v780_v10 = vpack.c.bf16 %v748_v2, %v748_v2  ;;  %v760_v2 = vld [vmem:[#allocation2 + $0xda] sm:$0xff] }
  0x57   : > { %v540_v19 = vld [vmem:[#allocation2 + $0x111] sm:$0xff]  ;;  %v577_v28 = vpack.c.bf16 %v545_v25, %v545_v25  ;;  %v3406_v63 = vpack.c.bf16 %v429_v60, %v429_v60  ;;  %v758_v25 = vld [vmem:[#allocation2 + $0xc2] sm:$0xff]  ;;  %501 = vst.msk [vmem:[#allocation3 + $0x40] sm:$0xf] %vm484_vm3, %v3465_v52 }
  0x58   : > { %633 = vrot.lane.b32.xlu1 %v559_v32, %s3074_s20  ;;  %v572_v21 = vpack.c.bf16 %v540_v19, %v540_v19  ;;  %v548_v33 = vld [vmem:[#allocation2 + $0x171] sm:$0xff]  ;;  %486 = vst.msk [vmem:[#allocation3 + $0x4] sm:$0xf] %vm484_vm3, %v453_v39  ;;  %v790_v29 = vpack.c.bf16 %v758_v25, %v758_v25  ;;  %v437_v44 = vld [vmem:[#allocation2 + $0xc8] sm:$0xff] }
  0x59   : > { %v543_v24 = vld [vmem:[#allocation2 + $0x139] sm:$0xff]  ;;  %v580_v37 = vpack.c.bf16 %v548_v33, %v548_v33  ;;  %494 = vst.msk [vmem:[#allocation3 + $0x24] sm:$0xf] %vm484_vm3, %v3406_v63  ;;  %v427_v5 = vld [vmem:[#allocation2 + $0x50] sm:$0xff]  ;;  %v442_v25 = vld [vmem:[#allocation2 + $0x108] sm:$0xff] }
  0x5a   : > { %v575_v26 = vpack.c.bf16 %v543_v24, %v543_v24  ;;  %v546_v32 = vld [vmem:[#allocation2 + $0x159] sm:$0xff]  ;;  %v3414_v7 = vpack.c.bf16 %v427_v5, %v427_v5  ;;  %v751_v17 = vld [vmem:[#allocation2 + $0x6a] sm:$0xff] }
  0x5b   : > { %643 = vrot.lane.b32.xlu0 %v564_v35, %s3074_s20  ;;  %v578_v35 = vpack.c.bf16 %v546_v32, %v546_v32  ;;  %v430_v19 = vld [vmem:[#allocation2 + $0x78] sm:$0xff]  ;;  %v783_v22 = vpack.c.bf16 %v751_v17, %v751_v17  ;;  %v764_v60 = vld [vmem:[#allocation2 + $0x10a] sm:$0xff] }
  0x5c   : > { %492 = vst.msk [vmem:[#allocation3 + $0x1c] sm:$0xf] %vm484_vm3, %v3414_v7  ;;  %v433_v32 = vld [vmem:[#allocation2 + $0x98] sm:$0xff]  ;;  %v767_v17 = vld [vmem:[#allocation2 + $0x12a] sm:$0xff] }
  0x5d   : > { %v441_v58 = vld [vmem:[#allocation2 + $0xf8] sm:$0xff] }
  0x5e   : > { %635 = vrot.lane.b32.xlu2 %v560_v43, %s3074_s20  ;;  %v3381_v43 = vpack.c.bf16 %v424_v40, %v424_v40  ;;  %v761_v40 = vld [vmem:[#allocation2 + $0xe2] sm:$0xff] }
  0x5f   : > { %v793_v46 = vpack.c.bf16 %v761_v40, %v761_v40 }
  0x60   : > { %639 = vrot.lane.b32.xlu1 %v562_v47, %s3074_s20  ;;  %489 = vst.msk [vmem:[#allocation3 + $0x10] sm:$0xf] %vm484_vm3, %v3381_v43  ;;  %v774_v47 = vpack.c.bf16 %v742_v42, %v742_v42 }
  0x63   : > { %649 = vrot.lane.b32.xlu0 %v567_v50, %s3074_s20  ;;  %v426_v50 = vld [vmem:[#allocation2 + $0x48] sm:$0xff] }
  0x64   : > { %v3392_v51 = vpack.c.bf16 %v426_v50, %v426_v50 }
  0x66   : > { %641 = vrot.lane.b32.xlu2 %v563_v56, %s3074_s20  ;;  %v423_v56 = vld [vmem:[#allocation2 + $0x20] sm:$0xff]  ;;  %491 = vst.msk [vmem:[#allocation3 + $0x18] sm:$0xf] %vm484_vm3, %v3392_v51 }
  0x67   : > { %v3399_v57 = vpack.c.bf16 %v423_v56, %v423_v56 }
  0x68   : > { %645 = vrot.lane.b32.xlu1 %v565_v59, %s3074_s20  ;;  %v777_v59 = vpack.c.bf16 %v745_v54, %v745_v54 }
  0x69   : > { %488 = vst.msk [vmem:[#allocation3 + $0xc] sm:$0xf] %vm484_vm3, %v3399_v57 }
  0x6b   : > { %655 = vrot.lane.b32.xlu0 %v570_v62, %s3074_s20  ;;  %v752_v62 = vld [vmem:[#allocation2 + $0x7a] sm:$0xff] }
  0x6c   : > { %v784_v1 = vpack.c.bf16 %v752_v62, %v752_v62 }
  0x6e   : > { %647 = vrot.lane.b32.xlu2 %v566_v4, %s3074_s20  ;;  %v3411_v4 = vpack.c.bf16 %v428_v0, %v428_v0  ;;  %v440_v0 = vld [vmem:[#allocation2 + $0xf0] sm:$0xff] }
  0x6f   : > { %v3480_v5 = vpack.c.bf16 %v440_v0, %v440_v0  ;;  %v449_v0 = vld [vmem:[#allocation2 + $0x158] sm:$0xff] }
  0x70   : > { %651 = vrot.lane.b32.xlu1 %v568_v6, %s3074_s20  ;;  %493 = vst.msk [vmem:[#allocation3 + $0x20] sm:$0xf] %vm484_vm3, %v3411_v4 }
  0x71   : > { %505 = vst.msk [vmem:[#allocation3 + $0x50] sm:$0xf] %vm484_vm3, %v3480_v5 }
  0x73   : > { %661 = vrot.lane.b32.xlu0 %v573_v9, %s3074_s20  ;;  %v750_v9 = vld [vmem:[#allocation2 + $0x62] sm:$0xff] }
  0x74   : > { %v782_v12 = vpack.c.bf16 %v750_v9, %v750_v9 }
  0x76   : > { %653 = vrot.lane.b32.xlu2 %v569_v14, %s3074_s20  ;;  %v3422_v14 = vpack.c.bf16 %v432_v11, %v432_v11  ;;  %v762_v11 = vld [vmem:[#allocation2 + $0xf2] sm:$0xff] }
  0x78   : > { %657 = vrot.lane.b32.xlu1 %v571_v16, %s3074_s20  ;;  %497 = vst.msk [vmem:[#allocation3 + $0x30] sm:$0xf] %vm484_vm3, %v3422_v14  ;;  %v787_v16 = vpack.c.bf16 %v755_v13, %v755_v13  ;;  %v792_v13 = vpack.c.bf16 %v760_v2, %v760_v2  ;;  %v769_v2 = vld [vmem:[#allocation2 + $0x142] sm:$0xff] }
  0x7b   : > { %667 = vrot.lane.b32.xlu0 %v576_v18, %s3074_s20  ;;  %v3427_v18 = vpack.c.bf16 %v431_v15, %v431_v15  ;;  %v444_v15 = vld [vmem:[#allocation2 + $0x120] sm:$0xff] }
  0x7d   : > { %496 = vst.msk [vmem:[#allocation3 + $0x2c] sm:$0xf] %vm484_vm3, %v3427_v18 }
  0x7e   : > { %659 = vrot.lane.b32.xlu2 %v572_v21, %s3074_s20  ;;  %v3430_v21 = vpack.c.bf16 %v430_v19, %v430_v19  ;;  %v3492_v19 = vpack.c.bf16 %v444_v15, %v444_v15 }
  0x80   : > { %663 = vrot.lane.b32.xlu1 %v574_v3, %s3074_s20  ;;  %v753_v3 = vld [vmem:[#allocation2 + $0x82] sm:$0xff]  ;;  %495 = vst.msk [vmem:[#allocation3 + $0x28] sm:$0xf] %vm484_vm3, %v3430_v21 }
  0x81   : > { %v785_v24 = vpack.c.bf16 %v753_v3, %v753_v3  ;;  %v443_v3 = vld [vmem:[#allocation2 + $0x110] sm:$0xff]  ;;  %509 = vst.msk [vmem:[#allocation3 + $0x60] sm:$0xf] %vm484_vm3, %v3492_v19 }
  0x83   : > { %673 = vrot.lane.b32.xlu0 %v579_v23, %s3074_s20  ;;  %v435_v23 = vld [vmem:[#allocation2 + $0xb0] sm:$0xff] }
  0x86   : > { %665 = vrot.lane.b32.xlu2 %v575_v26, %s3074_s20  ;;  %v3438_v26 = vpack.c.bf16 %v435_v23, %v435_v23  ;;  %v763_v23 = vld [vmem:[#allocation2 + $0xfa] sm:$0xff] }
  0x88   : > { %669 = vrot.lane.b32.xlu1 %v577_v28, %s3074_s20  ;;  %v434_v28 = vld [vmem:[#allocation2 + $0xa8] sm:$0xff]  ;;  %500 = vst.msk [vmem:[#allocation3 + $0x3c] sm:$0xf] %vm484_vm3, %v3438_v26 }
  0x89   : > { %v614_v34 = vpop.permute.xlu0 %613 }
  0x8a   : > { %710 = vst.msk [vmem:[#allocation3] sm:$0xf] %vm709_vm4, %v614_v34  ;;  %v3447_v34 = vpack.c.bf16 %v433_v32, %v433_v32  ;;  %v795_v32 = vpack.c.bf16 %v763_v23, %v763_v23 }
  0x8b   : > { %840 = vrot.lane.b32.xlu0 %v775_v31, %s3075_s29  ;;  %v3444_v31 = vpack.c.bf16 %v434_v28, %v434_v28  ;;  %v3501_v28 = vpack.c.bf16 %v442_v25, %v442_v25 }
  0x8c   : > { %498 = vst.msk [vmem:[#allocation3 + $0x34] sm:$0xf] %vm484_vm3, %v3447_v34 }
  0x8d   : > { %499 = vst.msk [vmem:[#allocation3 + $0x38] sm:$0xf] %vm484_vm3, %v3444_v31 }
  0x8e   : > { %671 = vrot.lane.b32.xlu2 %v578_v35, %s3074_s20  ;;  %v756_v35 = vld [vmem:[#allocation2 + $0xaa] sm:$0xff]  ;;  %507 = vst.msk [vmem:[#allocation3 + $0x58] sm:$0xf] %vm484_vm3, %v3501_v28 }
  0x8f   : > { %v788_v39 = vpack.c.bf16 %v756_v35, %v756_v35 }
  0x90   : > { %675 = vrot.lane.b32.xlu1 %v580_v37, %s3074_s20  ;;  %v786_v37 = vpack.c.bf16 %v754_v30, %v754_v30 }
  0x93   : > { %846 = vrot.lane.b32.xlu0 %v778_v41, %s3075_s29  ;;  %v3456_v41 = vpack.c.bf16 %v438_v38, %v438_v38 }
  0x95   : > { %503 = vst.msk [vmem:[#allocation3 + $0x48] sm:$0xf] %vm484_vm3, %v3456_v41 }
  0x96   : > { %838 = vrot.lane.b32.xlu2 %v774_v47, %s3075_s29  ;;  %v757_v47 = vld [vmem:[#allocation2 + $0xb2] sm:$0xff] }
  0x97   : > { %v789_v56 = vpack.c.bf16 %v757_v47, %v757_v47 }
  0x98   : > { %842 = vrot.lane.b32.xlu1 %v776_v48, %s3075_s29  ;;  %v3462_v48 = vpack.c.bf16 %v437_v44, %v437_v44 }
  0x9a   : > { %502 = vst.msk [vmem:[#allocation3 + $0x44] sm:$0xf] %vm484_vm3, %v3462_v48 }
  0x9b   : > { %852 = vrot.lane.b32.xlu0 %v781_v53, %s3075_s29  ;;  %v759_v53 = vld [vmem:[#allocation2 + $0xca] sm:$0xff] }
  0x9e   : > { %844 = vrot.lane.b32.xlu2 %v777_v59, %s3075_s29  ;;  %v791_v59 = vpack.c.bf16 %v759_v53, %v759_v53 }
  0xa0   : > { %848 = vrot.lane.b32.xlu1 %v779_v61, %s3075_s29  ;;  %v622_v6 = vpop.permute.xlu2 %621  ;;  %v3474_v61 = vpack.c.bf16 %v441_v58, %v441_v58 }
  0xa1   : > { %714 = vst.msk [vmem:[#allocation3 + $0x10] sm:$0xf] %vm709_vm4, %v622_v6  ;;  %v439_v6 = vld [vmem:[#allocation2 + $0xe0] sm:$0xff] }
  0xa2   : > { %506 = vst.msk [vmem:[#allocation3 + $0x54] sm:$0xf] %vm484_vm3, %v3474_v61 }
  0xa3   : > { %858 = vrot.lane.b32.xlu0 %v784_v1, %s3075_s29  ;;  %v796_v1 = vpack.c.bf16 %v764_v60, %v764_v60 }
  0xa6   : > { %850 = vrot.lane.b32.xlu2 %v780_v10, %s3075_s29  ;;  %v3483_v10 = vpack.c.bf16 %v439_v6, %v439_v6  ;;  %v3534_v6 = vpack.c.bf16 %v449_v0, %v449_v0 }
  0xa8   : > { %854 = vrot.lane.b32.xlu1 %v782_v12, %s3075_s29  ;;  %v624_v20 = vpop.permute.xlu2 %623  ;;  %504 = vst.msk [vmem:[#allocation3 + $0x4c] sm:$0xf] %vm484_vm3, %v3483_v10 }
  0xa9   : > { %715 = vst.msk [vmem:[#allocation3 + $0x14] sm:$0xf] %vm709_vm4, %v624_v20 }
  0xaa   : > { %514 = vst.msk [vmem:[#allocation3 + $0x74] sm:$0xf] %vm484_vm3, %v3534_v6 }
  0xab   : > { %864 = vrot.lane.b32.xlu0 %v787_v16, %s3075_s29  ;;  %v794_v16 = vpack.c.bf16 %v762_v11, %v762_v11 }
  0xad   : > { %v616_v27 = vpop.permute.xlu0 %615 }
  0xae   : > { %711 = vst.msk [vmem:[#allocation3 + $0x4] sm:$0xf] %vm709_vm4, %v616_v27  ;;  %856 = vrot.lane.b32.xlu2 %v783_v22, %s3075_s29  ;;  %v799_v22 = vpack.c.bf16 %v767_v17, %v767_v17 }
  0xb0   : > { %860 = vrot.lane.b32.xlu1 %v785_v24, %s3075_s29  ;;  %v630_v33 = vpop.permute.xlu2 %629  ;;  %v3498_v24 = vpack.c.bf16 %v443_v3, %v443_v3  ;;  %v772_v3 = vld [vmem:[#allocation2 + $0x16a] sm:$0xff] }
  0xb1   : > { %718 = vst.msk [vmem:[#allocation3 + $0x20] sm:$0xf] %vm709_vm4, %v630_v33  ;;  %v447_v33 = vld [vmem:[#allocation2 + $0x140] sm:$0xff] }
  0xb2   : > { %v618_v36 = vpop.permute.xlu1 %617  ;;  %508 = vst.msk [vmem:[#allocation3 + $0x5c] sm:$0xf] %vm484_vm3, %v3498_v24 }
  0xb3   : > { %712 = vst.msk [vmem:[#allocation3 + $0x8] sm:$0xf] %vm709_vm4, %v618_v36  ;;  %870 = vrot.lane.b32.xlu0 %v790_v29, %s3075_s29  ;;  %v765_v29 = vld [vmem:[#allocation2 + $0x112] sm:$0xff] }
  0xb4   : > { %v797_v35 = vpack.c.bf16 %v765_v29, %v765_v29  ;;  %v770_v36 = vld [vmem:[#allocation2 + $0x152] sm:$0xff]  ;;  %v804_v29 = vpack.c.bf16 %v772_v3, %v772_v3 }
  0xb5   : > { %v626_v42 = vpop.permute.xlu0 %625  ;;  %v802_v40 = vpack.c.bf16 %v770_v36, %v770_v36 }
  0xb6   : > { %716 = vst.msk [vmem:[#allocation3 + $0x18] sm:$0xf] %vm709_vm4, %v626_v42  ;;  %862 = vrot.lane.b32.xlu2 %v786_v37, %s3075_s29  ;;  %v3510_v37 = vpack.c.bf16 %v447_v33, %v447_v33  ;;  %v766_v42 = vld [vmem:[#allocation2 + $0x122] sm:$0xff] }
  0xb8   : > { %866 = vrot.lane.b32.xlu1 %v788_v39, %s3075_s29  ;;  %v636_v50 = vpop.permute.xlu2 %635  ;;  %v446_v39 = vld [vmem:[#allocation2 + $0x138] sm:$0xff]  ;;  %512 = vst.msk [vmem:[#allocation3 + $0x6c] sm:$0xf] %vm484_vm3, %v3510_v37 }
  0xb9   : > { %721 = vst.msk [vmem:[#allocation3 + $0x2c] sm:$0xf] %vm709_vm4, %v636_v50  ;;  %v3516_v44 = vpack.c.bf16 %v446_v39, %v446_v39  ;;  %v768_v50 = vld [vmem:[#allocation2 + $0x13a] sm:$0xff] }
  0xba   : > { %v620_v54 = vpop.permute.xlu1 %619  ;;  %v800_v58 = vpack.c.bf16 %v768_v50, %v768_v50  ;;  %v3063_v39 = vld [vmem:[%s4539_s1] ss:$0 sm:$0xff] }
  0xbb   : > { %713 = vst.msk [vmem:[#allocation3 + $0xc] sm:$0xf] %vm709_vm4, %v620_v54  ;;  %876 = vrot.lane.b32.xlu0 %v793_v46, %s3075_s29  ;;  %v445_v46 = vld [vmem:[#allocation2 + $0x128] sm:$0xff]  ;;  %v798_v54 = vpack.c.bf16 %v766_v42, %v766_v42 }
  0xbc   : > { %v3519_v49 = vpack.c.bf16 %v445_v46, %v445_v46  ;;  %511 = vst.msk [vmem:[#allocation3 + $0x68] sm:$0xf] %vm484_vm3, %v3516_v44 }
  0xbd   : > { %v632_v62 = vpop.permute.xlu0 %631 }
  0xbe   : > { %719 = vst.msk [vmem:[#allocation3 + $0x24] sm:$0xf] %vm709_vm4, %v632_v62  ;;  %868 = vrot.lane.b32.xlu2 %v789_v56, %s3075_s29  ;;  %v450_v56 = vld [vmem:[#allocation2 + $0x168] sm:$0xff] }
  0xbf   : > { %510 = vst.msk [vmem:[#allocation3 + $0x64] sm:$0xf] %vm484_vm3, %v3519_v49  ;;  %v3528_v60 = vpack.c.bf16 %v450_v56, %v450_v56 }
  0xc0   : > { %872 = vrot.lane.b32.xlu1 %v791_v59, %s3075_s29  ;;  %v642_v9 = vpop.permute.xlu2 %641  ;;  %v773_v59 = vld [vmem:[#allocation2 + $0x172] sm:$0xff] }
  0xc1   : > { %724 = vst.msk [vmem:[#allocation3 + $0x38] sm:$0xf] %vm709_vm4, %v642_v9  ;;  %v448_v9 = vld [vmem:[#allocation2 + $0x150] sm:$0xff] }
  0xc2   : > { %v628_v12 = vpop.permute.xlu1 %627  ;;  %515 = vst.msk [vmem:[#allocation3 + $0x78] sm:$0xf] %vm484_vm3, %v3528_v60 }
  0xc3   : > { %717 = vst.msk [vmem:[#allocation3 + $0x1c] sm:$0xf] %vm709_vm4, %v628_v12  ;;  %882 = vrot.lane.b32.xlu0 %v796_v1, %s3075_s29  ;;  %v805_v1 = vpack.c.bf16 %v773_v59, %v773_v59  ;;  %v3537_v12 = vpack.c.bf16 %v448_v9, %v448_v9 }
  0xc5   : > { %v638_v20 = vpop.permute.xlu0 %637  ;;  %513 = vst.msk [vmem:[#allocation3 + $0x70] sm:$0xf] %vm484_vm3, %v3537_v12 }
  0xc6   : > { %722 = vst.msk [vmem:[#allocation3 + $0x30] sm:$0xf] %vm709_vm4, %v638_v20  ;;  %874 = vrot.lane.b32.xlu2 %v792_v13, %s3075_s29  ;;  %v771_v13 = vld [vmem:[#allocation2 + $0x15a] sm:$0xff] }
  0xc7   : > { %v803_v17 = vpack.c.bf16 %v771_v13, %v771_v13  ;;  %v1198_v13 = vld [vmem:[#allocation2 + $0x61] sm:$0xff] }
  0xc8   : > { %878 = vrot.lane.b32.xlu1 %v794_v16, %s3075_s29  ;;  %v648_v27 = vpop.permute.xlu2 %647  ;;  %v801_v16 = vpack.c.bf16 %v769_v2, %v769_v2 }
  0xc9   : > { %727 = vst.msk [vmem:[#allocation3 + $0x44] sm:$0xf] %vm709_vm4, %v648_v27 }
  0xca   : > { %v634_v30 = vpop.permute.xlu1 %633 }
  0xcb   : > { %720 = vst.msk [vmem:[#allocation3 + $0x28] sm:$0xf] %vm709_vm4, %v634_v30  ;;  %888 = vrot.lane.b32.xlu0 %v799_v22, %s3075_s29  ;;  %v451_v22 = vld [vmem:[#allocation2 + $0x170] sm:$0xff] }
  0xcc   : > { %v3549_v25 = vpack.c.bf16 %v451_v22, %v451_v22 }
  0xcd   : > { %v644_v38 = vpop.permute.xlu0 %643 }
  0xce   : > { %725 = vst.msk [vmem:[#allocation3 + $0x3c] sm:$0xf] %vm709_vm4, %v644_v38  ;;  %880 = vrot.lane.b32.xlu2 %v795_v32, %s3075_s29 }
  0xcf   : > { %516 = vst.msk [vmem:[#allocation3 + $0x7c] sm:$0xf] %vm484_vm3, %v3549_v25 }
  0xd0   : > { %884 = vrot.lane.b32.xlu1 %v797_v35, %s3075_s29  ;;  %v654_v47 = vpop.permute.xlu2 %653 }
  0xd1   : > { %730 = vst.msk [vmem:[#allocation3 + $0x50] sm:$0xf] %vm709_vm4, %v654_v47  ;;  %v3064_v47 = vld [vmem:[%s4540_s2] ss:$0 sm:$0xff] }
  0xd2   : > { %v640_v53 = vpop.permute.xlu1 %639 }
  0xd3   : > { %723 = vst.msk [vmem:[#allocation3 + $0x34] sm:$0xf] %vm709_vm4, %v640_v53  ;;  %894 = vrot.lane.b32.xlu0 %v802_v40, %s3075_s29  ;;  %v1192_v53 = vld [vmem:[#allocation2 + $0x19] sm:$0xff] }
  0xd5   : > { %v650_v62 = vpop.permute.xlu0 %649 }
  0xd6   : > { %728 = vst.msk [vmem:[#allocation3 + $0x48] sm:$0xf] %vm709_vm4, %v650_v62  ;;  %886 = vrot.lane.b32.xlu2 %v798_v54, %s3075_s29  ;;  %v1195_v62 = vld [vmem:[#allocation2 + $0x39] sm:$0xff] }
  0xd8   : > { %890 = vrot.lane.b32.xlu1 %v800_v58, %s3075_s29  ;;  %v660_v11 = vpop.permute.xlu2 %659 }
  0xd9   : > { %733 = vst.msk [vmem:[#allocation3 + $0x5c] sm:$0xf] %vm709_vm4, %v660_v11 }
  0xda   : > { %v646_v15 = vpop.permute.xlu1 %645 }
  0xdb   : > { %726 = vst.msk [vmem:[#allocation3 + $0x40] sm:$0xf] %vm709_vm4, %v646_v15  ;;  %900 = vrot.lane.b32.xlu0 %v805_v1, %s3075_s29 }
  0xdd   : > { %v656_v20 = vpop.permute.xlu0 %655 }
  0xde   : > { %731 = vst.msk [vmem:[#allocation3 + $0x54] sm:$0xf] %vm709_vm4, %v656_v20  ;;  %892 = vrot.lane.b32.xlu2 %v801_v16, %s3075_s29  ;;  %v1194_v16 = vld [vmem:[#allocation2 + $0x31] sm:$0xff]  ;;  %v1196_v20 = vld [vmem:[#allocation2 + $0x49] sm:$0xff] }
  0xdf   : > { %v3672_v22 = vpack.c.bf16 %v1194_v16, %v1194_v16 }
  0xe0   : > { %896 = vrot.lane.b32.xlu1 %v803_v17, %s3075_s29  ;;  %v666_v23 = vpop.permute.xlu2 %665 }
  0xe1   : > { %736 = vst.msk [vmem:[#allocation3 + $0x68] sm:$0xf] %vm709_vm4, %v666_v23  ;;  %v3677_v23 = vpack.c.bf16 %v1196_v20, %v1196_v20  ;;  %v1215_v20 = vld [vmem:[#allocation2 + $0x129] sm:$0xff] }
  0xe2   : > { %v652_v27 = vpop.permute.xlu1 %651 }
  0xe3   : > { %729 = vst.msk [vmem:[#allocation3 + $0x4c] sm:$0xf] %vm709_vm4, %v652_v27  ;;  %1067 = vrot.lane.b32.xlu0 %v3381_v43, %s3076_s30 }
  0xe5   : > { %v662_v30 = vpop.permute.xlu0 %661 }
  0xe6   : > { %734 = vst.msk [vmem:[#allocation3 + $0x60] sm:$0xf] %vm709_vm4, %v662_v30  ;;  %898 = vrot.lane.b32.xlu2 %v804_v29, %s3075_s29  ;;  %v1197_v30 = vld [vmem:[#allocation2 + $0x51] sm:$0xff]  ;;  %s4418_s29 = scalar_lea.vmem %s4543_s5, %s2924_s21 }
  0xe8   : > { %1063 = vrot.lane.b32.xlu1 %v3384_v45, %s3076_s30  ;;  %v672_v32 = vpop.permute.xlu2 %671 }
  0xe9   : > { %739 = vst.msk [vmem:[#allocation3 + $0x74] sm:$0xf] %vm709_vm4, %v672_v32 }
  0xea   : > { %v658_v33 = vpop.permute.xlu1 %657 }
  0xeb   : > { %732 = vst.msk [vmem:[#allocation3 + $0x58] sm:$0xf] %vm709_vm4, %v658_v33  ;;  %1073 = vrot.lane.b32.xlu0 %v3414_v7, %s3076_s30  ;;  %v1199_v33 = vld [vmem:[#allocation2 + $0x69] sm:$0xff] }
  0xed   : > { %v668_v35 = vpop.permute.xlu0 %667 }
  0xee   : > { %737 = vst.msk [vmem:[#allocation3 + $0x6c] sm:$0xf] %vm709_vm4, %v668_v35  ;;  %1065 = vrot.lane.b32.xlu2 %v3399_v57, %s3076_s30 }
  0xf0   : > { %1069 = vrot.lane.b32.xlu1 %v3394_v55, %s3076_s30  ;;  %v839_v43 = vpop.permute.xlu2 %838 }
  0xf1   : > { %935 = vst.msk [vmem:[#allocation3] sm:$0xf] %vm934_vm5, %v839_v43  ;;  %v3685_v43 = vpack.c.bf16 %v1197_v30, %v1197_v30 }
  0xf2   : > { %v664_v45 = vpop.permute.xlu1 %663 }
  0xf3   : > { %735 = vst.msk [vmem:[#allocation3 + $0x64] sm:$0xf] %vm709_vm4, %v664_v45  ;;  %1079 = vrot.lane.b32.xlu0 %v3430_v21, %s3076_s30  ;;  %v3689_v45 = vpack.c.bf16 %v1199_v33, %v1199_v33 }
  0xf5   : > { %v674_v7 = vpop.permute.xlu0 %673 }
  0xf6   : > { %740 = vst.msk [vmem:[#allocation3 + $0x78] sm:$0xf] %vm709_vm4, %v674_v7  ;;  %1071 = vrot.lane.b32.xlu2 %v3392_v51, %s3076_s30  ;;  %v1204_v7 = vld [vmem:[#allocation2 + $0xa9] sm:$0xff] }
  0xf8   : > { %1075 = vrot.lane.b32.xlu1 %v3411_v4, %s3076_s30  ;;  %v845_v57 = vpop.permute.xlu2 %844 }
  0xf9   : > { %938 = vst.msk [vmem:[#allocation3 + $0xc] sm:$0xf] %vm934_vm5, %v845_v57 }
  0xfa   : > { %v670_v36 = vpop.permute.xlu1 %669 }
  0xfb   : > { %738 = vst.msk [vmem:[#allocation3 + $0x70] sm:$0xf] %vm709_vm4, %v670_v36  ;;  %1085 = vrot.lane.b32.xlu0 %v3447_v34, %s3076_s30  ;;  %v3694_v36 = vpack.c.bf16 %v1204_v7, %v1204_v7  ;;  %v1218_v7 = vld [vmem:[#allocation2 + $0x151] sm:$0xff] }
  0xfd   : > { %v841_v21 = vpop.permute.xlu0 %840 }
  0xfe   : > { %936 = vst.msk [vmem:[#allocation3 + $0x4] sm:$0xf] %vm934_vm5, %v841_v21  ;;  %1077 = vrot.lane.b32.xlu2 %v3406_v63, %s3076_s30  ;;  %v1200_v21 = vld [vmem:[#allocation2 + $0x79] sm:$0xff] }
 0x100   : > { %1081 = vrot.lane.b32.xlu1 %v3427_v18, %s3076_s30  ;;  %v851_v51 = vpop.permute.xlu2 %850  ;;  %v313_v18 = vld [vmem:[%s3191_s24 + $0xf0] sm:$0xff] }
 0x101   : > { %941 = vst.msk [vmem:[#allocation3 + $0x18] sm:$0xf] %vm934_vm5, %v851_v51  ;;  %v349_v40 = vmul.f32 %v3063_v39, %v313_v18 }
 0x102   : > { %v676_v4 = vpop.permute.xlu1 %675 }
 0x103   : > { %741 = vst.msk [vmem:[#allocation3 + $0x7c] sm:$0xf] %vm709_vm4, %v676_v4  ;;  %1091 = vrot.lane.b32.xlu0 %v3465_v52, %s3076_s30  ;;  %v1202_v4 = vld [vmem:[#allocation2 + $0x91] sm:$0xff] }
 0x104   : > { %v3702_v18 = vpack.c.bf16 %v1202_v4, %v1202_v4  ;;  %v3766_v4 = vpack.c.bf16 %v1218_v7, %v1218_v7  ;;  %v1652_v7 = vld [vmem:[#allocation2 + $0x98] sm:$0xff] }
 0x105   : > { %v847_v34 = vpop.permute.xlu0 %846 }
 0x106   : > { %939 = vst.msk [vmem:[#allocation3 + $0x10] sm:$0xf] %vm934_vm5, %v847_v34  ;;  %1083 = vrot.lane.b32.xlu2 %v3422_v14, %s3076_s30  ;;  %v385_v14 = vadd.f32 %v3217_v8, %v349_v40 }
 0x108   : > { %1087 = vrot.lane.b32.xlu1 %v3444_v31, %s3076_s30  ;;  %v857_v63 = vpop.permute.xlu2 %856  ;;  %418 = vst.msk [vmem:[#allocation2 + $0x181] sm:$0xff] %vm237_vm0, %v385_v14  ;;  %v1203_v14 = vld [vmem:[#allocation2 + $0x99] sm:$0xff] }
 0x109   : > { %944 = vst.msk [vmem:[#allocation3 + $0x24] sm:$0xf] %vm934_vm5, %v857_v63  ;;  %v1232_v63 = vpack.c.bf16 %v1200_v21, %v1200_v21  ;;  %v1220_v21 = vld [vmem:[#allocation2 + $0x169] sm:$0xff] }
 0x10a   : > { %v843_v38 = vpop.permute.xlu1 %842 }
 0x10b   : > { %937 = vst.msk [vmem:[#allocation3 + $0x8] sm:$0xf] %vm934_vm5, %v843_v38  ;;  %1097 = vrot.lane.b32.xlu0 %v3483_v10, %s3076_s30  ;;  %v1207_v38 = vld [vmem:[#allocation2 + $0xc9] sm:$0xff] }
 0x10c   : > { %v1239_v40 = vpack.c.bf16 %v1207_v38, %v1207_v38 }
 0x10d   : > { %v853_v52 = vpop.permute.xlu0 %852 }
 0x10e   : > { %942 = vst.msk [vmem:[#allocation3 + $0x1c] sm:$0xf] %vm934_vm5, %v853_v52  ;;  %1089 = vrot.lane.b32.xlu2 %v3438_v26, %s3076_s30 }
 0x10f   : > { %v997_v56 = vld [vmem:[#allocation2 + $0x180] sm:$0xff] }
 0x110   : > { %1093 = vrot.lane.b32.xlu1 %v3462_v48, %s3076_s30  ;;  %v863_v31 = vpop.permute.xlu2 %862  ;;  %v1029_v59 = vpack.c.bf16 %v997_v56, %v997_v56 }
 0x111   : > { %947 = vst.msk [vmem:[#allocation3 + $0x30] sm:$0xf] %vm934_vm5, %v863_v31  ;;  %v1205_v31 = vld [vmem:[#allocation2 + $0xb1] sm:$0xff] }
 0x112   : > { %v849_v42 = vpop.permute.xlu1 %848 }
 0x113   : > { %940 = vst.msk [vmem:[#allocation3 + $0x14] sm:$0xf] %vm934_vm5, %v849_v42  ;;  %1103 = vrot.lane.b32.xlu0 %v3501_v28, %s3076_s30  ;;  %v314_v28 = vld [vmem:[%s3191_s24 + $0xf8] sm:$0xff] }
 0x115   : > { %v859_v8 = vpop.permute.xlu0 %858 }
 0x116   : > { %945 = vst.msk [vmem:[#allocation3 + $0x28] sm:$0xf] %vm934_vm5, %v859_v8  ;;  %1095 = vrot.lane.b32.xlu2 %v3456_v41, %s3076_s30  ;;  %v3709_v8 = vpack.c.bf16 %v1203_v14, %v1203_v14 }
 0x118   : > { %1099 = vrot.lane.b32.xlu1 %v3480_v5, %s3076_s30  ;;  %v869_v26 = vpop.permute.xlu2 %868  ;;  %v350_v5 = vmul.f32 %v3063_v39, %v314_v28 }
 0x119   : > { %950 = vst.msk [vmem:[#allocation3 + $0x3c] sm:$0xf] %vm934_vm5, %v869_v26  ;;  %v3713_v26 = vpack.c.bf16 %v1205_v31, %v1205_v31 }
 0x11a   : > { %v855_v48 = vpop.permute.xlu1 %854 }
 0x11b   : > { %943 = vst.msk [vmem:[#allocation3 + $0x20] sm:$0xf] %vm934_vm5, %v855_v48  ;;  %1109 = vrot.lane.b32.xlu0 %v3519_v49, %s3076_s30  ;;  %v386_v49 = vadd.f32 %v3064_v47, %v350_v5  ;;  %v1210_v48 = vld [vmem:[#allocation2 + $0xf1] sm:$0xff] }
 0x11c   : > { %v3718_v28 = vpack.c.bf16 %v1210_v48, %v1210_v48 }
 0x11d   : > { %v865_v10 = vpop.permute.xlu0 %864  ;;  %419 = vst.msk [vmem:[#allocation2 + $0x189] sm:$0xff] %vm237_vm0, %v386_v49 }
 0x11e   : > { %948 = vst.msk [vmem:[#allocation3 + $0x34] sm:$0xf] %vm934_vm5, %v865_v10  ;;  %1101 = vrot.lane.b32.xlu2 %v3474_v61, %s3076_s30 }
 0x120   : > { %1105 = vrot.lane.b32.xlu1 %v3498_v24, %s3076_s30  ;;  %v875_v41 = vpop.permute.xlu2 %874 }
 0x121   : > { %953 = vst.msk [vmem:[#allocation3 + $0x48] sm:$0xf] %vm934_vm5, %v875_v41  ;;  %v1206_v41 = vld [vmem:[#allocation2 + $0xc1] sm:$0xff] }
 0x122   : > { %v861_v46 = vpop.permute.xlu1 %860  ;;  %v3723_v49 = vpack.c.bf16 %v1206_v41, %v1206_v41  ;;  %v1417_v41 = vld [vmem:[#allocation2 + $0x1a] sm:$0xff] }
 0x123   : > { %946 = vst.msk [vmem:[#allocation3 + $0x2c] sm:$0xf] %vm934_vm5, %v861_v46  ;;  %1115 = vrot.lane.b32.xlu0 %v3537_v12, %s3076_s30  ;;  %v1208_v46 = vld [vmem:[#allocation2 + $0xd9] sm:$0xff] }
 0x124   : > { %v998_v1 = vld [vmem:[#allocation2 + $0x188] sm:$0xff] }
 0x125   : > { %v871_v61 = vpop.permute.xlu0 %870  ;;  %v1030_v11 = vpack.c.bf16 %v998_v1, %v998_v1 }
 0x126   : > { %951 = vst.msk [vmem:[#allocation3 + $0x40] sm:$0xf] %vm934_vm5, %v871_v61  ;;  %1107 = vrot.lane.b32.xlu2 %v3492_v19, %s3076_s30  ;;  %v1224_v19 = vpack.c.bf16 %v1192_v53, %v1192_v53  ;;  %v1240_v61 = vpack.c.bf16 %v1208_v46, %v1208_v46  ;;  %v1419_v46 = vld [vmem:[#allocation2 + $0x32] sm:$0xff] }
 0x128   : > { %1111 = vrot.lane.b32.xlu1 %v3516_v44, %s3076_s30  ;;  %v881_v24 = vpop.permute.xlu2 %880 }
 0x129   : > { %956 = vst.msk [vmem:[#allocation3 + $0x54] sm:$0xf] %vm934_vm5, %v881_v24  ;;  %v1213_v24 = vld [vmem:[#allocation2 + $0x111] sm:$0xff] }
 0x12a   : > { %v867_v50 = vpop.permute.xlu1 %866  ;;  %v3731_v53 = vpack.c.bf16 %v1213_v24, %v1213_v24  ;;  %v1451_v24 = vpack.c.bf16 %v1419_v46, %v1419_v46 }
 0x12b   : > { %949 = vst.msk [vmem:[#allocation3 + $0x38] sm:$0xf] %vm934_vm5, %v867_v50  ;;  %1121 = vrot.lane.b32.xlu0 %v3549_v25, %s3076_s30  ;;  %v1201_v25 = vld [vmem:[#allocation2 + $0x81] sm:$0xff] }
 0x12c   : > { %v1233_v29 = vpack.c.bf16 %v1201_v25, %v1201_v25  ;;  %v1217_v25 = vld [vmem:[#allocation2 + $0x141] sm:$0xff] }
 0x12d   : > { %v877_v54 = vpop.permute.xlu0 %876  ;;  %v1249_v30 = vpack.c.bf16 %v1217_v25, %v1217_v25 }
 0x12e   : > { %954 = vst.msk [vmem:[#allocation3 + $0x4c] sm:$0xf] %vm934_vm5, %v877_v54  ;;  %1113 = vrot.lane.b32.xlu2 %v3510_v37, %s3076_s30  ;;  %v3659_v37 = vpack.c.bf16 %v1195_v62, %v1195_v62  ;;  %v1209_v54 = vld [vmem:[#allocation2 + $0xe1] sm:$0xff]  ;;  %v1216_v62 = vld [vmem:[#allocation2 + $0x139] sm:$0xff] }
 0x12f   : > { %v1248_v1 = vpack.c.bf16 %v1216_v62, %v1216_v62 }
 0x130   : > { %1117 = vrot.lane.b32.xlu1 %v3534_v6, %s3076_s30  ;;  %v887_v44 = vpop.permute.xlu2 %886  ;;  %v1193_v6 = vld [vmem:[#allocation2 + $0x21] sm:$0xff] }
 0x131   : > { %959 = vst.msk [vmem:[#allocation3 + $0x60] sm:$0xf] %vm934_vm5, %v887_v44  ;;  %v1225_v12 = vpack.c.bf16 %v1193_v6, %v1193_v6  ;;  %v1211_v44 = vld [vmem:[#allocation2 + $0xf9] sm:$0xff] }
 0x132   : > { %v873_v58 = vpop.permute.xlu1 %872 }
 0x133   : > { %952 = vst.msk [vmem:[#allocation3 + $0x44] sm:$0xf] %vm934_vm5, %v873_v58  ;;  %1288 = vrot.lane.b32.xlu0 %v1224_v19, %s3077_s10  ;;  %v1241_v58 = vpack.c.bf16 %v1209_v54, %v1209_v54  ;;  %v1643_v54 = vld [vmem:[#allocation2 + $0x30] sm:$0xff] }
 0x135   : > { %v883_v0 = vpop.permute.xlu0 %882 }
 0x136   : > { %957 = vst.msk [vmem:[#allocation3 + $0x58] sm:$0xf] %vm934_vm5, %v883_v0  ;;  %1119 = vrot.lane.b32.xlu2 %v3528_v60, %s3076_s30  ;;  %v3668_v60 = vpack.c.bf16 %v1198_v13, %v1198_v13 }
 0x138   : > { %1123 = vrot.lane.b32.xlu1 %v1029_v59, %s3076_s30  ;;  %v893_v2 = vpop.permute.xlu2 %892  ;;  %v3738_v59 = vpack.c.bf16 %v1211_v44, %v1211_v44 }
 0x139   : > { %962 = vst.msk [vmem:[#allocation3 + $0x6c] sm:$0xf] %vm934_vm5, %v893_v2  ;;  %v1212_v2 = vld [vmem:[#allocation2 + $0x109] sm:$0xff] }
 0x13a   : > { %v879_v9 = vpop.permute.xlu1 %878 }
 0x13b   : > { %955 = vst.msk [vmem:[#allocation3 + $0x50] sm:$0xf] %vm934_vm5, %v879_v9  ;;  %1294 = vrot.lane.b32.xlu0 %v3659_v37, %s3077_s10  ;;  %v1214_v9 = vld [vmem:[#allocation2 + $0x121] sm:$0xff] }
 0x13c   : > { %v1246_v13 = vpack.c.bf16 %v1214_v9, %v1214_v9  ;;  %v1646_v9 = vld [vmem:[#allocation2 + $0x50] sm:$0xff] }
 0x13d   : > { %v889_v15 = vpop.permute.xlu0 %888 }
 0x13e   : > { %960 = vst.msk [vmem:[#allocation3 + $0x64] sm:$0xf] %vm934_vm5, %v889_v15  ;;  %1125 = vrot.lane.b32.xlu2 %v1030_v11, %s3076_s30  ;;  %v1219_v15 = vld [vmem:[#allocation2 + $0x159] sm:$0xff] }
 0x140   : > { %1290 = vrot.lane.b32.xlu1 %v1225_v12, %s3077_s10  ;;  %v899_v17 = vpop.permute.xlu2 %898  ;;  %v3745_v12 = vpack.c.bf16 %v1212_v2, %v1212_v2 }
 0x141   : > { %965 = vst.msk [vmem:[#allocation3 + $0x78] sm:$0xf] %vm934_vm5, %v899_v17  ;;  %v3752_v17 = vpack.c.bf16 %v1219_v15, %v1219_v15  ;;  %v1426_v15 = vld [vmem:[#allocation2 + $0x82] sm:$0xff] }
 0x142   : > { %v885_v3 = vpop.permute.xlu1 %884 }
 0x143   : > { %958 = vst.msk [vmem:[#allocation3 + $0x5c] sm:$0xf] %vm934_vm5, %v885_v3  ;;  %1300 = vrot.lane.b32.xlu0 %v3668_v60, %s3077_s10 }
 0x145   : > { %v895_v27 = vpop.permute.xlu0 %894 }
 0x146   : > { %963 = vst.msk [vmem:[#allocation3 + $0x70] sm:$0xf] %vm934_vm5, %v895_v27  ;;  %1292 = vrot.lane.b32.xlu2 %v3672_v22, %s3077_s10 }
 0x148   : > { %1296 = vrot.lane.b32.xlu1 %v3677_v23, %s3077_s10  ;;  %v1066_v32 = vpop.permute.xlu2 %1065 }
 0x149   : > { %1161 = vst.msk [vmem:[#allocation3 + $0x4] sm:$0xf] %vm1159_vm6, %v1066_v32  ;;  %v1222_v32 = vld [vmem:[#allocation2 + $0x181] sm:$0xff] }
 0x14a   : > { %v891_v35 = vpop.permute.xlu1 %890 }
 0x14b   : > { %961 = vst.msk [vmem:[#allocation3 + $0x68] sm:$0xf] %vm934_vm5, %v891_v35  ;;  %1306 = vrot.lane.b32.xlu0 %v1233_v29, %s3077_s10  ;;  %v3756_v29 = vpack.c.bf16 %v1215_v20, %v1215_v20  ;;  %v1254_v35 = vpack.c.bf16 %v1222_v32, %v1222_v32  ;;  %v3810_v20 = vpack.c.bf16 %v1426_v15, %v1426_v15 }
 0x14d   : > { %v901_v57 = vpop.permute.xlu0 %900 }
 0x14e   : > { %966 = vst.msk [vmem:[#allocation3 + $0x7c] sm:$0xf] %vm934_vm5, %v901_v57  ;;  %1298 = vrot.lane.b32.xlu2 %v3685_v43, %s3077_s10 }
 0x150   : > { %1302 = vrot.lane.b32.xlu1 %v3689_v45, %s3077_s10  ;;  %v1072_v51 = vpop.permute.xlu2 %1071 }
 0x151   : > { %1164 = vst.msk [vmem:[#allocation3 + $0x10] sm:$0xf] %vm1159_vm6, %v1072_v51 }
 0x152   : > { %v897_v34 = vpop.permute.xlu1 %896 }
 0x153   : > { %964 = vst.msk [vmem:[#allocation3 + $0x74] sm:$0xf] %vm934_vm5, %v897_v34  ;;  %1312 = vrot.lane.b32.xlu0 %v3694_v36, %s3077_s10  ;;  %v1252_v34 = vpack.c.bf16 %v1220_v21, %v1220_v21 }
 0x155   : > { %v1068_v39 = vpop.permute.xlu0 %1067 }
 0x156   : > { %1162 = vst.msk [vmem:[#allocation3 + $0x8] sm:$0xf] %vm1159_vm6, %v1068_v39  ;;  %1304 = vrot.lane.b32.xlu2 %v1232_v63, %s3077_s10  ;;  %v1418_v63 = vld [vmem:[#allocation2 + $0x22] sm:$0xff] }
 0x157   : > { %v1450_v39 = vpack.c.bf16 %v1418_v63, %v1418_v63 }
 0x158   : > { %1308 = vrot.lane.b32.xlu1 %v3702_v18, %s3077_s10  ;;  %v1078_v52 = vpop.permute.xlu2 %1077 }
 0x159   : > { %1167 = vst.msk [vmem:[#allocation3 + $0x1c] sm:$0xf] %vm1159_vm6, %v1078_v52  ;;  %v1223_v52 = vld [vmem:[#allocation2 + $0x189] sm:$0xff] }
 0x15a   : > { %v1064_v42 = vpop.permute.xlu1 %1063  ;;  %v1255_v48 = vpack.c.bf16 %v1223_v52, %v1223_v52 }
 0x15b   : > { %1160 = vst.msk [vmem:[#allocation3] sm:$0xf] %vm1159_vm6, %v1064_v42  ;;  %1318 = vrot.lane.b32.xlu0 %v1239_v40, %s3077_s10  ;;  %v1221_v40 = vld [vmem:[#allocation2 + $0x171] sm:$0xff] }
 0x15c   : > { %v3775_v42 = vpack.c.bf16 %v1221_v40, %v1221_v40 }
 0x15d   : > { %v1074_v10 = vpop.permute.xlu0 %1073 }
 0x15e   : > { %1165 = vst.msk [vmem:[#allocation3 + $0x14] sm:$0xf] %vm1159_vm6, %v1074_v10  ;;  %1310 = vrot.lane.b32.xlu2 %v3709_v8, %s3077_s10 }
 0x160   : > { %1314 = vrot.lane.b32.xlu1 %v3713_v26, %s3077_s10  ;;  %v1084_v5 = vpop.permute.xlu2 %1083 }
 0x161   : > { %1170 = vst.msk [vmem:[#allocation3 + $0x28] sm:$0xf] %vm1159_vm6, %v1084_v5 }
 0x162   : > { %v1070_v47 = vpop.permute.xlu1 %1069 }
 0x163   : > { %1163 = vst.msk [vmem:[#allocation3 + $0xc] sm:$0xf] %vm1159_vm6, %v1070_v47  ;;  %1324 = vrot.lane.b32.xlu0 %v3718_v28, %s3077_s10 }
 0x165   : > { %v1080_v50 = vpop.permute.xlu0 %1079 }
 0x166   : > { %1168 = vst.msk [vmem:[#allocation3 + $0x20] sm:$0xf] %vm1159_vm6, %v1080_v50  ;;  %1316 = vrot.lane.b32.xlu2 %v3723_v49, %s3077_s10 }
 0x168   : > { %1320 = vrot.lane.b32.xlu1 %v1240_v61, %s3077_s10  ;;  %v1090_v19 = vpop.permute.xlu2 %1089  ;;  %v1449_v61 = vpack.c.bf16 %v1417_v41, %v1417_v41 }
 0x169   : > { %1173 = vst.msk [vmem:[#allocation3 + $0x34] sm:$0xf] %vm1159_vm6, %v1090_v19 }
 0x16a   : > { %v1076_v56 = vpop.permute.xlu1 %1075 }
 0x16b   : > { %1166 = vst.msk [vmem:[#allocation3 + $0x18] sm:$0xf] %vm1159_vm6, %v1076_v56  ;;  %1330 = vrot.lane.b32.xlu0 %v3731_v53, %s3077_s10  ;;  %v1675_v56 = vpack.c.bf16 %v1643_v54, %v1643_v54 }
 0x16d   : > { %v1086_v0 = vpop.permute.xlu0 %1085 }
 0x16e   : > { %1171 = vst.msk [vmem:[#allocation3 + $0x2c] sm:$0xf] %vm1159_vm6, %v1086_v0  ;;  %1322 = vrot.lane.b32.xlu2 %v1241_v58, %s3077_s10 }
 0x170   : > { %1326 = vrot.lane.b32.xlu1 %v3738_v59, %s3077_s10  ;;  %v1096_v6 = vpop.permute.xlu2 %1095 }
 0x171   : > { %1176 = vst.msk [vmem:[#allocation3 + $0x40] sm:$0xf] %vm1159_vm6, %v1096_v6 }
 0x172   : > { %v1082_v11 = vpop.permute.xlu1 %1081 }
 0x173   : > { %1169 = vst.msk [vmem:[#allocation3 + $0x24] sm:$0xf] %vm1159_vm6, %v1082_v11  ;;  %1336 = vrot.lane.b32.xlu0 %v1248_v1, %s3077_s10  ;;  %v2094_v1 = vld [vmem:[#allocation2 + $0x3a] sm:$0xff] }
 0x174   : > { %v2126_v6 = vpack.c.bf16 %v2094_v1, %v2094_v1 }
 0x175   : > { %v1092_v16 = vpop.permute.xlu0 %1091 }
 0x176   : > { %1174 = vst.msk [vmem:[#allocation3 + $0x38] sm:$0xf] %vm1159_vm6, %v1092_v16  ;;  %1328 = vrot.lane.b32.xlu2 %v3745_v12, %s3077_s10 }
 0x178   : > { %1332 = vrot.lane.b32.xlu1 %v1246_v13, %s3077_s10  ;;  %v1102_v3 = vpop.permute.xlu2 %1101 }
 0x179   : > { %1179 = vst.msk [vmem:[#allocation3 + $0x4c] sm:$0xf] %vm1159_vm6, %v1102_v3 }
 0x17a   : > { %v1088_v27 = vpop.permute.xlu1 %1087 }
 0x17b   : > { %1172 = vst.msk [vmem:[#allocation3 + $0x30] sm:$0xf] %vm1159_vm6, %v1088_v27  ;;  %1342 = vrot.lane.b32.xlu0 %v3752_v17, %s3077_s10  ;;  %v1651_v27 = vld [vmem:[#allocation2 + $0x90] sm:$0xff] }
 0x17d   : > { %v1098_v33 = vpop.permute.xlu0 %1097 }
 0x17e   : > { %1177 = vst.msk [vmem:[#allocation3 + $0x44] sm:$0xf] %vm1159_vm6, %v1098_v33  ;;  %1334 = vrot.lane.b32.xlu2 %v3756_v29, %s3077_s10  ;;  %v1683_v33 = vpack.c.bf16 %v1651_v27, %v1651_v27 }
 0x180   : > { %1338 = vrot.lane.b32.xlu1 %v1249_v30, %s3077_s10  ;;  %v1108_v57 = vpop.permute.xlu2 %1107 }
 0x181   : > { %1182 = vst.msk [vmem:[#allocation3 + $0x58] sm:$0xf] %vm1159_vm6, %v1108_v57 }
 0x182   : > { %v1094_v51 = vpop.permute.xlu1 %1093 }
 0x183   : > { %1175 = vst.msk [vmem:[#allocation3 + $0x3c] sm:$0xf] %vm1159_vm6, %v1094_v51  ;;  %1348 = vrot.lane.b32.xlu0 %v1254_v35, %s3077_s10  ;;  %v1684_v51 = vpack.c.bf16 %v1652_v7, %v1652_v7 }
 0x185   : > { %v1104_v38 = vpop.permute.xlu0 %1103 }
 0x186   : > { %1180 = vst.msk [vmem:[#allocation3 + $0x50] sm:$0xf] %vm1159_vm6, %v1104_v38  ;;  %1340 = vrot.lane.b32.xlu2 %v3766_v4, %s3077_s10 }
 0x188   : > { %1344 = vrot.lane.b32.xlu1 %v1252_v34, %s3077_s10  ;;  %v1114_v14 = vpop.permute.xlu2 %1113 }
 0x189   : > { %1185 = vst.msk [vmem:[#allocation3 + $0x64] sm:$0xf] %vm1159_vm6, %v1114_v14  ;;  %v1434_v14 = vld [vmem:[#allocation2 + $0xe2] sm:$0xff] }
 0x18a   : > { %v1100_v31 = vpop.permute.xlu1 %1099 }
 0x18b   : > { %1178 = vst.msk [vmem:[#allocation3 + $0x48] sm:$0xf] %vm1159_vm6, %v1100_v31  ;;  %1515 = vrot.lane.b32.xlu0 %v1450_v39, %s3078_s11  ;;  %v2095_v39 = vld [vmem:[#allocation2 + $0x4a] sm:$0xff]  ;;  %v3837_v31 = vpack.c.bf16 %v1434_v14, %v1434_v14 }
 0x18d   : > { %v1110_v10 = vpop.permute.xlu0 %1109 }
 0x18e   : > { %1183 = vst.msk [vmem:[#allocation3 + $0x5c] sm:$0xf] %vm1159_vm6, %v1110_v10  ;;  %1346 = vrot.lane.b32.xlu2 %v3775_v42, %s3077_s10  ;;  %v2102_v10 = vld [vmem:[#allocation2 + $0x9a] sm:$0xff] }
 0x18f   : > { %v2134_v46 = vpack.c.bf16 %v2102_v10, %v2102_v10 }
 0x190   : > { %1350 = vrot.lane.b32.xlu1 %v1255_v48, %s3077_s10  ;;  %v1120_v5 = vpop.permute.xlu2 %1119 }
 0x191   : > { %1188 = vst.msk [vmem:[#allocation3 + $0x70] sm:$0xf] %vm1159_vm6, %v1120_v5 }
 0x192   : > { %v1106_v47 = vpop.permute.xlu1 %1105 }
 0x193   : > { %1181 = vst.msk [vmem:[#allocation3 + $0x54] sm:$0xf] %vm1159_vm6, %v1106_v47  ;;  %1741 = vrot.lane.b32.xlu0 %v3394_v55, %s3079_s12  ;;  %v1425_v55 = vld [vmem:[#allocation2 + $0x7a] sm:$0xff] }
 0x194   : > { %v3795_v62 = vpack.c.bf16 %v1425_v55, %v1425_v55 }
 0x195   : > { %v1116_v50 = vpop.permute.xlu0 %1115 }
 0x196   : > { %1186 = vst.msk [vmem:[#allocation3 + $0x68] sm:$0xf] %vm1159_vm6, %v1116_v50  ;;  %1513 = vrot.lane.b32.xlu2 %v1449_v61, %s3078_s11 }
 0x198   : > { %1517 = vrot.lane.b32.xlu1 %v1451_v24, %s3078_s11  ;;  %v1126_v19 = vpop.permute.xlu2 %1125 }
 0x199   : > { %1191 = vst.msk [vmem:[#allocation3 + $0x7c] sm:$0xf] %vm1159_vm6, %v1126_v19 }
 0x19a   : > { %v1112_v44 = vpop.permute.xlu1 %1111 }
 0x19b   : > { %1184 = vst.msk [vmem:[#allocation3 + $0x60] sm:$0xf] %vm1159_vm6, %v1112_v44  ;;  %2189 = vrot.lane.b32.xlu0 %v1451_v24, %s3080_s13  ;;  %v1659_v24 = vld [vmem:[#allocation2 + $0xf0] sm:$0xff]  ;;  %v2110_v44 = vld [vmem:[#allocation2 + $0xfa] sm:$0xff] }
 0x19c   : > { %v1691_v19 = vpack.c.bf16 %v1659_v24, %v1659_v24  ;;  %v3856_v55 = vpack.c.bf16 %v2110_v44, %v2110_v44  ;;  %v1441_v44 = vld [vmem:[#allocation2 + $0x13a] sm:$0xff] }
 0x19d   : > { %v1122_v58 = vpop.permute.xlu0 %1121 }
 0x19e   : > { %1189 = vst.msk [vmem:[#allocation3 + $0x74] sm:$0xf] %vm1159_vm6, %v1122_v58  ;;  %1739 = vrot.lane.b32.xlu2 %v1675_v56, %s3079_s12  ;;  %v1660_v58 = vld [vmem:[#allocation2 + $0xf8] sm:$0xff] }
 0x1a0   : > { %1964 = vrot.lane.b32.xlu1 %v3672_v22, %s3081_s14  ;;  %v1293_v0 = vpop.permute.xlu2 %1292  ;;  %v1678_v22 = vpack.c.bf16 %v1646_v9, %v1646_v9 }
 0x1a1   : > { %1387 = vst.msk [vmem:[#allocation3 + $0x8] sm:$0xf] %vm1384_vm7, %v1293_v0 }
 0x1a2   : > { %v1118_v2 = vpop.permute.xlu1 %1117 }
 0x1a3   : > { %1187 = vst.msk [vmem:[#allocation3 + $0x6c] sm:$0xf] %vm1159_vm6, %v1118_v2  ;;  %1529 = vrot.lane.b32.xlu0 %v3795_v62, %s3078_s11  ;;  %v1692_v2 = vpack.c.bf16 %v1660_v58, %v1660_v58  ;;  %v1668_v58 = vld [vmem:[#allocation2 + $0x158] sm:$0xff] }
 0x1a5   : > { %v1289_v11 = vpop.permute.xlu0 %1288 }
 0x1a6   : > { %1385 = vst.msk [vmem:[#allocation3] sm:$0xf] %vm1384_vm7, %v1289_v11  ;;  %1966 = vrot.lane.b32.xlu2 %v3659_v37, %s3081_s14  ;;  %v1645_v37 = vld [vmem:[#allocation2 + $0x48] sm:$0xff] }
 0x1a7   : > { %v1677_v32 = vpack.c.bf16 %v1645_v37, %v1645_v37 }
 0x1a8   : > { %2191 = vrot.lane.b32.xlu1 %v2126_v6, %s3080_s13  ;;  %v1299_v13 = vpop.permute.xlu2 %1298 }
 0x1a9   : > { %1390 = vst.msk [vmem:[#allocation3 + $0x14] sm:$0xf] %vm1384_vm7, %v1299_v13  ;;  %v1648_v13 = vld [vmem:[#allocation2 + $0x68] sm:$0xff] }
 0x1aa   : > { %v1124_v16 = vpop.permute.xlu1 %1123 }
 0x1ab   : > { %1190 = vst.msk [vmem:[#allocation3 + $0x78] sm:$0xf] %vm1159_vm6, %v1124_v16  ;;  %1745 = vrot.lane.b32.xlu0 %v1678_v22, %s3079_s12  ;;  %v1680_v16 = vpack.c.bf16 %v1648_v13, %v1648_v13 }
 0x1ad   : > { %v1295_v3 = vpop.permute.xlu0 %1294 }
 0x1ae   : > { %1388 = vst.msk [vmem:[#allocation3 + $0xc] sm:$0xf] %vm1384_vm7, %v1295_v3  ;;  %1519 = vrot.lane.b32.xlu2 %v2126_v6, %s3078_s11  ;;  %v2109_v6 = vld [vmem:[#allocation2 + $0xf2] sm:$0xff] }
 0x1af   : > { %v3868_v22 = vpack.c.bf16 %v2109_v6, %v2109_v6  ;;  %v1662_v6 = vld [vmem:[#allocation2 + $0x110] sm:$0xff] }
 0x1b0   : > { %1531 = vrot.lane.b32.xlu1 %v3810_v20, %s3078_s11  ;;  %v1305_v25 = vpop.permute.xlu2 %1304  ;;  %v1694_v13 = vpack.c.bf16 %v1662_v6, %v1662_v6 }
 0x1b1   : > { %1393 = vst.msk [vmem:[#allocation3 + $0x20] sm:$0xf] %vm1384_vm7, %v1305_v25  ;;  %v1647_v25 = vld [vmem:[#allocation2 + $0x60] sm:$0xff] }
 0x1b2   : > { %v1291_v30 = vpop.permute.xlu1 %1290 }
 0x1b3   : > { %1386 = vst.msk [vmem:[#allocation3 + $0x4] sm:$0xf] %vm1384_vm7, %v1291_v30  ;;  %1968 = vrot.lane.b32.xlu0 %v3677_v23, %s3081_s14  ;;  %v2101_v23 = vld [vmem:[#allocation2 + $0x92] sm:$0xff]  ;;  %v1653_v30 = vld [vmem:[#allocation2 + $0xa8] sm:$0xff] }
 0x1b4   : > { %v2133_v63 = vpack.c.bf16 %v2101_v23, %v2101_v23  ;;  %v1685_v7 = vpack.c.bf16 %v1653_v30, %v1653_v30  ;;  %v1654_v23 = vld [vmem:[#allocation2 + $0xb0] sm:$0xff] }
 0x1b5   : > { %v1301_v35 = vpop.permute.xlu0 %1300 }
 0x1b6   : > { %1391 = vst.msk [vmem:[#allocation3 + $0x18] sm:$0xf] %vm1384_vm7, %v1301_v35  ;;  %1743 = vrot.lane.b32.xlu2 %v1677_v32, %s3079_s12  ;;  %v2354_v35 = vld [vmem:[%s4541_s3 + $0x10] sm:$0x3] }
 0x1b8   : > { %1755 = vrot.lane.b32.xlu1 %v1683_v33, %s3079_s12  ;;  %v1311_v57 = vpop.permute.xlu2 %1310  ;;  %v1679_v33 = vpack.c.bf16 %v1647_v25, %v1647_v25  ;;  %v2112_v25 = vld [vmem:[#allocation2 + $0x112] sm:$0xff] }
 0x1b9   : > { %1396 = vst.msk [vmem:[#allocation3 + $0x2c] sm:$0xf] %vm1384_vm7, %v1311_v57  ;;  %v2444_v57 = vunpack.c.l.b16 %v2354_v35  ;;  %v3957_v30 = vpack.c.bf16 %v2112_v25, %v2112_v25  ;;  %v2111_v35 = vld [vmem:[#allocation2 + $0x10a] sm:$0xff]  ;;  %v1888_v25 = vld [vmem:[#allocation2 + $0x121] sm:$0xff] }
 0x1ba   : > { %v1297_v21 = vpop.permute.xlu1 %1296 }
 0x1bb   : > { %1389 = vst.msk [vmem:[#allocation3 + $0x10] sm:$0xf] %vm1384_vm7, %v1297_v21  ;;  %1982 = vrot.lane.b32.xlu0 %v3709_v8, %s3081_s14  ;;  %v2127_v8 = vpack.c.bf16 %v2095_v39, %v2095_v39  ;;  %v3034_v39 = vld [vmem:[%s4541_s3 + $0x8] sm:$0xff] }
 0x1bd   : > { %v1307_v34 = vpop.permute.xlu0 %1306 }
 0x1be   : > { %1394 = vst.msk [vmem:[#allocation3 + $0x24] sm:$0xf] %vm1384_vm7, %v1307_v34  ;;  %1757 = vrot.lane.b32.xlu2 %v1684_v51, %s3079_s12  ;;  %v2447_v51 = vpack.c.b16 %v2444_v57, %v2444_v57 }
 0x1c0   : > { %1970 = vrot.lane.b32.xlu1 %v3685_v43, %s3081_s14  ;;  %v1317_v38 = vpop.permute.xlu2 %1316  ;;  %v2096_v43 = vld [vmem:[#allocation2 + $0x52] sm:$0xff] }
 0x1c1   : > { %1399 = vst.msk [vmem:[#allocation3 + $0x38] sm:$0xf] %vm1384_vm7, %v1317_v38  ;;  %v2128_v5 = vpack.c.bf16 %v2096_v43, %v2096_v43  ;;  %v1686_v38 = vpack.c.bf16 %v1654_v23, %v1654_v23  ;;  %v2097_v43 = vld [vmem:[#allocation2 + $0x62] sm:$0xff] }
 0x1c2   : > { %v1303_v40 = vpop.permute.xlu1 %1302  ;;  %v3911_v10 = vpack.c.bf16 %v2097_v43, %v2097_v43 }
 0x1c3   : > { %1392 = vst.msk [vmem:[#allocation3 + $0x1c] sm:$0xf] %vm1384_vm7, %v1303_v40  ;;  %2205 = vrot.lane.b32.xlu0 %v2133_v63, %s3080_s13  ;;  %v2103_v40 = vld [vmem:[#allocation2 + $0xaa] sm:$0xff] }
 0x1c4   : > { %v3901_v14 = vpack.c.bf16 %v2103_v40, %v2103_v40 }
 0x1c5   : > { %v1313_v52 = vpop.permute.xlu0 %1312 }
 0x1c6   : > { %1397 = vst.msk [vmem:[#allocation3 + $0x30] sm:$0xf] %vm1384_vm7, %v1313_v52  ;;  %1980 = vrot.lane.b32.xlu2 %v3702_v18, %s3081_s14  ;;  %v1433_v18 = vld [vmem:[#allocation2 + $0xda] sm:$0xff] }
 0x1c7   : > { %v3848_v54 = vpack.c.bf16 %v1433_v18, %v1433_v18  ;;  %v3033_v52 = vld [vmem:[%s4541_s3] sm:$0xff] }
 0x1c8   : > { %2193 = vrot.lane.b32.xlu1 %v2127_v8, %s3080_s13  ;;  %v1323_v48 = vpop.permute.xlu2 %1322 }
 0x1c9   : > { %1402 = vst.msk [vmem:[#allocation3 + $0x44] sm:$0xf] %vm1384_vm7, %v1323_v48 }
 0x1ca   : > { %v1309_v41 = vpop.permute.xlu1 %1308 }
 0x1cb   : > { %1395 = vst.msk [vmem:[#allocation3 + $0x28] sm:$0xf] %vm1384_vm7, %v1309_v41  ;;  %1547 = vrot.lane.b32.xlu0 %v3837_v31, %s3078_s11 }
 0x1cd   : > { %v1319_v47 = vpop.permute.xlu0 %1318 }
 0x1ce   : > { %1400 = vst.msk [vmem:[#allocation3 + $0x3c] sm:$0xf] %vm1384_vm7, %v1319_v47  ;;  %2195 = vrot.lane.b32.xlu2 %v2128_v5, %s3080_s13 }
 0x1d0   : > { %2207 = vrot.lane.b32.xlu1 %v2134_v46, %s3080_s13  ;;  %v1329_v61 = vpop.permute.xlu2 %1328 }
 0x1d1   : > { %1405 = vst.msk [vmem:[#allocation3 + $0x50] sm:$0xf] %vm1384_vm7, %v1329_v61 }
 0x1d2   : > { %v1315_v50 = vpop.permute.xlu1 %1314 }
 0x1d3   : > { %1398 = vst.msk [vmem:[#allocation3 + $0x34] sm:$0xf] %vm1384_vm7, %v1315_v50  ;;  %1996 = vrot.lane.b32.xlu0 %v3718_v28, %s3081_s14 }
 0x1d5   : > { %v1325_v56 = vpop.permute.xlu0 %1324 }
 0x1d6   : > { %1403 = vst.msk [vmem:[#allocation3 + $0x48] sm:$0xf] %vm1384_vm7, %v1325_v56  ;;  %1545 = vrot.lane.b32.xlu2 %v3848_v54, %s3078_s11 }
 0x1d8   : > { %1771 = vrot.lane.b32.xlu1 %v1691_v19, %s3079_s12  ;;  %v1335_v0 = vpop.permute.xlu2 %1334 }
 0x1d9   : > { %1408 = vst.msk [vmem:[#allocation3 + $0x5c] sm:$0xf] %vm1384_vm7, %v1335_v0 }
 0x1da   : > { %v1321_v1 = vpop.permute.xlu1 %1320 }
 0x1db   : > { %1401 = vst.msk [vmem:[#allocation3 + $0x40] sm:$0xf] %vm1384_vm7, %v1321_v1  ;;  %2223 = vrot.lane.b32.xlu0 %v3856_v55, %s3080_s13  ;;  %v1700_v1 = vpack.c.bf16 %v1668_v58, %v1668_v58 }
 0x1dd   : > { %v1331_v28 = vpop.permute.xlu0 %1330 }
 0x1de   : > { %1406 = vst.msk [vmem:[#allocation3 + $0x54] sm:$0xf] %vm1384_vm7, %v1331_v28  ;;  %1773 = vrot.lane.b32.xlu2 %v1692_v2, %s3079_s12  ;;  %v1442_v2 = vld [vmem:[#allocation2 + $0x142] sm:$0xff] }
 0x1e0   : > { %1998 = vrot.lane.b32.xlu1 %v3738_v59, %s3081_s14  ;;  %v1341_v9 = vpop.permute.xlu2 %1340 }
 0x1e1   : > { %1411 = vst.msk [vmem:[#allocation3 + $0x68] sm:$0xf] %vm1384_vm7, %v1341_v9 }
 0x1e2   : > { %v1327_v11 = vpop.permute.xlu1 %1326 }
 0x1e3   : > { %1404 = vst.msk [vmem:[#allocation3 + $0x4c] sm:$0xf] %vm1384_vm7, %v1327_v11  ;;  %1533 = vrot.lane.b32.xlu0 %v2133_v63, %s3078_s11  ;;  %v2501_v63 = vsel %vm2499_vm10, %v2447_v51, 0  ;;  %v3942_v11 = vpack.c.bf16 %v1442_v2, %v1442_v2 }
 0x1e4   : > { %2508 = vmatpush.bf16.msra.mxu0 %v2501_v63  ;;  %3035 = vmatpush.bf16.msra.mxu1 %v2501_v63 }
 0x1e5   : > { %v1337_v15 = vpop.permute.xlu0 %1336  ;;  %3036 = vmatpush.bf16.msra.mxu2 %v2501_v63  ;;  %3037 = vmatpush.bf16.msra.mxu3 %v2501_v63 }
 0x1e6   : > { %1409 = vst.msk [vmem:[#allocation3 + $0x60] sm:$0xf] %vm1384_vm7, %v1337_v15  ;;  %2221 = vrot.lane.b32.xlu2 %v3868_v22, %s3080_s13 }
 0x1e8   : > { %1521 = vrot.lane.b32.xlu1 %v2127_v8, %s3078_s11  ;;  %v1347_v59 = vpop.permute.xlu2 %1346  ;;  %2509 = vmatpush.bf16.msra.mxu0 %v3034_v39 }
 0x1e9   : > { %1414 = vst.msk [vmem:[#allocation3 + $0x74] sm:$0xf] %vm1384_vm7, %v1347_v59  ;;  %3038 = vmatpush.bf16.msra.mxu1 %v3034_v39  ;;  %3039 = vmatpush.bf16.msra.mxu2 %v3034_v39 }
 0x1ea   : > { %v1333_v3 = vpop.permute.xlu1 %1332  ;;  %3040 = vmatpush.bf16.msra.mxu3 %v3034_v39 }
 0x1eb   : > { %1407 = vst.msk [vmem:[#allocation3 + $0x58] sm:$0xf] %vm1384_vm7, %v1333_v3  ;;  %1749 = vrot.lane.b32.xlu0 %v1680_v16, %s3079_s12 }
 0x1ec   : > { %2510 = vmatpush.bf16.msra.mxu0 %v3033_v52 }
 0x1ed   : > { %v1343_v37 = vpop.permute.xlu0 %1342  ;;  %3041 = vmatpush.bf16.msra.mxu1 %v3033_v52  ;;  %3042 = vmatpush.bf16.msra.mxu2 %v3033_v52 }
 0x1ee   : > { %1412 = vst.msk [vmem:[#allocation3 + $0x6c] sm:$0xf] %vm1384_vm7, %v1343_v37  ;;  %1523 = vrot.lane.b32.xlu2 %v2128_v5, %s3078_s11  ;;  %3043 = vmatpush.bf16.msra.mxu3 %v3033_v52 }
 0x1f0   : > { %1535 = vrot.lane.b32.xlu1 %v2134_v46, %s3078_s11  ;;  %v1514_v27 = vpop.permute.xlu2 %1513  ;;  %v2104_v46 = vld [vmem:[#allocation2 + $0xb2] sm:$0xff] }
 0x1f1   : > { %1610 = vst.msk [vmem:[#allocation3] sm:$0xf] %vm1609_vm8, %v1514_v27  ;;  %v3925_v61 = vpack.c.bf16 %v2104_v46, %v2104_v46  ;;  %v1656_v46 = vld [vmem:[#allocation2 + $0xc8] sm:$0xff] }
 0x1f2   : > { %v1339_v32 = vpop.permute.xlu1 %1338 }
 0x1f3   : > { %1410 = vst.msk [vmem:[#allocation3 + $0x64] sm:$0xf] %vm1384_vm7, %v1339_v32  ;;  %1972 = vrot.lane.b32.xlu0 %v3668_v60, %s3081_s14 }
 0x1f5   : > { %v1349_v21 = vpop.permute.xlu0 %1348 }
 0x1f6   : > { %1415 = vst.msk [vmem:[#allocation3 + $0x78] sm:$0xf] %vm1384_vm7, %v1349_v21  ;;  %1747 = vrot.lane.b32.xlu2 %v1679_v33, %s3079_s12  ;;  %v3971_v21 = vpack.c.bf16 %v2111_v35, %v2111_v35  ;;  %v1669_v35 = vld [vmem:[#allocation2 + $0x168] sm:$0xff] }
 0x1f8   : > { %1759 = vrot.lane.b32.xlu1 %v1685_v7, %s3079_s12  ;;  %v1740_v34 = vpop.permute.xlu2 %1739  ;;  %v2117_v7 = vld [vmem:[#allocation2 + $0x152] sm:$0xff] }
 0x1f9   : > { %1836 = vst.msk [vmem:[#allocation3] sm:$0xf] %vm1835_vm9, %v1740_v34  ;;  %v3977_v51 = vpack.c.bf16 %v2117_v7, %v2117_v7 }
 0x1fa   : > { %v1345_v60 = vpop.permute.xlu1 %1344 }
 0x1fb   : > { %1413 = vst.msk [vmem:[#allocation3 + $0x70] sm:$0xf] %vm1384_vm7, %v1345_v60  ;;  %1986 = vrot.lane.b32.xlu0 %v3713_v26, %s3081_s14  ;;  %v1655_v60 = vld [vmem:[#allocation2 + $0xc0] sm:$0xff] }
 0x1fc   : > { %v1687_v39 = vpack.c.bf16 %v1655_v60, %v1655_v60  ;;  %v1894_v60 = vld [vmem:[#allocation2 + $0x169] sm:$0xff] }
 0x1fd   : > { %v1516_v8 = vpop.permute.xlu0 %1515 }
 0x1fe   : > { %1611 = vst.msk [vmem:[#allocation3 + $0x4] sm:$0xf] %vm1609_vm8, %v1516_v8  ;;  %1761 = vrot.lane.b32.xlu2 %v1686_v38, %s3079_s12  ;;  %v1649_v8 = vld [vmem:[#allocation2 + $0x78] sm:$0xff] }
 0x1ff   : > { %v1681_v43 = vpack.c.bf16 %v1649_v8, %v1649_v8 }
 0x200   : > { %1974 = vrot.lane.b32.xlu1 %v3689_v45, %s3081_s14  ;;  %v1967_v26 = vpop.permute.xlu2 %1966  ;;  %v2098_v45 = vld [vmem:[#allocation2 + $0x6a] sm:$0xff] }
 0x201   : > { %v3920_v18 = vpack.c.bf16 %v2098_v45, %v2098_v45  ;;  %v1650_v45 = vld [vmem:[#allocation2 + $0x80] sm:$0xff] }
 0x202   : > { %v1351_v48 = vpop.permute.xlu1 %1350 }
 0x203   : > { %1416 = vst.msk [vmem:[#allocation3 + $0x7c] sm:$0xf] %vm1384_vm7, %v1351_v48  ;;  %2209 = vrot.lane.b32.xlu0 %v3901_v14, %s3080_s13  ;;  %v1875_v48 = vld [vmem:[#allocation2 + $0x81] sm:$0xff] }
 0x205   : > { %v1742_v41 = vpop.permute.xlu0 %1741 }
 0x206   : > { %1837 = vst.msk [vmem:[#allocation3 + $0x4] sm:$0xf] %vm1835_vm9, %v1742_v41  ;;  %1984 = vrot.lane.b32.xlu2 %v3694_v36, %s3081_s14  ;;  %v1661_v36 = vld [vmem:[#allocation2 + $0x108] sm:$0xff]  ;;  %v1907_v41 = vpack.c.bf16 %v1875_v48, %v1875_v48  ;;  %v2120_v48 = vld [vmem:[#allocation2 + $0x172] sm:$0xff] }
 0x207   : > { %2062 = vst.msk [vmem:[#allocation3 + $0x4] sm:$0xf] %vm2060_vm11, %v1967_v26  ;;  %v1693_v50 = vpack.c.bf16 %v1661_v36, %v1661_v36 }
 0x208   : > { %2197 = vrot.lane.b32.xlu1 %v3911_v10, %s3080_s13  ;;  %v1520_v5 = vpop.permute.xlu2 %1519 }
 0x209   : > { %1613 = vst.msk [vmem:[#allocation3 + $0xc] sm:$0xf] %vm1609_vm8, %v1520_v5 }
 0x20a   : > { %v1518_v47 = vpop.permute.xlu1 %1517 }
 0x20b   : > { %1612 = vst.msk [vmem:[#allocation3 + $0x8] sm:$0xf] %vm1609_vm8, %v1518_v47  ;;  %1551 = vrot.lane.b32.xlu0 %v3856_v55, %s3078_s11  ;;  %v3935_v55 = vpack.c.bf16 %v1441_v44, %v1441_v44 }
 0x20d   : > { %v2190_v24 = vpop.permute.xlu0 %2189 }
 0x20e   : > { %2199 = vrot.lane.b32.xlu2 %v3920_v18, %s3080_s13 }
 0x210   : > { %2211 = vrot.lane.b32.xlu1 %v3925_v61, %s3080_s13  ;;  %v1744_v19 = vpop.permute.xlu2 %1743 }
 0x211   : > { %1838 = vst.msk [vmem:[#allocation3 + $0x8] sm:$0xf] %vm1835_vm9, %v1744_v19 }
 0x212   : > { %v1965_v56 = vpop.permute.xlu1 %1964 }
 0x213   : > { %2061 = vst.msk [vmem:[#allocation3] sm:$0xf] %vm2060_vm11, %v1965_v56  ;;  %1775 = vrot.lane.b32.xlu0 %v1693_v50, %s3079_s12  ;;  %v2106_v56 = vld [vmem:[#allocation2 + $0xca] sm:$0xff] }
 0x214   : > { %2286 = vst.msk [vmem:[#allocation3] sm:$0xf] %vm2285_vm12, %v2190_v24  ;;  %v1874_v24 = vld [vmem:[#allocation2 + $0x79] sm:$0xff] }
 0x215   : > { %v1530_v0 = vpop.permute.xlu0 %1529  ;;  %v1906_v44 = vpack.c.bf16 %v1874_v24, %v1874_v24 }
 0x216   : > { %1618 = vst.msk [vmem:[#allocation3 + $0x20] sm:$0xf] %vm1609_vm8, %v1530_v0  ;;  %1549 = vrot.lane.b32.xlu2 %v3868_v22, %s3078_s11  ;;  %v1667_v22 = vld [vmem:[#allocation2 + $0x150] sm:$0xff]  ;;  %v4015_v0 = vpack.c.bf16 %v2106_v56, %v2106_v56  ;;  %v1883_v56 = vld [vmem:[#allocation2 + $0xe1] sm:$0xff] }
 0x217   : > { %v1699_v37 = vpack.c.bf16 %v1667_v22, %v1667_v22 }
 0x218   : > { %1561 = vrot.lane.b32.xlu1 %v3935_v55, %s3078_s11  ;;  %v1758_v28 = vpop.permute.xlu2 %1757 }
 0x21a   : > { %v2192_v9 = vpop.permute.xlu1 %2191 }
 0x21b   : > { %2287 = vst.msk [vmem:[#allocation3 + $0x4] sm:$0xf] %vm2285_vm12, %v2192_v9  ;;  %1789 = vrot.lane.b32.xlu0 %v1700_v1, %s3079_s12  ;;  %v1881_v1 = vld [vmem:[#allocation2 + $0xc9] sm:$0xff] }
 0x21c   : > { %v1913_v6 = vpack.c.bf16 %v1881_v1, %v1881_v1  ;;  %v1915_v1 = vpack.c.bf16 %v1883_v56, %v1883_v56 }
 0x21d   : > { %v1746_v15 = vpop.permute.xlu0 %1745 }
 0x21e   : > { %1839 = vst.msk [vmem:[#allocation3 + $0xc] sm:$0xf] %vm1835_vm9, %v1746_v15  ;;  %1563 = vrot.lane.b32.xlu2 %v3942_v11, %s3078_s11 }
 0x220   : > { %1777 = vrot.lane.b32.xlu1 %v1694_v13, %s3079_s12  ;;  %v1981_v16 = vpop.permute.xlu2 %1980  ;;  %v2105_v13 = vld [vmem:[#allocation2 + $0xc2] sm:$0xff] }
 0x221   : > { %v4028_v22 = vpack.c.bf16 %v2105_v13, %v2105_v13 }
 0x222   : > { %v1532_v59 = vpop.permute.xlu1 %1531  ;;  %v3017_v3 = vld [vmem:[#allocation3] sm:$0xff] }
 0x223   : > { %1619 = vst.msk [vmem:[#allocation3 + $0x24] sm:$0xf] %vm1609_vm8, %v1532_v59  ;;  %2012 = vrot.lane.b32.xlu0 %v3766_v4, %s3081_s14  ;;  %2997 = vmatmul.msk.bf16.vlgmr.msra.gmra.mxu0 %vm2450_vm13, %v3017_v3 }
 0x224   : > { %1845 = vst.msk [vmem:[#allocation3 + $0x24] sm:$0xf] %vm1835_vm9, %v1758_v28 }
 0x225   : > { %v1969_v27 = vpop.permute.xlu0 %1968 }
 0x226   : > { %2063 = vst.msk [vmem:[#allocation3 + $0x8] sm:$0xf] %vm2060_vm11, %v1969_v27  ;;  %1787 = vrot.lane.b32.xlu2 %v1699_v37, %s3079_s12 }
 0x228   : > { %2000 = vrot.lane.b32.xlu1 %v3745_v12, %s3081_s14  ;;  %v2196_v32 = vpop.permute.xlu2 %2195 }
 0x22a   : > { %v1756_v33 = vpop.permute.xlu1 %1755 }
 0x22b   : > { %1844 = vst.msk [vmem:[#allocation3 + $0x20] sm:$0xf] %vm1835_vm9, %v1756_v33  ;;  %2227 = vrot.lane.b32.xlu0 %v3957_v30, %s3080_s13  ;;  %v1663_v33 = vld [vmem:[#allocation2 + $0x120] sm:$0xff] }
 0x22c   : > { %2069 = vst.msk [vmem:[#allocation3 + $0x20] sm:$0xf] %vm2060_vm11, %v1981_v16  ;;  %v1664_v16 = vld [vmem:[#allocation2 + $0x128] sm:$0xff]  ;;  %v1695_v7 = vpack.c.bf16 %v1663_v33, %v1663_v33 }
 0x22d   : > { %v1983_v4 = vpop.permute.xlu0 %1982  ;;  %v1696_v3 = vpack.c.bf16 %v1664_v16, %v1664_v16 }
 0x22e   : > { %2070 = vst.msk [vmem:[#allocation3 + $0x24] sm:$0xf] %vm2060_vm11, %v1983_v4  ;;  %2002 = vrot.lane.b32.xlu2 %v3731_v53, %s3081_s14 }
 0x230   : > { %2014 = vrot.lane.b32.xlu1 %v3752_v17, %s3081_s14  ;;  %v1546_v12 = vpop.permute.xlu2 %1545  ;;  %v2118_v17 = vld [vmem:[#allocation2 + $0x15a] sm:$0xff] }
 0x231   : > { %1626 = vst.msk [vmem:[#allocation3 + $0x40] sm:$0xf] %vm1609_vm8, %v1546_v12  ;;  %v3984_v63 = vpack.c.bf16 %v2118_v17, %v2118_v17 }
 0x232   : > { %v1971_v57 = vpop.permute.xlu1 %1970 }
 0x233   : > { %2064 = vst.msk [vmem:[#allocation3 + $0xc] sm:$0xf] %vm2060_vm11, %v1971_v57  ;;  %1525 = vrot.lane.b32.xlu0 %v3911_v10, %s3078_s11  ;;  %v1701_v57 = vpack.c.bf16 %v1669_v35, %v1669_v35  ;;  %v1897_v35 = vld [vmem:[#allocation2 + $0x189] sm:$0xff] }
 0x234   : > { %2289 = vst.msk [vmem:[#allocation3 + $0xc] sm:$0xf] %vm2285_vm12, %v2196_v32  ;;  %v1920_v32 = vpack.c.bf16 %v1888_v25, %v1888_v25  ;;  %v1671_v25 = vld [vmem:[#allocation2 + $0x180] sm:$0xff] }
 0x235   : > { %v2206_v53 = vpop.permute.xlu0 %2205 }
 0x236   : > { %2294 = vst.msk [vmem:[#allocation3 + $0x20] sm:$0xf] %vm2285_vm12, %v2206_v53  ;;  %2225 = vrot.lane.b32.xlu2 %v3971_v21, %s3080_s13 }
 0x238   : > { %2237 = vrot.lane.b32.xlu1 %v3977_v51, %s3080_s13  ;;  %v1774_v23 = vpop.permute.xlu2 %1773 }
 0x23a   : > { %v2194_v34 = vpop.permute.xlu1 %2193 }
 0x23b   : > { %2288 = vst.msk [vmem:[#allocation3 + $0x8] sm:$0xf] %vm2285_vm12, %v2194_v34  ;;  %1539 = vrot.lane.b32.xlu0 %v3925_v61, %s3078_s11  ;;  %v1682_v61 = vpack.c.bf16 %v1650_v45, %v1650_v45 }
 0x23d   : > { %v1548_v38 = vpop.permute.xlu0 %1547 }
 0x23e   : > { %1627 = vst.msk [vmem:[#allocation3 + $0x44] sm:$0xf] %vm1609_vm8, %v1548_v38  ;;  %2239 = vrot.lane.b32.xlu2 %v3984_v63, %s3080_s13 }
 0x23f   : > { %1853 = vst.msk [vmem:[#allocation3 + $0x44] sm:$0xf] %vm1835_vm9, %v1774_v23  ;;  %v2119_v23 = vld [vmem:[#allocation2 + $0x16a] sm:$0xff] }
 0x240   : > { %1527 = vrot.lane.b32.xlu1 %v3920_v18, %s3078_s11  ;;  %v2222_v40 = vpop.permute.xlu2 %2221 }
 0x242   : > { %v2208_v52 = vpop.permute.xlu1 %2207  ;;  %v3018_v26 = vld [vmem:[#allocation3 + $0x8] sm:$0xff] }
 0x243   : > { %2295 = vst.msk [vmem:[#allocation3 + $0x24] sm:$0xf] %vm2285_vm12, %v2208_v52  ;;  %1763 = vrot.lane.b32.xlu0 %v1687_v39, %s3079_s12  ;;  %2998 = vmatmul.msk.bf16.gmra.mxu0 %vm2450_vm13, %v3018_v26  ;;  %v2113_v39 = vld [vmem:[#allocation2 + $0x122] sm:$0xff]  ;;  %v1926_v52 = vpack.c.bf16 %v1894_v60, %v1894_v60 }
 0x244   : > { %v1896_v60 = vld [vmem:[#allocation2 + $0x181] sm:$0xff] }
 0x245   : > { %v1997_v10 = vpop.permute.xlu0 %1996 }
 0x246   : > { %1537 = vrot.lane.b32.xlu2 %v3901_v14, %s3078_s11  ;;  %v1688_v14 = vpack.c.bf16 %v1656_v46, %v1656_v46  ;;  %v1882_v46 = vld [vmem:[#allocation2 + $0xd9] sm:$0xff] }
 0x248   : > { %1751 = vrot.lane.b32.xlu1 %v1681_v43, %s3079_s12  ;;  %v1524_v5 = vpop.permute.xlu2 %1523  ;;  %v2114_v43 = vld [vmem:[#allocation2 + $0x12a] sm:$0xff] }
 0x249   : > { %1615 = vst.msk [vmem:[#allocation3 + $0x14] sm:$0xf] %vm1609_vm8, %v1524_v5  ;;  %v2146_v45 = vpack.c.bf16 %v2114_v43, %v2114_v43  ;;  %v2152_v5 = vpack.c.bf16 %v2120_v48, %v2120_v48 }
 0x24a   : > { %v1772_v47 = vpop.permute.xlu1 %1771  ;;  %v3021_v18 = vld [vmem:[#allocation3 + $0x20] sm:$0xff] }
 0x24b   : > { %1852 = vst.msk [vmem:[#allocation3 + $0x40] sm:$0xf] %vm1835_vm9, %v1772_v47  ;;  %1978 = vrot.lane.b32.xlu0 %v1907_v41, %s3081_s14  ;;  %3001 = vmatmul.msk.bf16.vlgmr.msra.gmra.mxu1 %vm2450_vm13, %v3021_v18  ;;  %v1914_v18 = vpack.c.bf16 %v1882_v46, %v1882_v46 }
 0x24c   : > { %2077 = vst.msk [vmem:[#allocation3 + $0x40] sm:$0xf] %vm2060_vm11, %v1997_v10 }
 0x24d   : > { %v2224_v36 = vpop.permute.xlu0 %2223  ;;  %2302 = vst.msk [vmem:[#allocation3 + $0x40] sm:$0xf] %vm2285_vm12, %v2222_v40 }
 0x24e   : > { %1753 = vrot.lane.b32.xlu2 %v1682_v61, %s3079_s12 }
 0x250   : > { %1765 = vrot.lane.b32.xlu1 %v1688_v14, %s3079_s12  ;;  %v1748_v50 = vpop.permute.xlu2 %1747  ;;  %v1657_v14 = vld [vmem:[#allocation2 + $0xd8] sm:$0xff] }
 0x251   : > { %v1689_v24 = vpack.c.bf16 %v1657_v14, %v1657_v14  ;;  %v2124_v14 = vld [vmem:[#allocation2 + $0x1a2] sm:$0xff] }
 0x252   : > { %v1999_v19 = vpop.permute.xlu1 %1998 }
 0x253   : > { %2078 = vst.msk [vmem:[#allocation3 + $0x44] sm:$0xf] %vm2060_vm11, %v1999_v19  ;;  %2201 = vrot.lane.b32.xlu0 %v3795_v62, %s3080_s13  ;;  %v1658_v19 = vld [vmem:[#allocation2 + $0xe0] sm:$0xff] }
 0x254   : > { %2303 = vst.msk [vmem:[#allocation3 + $0x44] sm:$0xf] %vm2285_vm12, %v2224_v36 }
 0x255   : > { %v1534_v58 = vpop.permute.xlu0 %1533 }
 0x256   : > { %1620 = vst.msk [vmem:[#allocation3 + $0x28] sm:$0xf] %vm1609_vm8, %v1534_v58  ;;  %1976 = vrot.lane.b32.xlu2 %v1906_v44, %s3081_s14 }
 0x258   : > { %1988 = vrot.lane.b32.xlu1 %v3723_v49, %s3081_s14  ;;  %v1762_v2 = vpop.permute.xlu2 %1761 }
 0x25a   : > { %v1522_v28 = vpop.permute.xlu1 %1521 }
 0x25b   : > { %1614 = vst.msk [vmem:[#allocation3 + $0x10] sm:$0xf] %vm1609_vm8, %v1522_v28  ;;  %2215 = vrot.lane.b32.xlu0 %v4015_v0, %s3080_s13  ;;  %v3025_v62 = vld [vmem:[#allocation3 + $0x40] sm:$0xff] }
 0x25c   : > { %1840 = vst.msk [vmem:[#allocation3 + $0x10] sm:$0xf] %vm1835_vm9, %v1748_v50  ;;  %3005 = vmatmul.msk.bf16.vlgmr.msra.gmra.mxu2 %vm2450_vm13, %v3025_v62  ;;  %v1666_v62 = vld [vmem:[#allocation2 + $0x140] sm:$0xff] }
 0x25d   : > { %v1750_v9 = vpop.permute.xlu0 %1749 }
 0x25e   : > { %1841 = vst.msk [vmem:[#allocation3 + $0x14] sm:$0xf] %vm1835_vm9, %v1750_v9  ;;  %1990 = vrot.lane.b32.xlu2 %v1913_v6, %s3081_s14 }
 0x260   : > { %2203 = vrot.lane.b32.xlu1 %v3810_v20, %s3080_s13  ;;  %v1985_v49 = vpop.permute.xlu2 %1984 }
 0x262   : > { %v1536_v15 = vpop.permute.xlu1 %1535 }
 0x263   : > { %1621 = vst.msk [vmem:[#allocation3 + $0x2c] sm:$0xf] %vm1609_vm8, %v1536_v15  ;;  %1565 = vrot.lane.b32.xlu0 %v3977_v51, %s3078_s11 }
 0x264   : > { %1847 = vst.msk [vmem:[#allocation3 + $0x2c] sm:$0xf] %vm1835_vm9, %v1762_v2 }
 0x265   : > { %v1973_v59 = vpop.permute.xlu0 %1972 }
 0x266   : > { %2065 = vst.msk [vmem:[#allocation3 + $0x10] sm:$0xf] %vm2060_vm11, %v1973_v59  ;;  %2213 = vrot.lane.b32.xlu2 %v4028_v22, %s3080_s13  ;;  %v1890_v59 = vld [vmem:[#allocation2 + $0x139] sm:$0xff] }
 0x268   : > { %1553 = vrot.lane.b32.xlu1 %v3971_v21, %s3078_s11  ;;  %v2200_v20 = vpop.permute.xlu2 %2199 }
 0x26a   : > { %v1760_v37 = vpop.permute.xlu1 %1759 }
 0x26b   : > { %1846 = vst.msk [vmem:[#allocation3 + $0x28] sm:$0xf] %vm1835_vm9, %v1760_v37  ;;  %1781 = vrot.lane.b32.xlu0 %v1696_v3, %s3079_s12 }
 0x26c   : > { %2071 = vst.msk [vmem:[#allocation3 + $0x28] sm:$0xf] %vm2060_vm11, %v1985_v49  ;;  %v1698_v49 = vpack.c.bf16 %v1666_v62, %v1666_v62 }
 0x26d   : > { %v1987_v27 = vpop.permute.xlu0 %1986 }
 0x26e   : > { %2072 = vst.msk [vmem:[#allocation3 + $0x2c] sm:$0xf] %vm2060_vm11, %v1987_v27  ;;  %1555 = vrot.lane.b32.xlu2 %v3957_v30, %s3078_s11  ;;  %v1670_v30 = vld [vmem:[#allocation2 + $0x170] sm:$0xff] }
 0x26f   : > { %v1702_v17 = vpack.c.bf16 %v1670_v30, %v1670_v30  ;;  %v1891_v30 = vld [vmem:[#allocation2 + $0x141] sm:$0xff] }
 0x270   : > { %1567 = vrot.lane.b32.xlu1 %v3984_v63, %s3078_s11  ;;  %v1550_v4 = vpop.permute.xlu2 %1549  ;;  %v4060_v63 = vpack.c.bf16 %v2119_v23, %v2119_v23  ;;  %v2121_v23 = vld [vmem:[#allocation2 + $0x182] sm:$0xff] }
 0x271   : > { %1628 = vst.msk [vmem:[#allocation3 + $0x48] sm:$0xf] %vm1609_vm8, %v1550_v4  ;;  %v1703_v4 = vpack.c.bf16 %v1671_v25, %v1671_v25 }
 0x272   : > { %v1975_v12 = vpop.permute.xlu1 %1974 }
 0x273   : > { %2066 = vst.msk [vmem:[#allocation3 + $0x14] sm:$0xf] %vm2060_vm11, %v1975_v12  ;;  %2004 = vrot.lane.b32.xlu0 %v1920_v32, %s3081_s14 }
 0x274   : > { %2291 = vst.msk [vmem:[#allocation3 + $0x14] sm:$0xf] %vm2285_vm12, %v2200_v20  ;;  %v1665_v20 = vld [vmem:[#allocation2 + $0x138] sm:$0xff] }
 0x275   : > { %v2210_v21 = vpop.permute.xlu0 %2209  ;;  %v1697_v33 = vpack.c.bf16 %v1665_v20, %v1665_v20 }
 0x276   : > { %2296 = vst.msk [vmem:[#allocation3 + $0x28] sm:$0xf] %vm2285_vm12, %v2210_v21  ;;  %1779 = vrot.lane.b32.xlu2 %v1695_v7, %s3079_s12  ;;  %v1929_v7 = vpack.c.bf16 %v1897_v35, %v1897_v35 }
 0x278   : > { %1791 = vrot.lane.b32.xlu1 %v1701_v57, %s3079_s12  ;;  %v1564_v51 = vpop.permute.xlu2 %1563  ;;  %v1672_v57 = vld [vmem:[#allocation2 + $0x188] sm:$0xff] }
 0x279   : > { %1635 = vst.msk [vmem:[#allocation3 + $0x64] sm:$0xf] %vm1609_vm8, %v1564_v51 }
 0x27a   : > { %v2198_v53 = vpop.permute.xlu1 %2197 }
 0x27b   : > { %2290 = vst.msk [vmem:[#allocation3 + $0x10] sm:$0xf] %vm2285_vm12, %v2198_v53  ;;  %2018 = vrot.lane.b32.xlu0 %v3775_v42, %s3081_s14  ;;  %v2145_v42 = vpack.c.bf16 %v2113_v39, %v2113_v39  ;;  %v1704_v53 = vpack.c.bf16 %v1672_v57, %v1672_v57 }
 0x27d   : > { %v1552_v34 = vpop.permute.xlu0 %1551 }
 0x27e   : > { %1629 = vst.msk [vmem:[#allocation3 + $0x4c] sm:$0xf] %vm1609_vm8, %v1552_v34  ;;  %1793 = vrot.lane.b32.xlu2 %v1702_v17, %s3079_s12  ;;  %v1923_v17 = vpack.c.bf16 %v1891_v30, %v1891_v30 }
 0x280   : > { %2006 = vrot.lane.b32.xlu1 %v3756_v29, %s3081_s14  ;;  %v1788_v38 = vpop.permute.xlu2 %1787 }
 0x282   : > { %v2212_v40 = vpop.permute.xlu1 %2211  ;;  %v3019_v8 = vld [vmem:[#allocation3 + $0x10] sm:$0xff] }
 0x283   : > { %2297 = vst.msk [vmem:[#allocation3 + $0x2c] sm:$0xf] %vm2285_vm12, %v2212_v40  ;;  %2241 = vrot.lane.b32.xlu0 %v4060_v63, %s3080_s13  ;;  %2999 = vmatmul.msk.bf16.gmra.mxu0 %vm2450_vm13, %v3019_v8  ;;  %v1928_v8 = vpack.c.bf16 %v1896_v60, %v1896_v60 }
 0x285   : > { %v1776_v26 = vpop.permute.xlu0 %1775 }
 0x286   : > { %1854 = vst.msk [vmem:[#allocation3 + $0x48] sm:$0xf] %vm1835_vm9, %v1776_v26  ;;  %2016 = vrot.lane.b32.xlu2 %v1926_v52, %s3081_s14  ;;  %v2122_v52 = vld [vmem:[#allocation2 + $0x18a] sm:$0xff] }
 0x287   : > { %v2154_v26 = vpack.c.bf16 %v2122_v52, %v2122_v52 }
 0x288   : > { %2229 = vrot.lane.b32.xlu1 %v2145_v42, %s3080_s13  ;;  %v2003_v29 = vpop.permute.xlu2 %2002 }
 0x28a   : > { %v1562_v10 = vpop.permute.xlu1 %1561  ;;  %v3022_v41 = vld [vmem:[#allocation3 + $0x28] sm:$0xff] }
 0x28b   : > { %1634 = vst.msk [vmem:[#allocation3 + $0x60] sm:$0xf] %vm1609_vm8, %v1562_v10  ;;  %1543 = vrot.lane.b32.xlu0 %v4015_v0, %s3078_s11  ;;  %3002 = vmatmul.msk.bf16.gmra.mxu1 %vm2450_vm13, %v3022_v41  ;;  %v1690_v0 = vpack.c.bf16 %v1658_v19, %v1658_v19 }
 0x28c   : > { %1860 = vst.msk [vmem:[#allocation3 + $0x60] sm:$0xf] %vm1835_vm9, %v1788_v38 }
 0x28d   : > { %v1790_v47 = vpop.permute.xlu0 %1789 }
 0x28e   : > { %1861 = vst.msk [vmem:[#allocation3 + $0x64] sm:$0xf] %vm1835_vm9, %v1790_v47  ;;  %2231 = vrot.lane.b32.xlu2 %v2146_v45, %s3080_s13  ;;  %v1673_v47 = vld [vmem:[#allocation2 + $0x198] sm:$0xff] }
 0x290   : > { %2243 = vrot.lane.b32.xlu1 %v2152_v5, %s3080_s13  ;;  %v2226_v61 = vpop.permute.xlu2 %2225 }
 0x292   : > { %v1778_v36 = vpop.permute.xlu1 %1777 }
 0x293   : > { %1855 = vst.msk [vmem:[#allocation3 + $0x4c] sm:$0xf] %vm1835_vm9, %v1778_v36  ;;  %1992 = vrot.lane.b32.xlu0 %v1914_v18, %s3081_s14 }
 0x294   : > { %2080 = vst.msk [vmem:[#allocation3 + $0x4c] sm:$0xf] %vm2060_vm11, %v2003_v29 }
 0x295   : > { %v2013_v50 = vpop.permute.xlu0 %2012 }
 0x296   : > { %2085 = vst.msk [vmem:[#allocation3 + $0x60] sm:$0xf] %vm2060_vm11, %v2013_v50  ;;  %1541 = vrot.lane.b32.xlu2 %v4028_v22, %s3078_s11  ;;  %v1674_v50 = vld [vmem:[#allocation2 + $0x1a0] sm:$0xff] }
 0x298   : > { %1767 = vrot.lane.b32.xlu1 %v1689_v24, %s3079_s12  ;;  %v2240_v44 = vpop.permute.xlu2 %2239 }
 0x29a   : > { %v2001_v58 = vpop.permute.xlu1 %2000 }
 0x29b   : > { %2079 = vst.msk [vmem:[#allocation3 + $0x48] sm:$0xf] %vm2060_vm11, %v2001_v58  ;;  %2219 = vrot.lane.b32.xlu0 %v3837_v31, %s3080_s13 }
 0x29c   : > { %2304 = vst.msk [vmem:[#allocation3 + $0x48] sm:$0xf] %vm2285_vm12, %v2226_v61  ;;  %v1705_v61 = vpack.c.bf16 %v1673_v47, %v1673_v47 }
 0x29d   : > { %v2228_v2 = vpop.permute.xlu0 %2227 }
 0x29e   : > { %2305 = vst.msk [vmem:[#allocation3 + $0x4c] sm:$0xf] %vm2285_vm12, %v2228_v2  ;;  %1769 = vrot.lane.b32.xlu2 %v1690_v0, %s3079_s12  ;;  %v1706_v0 = vpack.c.bf16 %v1674_v50, %v1674_v50 }
 0x2a0   : > { %1994 = vrot.lane.b32.xlu1 %v1915_v1, %s3081_s14  ;;  %v1538_v28 = vpop.permute.xlu2 %1537  ;;  %v4100_v6 = vpop.f32.mrf.mxu0 }
 0x2a1   : > { %1622 = vst.msk [vmem:[#allocation3 + $0x30] sm:$0xf] %vm1609_vm8, %v1538_v28  ;;  %v2123_v28 = vld [vmem:[#allocation2 + $0x19a] sm:$0xff] }
 0x2a2   : > { %2592 = vst.msk [vmem:[%s4097_s26] sm:$0xff] %vm237_vm0, %v4100_v6  ;;  %v2015_v31 = vpop.permute.xlu1 %2014 }
 0x2a3   : > { %2086 = vst.msk [vmem:[#allocation3 + $0x64] sm:$0xf] %vm2060_vm11, %v2015_v31  ;;  %1569 = vrot.lane.b32.xlu0 %v4060_v63, %s3078_s11  ;;  %v2153_v63 = vpack.c.bf16 %v2121_v23, %v2121_v23 }
 0x2a4   : > { %2311 = vst.msk [vmem:[#allocation3 + $0x64] sm:$0xf] %vm2285_vm12, %v2240_v44  ;;  %v1899_v44 = vld [vmem:[#allocation2 + $0x1a1] sm:$0xff] }
 0x2a5   : > { %v1526_v9 = vpop.permute.xlu0 %1525  ;;  %v3026_v13 = vld [vmem:[#allocation3 + $0x48] sm:$0xff]  ;;  %v1931_v1 = vpack.c.bf16 %v1899_v44, %v1899_v44 }
 0x2a6   : > { %1616 = vst.msk [vmem:[#allocation3 + $0x18] sm:$0xf] %vm1609_vm8, %v1526_v9  ;;  %2217 = vrot.lane.b32.xlu2 %v3848_v54, %s3080_s13  ;;  %3006 = vmatmul.msk.bf16.gmra.mxu2 %vm2450_vm13, %v3026_v13  ;;  %v1922_v54 = vpack.c.bf16 %v1890_v59, %v1890_v59  ;;  %v2155_v13 = vpack.c.bf16 %v2123_v28, %v2123_v28 }
 0x2a8   : > { %1557 = vrot.lane.b32.xlu1 %v2145_v42, %s3078_s11  ;;  %v1754_v15 = vpop.permute.xlu2 %1753  ;;  %v4115_v22 = vpop.f32.mrf.mxu0 }
 0x2a9   : > { %2593 = vst.msk [vmem:[%s4097_s26 + $0x8] sm:$0xff] %vm237_vm0, %v4115_v22 }
 0x2aa   : > { %v2238_v16 = vpop.permute.xlu1 %2237 }
 0x2ab   : > { %2310 = vst.msk [vmem:[#allocation3 + $0x60] sm:$0xf] %vm2285_vm12, %v2238_v16  ;;  %1785 = vrot.lane.b32.xlu0 %v1698_v49, %s3079_s12 }
 0x2ad   : > { %v1540_v3 = vpop.permute.xlu0 %1539 }
 0x2ae   : > { %1623 = vst.msk [vmem:[#allocation3 + $0x34] sm:$0xf] %vm1609_vm8, %v1540_v3  ;;  %1559 = vrot.lane.b32.xlu2 %v2146_v45, %s3078_s11 }
 0x2b0   : > { %1571 = vrot.lane.b32.xlu1 %v2152_v5, %s3078_s11  ;;  %v1977_v37 = vpop.permute.xlu2 %1976 }
 0x2b2   : > { %v1528_v27 = vpop.permute.xlu1 %1527  ;;  %v3029_v32 = vld [vmem:[#allocation3 + $0x60] sm:$0xff] }
 0x2b3   : > { %1617 = vst.msk [vmem:[#allocation3 + $0x1c] sm:$0xf] %vm1609_vm8, %v1528_v27  ;;  %2008 = vrot.lane.b32.xlu0 %v1922_v54, %s3081_s14  ;;  %3009 = vmatmul.msk.bf16.vlgmr.msra.gmra.mxu3 %vm2450_vm13, %v3029_v32 }
 0x2b4   : > { %1843 = vst.msk [vmem:[#allocation3 + $0x1c] sm:$0xf] %vm1835_vm9, %v1754_v15 }
 0x2b5   : > { %v1764_v12 = vpop.permute.xlu0 %1763 }
 0x2b6   : > { %1848 = vst.msk [vmem:[#allocation3 + $0x30] sm:$0xf] %vm1835_vm9, %v1764_v12  ;;  %1783 = vrot.lane.b32.xlu2 %v1697_v33, %s3079_s12 }
 0x2b8   : > { %1795 = vrot.lane.b32.xlu1 %v1703_v4, %s3079_s12  ;;  %v1991_v21 = vpop.permute.xlu2 %1990 }
 0x2ba   : > { %v1752_v51 = vpop.permute.xlu1 %1751 }
 0x2bb   : > { %1842 = vst.msk [vmem:[#allocation3 + $0x18] sm:$0xf] %vm1835_vm9, %v1752_v51  ;;  %2022 = vrot.lane.b32.xlu0 %v1929_v7, %s3081_s14 }
 0x2bc   : > { %2067 = vst.msk [vmem:[#allocation3 + $0x18] sm:$0xf] %vm2060_vm11, %v1977_v37 }
 0x2bd   : > { %v1979_v34 = vpop.permute.xlu0 %1978 }
 0x2be   : > { %2068 = vst.msk [vmem:[#allocation3 + $0x1c] sm:$0xf] %vm2060_vm11, %v1979_v34  ;;  %1797 = vrot.lane.b32.xlu2 %v1704_v53, %s3079_s12 }
 0x2c0   : > { %2010 = vrot.lane.b32.xlu1 %v1923_v17, %s3081_s14  ;;  %v2214_v38 = vpop.permute.xlu2 %2213  ;;  %v4138_v39 = vpop.f32.mrf.mxu0 }
 0x2c1   : > { %2594 = vst.msk [vmem:[%s4097_s26 + $0x10] sm:$0xff] %vm237_vm0, %v4138_v39 }
 0x2c2   : > { %v1766_v40 = vpop.permute.xlu1 %1765 }
 0x2c3   : > { %1849 = vst.msk [vmem:[#allocation3 + $0x34] sm:$0xf] %vm1835_vm9, %v1766_v40  ;;  %2245 = vrot.lane.b32.xlu0 %v2153_v63, %s3080_s13 }
 0x2c4   : > { %2074 = vst.msk [vmem:[#allocation3 + $0x34] sm:$0xf] %vm2060_vm11, %v1991_v21 }
 0x2c5   : > { %v2202_v42 = vpop.permute.xlu0 %2201 }
 0x2c6   : > { %2292 = vst.msk [vmem:[#allocation3 + $0x18] sm:$0xf] %vm2285_vm12, %v2202_v42  ;;  %2020 = vrot.lane.b32.xlu2 %v1928_v8, %s3081_s14 }
 0x2c8   : > { %2233 = vrot.lane.b32.xlu1 %v3935_v55, %s3080_s13  ;;  %v1556_v43 = vpop.permute.xlu2 %1555  ;;  %v4150_v29 = vpop.f32.mrf.mxu1  ;;  %v1898_v55 = vld [vmem:[#allocation2 + $0x199] sm:$0xff] }
 0x2c9   : > { %v4152_v48 = vpop.f32.mrf.mxu0  ;;  %1631 = vst.msk [vmem:[#allocation3 + $0x54] sm:$0xf] %vm1609_vm8, %v1556_v43  ;;  %v1930_v45 = vpack.c.bf16 %v1898_v55, %v1898_v55 }
 0x2ca   : > { %2600 = vst.msk [vmem:[%s4097_s26 + $0x40] sm:$0xff] %vm237_vm0, %v4150_v29  ;;  %v1989_v10 = vpop.permute.xlu1 %1988 }
 0x2cb   : > { %2073 = vst.msk [vmem:[#allocation3 + $0x30] sm:$0xf] %vm2060_vm11, %v1989_v10  ;;  %1575 = vrot.lane.b32.xlu0 %v2154_v26, %s3078_s11 }
 0x2cc   : > { %2595 = vst.msk [vmem:[%s4097_s26 + $0x18] sm:$0xff] %vm237_vm0, %v4152_v48 }
 0x2cd   : > { %v2216_v41 = vpop.permute.xlu0 %2215  ;;  %2298 = vst.msk [vmem:[#allocation3 + $0x30] sm:$0xf] %vm2285_vm12, %v2214_v38 }
 0x2ce   : > { %2299 = vst.msk [vmem:[#allocation3 + $0x34] sm:$0xf] %vm2285_vm12, %v2216_v41  ;;  %2235 = vrot.lane.b32.xlu2 %v3942_v11, %s3080_s13  ;;  %v2156_v11 = vpack.c.bf16 %v2124_v14, %v2124_v14 }
 0x2d0   : > { %2247 = vrot.lane.b32.xlu1 %v2154_v26, %s3080_s13  ;;  %v1780_v5 = vpop.permute.xlu2 %1779  ;;  %v4168_v46 = vpop.f32.mrf.mxu1 }
 0x2d1   : > { %2601 = vst.msk [vmem:[%s4097_s26 + $0x48] sm:$0xff] %vm237_vm0, %v4168_v46 }
 0x2d2   : > { %v2204_v18 = vpop.permute.xlu1 %2203 }
 0x2d3   : > { %2293 = vst.msk [vmem:[#allocation3 + $0x1c] sm:$0xf] %vm2285_vm12, %v2204_v18  ;;  %2024 = vrot.lane.b32.xlu0 %v1930_v45, %s3081_s14 }
 0x2d5   : > { %v1566_v36 = vpop.permute.xlu0 %1565  ;;  %v3023_v24 = vld [vmem:[#allocation3 + $0x30] sm:$0xff] }
 0x2d6   : > { %1636 = vst.msk [vmem:[#allocation3 + $0x68] sm:$0xf] %vm1609_vm8, %v1566_v36  ;;  %1573 = vrot.lane.b32.xlu2 %v2153_v63, %s3078_s11  ;;  %3003 = vmatmul.msk.bf16.gmra.mxu1 %vm2450_vm13, %v3023_v24 }
 0x2d8   : > { %1799 = vrot.lane.b32.xlu1 %v1705_v61, %s3079_s12  ;;  %v1794_v19 = vpop.permute.xlu2 %1793 }
 0x2da   : > { %v1554_v56 = vpop.permute.xlu1 %1553  ;;  %v3020_v58 = vld [vmem:[#allocation3 + $0x18] sm:$0xff] }
 0x2db   : > { %1630 = vst.msk [vmem:[#allocation3 + $0x50] sm:$0xf] %vm1609_vm8, %v1554_v56  ;;  %2251 = vrot.lane.b32.xlu0 %v2156_v11, %s3080_s13  ;;  %3000 = vmatmul.msk.bf16.gmra.mxu0 %vm2450_vm13, %v3020_v58 }
 0x2dc   : > { %1856 = vst.msk [vmem:[#allocation3 + $0x50] sm:$0xf] %vm1835_vm9, %v1780_v5 }
 0x2dd   : > { %v1782_v2 = vpop.permute.xlu0 %1781 }
 0x2de   : > { %1857 = vst.msk [vmem:[#allocation3 + $0x54] sm:$0xf] %vm1835_vm9, %v1782_v2  ;;  %1801 = vrot.lane.b32.xlu2 %v1706_v0, %s3079_s12 }
 0x2df   : > { %v4186_v31 = vpop.f32.mrf.mxu2 }
 0x2e0   : > { %2026 = vrot.lane.b32.xlu1 %v1931_v1, %s3081_s14  ;;  %v2017_v62 = vpop.permute.xlu2 %2016  ;;  %2608 = vst.msk [vmem:[%s4097_s26 + $0x80] sm:$0xff] %vm237_vm0, %v4186_v31 }
 0x2e2   : > { %v1568_v9 = vpop.permute.xlu1 %1567 }
 0x2e3   : > { %1637 = vst.msk [vmem:[#allocation3 + $0x6c] sm:$0xf] %vm1609_vm8, %v1568_v9 }
 0x2e4   : > { %1863 = vst.msk [vmem:[#allocation3 + $0x6c] sm:$0xf] %vm1835_vm9, %v1794_v19 }
 0x2e5   : > { %v2005_v49 = vpop.permute.xlu0 %2004 }
 0x2e6   : > { %2081 = vst.msk [vmem:[#allocation3 + $0x50] sm:$0xf] %vm2060_vm11, %v2005_v49  ;;  %2249 = vrot.lane.b32.xlu2 %v2155_v13, %s3080_s13 }
 0x2e7   : > { %v4195_v15 = vpop.f32.mrf.mxu2 }
 0x2e8   : > { %v2232_v16 = vpop.permute.xlu2 %2231  ;;  %2609 = vst.msk [vmem:[%s4097_s26 + $0x88] sm:$0xff] %vm237_vm0, %v4195_v15 }
 0x2ea   : > { %v1792_v59 = vpop.permute.xlu1 %1791 }
 0x2eb   : > { %1862 = vst.msk [vmem:[#allocation3 + $0x68] sm:$0xf] %vm1835_vm9, %v1792_v59 }
 0x2ec   : > { %2087 = vst.msk [vmem:[#allocation3 + $0x68] sm:$0xf] %vm2060_vm11, %v2017_v62 }
 0x2ed   : > { %v2019_v3 = vpop.permute.xlu0 %2018 }
 0x2ee   : > { %2088 = vst.msk [vmem:[#allocation3 + $0x6c] sm:$0xf] %vm2060_vm11, %v2019_v3  ;;  %v2625_v3 = vsel %vm237_vm0, %v4115_v22, 0.0 }
 0x2f0   : > { %v1542_v54 = vpop.permute.xlu2 %1541 }
 0x2f1   : > { %1624 = vst.msk [vmem:[#allocation3 + $0x38] sm:$0xf] %vm1609_vm8, %v1542_v54  ;;  %v2624_v54 = vsel %vm237_vm0, %v4100_v6, 0.0 }
 0x2f2   : > { %v2007_v20 = vpop.permute.xlu1 %2006 }
 0x2f3   : > { %2082 = vst.msk [vmem:[#allocation3 + $0x54] sm:$0xf] %vm2060_vm11, %v2007_v20  ;;  %v2627_v20 = vsel %vm237_vm0, %v4138_v39, 0.0 }
 0x2f4   : > { %2307 = vst.msk [vmem:[#allocation3 + $0x54] sm:$0xf] %vm2285_vm12, %v2232_v16 }
 0x2f5   : > { %v2242_v37 = vpop.permute.xlu0 %2241 }
 0x2f6   : > { %2312 = vst.msk [vmem:[#allocation3 + $0x68] sm:$0xf] %vm2285_vm12, %v2242_v37  ;;  %v2626_v37 = vadd.f32 %v2625_v3, %v2624_v54 }
 0x2f8   : > { %v1770_v25 = vpop.permute.xlu2 %1769 }
 0x2fa   : > { %v2230_v27 = vpop.permute.xlu1 %2229 }
 0x2fb   : > { %2306 = vst.msk [vmem:[#allocation3 + $0x50] sm:$0xf] %vm2285_vm12, %v2230_v27  ;;  %v2628_v27 = vadd.f32 %v2627_v20, %v2626_v37 }
 0x2fd   : > { %v1544_v32 = vpop.permute.xlu0 %1543 }
 0x2fe   : > { %1625 = vst.msk [vmem:[#allocation3 + $0x3c] sm:$0xf] %vm1609_vm8, %v1544_v32 }
 0x2ff   : > { %1851 = vst.msk [vmem:[#allocation3 + $0x3c] sm:$0xf] %vm1835_vm9, %v1770_v25  ;;  %v2629_v25 = vsel %vm237_vm0, %v4152_v48, 0.0 }
 0x300   : > { %v2218_v33 = vpop.permute.xlu2 %2217  ;;  %v4210_v4 = vpop.f32.mrf.mxu0 }
 0x301   : > { %2596 = vst.msk [vmem:[%s4097_s26 + $0x20] sm:$0xff] %vm237_vm0, %v4210_v4 }
 0x302   : > { %v2244_v35 = vpop.permute.xlu1 %2243  ;;  %v3027_v12 = vld [vmem:[#allocation3 + $0x50] sm:$0xff] }
 0x303   : > { %2313 = vst.msk [vmem:[#allocation3 + $0x6c] sm:$0xf] %vm2285_vm12, %v2244_v35  ;;  %3007 = vmatmul.msk.bf16.gmra.mxu2 %vm2450_vm13, %v3027_v12  ;;  %v2631_v35 = vsel %vm237_vm0, %v4210_v4, 0.0  ;;  %v2630_v12 = vadd.f32 %v2629_v25, %v2628_v27 }
 0x305   : > { %v1993_v7 = vpop.permute.xlu0 %1992 }
 0x308   : > { %v1560_v57 = vpop.permute.xlu2 %1559  ;;  %v4217_v21 = vpop.f32.mrf.mxu1 }
 0x309   : > { %v4219_v30 = vpop.f32.mrf.mxu0  ;;  %1633 = vst.msk [vmem:[#allocation3 + $0x5c] sm:$0xf] %vm1609_vm8, %v1560_v57  ;;  %v2632_v57 = vadd.f32 %v2631_v35, %v2630_v12 }
 0x30a   : > { %2602 = vst.msk [vmem:[%s4097_s26 + $0x50] sm:$0xff] %vm237_vm0, %v4217_v21  ;;  %v1768_v51 = vpop.permute.xlu1 %1767  ;;  %v3030_v53 = vld [vmem:[#allocation3 + $0x68] sm:$0xff] }
 0x30b   : > { %1850 = vst.msk [vmem:[#allocation3 + $0x38] sm:$0xf] %vm1835_vm9, %v1768_v51  ;;  %3010 = vmatmul.msk.bf16.gmra.mxu3 %vm2450_vm13, %v3030_v53 }
 0x30c   : > { %2597 = vst.msk [vmem:[%s4097_s26 + $0x28] sm:$0xff] %vm237_vm0, %v4219_v30 }
 0x30d   : > { %2075 = vst.msk [vmem:[#allocation3 + $0x38] sm:$0xf] %vm2060_vm11, %v1993_v7  ;;  %v2220_v17 = vpop.permute.xlu0 %2219  ;;  %v2633_v7 = vsel %vm237_vm0, %v4219_v30, 0.0 }
 0x30e   : > { %2300 = vst.msk [vmem:[#allocation3 + $0x38] sm:$0xf] %vm2285_vm12, %v2218_v33  ;;  %v2634_v53 = vadd.f32 %v2633_v7, %v2632_v57 }
 0x310   : > { %v1784_v23 = vpop.permute.xlu2 %1783  ;;  %v4232_v34 = vpop.f32.mrf.mxu1 }
 0x311   : > { %2603 = vst.msk [vmem:[%s4097_s26 + $0x58] sm:$0xff] %vm237_vm0, %v4232_v34 }
 0x312   : > { %v1995_v63 = vpop.permute.xlu1 %1994 }
 0x313   : > { %2076 = vst.msk [vmem:[#allocation3 + $0x3c] sm:$0xf] %vm2060_vm11, %v1995_v63 }
 0x314   : > { %2301 = vst.msk [vmem:[#allocation3 + $0x3c] sm:$0xf] %vm2285_vm12, %v2220_v17 }
 0x315   : > { %v1570_v60 = vpop.permute.xlu0 %1569 }
 0x316   : > { %1638 = vst.msk [vmem:[#allocation3 + $0x70] sm:$0xf] %vm1609_vm8, %v1570_v60 }
 0x318   : > { %v1798_v38 = vpop.permute.xlu2 %1797 }
 0x31a   : > { %v1558_v40 = vpop.permute.xlu1 %1557 }
 0x31b   : > { %1632 = vst.msk [vmem:[#allocation3 + $0x58] sm:$0xf] %vm1609_vm8, %v1558_v40  ;;  %v3024_v8 = vld [vmem:[#allocation3 + $0x38] sm:$0xff]  ;;  %v2639_v40 = vsel %vm237_vm0, %v4150_v29, 0.0 }
 0x31c   : > { %1858 = vst.msk [vmem:[#allocation3 + $0x58] sm:$0xf] %vm1835_vm9, %v1784_v23  ;;  %3004 = vmatmul.msk.bf16.gmra.mxu1 %vm2450_vm13, %v3024_v8 }
 0x31d   : > { %v1786_v52 = vpop.permute.xlu0 %1785 }
 0x31e   : > { %1859 = vst.msk [vmem:[#allocation3 + $0x5c] sm:$0xf] %vm1835_vm9, %v1786_v52  ;;  %v2641_v52 = vsel %vm237_vm0, %v4168_v46, 0.0 }
 0x320   : > { %v2021_v42 = vpop.permute.xlu2 %2020 }
 0x322   : > { %v1572_v26 = vpop.permute.xlu1 %1571 }
 0x323   : > { %1639 = vst.msk [vmem:[#allocation3 + $0x74] sm:$0xf] %vm1609_vm8, %v1572_v26 }
 0x324   : > { %1865 = vst.msk [vmem:[#allocation3 + $0x74] sm:$0xf] %vm1835_vm9, %v1798_v38 }
 0x325   : > { %v2009_v43 = vpop.permute.xlu0 %2008 }
 0x326   : > { %2083 = vst.msk [vmem:[#allocation3 + $0x58] sm:$0xf] %vm2060_vm11, %v2009_v43  ;;  %v2643_v43 = vsel %vm237_vm0, %v4217_v21, 0.0 }
 0x328   : > { %v2236_v10 = vpop.permute.xlu2 %2235 }
 0x329   : > { %v4247_v41 = vpop.f32.mrf.mxu2 }
 0x32a   : > { %v1796_v55 = vpop.permute.xlu1 %1795  ;;  %2610 = vst.msk [vmem:[%s4097_s26 + $0x90] sm:$0xff] %vm237_vm0, %v4247_v41 }
 0x32b   : > { %1864 = vst.msk [vmem:[#allocation3 + $0x70] sm:$0xf] %vm1835_vm9, %v1796_v55  ;;  %v2645_v55 = vsel %vm237_vm0, %v4232_v34, 0.0 }
 0x32c   : > { %2089 = vst.msk [vmem:[#allocation3 + $0x70] sm:$0xf] %vm2060_vm11, %v2021_v42 }
 0x32d   : > { %v2023_v45 = vpop.permute.xlu0 %2022 }
 0x32e   : > { %2090 = vst.msk [vmem:[#allocation3 + $0x74] sm:$0xf] %vm2060_vm11, %v2023_v45 }
 0x330   : > { %v1574_v5 = vpop.permute.xlu2 %1573 }
 0x331   : > { %1640 = vst.msk [vmem:[#allocation3 + $0x78] sm:$0xf] %vm1609_vm8, %v1574_v5  ;;  %v4256_v18 = vpop.f32.mrf.mxu2 }
 0x332   : > { %v2011_v47 = vpop.permute.xlu1 %2010  ;;  %2611 = vst.msk [vmem:[%s4097_s26 + $0x98] sm:$0xff] %vm237_vm0, %v4256_v18 }
 0x333   : > { %2084 = vst.msk [vmem:[#allocation3 + $0x5c] sm:$0xf] %vm2060_vm11, %v2011_v47 }
 0x334   : > { %2309 = vst.msk [vmem:[#allocation3 + $0x5c] sm:$0xf] %vm2285_vm12, %v2236_v10 }
 0x335   : > { %v2246_v61 = vpop.permute.xlu0 %2245 }
 0x336   : > { %2314 = vst.msk [vmem:[#allocation3 + $0x70] sm:$0xf] %vm2285_vm12, %v2246_v61  ;;  %v4264_v14 = vpop.f32.mrf.mxu3 }
 0x337   : > { %2616 = vst.msk [vmem:[%s4097_s26 + $0xc0] sm:$0xff] %vm237_vm0, %v4264_v14 }
 0x338   : > { %v1802_v24 = vpop.permute.xlu2 %1801 }
 0x33a   : > { %v2234_v36 = vpop.permute.xlu1 %2233 }
 0x33b   : > { %2308 = vst.msk [vmem:[#allocation3 + $0x58] sm:$0xf] %vm2285_vm12, %v2234_v36 }
 0x33d   : > { %v1576_v11 = vpop.permute.xlu0 %1575 }
 0x33e   : > { %1641 = vst.msk [vmem:[#allocation3 + $0x7c] sm:$0xf] %vm1609_vm8, %v1576_v11  ;;  %v4271_v50 = vpop.f32.mrf.mxu3 }
 0x33f   : > { %1867 = vst.msk [vmem:[#allocation3 + $0x7c] sm:$0xf] %vm1835_vm9, %v1802_v24 }
 0x340   : > { %2617 = vst.msk [vmem:[%s4097_s26 + $0xc8] sm:$0xff] %vm237_vm0, %v4271_v50  ;;  %v2250_v1 = vpop.permute.xlu2 %2249 }
 0x342   : > { %v2248_v19 = vpop.permute.xlu1 %2247  ;;  %v3028_v44 = vld [vmem:[#allocation3 + $0x58] sm:$0xff] }
 0x343   : > { %2315 = vst.msk [vmem:[#allocation3 + $0x74] sm:$0xf] %vm2285_vm12, %v2248_v19  ;;  %3008 = vmatmul.msk.bf16.gmra.mxu2 %vm2450_vm13, %v3028_v44 }
 0x345   : > { %v2025_v56 = vpop.permute.xlu0 %2024 }
 0x34a   : > { %v1800_v58 = vpop.permute.xlu1 %1799  ;;  %v3031_v0 = vld [vmem:[#allocation3 + $0x70] sm:$0xff] }
 0x34b   : > { %1866 = vst.msk [vmem:[#allocation3 + $0x78] sm:$0xf] %vm1835_vm9, %v1800_v58  ;;  %3011 = vmatmul.msk.bf16.gmra.mxu3 %vm2450_vm13, %v3031_v0  ;;  %v2657_v0 = vsel %vm237_vm0, %v4195_v15, 0.0 }
 0x34c   : > { %2091 = vst.msk [vmem:[#allocation3 + $0x78] sm:$0xf] %vm2060_vm11, %v2025_v56  ;;  %v2655_v56 = vsel %vm237_vm0, %v4186_v31, 0.0 }
 0x34d   : > { %2316 = vst.msk [vmem:[#allocation3 + $0x78] sm:$0xf] %vm2285_vm12, %v2250_v1  ;;  %v2252_v2 = vpop.permute.xlu0 %2251 }
 0x352   : > { %v2027_v28 = vpop.permute.xlu1 %2026 }
 0x353   : > { %2092 = vst.msk [vmem:[#allocation3 + $0x7c] sm:$0xf] %vm2060_vm11, %v2027_v28  ;;  %v4285_v62 = vpop.f32.mrf.mxu1 }
 0x354   : > { %2317 = vst.msk [vmem:[#allocation3 + $0x7c] sm:$0xf] %vm2285_vm12, %v2252_v2  ;;  %v2647_v5 = vsel %vm237_vm0, %v4285_v62, 0.0  ;;  %v2659_v2 = vsel %vm237_vm0, %v4247_v41, 0.0 }
 0x355   : > { %2604 = vst.msk [vmem:[%s4097_s26 + $0x60] sm:$0xff] %vm237_vm0, %v4285_v62 }
 0x358   : > { %v4290_v9 = vpop.f32.mrf.mxu0 }
 0x359   : > { %2598 = vst.msk [vmem:[%s4097_s26 + $0x30] sm:$0xff] %vm237_vm0, %v4290_v9  ;;  %v2635_v51 = vsel %vm237_vm0, %v4290_v9, 0.0 }
 0x35a   : > { %v2636_v23 = vadd.f32 %v2635_v51, %v2634_v53 }
 0x35b   : > { %v3032_v13 = vld [vmem:[#allocation3 + $0x78] sm:$0xff]  ;;  %v4295_v49 = vpop.f32.mrf.mxu1 }
 0x35c   : > { %3012 = vmatmul.msk.bf16.gmra.mxu3 %vm2450_vm13, %v3032_v13  ;;  %2605 = vst.msk [vmem:[%s4097_s26 + $0x68] sm:$0xff] %vm237_vm0, %v4295_v49  ;;  %v2649_v61 = vsel %vm237_vm0, %v4295_v49, 0.0  ;;  %v2661_v13 = vsel %vm237_vm0, %v4256_v18, 0.0 }
 0x360   : > { %v4301_v16 = vpop.f32.mrf.mxu0 }
 0x361   : > { %2599 = vst.msk [vmem:[%s4097_s26 + $0x38] sm:$0xff] %vm237_vm0, %v4301_v16  ;;  %v2637_v17 = vsel %vm237_vm0, %v4301_v16, 0.0 }
 0x362   : > { %v2638_v60 = vadd.f32 %v2637_v17, %v2636_v23  ;;  %v2671_v17 = vsel %vm237_vm0, %v4264_v14, 0.0 }
 0x364   : > { %v2640_v8 = vadd.f32 %v2639_v40, %v2638_v60  ;;  %v2673_v60 = vsel %vm237_vm0, %v4271_v50, 0.0 }
 0x366   : > { %v2642_v42 = vadd.f32 %v2641_v52, %v2640_v8 }
 0x368   : > { %v2644_v10 = vadd.f32 %v2643_v43, %v2642_v42 }
 0x36a   : > { %v2646_v45 = vadd.f32 %v2645_v55, %v2644_v10 }
 0x36c   : > { %v2648_v47 = vadd.f32 %v2647_v5, %v2646_v45 }
 0x36e   : > { %v2650_v24 = vadd.f32 %v2649_v61, %v2648_v47 }
 0x386   : > { %v4306_v59 = vpop.f32.mrf.mxu2 }
 0x387   : > { %2612 = vst.msk [vmem:[%s4097_s26 + $0xa0] sm:$0xff] %vm237_vm0, %v4306_v59  ;;  %v2663_v20 = vsel %vm237_vm0, %v4306_v59, 0.0 }
 0x38e   : > { %v4319_v32 = vpop.f32.mrf.mxu2  ;;  %v4321_v33 = vpop.f32.mrf.mxu3 }
 0x38f   : > { %2613 = vst.msk [vmem:[%s4097_s26 + $0xa8] sm:$0xff] %vm237_vm0, %v4319_v32  ;;  %v2665_v25 = vsel %vm237_vm0, %v4319_v32, 0.0  ;;  %v2675_v52 = vsel %vm237_vm0, %v4321_v33, 0.0 }
 0x390   : > { %2618 = vst.msk [vmem:[%s4097_s26 + $0xd0] sm:$0xff] %vm237_vm0, %v4321_v33 }
 0x396   : > { %v4337_v63 = vpop.f32.mrf.mxu3 }
 0x397   : > { %2619 = vst.msk [vmem:[%s4097_s26 + $0xd8] sm:$0xff] %vm237_vm0, %v4337_v63  ;;  %v2677_v43 = vsel %vm237_vm0, %v4337_v63, 0.0 }
 0x399   : > { %v4342_v38 = vpop.f32.mrf.mxu1 }
 0x39a   : > { %2606 = vst.msk [vmem:[%s4097_s26 + $0x70] sm:$0xff] %vm237_vm0, %v4342_v38  ;;  %v2651_v36 = vsel %vm237_vm0, %v4342_v38, 0.0 }
 0x39b   : > { %v2652_v19 = vadd.f32 %v2651_v36, %v2650_v24 }
 0x3a1   : > { %v4351_v26 = vpop.f32.mrf.mxu1 }
 0x3a2   : > { %2607 = vst.msk [vmem:[%s4097_s26 + $0x78] sm:$0xff] %vm237_vm0, %v4351_v26  ;;  %v2653_v11 = vsel %vm237_vm0, %v4351_v26, 0.0 }
 0x3a3   : > { %v2654_v44 = vadd.f32 %v2653_v11, %v2652_v19 }
 0x3a5   : > { %v2656_v58 = vadd.f32 %v2655_v56, %v2654_v44 }
 0x3a7   : > { %v2658_v1 = vadd.f32 %v2657_v0, %v2656_v58 }
 0x3a9   : > { %v2660_v28 = vadd.f32 %v2659_v2, %v2658_v1 }
 0x3ab   : > { %v2662_v3 = vadd.f32 %v2661_v13, %v2660_v28 }
 0x3ad   : > { %v2664_v37 = vadd.f32 %v2663_v20, %v2662_v3 }
 0x3af   : > { %v2666_v35 = vadd.f32 %v2665_v25, %v2664_v37 }
 0x3c6   : > { %v4376_v54 = vpop.f32.mrf.mxu2 }
 0x3c7   : > { %2614 = vst.msk [vmem:[%s4097_s26 + $0xb0] sm:$0xff] %vm237_vm0, %v4376_v54  ;;  %v2667_v27 = vsel %vm237_vm0, %v4376_v54, 0.0 }
 0x3c8   : > { %v2668_v12 = vadd.f32 %v2667_v27, %v2666_v35 }
 0x3ce   : > { %v4387_v7 = vpop.f32.mrf.mxu2  ;;  %v2582_v57 = vpop.f32.mrf.mxu3 }
 0x3cf   : > { %2615 = vst.msk [vmem:[%s4097_s26 + $0xb8] sm:$0xff] %vm237_vm0, %v4387_v7  ;;  %v2669_v51 = vsel %vm237_vm0, %v4387_v7, 0.0  ;;  %v2679_v45 = vsel %vm237_vm0, %v2582_v57, 0.0 }
 0x3d0   : > { %v2670_v53 = vadd.f32 %v2669_v51, %v2668_v12  ;;  %2620 = vst.msk [vmem:[%s4097_s26 + $0xe0] sm:$0xff] %vm237_vm0, %v2582_v57 }
 0x3d2   : > { %v2672_v23 = vadd.f32 %v2671_v17, %v2670_v53 }
 0x3d4   : > { %v2674_v40 = vadd.f32 %v2673_v60, %v2672_v23 }
 0x3d6   : > { %v2584_v8 = vpop.f32.mrf.mxu3  ;;  %v2676_v42 = vadd.f32 %v2675_v52, %v2674_v40 }
 0x3d7   : > { %2621 = vst.msk [vmem:[%s4097_s26 + $0xe8] sm:$0xff] %vm237_vm0, %v2584_v8  ;;  %v2681_v47 = vsel %vm237_vm0, %v2584_v8, 0.0 }
 0x3d8   : > { %v2678_v10 = vadd.f32 %v2677_v43, %v2676_v42 }
 0x3da   : > { %v2680_v5 = vadd.f32 %v2679_v45, %v2678_v10 }
 0x3dc   : > { %v2682_v36 = vadd.f32 %v2681_v47, %v2680_v5 }
 0x3df   : > { %v2587_v55 = vpop.f32.mrf.mxu3 }
 0x3e0   : > { %2622 = vst.msk [vmem:[%s4097_s26 + $0xf0] sm:$0xff] %vm237_vm0, %v2587_v55  ;;  %v2683_v61 = vsel %vm237_vm0, %v2587_v55, 0.0 }
 0x3e1   : > { %v2684_v24 = vadd.f32 %v2683_v61, %v2682_v36 }
 0x3e7   : > { %v2589_v11 = vpop.f32.mrf.mxu3 }
 0x3e8   : > { %2623 = vst.msk [vmem:[%s4097_s26 + $0xf8] sm:$0xff] %vm237_vm0, %v2589_v11  ;;  %v2685_v19 = vsel %vm237_vm0, %v2589_v11, 0.0 }
 0x3e9   : > { %v2686_v44 = vadd.f32 %v2685_v19, %v2684_v24 }
 0x3eb   : > { %v2687_v56 = vrot.slane %v2686_v44, 4 }
 0x3ed   : > { %v2688_v58 = vadd.f32 %v2687_v56, %v2686_v44 }
 0x3ef   : > { %v2689_v0 = vrot.slane %v2688_v58, 2 }
 0x3f1   : > { %v2690_v1 = vadd.f32 %v2689_v0, %v2688_v58 }
 0x3f3   : > { %v2691_v2 = vrot.slane %v2690_v1, 1 }
 0x3f5   : > { %v2692_v28 = vadd.f32 %v2691_v2, %v2690_v1 }
 0x3f7   : > { %v4420_v13 = vmul.f32 0.00390625, %v2692_v28 }
 0x3f9   : > { %2827 = vst.msk [vmem:[%s4418_s29] sm:$0x1] %vm246_vm1, %v4420_v13  ;;  %v4426_v3 = vsub.f32 %v2582_v57, %v4420_v13  ;;  %v4429_v20 = vsub.f32 %v2584_v8, %v4420_v13  ;;  %v4432_v37 = vsub.f32 %v2587_v55, %v4420_v13  ;;  %v4435_v25 = vsub.f32 %v2589_v11, %v4420_v13 }
 0x3fa   : > { %v2694_v27 = vsub.f32 %v4100_v6, %v4420_v13  ;;  %v2695_v35 = vsub.f32 %v4115_v22, %v4420_v13  ;;  %v2696_v12 = vsub.f32 %v4138_v39, %v4420_v13  ;;  %v2697_v57 = vsub.f32 %v4152_v48, %v4420_v13 }
 0x3fb   : > { %v2698_v17 = vsub.f32 %v4210_v4, %v4420_v13  ;;  %v2699_v60 = vsub.f32 %v4219_v30, %v4420_v13  ;;  %v2700_v39 = vsub.f32 %v4290_v9, %v4420_v13  ;;  %v2701_v4 = vsub.f32 %v4301_v16, %v4420_v13 }
 0x3fc   : > { %v2726_v51 = vmul.f32 %v2694_v27, %v2694_v27  ;;  %v2727_v53 = vmul.f32 %v2695_v35, %v2695_v35  ;;  %v2728_v23 = vmul.f32 %v2696_v12, %v2696_v12  ;;  %v2729_v40 = vmul.f32 %v2697_v57, %v2697_v57 }
 0x3fd   : > { %v2730_v52 = vmul.f32 %v2698_v17, %v2698_v17  ;;  %v2731_v43 = vmul.f32 %v2699_v60, %v2699_v60  ;;  %v2702_v55 = vsub.f32 %v4150_v29, %v4420_v13  ;;  %v2732_v45 = vmul.f32 %v2700_v39, %v2700_v39 }
 0x3fe   : > { %v2758_v6 = vsel %vm237_vm0, %v2726_v51, 0.0  ;;  %v2759_v22 = vsel %vm237_vm0, %v2727_v53, 0.0  ;;  %v2761_v48 = vsel %vm237_vm0, %v2728_v23, 0.0  ;;  %v2763_v10 = vsel %vm237_vm0, %v2729_v40, 0.0 }
 0x3ff   : > { %v2760_v8 = vadd.f32 %v2759_v22, %v2758_v6  ;;  %v2765_v5 = vsel %vm237_vm0, %v2730_v52, 0.0  ;;  %v2703_v9 = vsub.f32 %v4168_v46, %v4420_v13  ;;  %v2733_v61 = vmul.f32 %v2701_v4, %v2701_v4 }
 0x400   : > { %v2767_v36 = vsel %vm237_vm0, %v2731_v43, 0.0  ;;  %v2704_v16 = vsub.f32 %v4217_v21, %v4420_v13  ;;  %v2734_v11 = vmul.f32 %v2702_v55, %v2702_v55  ;;  %v2769_v19 = vsel %vm237_vm0, %v2732_v45, 0.0 }
 0x401   : > { %v2762_v42 = vadd.f32 %v2761_v48, %v2760_v8  ;;  %v2705_v29 = vsub.f32 %v4232_v34, %v4420_v13  ;;  %v2735_v56 = vmul.f32 %v2703_v9, %v2703_v9  ;;  %v2771_v58 = vsel %vm237_vm0, %v2733_v61, 0.0 }
 0x402   : > { %v2706_v46 = vsub.f32 %v4285_v62, %v4420_v13  ;;  %v2736_v1 = vmul.f32 %v2704_v16, %v2704_v16  ;;  %v2773_v2 = vsel %vm237_vm0, %v2734_v11, 0.0  ;;  %v2707_v21 = vsub.f32 %v4295_v49, %v4420_v13 }
 0x403   : > { %v2764_v30 = vadd.f32 %v2763_v10, %v2762_v42  ;;  %v2737_v27 = vmul.f32 %v2705_v29, %v2705_v29  ;;  %v2775_v35 = vsel %vm237_vm0, %v2735_v56, 0.0  ;;  %v2708_v34 = vsub.f32 %v4342_v38, %v4420_v13 }
 0x404   : > { %v2738_v57 = vmul.f32 %v2706_v46, %v2706_v46  ;;  %v2777_v51 = vsel %vm237_vm0, %v2736_v1, 0.0  ;;  %v2709_v62 = vsub.f32 %v4351_v26, %v4420_v13  ;;  %v2739_v17 = vmul.f32 %v2707_v21, %v2707_v21 }
 0x405   : > { %v2766_v47 = vadd.f32 %v2765_v5, %v2764_v30  ;;  %v2779_v23 = vsel %vm237_vm0, %v2737_v27, 0.0  ;;  %v2710_v49 = vsub.f32 %v4186_v31, %v4420_v13  ;;  %v2740_v40 = vmul.f32 %v2708_v34, %v2708_v34 }
 0x406   : > { %v2781_v6 = vsel %vm237_vm0, %v2738_v57, 0.0  ;;  %v2711_v38 = vsub.f32 %v4195_v15, %v4420_v13  ;;  %v2741_v8 = vmul.f32 %v2709_v62, %v2709_v62  ;;  %v2783_v39 = vsel %vm237_vm0, %v2739_v17, 0.0 }
 0x407   : > { %v2768_v24 = vadd.f32 %v2767_v36, %v2766_v47  ;;  %v2712_v26 = vsub.f32 %v4247_v41, %v4420_v13  ;;  %v2742_v48 = vmul.f32 %v2710_v49, %v2710_v49  ;;  %v2785_v42 = vsel %vm237_vm0, %v2740_v40, 0.0 }
 0x408   : > { %v2713_v31 = vsub.f32 %v4256_v18, %v4420_v13  ;;  %v2743_v43 = vmul.f32 %v2711_v38, %v2711_v38  ;;  %v2787_v10 = vsel %vm237_vm0, %v2741_v8, 0.0  ;;  %v2714_v15 = vsub.f32 %v4306_v59, %v4420_v13 }
 0x409   : > { %v2770_v44 = vadd.f32 %v2769_v19, %v2768_v24  ;;  %v2744_v55 = vmul.f32 %v2712_v26, %v2712_v26  ;;  %v2789_v45 = vsel %vm237_vm0, %v2742_v48, 0.0  ;;  %v2715_v41 = vsub.f32 %v4319_v32, %v4420_v13 }
 0x40a   : > { %v2745_v47 = vmul.f32 %v2713_v31, %v2713_v31  ;;  %v2791_v9 = vsel %vm237_vm0, %v2743_v43, 0.0  ;;  %v2716_v18 = vsub.f32 %v4376_v54, %v4420_v13  ;;  %v2746_v36 = vmul.f32 %v2714_v15, %v2714_v15 }
 0x40b   : > { %v2772_v0 = vadd.f32 %v2771_v58, %v2770_v44  ;;  %v2793_v24 = vsel %vm237_vm0, %v2744_v55, 0.0  ;;  %v2717_v59 = vsub.f32 %v4387_v7, %v4420_v13  ;;  %v2747_v11 = vmul.f32 %v2715_v41, %v2715_v41 }
 0x40c   : > { %v2795_v19 = vsel %vm237_vm0, %v2745_v47, 0.0  ;;  %v2718_v32 = vsub.f32 %v4264_v14, %v4420_v13  ;;  %v2748_v29 = vmul.f32 %v2716_v18, %v2716_v18  ;;  %v2797_v56 = vsel %vm237_vm0, %v2746_v36, 0.0 }
 0x40d   : > { %v2774_v28 = vadd.f32 %v2773_v2, %v2772_v0  ;;  %v2719_v54 = vsub.f32 %v4271_v50, %v4420_v13  ;;  %v2749_v0 = vmul.f32 %v2717_v59, %v2717_v59  ;;  %v2799_v46 = vsel %vm237_vm0, %v2747_v11, 0.0 }
 0x40e   : > { %v2720_v7 = vsub.f32 %v4321_v33, %v4420_v13  ;;  %v2750_v2 = vmul.f32 %v2718_v32, %v2718_v32  ;;  %v2721_v14 = vsub.f32 %v4337_v63, %v4420_v13  ;;  %v2754_v33 = vmul.f32 %v4426_v3, %v4426_v3 }
 0x40f   : > { %v2776_v12 = vadd.f32 %v2775_v35, %v2774_v28  ;;  %v2801_v28 = vsel %vm237_vm0, %v2748_v29, 0.0  ;;  %v2751_v27 = vmul.f32 %v2719_v54, %v2719_v54  ;;  %v2803_v35 = vsel %vm237_vm0, %v2749_v0, 0.0 }
 0x410   : > { %v2752_v34 = vmul.f32 %v2720_v7, %v2720_v7  ;;  %v2805_v50 = vsel %vm237_vm0, %v2750_v2, 0.0  ;;  %v2755_v63 = vmul.f32 %v4429_v20, %v4429_v20  ;;  %v2756_v49 = vmul.f32 %v4432_v37, %v4432_v37 }
 0x411   : > { %v2778_v53 = vadd.f32 %v2777_v51, %v2776_v12  ;;  %v2753_v51 = vmul.f32 %v2721_v14, %v2721_v14  ;;  %v2813_v40 = vsel %vm237_vm0, %v2754_v33, 0.0 }
 0x412   : > { %v2809_v17 = vsel %vm237_vm0, %v2752_v34, 0.0  ;;  %v2815_v3 = vsel %vm237_vm0, %v2755_v63, 0.0  ;;  %v2817_v8 = vsel %vm237_vm0, %v2756_v49, 0.0 }
 0x413   : > { %v2780_v60 = vadd.f32 %v2779_v23, %v2778_v53  ;;  %v2807_v53 = vsel %vm237_vm0, %v2751_v27, 0.0  ;;  %v2811_v13 = vsel %vm237_vm0, %v2753_v51, 0.0 }
 0x415   : > { %v2782_v22 = vadd.f32 %v2781_v6, %v2780_v60 }
 0x417   : > { %v2784_v52 = vadd.f32 %v2783_v39, %v2782_v22  ;;  %v2757_v22 = vmul.f32 %v4435_v25, %v4435_v25 }
 0x419   : > { %v2786_v4 = vadd.f32 %v2785_v42, %v2784_v52  ;;  %v2819_v20 = vsel %vm237_vm0, %v2757_v22, 0.0 }
 0x41b   : > { %v2788_v30 = vadd.f32 %v2787_v10, %v2786_v4 }
 0x41d   : > { %v2790_v5 = vadd.f32 %v2789_v45, %v2788_v30 }
 0x41f   : > { %v2792_v61 = vadd.f32 %v2791_v9, %v2790_v5 }
 0x421   : > { %v2794_v16 = vadd.f32 %v2793_v24, %v2792_v61 }
 0x423   : > { %v2796_v44 = vadd.f32 %v2795_v19, %v2794_v16 }
 0x425   : > { %v2798_v58 = vadd.f32 %v2797_v56, %v2796_v44 }
 0x427   : > { %v2800_v1 = vadd.f32 %v2799_v46, %v2798_v58 }
 0x429   : > { %v2802_v21 = vadd.f32 %v2801_v28, %v2800_v1 }
 0x42b   : > { %v2804_v12 = vadd.f32 %v2803_v35, %v2802_v21 }
 0x42d   : > { %v2806_v57 = vadd.f32 %v2805_v50, %v2804_v12 }
 0x42f   : > { %v2808_v62 = vadd.f32 %v2807_v53, %v2806_v57 }
 0x431   : > { %v2810_v23 = vadd.f32 %v2809_v17, %v2808_v62 }
 0x433   : > { %v2812_v60 = vadd.f32 %v2811_v13, %v2810_v23 }
 0x435   : > { %v2814_v6 = vadd.f32 %v2813_v40, %v2812_v60 }
 0x437   : > { %v2816_v38 = vadd.f32 %v2815_v3, %v2814_v6 }
 0x439   : > { %v2818_v39 = vadd.f32 %v2817_v8, %v2816_v38 }
 0x43b   : > { %v2820_v52 = vadd.f32 %v2819_v20, %v2818_v39 }
 0x43d   : > { %v2821_v26 = vrot.slane %v2820_v52, 4 }
 0x43f   : > { %v2822_v48 = vadd.f32 %v2821_v26, %v2820_v52 }
 0x441   : > { %v2823_v42 = vrot.slane %v2822_v48, 2 }
 0x443   : > { %v2824_v37 = vadd.f32 %v2823_v42, %v2822_v48 }
 0x445   : > { %v2825_v4 = vrot.slane %v2824_v37, 1 }
 0x447   : > { %v2826_v31 = vadd.f32 %v2825_v4, %v2824_v37 }
 0x449   : > { %2828 = vst.msk [vmem:[%s4418_s29 + $0x1] sm:$0x1] %vm246_vm1, %v2826_v31 }
 0x44a PF: > { %s16_s18 = sadd.s32 1, %s3071_s18  }
 0x44b   : > { %p13_p4 = scmp.ge.s32.totalorder %s16_s18, 4  }
 0x44d   :  { %15 = sbr.rel (!%p13_p4) target bundleno = 1 (0x1), region = 81 }

</bundles_post_ra>
